<compile_context>
chip_gen: v6e
topology: v6e:2x2x1
jax: 0.10.0
libtpu: 0.0.40
codegen_flags: <defaults>
</compile_context>

<pallas_src>
import functools
import math

import jax
import jax.numpy as jnp
from jax import lax
from jax.experimental import pallas as pl
from jax.experimental.pallas import tpu as pltpu


# --------------------------------------------------------------------------- fused kernel

def _decoder_fused_kernel(sf_ref, mask_ref, wqkv_ref, wsq_ref, wff1_ref, wff2_ref,
                          vec_ref, out_ref, *, F, A, T, D, K, H, mm_dtype):
    f32 = jnp.float32
    N = A * T                       # tokens per future (flattened agent,time)
    R = F * N                       # total rows
    dh = D // H
    scale = 1.0 / math.sqrt(dh)

    def mm(a, b):                   # MXU matmul, f32 accumulation
        return jnp.dot(a.astype(mm_dtype), b.astype(mm_dtype),
                       preferred_element_type=f32)

    def bmm(eq, a, b):              # batched MXU contraction (leading batch dim)
        return jnp.einsum(eq, a.astype(mm_dtype), b.astype(mm_dtype),
                          preferred_element_type=f32)

    def layer_norm(x, g, b):        # statistics kept in f32 on all generations
        mu = jnp.mean(x, axis=-1, keepdims=True)
        var = jnp.mean((x - mu) ** 2, axis=-1, keepdims=True)
        return (x - mu) * lax.rsqrt(var + 1e-5) * g + b

    vecs = vec_ref[...]             # (38+F, VW) lane-dense bias / LN / misc table
    wqkv_all = wqkv_ref[...]        # (4, D, 3D)
    wsq = wsq_ref[...]              # (6, D, D): [T_w_top, wo_U, wo_V, wo_W, wo_X, Z_w(pad)]
    wff1 = wff1_ref[...]            # (4, D, K*D)
    wff2 = wff2_ref[...]            # (4, K*D, D)
    masks = mask_ref[...]           # (2, N, N) additive: [across-time, across-agent]

    ROW_T_B = 0
    ROW_T_WFUT = 1                  # F rows
    ROW_ATT0 = 1 + F                # 8 rows per attention layer, 4 layers
    ROW_TAIL = ROW_ATT0 + 8 * 4     # Y_g, Y_b, Z_b, Z_g, Z_beta

    # ---- layer_T:  relu([x ; onehot_f] @ W + b) == relu(x @ W_top + W_fut[f] + b)
    sf = sf_ref[...].astype(f32)                                  # (N, D)
    proj = mm(sf, wsq[0])                                         # (N, D)
    t_b = vecs[ROW_T_B:ROW_T_B + 1, :D]                           # (1, D)
    t_wfut = vecs[ROW_T_WFUT:ROW_T_WFUT + F, :D]                  # (F, D)
    x = jnp.maximum(proj[None] + t_wfut[:, None, :] + t_b[None], 0.0)
    x = x.reshape(R, D)

    def att_block(x2, li, add_mask):
        # pre-LN transformer block: x + MHA(LN(x)) ; x + FFN(LN(x))
        base = ROW_ATT0 + 8 * li
        ln1_g = vecs[base + 0:base + 1, :D]
        ln1_b = vecs[base + 1:base + 2, :D]
        b_qkv = vecs[base + 2:base + 3, :3 * D]
        b_o   = vecs[base + 3:base + 4, :D]
        ln2_g = vecs[base + 4:base + 5, :D]
        ln2_b = vecs[base + 5:base + 6, :D]
        b_1   = vecs[base + 6:base + 7, :K * D]
        b_2   = vecs[base + 7:base + 8, :D]
        w_o = wsq[1 + li]
        w_1 = wff1[li]
        w_2 = wff2[li]

        xln = layer_norm(x2, ln1_g, ln1_b)
        qkv = mm(xln, wqkv_all[li]) + b_qkv                       # (R, 3D) fused Q/K/V

        def split_heads(off):       # -> (H*F, N, dh), head-major leading batch
            return jnp.concatenate(
                [qkv[:, off + h * dh: off + (h + 1) * dh].reshape(F, N, dh)
                 for h in range(H)], axis=0)

        qh = split_heads(0)
        kh = split_heads(D)
        vh = split_heads(2 * D)

        # all heads x all futures in one contraction + one masked softmax per layer
        s = bmm('bnd,bmd->bnm', qh, kh) * scale + add_mask[None]  # (H*F, N, N)
        s = s - jnp.max(s, axis=-1, keepdims=True)
        e = jnp.exp(s)                                            # f32 softmax
        pr = e * pl.reciprocal(jnp.sum(e, axis=-1, keepdims=True), approx=True)
        pv = bmm('bnm,bmd->bnd', pr, vh).reshape(H, R, dh)        # (H, R, dh)
        pv_cat = jnp.concatenate([pv[h] for h in range(H)], axis=-1)   # (R, D)

        x1 = x2 + mm(pv_cat, w_o) + b_o
        yln = layer_norm(x1, ln2_g, ln2_b)
        hid = jnp.maximum(mm(yln, w_1) + b_1, 0.0)
        return x1 + mm(hid, w_2) + b_2

    tmask = masks[0]
    amask = masks[1]
    x = att_block(x, 0, tmask)      # layer_U: across time
    x = att_block(x, 1, amask)      # layer_V: across agents
    x = att_block(x, 2, tmask)      # layer_W: across time
    x = att_block(x, 3, amask)      # layer_X: across agents

    # ---- layer_Y (LayerNorm) + layer_Z1 (Linear->ReLU->BatchNorm(batch stats)->Softplus)
    y = layer_norm(x, vecs[ROW_TAIL + 0:ROW_TAIL + 1, :D],
                   vecs[ROW_TAIL + 1:ROW_TAIL + 2, :D])
    h = jnp.maximum(mm(y, wsq[5]) + vecs[ROW_TAIL + 2:ROW_TAIL + 3, :D], 0.0)  # (R, D)
    mu = jnp.mean(h, axis=0, keepdims=True)               # per-channel stats over (F,A,T)
    var = jnp.mean((h - mu) ** 2, axis=0, keepdims=True)  # biased, as torch train() fwd
    z = (h - mu) * lax.rsqrt(var + 1e-5) * vecs[ROW_TAIL + 3:ROW_TAIL + 4, :D] \
        + vecs[ROW_TAIL + 4:ROW_TAIL + 5, :D]
    sp = jnp.maximum(z, 0.0) + jnp.log(1.0 + jnp.exp(-jnp.abs(z)))   # stable softplus
    out_ref[...] = sp[:, :4]


# --------------------------------------------------------------------------- wrapper

def _const_spec(shape):
    nd = len(shape)
    return pl.BlockSpec(tuple(shape), lambda b, _nd=nd: (0,) * _nd)


def decoder_forward(state_feat, batch_mask, packed, *, F, head_num,
                    matmul_dtype=jnp.bfloat16):
    """Fused Pallas decoder forward.

    state_feat: (A, T, D) or (B, A, T, D); batch_mask: (A, A) or (B, A, A).
    Returns (F, A, T, 4) or (B, F, A, T, 4).
    """
    single = state_feat.ndim == 3
    if single:
        state_feat = state_feat[None]
        batch_mask = batch_mask[None]
    B, A, T, D = state_feat.shape
    assert D % head_num == 0
    N = A * T
    R = F * N
    K = packed['w_ffn1'].shape[-1] // D

    # Structural additive block masks over the flattened (agent,time) token axis:
    # across-time: (a,t)->(a,t'); across-agent: (a,t)->(b,t) where batch_mask[a,b] > 0.
    neg = jnp.float32(-1e30)
    eye_a = jnp.eye(A, dtype=jnp.float32)
    time_allowed = (eye_a[:, None, :, None]
                    * jnp.ones((1, T, 1, T), jnp.float32)).reshape(N, N)
    bm = (batch_mask > 0).astype(jnp.float32)
    agent_allowed = (bm[:, :, None, :, None]
                     * jnp.eye(T, dtype=jnp.float32)[None, None, :, None, :]
                     ).reshape(B, N, N)
    tmask = jnp.where(time_allowed > 0, 0.0, neg)
    amask = jnp.where(agent_allowed > 0, 0.0, neg)
    masks = jnp.stack([jnp.broadcast_to(tmask, (B, N, N)), amask], axis=1)  # (B,2,N,N)

    sf = state_feat.reshape(B, N, D).astype(jnp.float32)

    kernel = functools.partial(
        _decoder_fused_kernel, F=F, A=A, T=T, D=D, K=K, H=head_num,
        mm_dtype=matmul_dtype)

    out = pl.pallas_call(
        kernel,
        out_shape=jax.ShapeDtypeStruct((B, R, 4), jnp.float32),
        grid=(B,),
        in_specs=[
            pl.BlockSpec((None, N, D), lambda b: (b, 0, 0)),        # per-scene tokens
            pl.BlockSpec((None, 2, N, N), lambda b: (b, 0, 0, 0)),  # per-scene masks
            _const_spec(packed['w_qkv'].shape),    # weights: constant index_maps ->
            _const_spec(packed['w_sq'].shape),     # stay VMEM-resident across scenes
            _const_spec(packed['w_ffn1'].shape),
            _const_spec(packed['w_ffn2'].shape),
            _const_spec(packed['vec'].shape),
        ],
        out_specs=pl.BlockSpec((None, R, 4), lambda b: (b, 0, 0)),
        compiler_params=pltpu.CompilerParams(
            dimension_semantics=("parallel",)),    # scenes shard across v7x cores
    )(sf, masks, packed['w_qkv'], packed['w_sq'], packed['w_ffn1'],
      packed['w_ffn2'], packed['vec'])

    out = out.reshape(B, F, A, T, 4)
    return out[0] if single else out


# --------------------------------------------------------------------------- params

def _xavier(key, shape):
    fan_in, fan_out = shape
    lim = math.sqrt(6.0 / (fan_in + fan_out))
    return jax.random.uniform(key, shape, jnp.float32, -lim, lim)


def _att_params(key, D, k):
    ks = jax.random.split(key, 6)
    return dict(
        ln1_g=jnp.ones((D,), jnp.float32), ln1_b=jnp.zeros((D,), jnp.float32),
        wq=_xavier(ks[0], (D, D)), bq=jnp.zeros((D,), jnp.float32),
        wk=_xavier(ks[1], (D, D)), bk=jnp.zeros((D,), jnp.float32),
        wv=_xavier(ks[2], (D, D)), bv=jnp.zeros((D,), jnp.float32),
        wo=_xavier(ks[3], (D, D)), bo=jnp.zeros((D,), jnp.float32),
        ln2_g=jnp.ones((D,), jnp.float32), ln2_b=jnp.zeros((D,), jnp.float32),
        w1=_xavier(ks[4], (D, k * D)), b1=jnp.zeros((k * D,), jnp.float32),
        w2=_xavier(ks[5], (k * D, D)), b2=jnp.zeros((D,), jnp.float32),
    )


def init_params(key, D, F, head_num, k):
    ks = jax.random.split(key, 6)
    t_w = _xavier(ks[0], (D + F, D))           # nn.Linear(D+F, D) weight, (in, out)
    return dict(
        T_w_top=t_w[:D, :], T_w_fut=t_w[D:, :], T_b=jnp.zeros((D,), jnp.float32),
        U=_att_params(ks[1], D, k), V=_att_params(ks[2], D, k),
        W=_att_params(ks[3], D, k), X=_att_params(ks[4], D, k),
        Y_g=jnp.ones((D,), jnp.float32), Y_b=jnp.zeros((D,), jnp.float32),
        Z_w=_xavier(ks[5], (D, 4)), Z_b=jnp.zeros((4,), jnp.float32),
        Z_g=jnp.ones((4,), jnp.float32), Z_beta=jnp.zeros((4,), jnp.float32),
    )


def pack_params(p, *, F, D, K):
    """Pack all parameter leaves into 5 stacked arrays (7 kernel inputs total)."""
    VW = max(3 * D, K * D, D)

    def row(v):
        v = jnp.asarray(v, jnp.float32).reshape(1, -1)
        return jnp.pad(v, ((0, 0), (0, VW - v.shape[1])))

    layers = [p['U'], p['V'], p['W'], p['X']]
    w_qkv = jnp.stack([jnp.concatenate([lp['wq'], lp['wk'], lp['wv']], axis=1)
                       for lp in layers])                                   # (4, D, 3D)
    z_w_pad = jnp.pad(p['Z_w'], ((0, 0), (0, D - p['Z_w'].shape[1])))       # (D, D)
    w_sq = jnp.stack([p['T_w_top']] + [lp['wo'] for lp in layers] + [z_w_pad])  # (6,D,D)
    w_ffn1 = jnp.stack([lp['w1'] for lp in layers])                         # (4, D, K*D)
    w_ffn2 = jnp.stack([lp['w2'] for lp in layers])                         # (4, K*D, D)

    rows = [row(p['T_b'])]
    rows += [row(p['T_w_fut'][f]) for f in range(F)]
    for lp in layers:
        rows += [row(lp['ln1_g']), row(lp['ln1_b']),
                 row(jnp.concatenate([lp['bq'].reshape(-1), lp['bk'].reshape(-1),
                                      lp['bv'].reshape(-1)])),
                 row(lp['bo']), row(lp['ln2_g']), row(lp['ln2_b']),
                 row(lp['b1']), row(lp['b2'])]
    rows += [row(p['Y_g']), row(p['Y_b']), row(p['Z_b']), row(p['Z_g']), row(p['Z_beta'])]
    vec = jnp.concatenate(rows, axis=0)                                     # (38+F, VW)

    return dict(w_qkv=w_qkv, w_sq=w_sq, w_ffn1=w_ffn1, w_ffn2=w_ffn2, vec=vec)


# --------------------------------------------------------------------------- main

if __name__ == "__main__":
    # small shapes consistent with the module (time_steps=T, feature_dim=D, F futures)
    A, T, D, HEADS, K, FUT = 2, 8, 32, 4, 2, 3

    key = jax.random.PRNGKey(0)
    k_x, k_p = jax.random.split(key)
    state_feat = jax.random.normal(k_x, (A, T, D), jnp.float32)
    batch_mask = jnp.ones((A, A), jnp.float32)   # all agents attend to each other

    params = init_params(k_p, D, FUT, HEADS, K)
    packed = pack_params(params, F=FUT, D=D, K=K)

    fwd = jax.jit(functools.partial(decoder_forward, F=FUT, head_num=HEADS))

    # single-scene path (matches the torch module's forward signature)
    out = jax.block_until_ready(fwd(state_feat, batch_mask, packed))
    assert out.shape == (FUT, A, T, 4), out.shape
    assert bool(jnp.all(jnp.isfinite(out)))

    # scene-batched path: grid=(B,), weights stay VMEM-resident across grid steps
    sf_b = jnp.stack([state_feat, state_feat * 0.5])
    bm_b = jnp.stack([batch_mask, batch_mask])
    out_b = jax.block_until_ready(fwd(sf_b, bm_b, packed))
    assert out_b.shape == (2, FUT, A, T, 4), out_b.shape
    assert bool(jnp.all(jnp.isfinite(out_b)))
    assert bool(jnp.allclose(out_b[0], out, atol=1e-4, rtol=1e-4))

    print("KERNEL_OK")
</pallas_src>

<mosaic_0001>
module attributes {stable_mosaic.version = 11 : i64} {
  func.func @_decoder_fused_kernel(%arg0: i32, %arg1: memref<1x16x32xf32, #tpu.memory_space<vmem>>, %arg2: memref<1x2x16x16xf32, #tpu.memory_space<vmem>>, %arg3: memref<4x32x96xf32, #tpu.memory_space<vmem>>, %arg4: memref<6x32x32xf32, #tpu.memory_space<vmem>>, %arg5: memref<4x32x64xf32, #tpu.memory_space<vmem>>, %arg6: memref<4x64x32xf32, #tpu.memory_space<vmem>>, %arg7: memref<41x96xf32, #tpu.memory_space<vmem>>, %arg8: memref<1x48x4xf32, #tpu.memory_space<vmem>>) attributes {dimension_semantics = [#tpu.dimension_semantics<parallel>], iteration_bounds = array<i64: 1>, scalar_prefetch = 0 : i64, scratch_operands = 0 : i64, tpu.core_type = #tpu.core_type<tc>, window_params = [{transform_indices = @transform_0, window_bounds = array<i64: 1, 16, 32>}, {transform_indices = @transform_1, window_bounds = array<i64: 1, 2, 16, 16>}, {pipeline_mode = #tpu.pipeline_mode<synchronous>, transform_indices = @transform_2, window_bounds = array<i64: 4, 32, 96>}, {pipeline_mode = #tpu.pipeline_mode<synchronous>, transform_indices = @transform_3, window_bounds = array<i64: 6, 32, 32>}, {pipeline_mode = #tpu.pipeline_mode<synchronous>, transform_indices = @transform_4, window_bounds = array<i64: 4, 32, 64>}, {pipeline_mode = #tpu.pipeline_mode<synchronous>, transform_indices = @transform_5, window_bounds = array<i64: 4, 64, 32>}, {pipeline_mode = #tpu.pipeline_mode<synchronous>, transform_indices = @transform_6, window_bounds = array<i64: 41, 96>}, {transform_indices = @transform_7, window_bounds = array<i64: 1, 48, 4>}]} {
    %c0 = arith.constant 0 : index
    %c0_0 = arith.constant 0 : index
    %0 = vector.load %arg7[%c0, %c0_0] : memref<41x96xf32, #tpu.memory_space<vmem>>, vector<41x96xf32>
    %c0_1 = arith.constant 0 : index
    %c0_2 = arith.constant 0 : index
    %c0_3 = arith.constant 0 : index
    %1 = vector.load %arg3[%c0_1, %c0_2, %c0_3] : memref<4x32x96xf32, #tpu.memory_space<vmem>>, vector<4x32x96xf32>
    %c0_4 = arith.constant 0 : index
    %c0_5 = arith.constant 0 : index
    %c0_6 = arith.constant 0 : index
    %2 = vector.load %arg4[%c0_4, %c0_5, %c0_6] : memref<6x32x32xf32, #tpu.memory_space<vmem>>, vector<6x32x32xf32>
    %c0_7 = arith.constant 0 : index
    %c0_8 = arith.constant 0 : index
    %c0_9 = arith.constant 0 : index
    %3 = vector.load %arg5[%c0_7, %c0_8, %c0_9] : memref<4x32x64xf32, #tpu.memory_space<vmem>>, vector<4x32x64xf32>
    %c0_10 = arith.constant 0 : index
    %c0_11 = arith.constant 0 : index
    %c0_12 = arith.constant 0 : index
    %4 = vector.load %arg6[%c0_10, %c0_11, %c0_12] : memref<4x64x32xf32, #tpu.memory_space<vmem>>, vector<4x64x32xf32>
    %c0_13 = arith.constant 0 : index
    %c0_14 = arith.constant 0 : index
    %c0_15 = arith.constant 0 : index
    %c0_16 = arith.constant 0 : index
    %5 = vector.load %arg2[%c0_13, %c0_14, %c0_15, %c0_16] : memref<1x2x16x16xf32, #tpu.memory_space<vmem>>, vector<1x2x16x16xf32>
    %6 = vector.shape_cast %5 : vector<1x2x16x16xf32> to vector<2x16x16xf32>
    %c0_17 = arith.constant 0 : index
    %c0_18 = arith.constant 0 : index
    %c0_19 = arith.constant 0 : index
    %7 = vector.load %arg1[%c0_17, %c0_18, %c0_19] : memref<1x16x32xf32, #tpu.memory_space<vmem>>, vector<1x16x32xf32>
    %8 = vector.shape_cast %7 : vector<1x16x32xf32> to vector<16x32xf32>
    %9 = vector.extract_strided_slice %2 {offsets = [0, 0, 0], sizes = [1, 32, 32], strides = [1, 1, 1]} : vector<6x32x32xf32> to vector<1x32x32xf32>
    %10 = vector.shape_cast %9 : vector<1x32x32xf32> to vector<32x32xf32>
    %11 = arith.truncf %8 : vector<16x32xf32> to vector<16x32xbf16>
    %12 = arith.truncf %10 : vector<32x32xf32> to vector<32x32xbf16>
    %cst = arith.constant dense<0.000000e+00> : vector<16x32xf32>
    %13 = tpu.matmul %11, %12, %cst {dimension_numbers = #tpu.dot_dimension_numbers<[1], [0], [0], [1], [0, 0, 1, 1], [], []>} : vector<16x32xbf16>, vector<32x32xbf16>, vector<16x32xf32> -> vector<16x32xf32>
    %14 = vector.extract_strided_slice %0 {offsets = [0, 0], sizes = [1, 32], strides = [1, 1]} : vector<41x96xf32> to vector<1x32xf32>
    %15 = vector.extract_strided_slice %0 {offsets = [1, 0], sizes = [3, 32], strides = [1, 1]} : vector<41x96xf32> to vector<3x32xf32>
    %16 = vector.shape_cast %13 : vector<16x32xf32> to vector<1x16x32xf32>
    %17 = vector.shape_cast %15 : vector<3x32xf32> to vector<3x1x32xf32>
    %18 = vector.broadcast %16 : vector<1x16x32xf32> to vector<3x16x32xf32>
    %19 = vector.broadcast %17 : vector<3x1x32xf32> to vector<3x16x32xf32>
    %20 = arith.addf %18, %19 : vector<3x16x32xf32>
    %21 = vector.shape_cast %14 : vector<1x32xf32> to vector<1x1x32xf32>
    %22 = vector.broadcast %21 : vector<1x1x32xf32> to vector<3x16x32xf32>
    %23 = arith.addf %20, %22 : vector<3x16x32xf32>
    %cst_20 = arith.constant 0.000000e+00 : f32
    %24 = vector.broadcast %cst_20 : f32 to vector<3x16x32xf32>
    %25 = arith.maximumf %23, %24 : vector<3x16x32xf32>
    %26 = vector.shape_cast %25 : vector<3x16x32xf32> to vector<48x32xf32>
    %27 = vector.extract_strided_slice %6 {offsets = [0, 0, 0], sizes = [1, 16, 16], strides = [1, 1, 1]} : vector<2x16x16xf32> to vector<1x16x16xf32>
    %28 = vector.shape_cast %27 : vector<1x16x16xf32> to vector<16x16xf32>
    %29 = vector.extract_strided_slice %6 {offsets = [1, 0, 0], sizes = [1, 16, 16], strides = [1, 1, 1]} : vector<2x16x16xf32> to vector<1x16x16xf32>
    %30 = vector.shape_cast %29 : vector<1x16x16xf32> to vector<16x16xf32>
    %31 = vector.extract_strided_slice %0 {offsets = [4, 0], sizes = [1, 32], strides = [1, 1]} : vector<41x96xf32> to vector<1x32xf32>
    %32 = vector.extract_strided_slice %0 {offsets = [5, 0], sizes = [1, 32], strides = [1, 1]} : vector<41x96xf32> to vector<1x32xf32>
    %33 = vector.extract_strided_slice %0 {offsets = [6, 0], sizes = [1, 96], strides = [1, 1]} : vector<41x96xf32> to vector<1x96xf32>
    %34 = vector.extract_strided_slice %0 {offsets = [7, 0], sizes = [1, 32], strides = [1, 1]} : vector<41x96xf32> to vector<1x32xf32>
    %35 = vector.extract_strided_slice %0 {offsets = [8, 0], sizes = [1, 32], strides = [1, 1]} : vector<41x96xf32> to vector<1x32xf32>
    %36 = vector.extract_strided_slice %0 {offsets = [9, 0], sizes = [1, 32], strides = [1, 1]} : vector<41x96xf32> to vector<1x32xf32>
    %37 = vector.extract_strided_slice %0 {offsets = [10, 0], sizes = [1, 64], strides = [1, 1]} : vector<41x96xf32> to vector<1x64xf32>
    %38 = vector.extract_strided_slice %0 {offsets = [11, 0], sizes = [1, 32], strides = [1, 1]} : vector<41x96xf32> to vector<1x32xf32>
    %39 = vector.extract_strided_slice %2 {offsets = [1, 0, 0], sizes = [1, 32, 32], strides = [1, 1, 1]} : vector<6x32x32xf32> to vector<1x32x32xf32>
    %40 = vector.shape_cast %39 : vector<1x32x32xf32> to vector<32x32xf32>
    %41 = vector.extract_strided_slice %3 {offsets = [0, 0, 0], sizes = [1, 32, 64], strides = [1, 1, 1]} : vector<4x32x64xf32> to vector<1x32x64xf32>
    %42 = vector.shape_cast %41 : vector<1x32x64xf32> to vector<32x64xf32>
    %43 = vector.extract_strided_slice %4 {offsets = [0, 0, 0], sizes = [1, 64, 32], strides = [1, 1, 1]} : vector<4x64x32xf32> to vector<1x64x32xf32>
    %44 = vector.shape_cast %43 : vector<1x64x32xf32> to vector<64x32xf32>
    %cst_21 = arith.constant dense<0.000000e+00> : vector<48xf32>
    %45 = vector.multi_reduction <add>, %26, %cst_21 [1] : vector<48x32xf32> to vector<48xf32>
    %46 = vector.shape_cast %45 : vector<48xf32> to vector<48x1xf32>
    %cst_22 = arith.constant 3.200000e+01 : f32
    %47 = vector.broadcast %cst_22 : f32 to vector<48x1xf32>
    %48 = arith.divf %46, %47 : vector<48x1xf32>
    %49 = vector.broadcast %48 : vector<48x1xf32> to vector<48x32xf32>
    %50 = arith.subf %26, %49 : vector<48x32xf32>
    %51 = arith.mulf %50, %50 : vector<48x32xf32>
    %cst_23 = arith.constant dense<0.000000e+00> : vector<48xf32>
    %52 = vector.multi_reduction <add>, %51, %cst_23 [1] : vector<48x32xf32> to vector<48xf32>
    %53 = vector.shape_cast %52 : vector<48xf32> to vector<48x1xf32>
    %cst_24 = arith.constant 3.200000e+01 : f32
    %54 = vector.broadcast %cst_24 : f32 to vector<48x1xf32>
    %55 = arith.divf %53, %54 : vector<48x1xf32>
    %56 = vector.broadcast %48 : vector<48x1xf32> to vector<48x32xf32>
    %57 = arith.subf %26, %56 : vector<48x32xf32>
    %cst_25 = arith.constant 9.99999974E-6 : f32
    %58 = vector.broadcast %cst_25 : f32 to vector<48x1xf32>
    %59 = arith.addf %55, %58 : vector<48x1xf32>
    %60 = math.rsqrt %59 : vector<48x1xf32>
    %61 = vector.broadcast %60 : vector<48x1xf32> to vector<48x32xf32>
    %62 = arith.mulf %57, %61 : vector<48x32xf32>
    %63 = vector.broadcast %31 : vector<1x32xf32> to vector<48x32xf32>
    %64 = arith.mulf %62, %63 : vector<48x32xf32>
    %65 = vector.broadcast %32 : vector<1x32xf32> to vector<48x32xf32>
    %66 = arith.addf %64, %65 : vector<48x32xf32>
    %67 = vector.extract_strided_slice %1 {offsets = [0, 0, 0], sizes = [1, 32, 96], strides = [1, 1, 1]} : vector<4x32x96xf32> to vector<1x32x96xf32>
    %68 = vector.shape_cast %67 : vector<1x32x96xf32> to vector<32x96xf32>
    %69 = arith.truncf %66 : vector<48x32xf32> to vector<48x32xbf16>
    %70 = arith.truncf %68 : vector<32x96xf32> to vector<32x96xbf16>
    %cst_26 = arith.constant dense<0.000000e+00> : vector<48x96xf32>
    %71 = tpu.matmul %69, %70, %cst_26 {dimension_numbers = #tpu.dot_dimension_numbers<[1], [0], [0], [1], [0, 0, 1, 1], [], []>} : vector<48x32xbf16>, vector<32x96xbf16>, vector<48x96xf32> -> vector<48x96xf32>
    %72 = vector.broadcast %33 : vector<1x96xf32> to vector<48x96xf32>
    %73 = arith.addf %71, %72 : vector<48x96xf32>
    %74 = vector.extract_strided_slice %73 {offsets = [0, 0], sizes = [48, 8], strides = [1, 1]} : vector<48x96xf32> to vector<48x8xf32>
    %75 = vector.shape_cast %74 : vector<48x8xf32> to vector<3x16x8xf32>
    %76 = vector.extract_strided_slice %73 {offsets = [0, 8], sizes = [48, 8], strides = [1, 1]} : vector<48x96xf32> to vector<48x8xf32>
    %77 = vector.shape_cast %76 : vector<48x8xf32> to vector<3x16x8xf32>
    %78 = vector.extract_strided_slice %73 {offsets = [0, 16], sizes = [48, 8], strides = [1, 1]} : vector<48x96xf32> to vector<48x8xf32>
    %79 = vector.shape_cast %78 : vector<48x8xf32> to vector<3x16x8xf32>
    %80 = vector.extract_strided_slice %73 {offsets = [0, 24], sizes = [48, 8], strides = [1, 1]} : vector<48x96xf32> to vector<48x8xf32>
    %81 = vector.shape_cast %80 : vector<48x8xf32> to vector<3x16x8xf32>
    %82 = tpu.concatenate %75, %77, %79, %81 in 0 : vector<3x16x8xf32>, vector<3x16x8xf32>, vector<3x16x8xf32>, vector<3x16x8xf32> -> vector<12x16x8xf32>
    %83 = vector.extract_strided_slice %73 {offsets = [0, 32], sizes = [48, 8], strides = [1, 1]} : vector<48x96xf32> to vector<48x8xf32>
    %84 = vector.shape_cast %83 : vector<48x8xf32> to vector<3x16x8xf32>
    %85 = vector.extract_strided_slice %73 {offsets = [0, 40], sizes = [48, 8], strides = [1, 1]} : vector<48x96xf32> to vector<48x8xf32>
    %86 = vector.shape_cast %85 : vector<48x8xf32> to vector<3x16x8xf32>
    %87 = vector.extract_strided_slice %73 {offsets = [0, 48], sizes = [48, 8], strides = [1, 1]} : vector<48x96xf32> to vector<48x8xf32>
    %88 = vector.shape_cast %87 : vector<48x8xf32> to vector<3x16x8xf32>
    %89 = vector.extract_strided_slice %73 {offsets = [0, 56], sizes = [48, 8], strides = [1, 1]} : vector<48x96xf32> to vector<48x8xf32>
    %90 = vector.shape_cast %89 : vector<48x8xf32> to vector<3x16x8xf32>
    %91 = tpu.concatenate %84, %86, %88, %90 in 0 : vector<3x16x8xf32>, vector<3x16x8xf32>, vector<3x16x8xf32>, vector<3x16x8xf32> -> vector<12x16x8xf32>
    %92 = vector.extract_strided_slice %73 {offsets = [0, 64], sizes = [48, 8], strides = [1, 1]} : vector<48x96xf32> to vector<48x8xf32>
    %93 = vector.shape_cast %92 : vector<48x8xf32> to vector<3x16x8xf32>
    %94 = vector.extract_strided_slice %73 {offsets = [0, 72], sizes = [48, 8], strides = [1, 1]} : vector<48x96xf32> to vector<48x8xf32>
    %95 = vector.shape_cast %94 : vector<48x8xf32> to vector<3x16x8xf32>
    %96 = vector.extract_strided_slice %73 {offsets = [0, 80], sizes = [48, 8], strides = [1, 1]} : vector<48x96xf32> to vector<48x8xf32>
    %97 = vector.shape_cast %96 : vector<48x8xf32> to vector<3x16x8xf32>
    %98 = vector.extract_strided_slice %73 {offsets = [0, 88], sizes = [48, 8], strides = [1, 1]} : vector<48x96xf32> to vector<48x8xf32>
    %99 = vector.shape_cast %98 : vector<48x8xf32> to vector<3x16x8xf32>
    %100 = tpu.concatenate %93, %95, %97, %99 in 0 : vector<3x16x8xf32>, vector<3x16x8xf32>, vector<3x16x8xf32>, vector<3x16x8xf32> -> vector<12x16x8xf32>
    %101 = arith.truncf %82 : vector<12x16x8xf32> to vector<12x16x8xbf16>
    %102 = arith.truncf %91 : vector<12x16x8xf32> to vector<12x16x8xbf16>
    "tpu.trace_start"() <{level = 10 : i32, message = "bnd,bmd->bnm"}> : () -> ()
    %cst_27 = arith.constant dense<0.000000e+00> : vector<12x16x16xf32>
    %103 = tpu.matmul %101, %102, %cst_27 {dimension_numbers = #tpu.dot_dimension_numbers<[2], [2], [1], [1], [0, 0, 0, 1, 1, 1], [0], [0]>} : vector<12x16x8xbf16>, vector<12x16x8xbf16>, vector<12x16x16xf32> -> vector<12x16x16xf32>
    "tpu.trace_stop"() : () -> ()
    %cst_28 = arith.constant 0.353553385 : f32
    %104 = vector.broadcast %cst_28 : f32 to vector<12x16x16xf32>
    %105 = arith.mulf %103, %104 : vector<12x16x16xf32>
    %106 = vector.shape_cast %28 : vector<16x16xf32> to vector<1x16x16xf32>
    %107 = vector.broadcast %106 : vector<1x16x16xf32> to vector<12x16x16xf32>
    %108 = arith.addf %105, %107 : vector<12x16x16xf32>
    %cst_29 = arith.constant dense<0xFF800000> : vector<12x16xf32>
    %109 = vector.multi_reduction <maximumf>, %108, %cst_29 [2] : vector<12x16x16xf32> to vector<12x16xf32>
    %110 = vector.shape_cast %109 : vector<12x16xf32> to vector<12x16x1xf32>
    %111 = vector.broadcast %110 : vector<12x16x1xf32> to vector<12x16x16xf32>
    %112 = arith.subf %108, %111 : vector<12x16x16xf32>
    %113 = math.exp %112 : vector<12x16x16xf32>
    %cst_30 = arith.constant dense<0.000000e+00> : vector<12x16xf32>
    %114 = vector.multi_reduction <add>, %113, %cst_30 [2] : vector<12x16x16xf32> to vector<12x16xf32>
    %115 = vector.shape_cast %114 : vector<12x16xf32> to vector<12x16x1xf32>
    %116 = tpu.reciprocal %115 {approx = true} : vector<12x16x1xf32> -> vector<12x16x1xf32>
    %117 = vector.broadcast %116 : vector<12x16x1xf32> to vector<12x16x16xf32>
    %118 = arith.mulf %113, %117 : vector<12x16x16xf32>
    %119 = arith.truncf %118 : vector<12x16x16xf32> to vector<12x16x16xbf16>
    %120 = arith.truncf %100 : vector<12x16x8xf32> to vector<12x16x8xbf16>
    "tpu.trace_start"() <{level = 10 : i32, message = "bnm,bmd->bnd"}> : () -> ()
    %cst_31 = arith.constant dense<0.000000e+00> : vector<12x16x8xf32>
    %121 = tpu.matmul %119, %120, %cst_31 {dimension_numbers = #tpu.dot_dimension_numbers<[2], [1], [1], [2], [0, 0, 0, 1, 1, 2], [0], [0]>} : vector<12x16x16xbf16>, vector<12x16x8xbf16>, vector<12x16x8xf32> -> vector<12x16x8xf32>
    "tpu.trace_stop"() : () -> ()
    %122 = vector.shape_cast %121 : vector<12x16x8xf32> to vector<4x48x8xf32>
    %123 = vector.extract_strided_slice %122 {offsets = [0, 0, 0], sizes = [1, 48, 8], strides = [1, 1, 1]} : vector<4x48x8xf32> to vector<1x48x8xf32>
    %124 = vector.shape_cast %123 : vector<1x48x8xf32> to vector<48x8xf32>
    %125 = vector.extract_strided_slice %122 {offsets = [1, 0, 0], sizes = [1, 48, 8], strides = [1, 1, 1]} : vector<4x48x8xf32> to vector<1x48x8xf32>
    %126 = vector.shape_cast %125 : vector<1x48x8xf32> to vector<48x8xf32>
    %127 = vector.extract_strided_slice %122 {offsets = [2, 0, 0], sizes = [1, 48, 8], strides = [1, 1, 1]} : vector<4x48x8xf32> to vector<1x48x8xf32>
    %128 = vector.shape_cast %127 : vector<1x48x8xf32> to vector<48x8xf32>
    %129 = vector.extract_strided_slice %122 {offsets = [3, 0, 0], sizes = [1, 48, 8], strides = [1, 1, 1]} : vector<4x48x8xf32> to vector<1x48x8xf32>
    %130 = vector.shape_cast %129 : vector<1x48x8xf32> to vector<48x8xf32>
    %131 = tpu.concatenate %124, %126, %128, %130 in 1 : vector<48x8xf32>, vector<48x8xf32>, vector<48x8xf32>, vector<48x8xf32> -> vector<48x32xf32>
    %132 = arith.truncf %131 : vector<48x32xf32> to vector<48x32xbf16>
    %133 = arith.truncf %40 : vector<32x32xf32> to vector<32x32xbf16>
    %cst_32 = arith.constant dense<0.000000e+00> : vector<48x32xf32>
    %134 = tpu.matmul %132, %133, %cst_32 {dimension_numbers = #tpu.dot_dimension_numbers<[1], [0], [0], [1], [0, 0, 1, 1], [], []>} : vector<48x32xbf16>, vector<32x32xbf16>, vector<48x32xf32> -> vector<48x32xf32>
    %135 = arith.addf %26, %134 : vector<48x32xf32>
    %136 = vector.broadcast %34 : vector<1x32xf32> to vector<48x32xf32>
    %137 = arith.addf %135, %136 : vector<48x32xf32>
    %cst_33 = arith.constant dense<0.000000e+00> : vector<48xf32>
    %138 = vector.multi_reduction <add>, %137, %cst_33 [1] : vector<48x32xf32> to vector<48xf32>
    %139 = vector.shape_cast %138 : vector<48xf32> to vector<48x1xf32>
    %cst_34 = arith.constant 3.200000e+01 : f32
    %140 = vector.broadcast %cst_34 : f32 to vector<48x1xf32>
    %141 = arith.divf %139, %140 : vector<48x1xf32>
    %142 = vector.broadcast %141 : vector<48x1xf32> to vector<48x32xf32>
    %143 = arith.subf %137, %142 : vector<48x32xf32>
    %144 = arith.mulf %143, %143 : vector<48x32xf32>
    %cst_35 = arith.constant dense<0.000000e+00> : vector<48xf32>
    %145 = vector.multi_reduction <add>, %144, %cst_35 [1] : vector<48x32xf32> to vector<48xf32>
    %146 = vector.shape_cast %145 : vector<48xf32> to vector<48x1xf32>
    %cst_36 = arith.constant 3.200000e+01 : f32
    %147 = vector.broadcast %cst_36 : f32 to vector<48x1xf32>
    %148 = arith.divf %146, %147 : vector<48x1xf32>
    %149 = vector.broadcast %141 : vector<48x1xf32> to vector<48x32xf32>
    %150 = arith.subf %137, %149 : vector<48x32xf32>
    %cst_37 = arith.constant 9.99999974E-6 : f32
    %151 = vector.broadcast %cst_37 : f32 to vector<48x1xf32>
    %152 = arith.addf %148, %151 : vector<48x1xf32>
    %153 = math.rsqrt %152 : vector<48x1xf32>
    %154 = vector.broadcast %153 : vector<48x1xf32> to vector<48x32xf32>
    %155 = arith.mulf %150, %154 : vector<48x32xf32>
    %156 = vector.broadcast %35 : vector<1x32xf32> to vector<48x32xf32>
    %157 = arith.mulf %155, %156 : vector<48x32xf32>
    %158 = vector.broadcast %36 : vector<1x32xf32> to vector<48x32xf32>
    %159 = arith.addf %157, %158 : vector<48x32xf32>
    %160 = arith.truncf %159 : vector<48x32xf32> to vector<48x32xbf16>
    %161 = arith.truncf %42 : vector<32x64xf32> to vector<32x64xbf16>
    %cst_38 = arith.constant dense<0.000000e+00> : vector<48x64xf32>
    %162 = tpu.matmul %160, %161, %cst_38 {dimension_numbers = #tpu.dot_dimension_numbers<[1], [0], [0], [1], [0, 0, 1, 1], [], []>} : vector<48x32xbf16>, vector<32x64xbf16>, vector<48x64xf32> -> vector<48x64xf32>
    %163 = vector.broadcast %37 : vector<1x64xf32> to vector<48x64xf32>
    %164 = arith.addf %162, %163 : vector<48x64xf32>
    %cst_39 = arith.constant 0.000000e+00 : f32
    %165 = vector.broadcast %cst_39 : f32 to vector<48x64xf32>
    %166 = arith.maximumf %164, %165 : vector<48x64xf32>
    %167 = arith.truncf %166 : vector<48x64xf32> to vector<48x64xbf16>
    %168 = arith.truncf %44 : vector<64x32xf32> to vector<64x32xbf16>
    %cst_40 = arith.constant dense<0.000000e+00> : vector<48x32xf32>
    %169 = tpu.matmul %167, %168, %cst_40 {dimension_numbers = #tpu.dot_dimension_numbers<[1], [0], [0], [1], [0, 0, 1, 1], [], []>} : vector<48x64xbf16>, vector<64x32xbf16>, vector<48x32xf32> -> vector<48x32xf32>
    %170 = arith.addf %137, %169 : vector<48x32xf32>
    %171 = vector.broadcast %38 : vector<1x32xf32> to vector<48x32xf32>
    %172 = arith.addf %170, %171 : vector<48x32xf32>
    %173 = vector.extract_strided_slice %0 {offsets = [12, 0], sizes = [1, 32], strides = [1, 1]} : vector<41x96xf32> to vector<1x32xf32>
    %174 = vector.extract_strided_slice %0 {offsets = [13, 0], sizes = [1, 32], strides = [1, 1]} : vector<41x96xf32> to vector<1x32xf32>
    %175 = vector.extract_strided_slice %0 {offsets = [14, 0], sizes = [1, 96], strides = [1, 1]} : vector<41x96xf32> to vector<1x96xf32>
    %176 = vector.extract_strided_slice %0 {offsets = [15, 0], sizes = [1, 32], strides = [1, 1]} : vector<41x96xf32> to vector<1x32xf32>
    %177 = vector.extract_strided_slice %0 {offsets = [16, 0], sizes = [1, 32], strides = [1, 1]} : vector<41x96xf32> to vector<1x32xf32>
    %178 = vector.extract_strided_slice %0 {offsets = [17, 0], sizes = [1, 32], strides = [1, 1]} : vector<41x96xf32> to vector<1x32xf32>
    %179 = vector.extract_strided_slice %0 {offsets = [18, 0], sizes = [1, 64], strides = [1, 1]} : vector<41x96xf32> to vector<1x64xf32>
    %180 = vector.extract_strided_slice %0 {offsets = [19, 0], sizes = [1, 32], strides = [1, 1]} : vector<41x96xf32> to vector<1x32xf32>
    %181 = vector.extract_strided_slice %2 {offsets = [2, 0, 0], sizes = [1, 32, 32], strides = [1, 1, 1]} : vector<6x32x32xf32> to vector<1x32x32xf32>
    %182 = vector.shape_cast %181 : vector<1x32x32xf32> to vector<32x32xf32>
    %183 = vector.extract_strided_slice %3 {offsets = [1, 0, 0], sizes = [1, 32, 64], strides = [1, 1, 1]} : vector<4x32x64xf32> to vector<1x32x64xf32>
    %184 = vector.shape_cast %183 : vector<1x32x64xf32> to vector<32x64xf32>
    %185 = vector.extract_strided_slice %4 {offsets = [1, 0, 0], sizes = [1, 64, 32], strides = [1, 1, 1]} : vector<4x64x32xf32> to vector<1x64x32xf32>
    %186 = vector.shape_cast %185 : vector<1x64x32xf32> to vector<64x32xf32>
    %cst_41 = arith.constant dense<0.000000e+00> : vector<48xf32>
    %187 = vector.multi_reduction <add>, %172, %cst_41 [1] : vector<48x32xf32> to vector<48xf32>
    %188 = vector.shape_cast %187 : vector<48xf32> to vector<48x1xf32>
    %cst_42 = arith.constant 3.200000e+01 : f32
    %189 = vector.broadcast %cst_42 : f32 to vector<48x1xf32>
    %190 = arith.divf %188, %189 : vector<48x1xf32>
    %191 = vector.broadcast %190 : vector<48x1xf32> to vector<48x32xf32>
    %192 = arith.subf %172, %191 : vector<48x32xf32>
    %193 = arith.mulf %192, %192 : vector<48x32xf32>
    %cst_43 = arith.constant dense<0.000000e+00> : vector<48xf32>
    %194 = vector.multi_reduction <add>, %193, %cst_43 [1] : vector<48x32xf32> to vector<48xf32>
    %195 = vector.shape_cast %194 : vector<48xf32> to vector<48x1xf32>
    %cst_44 = arith.constant 3.200000e+01 : f32
    %196 = vector.broadcast %cst_44 : f32 to vector<48x1xf32>
    %197 = arith.divf %195, %196 : vector<48x1xf32>
    %198 = vector.broadcast %190 : vector<48x1xf32> to vector<48x32xf32>
    %199 = arith.subf %172, %198 : vector<48x32xf32>
    %cst_45 = arith.constant 9.99999974E-6 : f32
    %200 = vector.broadcast %cst_45 : f32 to vector<48x1xf32>
    %201 = arith.addf %197, %200 : vector<48x1xf32>
    %202 = math.rsqrt %201 : vector<48x1xf32>
    %203 = vector.broadcast %202 : vector<48x1xf32> to vector<48x32xf32>
    %204 = arith.mulf %199, %203 : vector<48x32xf32>
    %205 = vector.broadcast %173 : vector<1x32xf32> to vector<48x32xf32>
    %206 = arith.mulf %204, %205 : vector<48x32xf32>
    %207 = vector.broadcast %174 : vector<1x32xf32> to vector<48x32xf32>
    %208 = arith.addf %206, %207 : vector<48x32xf32>
    %209 = vector.extract_strided_slice %1 {offsets = [1, 0, 0], sizes = [1, 32, 96], strides = [1, 1, 1]} : vector<4x32x96xf32> to vector<1x32x96xf32>
    %210 = vector.shape_cast %209 : vector<1x32x96xf32> to vector<32x96xf32>
    %211 = arith.truncf %208 : vector<48x32xf32> to vector<48x32xbf16>
    %212 = arith.truncf %210 : vector<32x96xf32> to vector<32x96xbf16>
    %cst_46 = arith.constant dense<0.000000e+00> : vector<48x96xf32>
    %213 = tpu.matmul %211, %212, %cst_46 {dimension_numbers = #tpu.dot_dimension_numbers<[1], [0], [0], [1], [0, 0, 1, 1], [], []>} : vector<48x32xbf16>, vector<32x96xbf16>, vector<48x96xf32> -> vector<48x96xf32>
    %214 = vector.broadcast %175 : vector<1x96xf32> to vector<48x96xf32>
    %215 = arith.addf %213, %214 : vector<48x96xf32>
    %216 = vector.extract_strided_slice %215 {offsets = [0, 0], sizes = [48, 8], strides = [1, 1]} : vector<48x96xf32> to vector<48x8xf32>
    %217 = vector.shape_cast %216 : vector<48x8xf32> to vector<3x16x8xf32>
    %218 = vector.extract_strided_slice %215 {offsets = [0, 8], sizes = [48, 8], strides = [1, 1]} : vector<48x96xf32> to vector<48x8xf32>
    %219 = vector.shape_cast %218 : vector<48x8xf32> to vector<3x16x8xf32>
    %220 = vector.extract_strided_slice %215 {offsets = [0, 16], sizes = [48, 8], strides = [1, 1]} : vector<48x96xf32> to vector<48x8xf32>
    %221 = vector.shape_cast %220 : vector<48x8xf32> to vector<3x16x8xf32>
    %222 = vector.extract_strided_slice %215 {offsets = [0, 24], sizes = [48, 8], strides = [1, 1]} : vector<48x96xf32> to vector<48x8xf32>
    %223 = vector.shape_cast %222 : vector<48x8xf32> to vector<3x16x8xf32>
    %224 = tpu.concatenate %217, %219, %221, %223 in 0 : vector<3x16x8xf32>, vector<3x16x8xf32>, vector<3x16x8xf32>, vector<3x16x8xf32> -> vector<12x16x8xf32>
    %225 = vector.extract_strided_slice %215 {offsets = [0, 32], sizes = [48, 8], strides = [1, 1]} : vector<48x96xf32> to vector<48x8xf32>
    %226 = vector.shape_cast %225 : vector<48x8xf32> to vector<3x16x8xf32>
    %227 = vector.extract_strided_slice %215 {offsets = [0, 40], sizes = [48, 8], strides = [1, 1]} : vector<48x96xf32> to vector<48x8xf32>
    %228 = vector.shape_cast %227 : vector<48x8xf32> to vector<3x16x8xf32>
    %229 = vector.extract_strided_slice %215 {offsets = [0, 48], sizes = [48, 8], strides = [1, 1]} : vector<48x96xf32> to vector<48x8xf32>
    %230 = vector.shape_cast %229 : vector<48x8xf32> to vector<3x16x8xf32>
    %231 = vector.extract_strided_slice %215 {offsets = [0, 56], sizes = [48, 8], strides = [1, 1]} : vector<48x96xf32> to vector<48x8xf32>
    %232 = vector.shape_cast %231 : vector<48x8xf32> to vector<3x16x8xf32>
    %233 = tpu.concatenate %226, %228, %230, %232 in 0 : vector<3x16x8xf32>, vector<3x16x8xf32>, vector<3x16x8xf32>, vector<3x16x8xf32> -> vector<12x16x8xf32>
    %234 = vector.extract_strided_slice %215 {offsets = [0, 64], sizes = [48, 8], strides = [1, 1]} : vector<48x96xf32> to vector<48x8xf32>
    %235 = vector.shape_cast %234 : vector<48x8xf32> to vector<3x16x8xf32>
    %236 = vector.extract_strided_slice %215 {offsets = [0, 72], sizes = [48, 8], strides = [1, 1]} : vector<48x96xf32> to vector<48x8xf32>
    %237 = vector.shape_cast %236 : vector<48x8xf32> to vector<3x16x8xf32>
    %238 = vector.extract_strided_slice %215 {offsets = [0, 80], sizes = [48, 8], strides = [1, 1]} : vector<48x96xf32> to vector<48x8xf32>
    %239 = vector.shape_cast %238 : vector<48x8xf32> to vector<3x16x8xf32>
    %240 = vector.extract_strided_slice %215 {offsets = [0, 88], sizes = [48, 8], strides = [1, 1]} : vector<48x96xf32> to vector<48x8xf32>
    %241 = vector.shape_cast %240 : vector<48x8xf32> to vector<3x16x8xf32>
    %242 = tpu.concatenate %235, %237, %239, %241 in 0 : vector<3x16x8xf32>, vector<3x16x8xf32>, vector<3x16x8xf32>, vector<3x16x8xf32> -> vector<12x16x8xf32>
    %243 = arith.truncf %224 : vector<12x16x8xf32> to vector<12x16x8xbf16>
    %244 = arith.truncf %233 : vector<12x16x8xf32> to vector<12x16x8xbf16>
    "tpu.trace_start"() <{level = 10 : i32, message = "bnd,bmd->bnm"}> : () -> ()
    %cst_47 = arith.constant dense<0.000000e+00> : vector<12x16x16xf32>
    %245 = tpu.matmul %243, %244, %cst_47 {dimension_numbers = #tpu.dot_dimension_numbers<[2], [2], [1], [1], [0, 0, 0, 1, 1, 1], [0], [0]>} : vector<12x16x8xbf16>, vector<12x16x8xbf16>, vector<12x16x16xf32> -> vector<12x16x16xf32>
    "tpu.trace_stop"() : () -> ()
    %cst_48 = arith.constant 0.353553385 : f32
    %246 = vector.broadcast %cst_48 : f32 to vector<12x16x16xf32>
    %247 = arith.mulf %245, %246 : vector<12x16x16xf32>
    %248 = vector.shape_cast %30 : vector<16x16xf32> to vector<1x16x16xf32>
    %249 = vector.broadcast %248 : vector<1x16x16xf32> to vector<12x16x16xf32>
    %250 = arith.addf %247, %249 : vector<12x16x16xf32>
    %cst_49 = arith.constant dense<0xFF800000> : vector<12x16xf32>
    %251 = vector.multi_reduction <maximumf>, %250, %cst_49 [2] : vector<12x16x16xf32> to vector<12x16xf32>
    %252 = vector.shape_cast %251 : vector<12x16xf32> to vector<12x16x1xf32>
    %253 = vector.broadcast %252 : vector<12x16x1xf32> to vector<12x16x16xf32>
    %254 = arith.subf %250, %253 : vector<12x16x16xf32>
    %255 = math.exp %254 : vector<12x16x16xf32>
    %cst_50 = arith.constant dense<0.000000e+00> : vector<12x16xf32>
    %256 = vector.multi_reduction <add>, %255, %cst_50 [2] : vector<12x16x16xf32> to vector<12x16xf32>
    %257 = vector.shape_cast %256 : vector<12x16xf32> to vector<12x16x1xf32>
    %258 = tpu.reciprocal %257 {approx = true} : vector<12x16x1xf32> -> vector<12x16x1xf32>
    %259 = vector.broadcast %258 : vector<12x16x1xf32> to vector<12x16x16xf32>
    %260 = arith.mulf %255, %259 : vector<12x16x16xf32>
    %261 = arith.truncf %260 : vector<12x16x16xf32> to vector<12x16x16xbf16>
    %262 = arith.truncf %242 : vector<12x16x8xf32> to vector<12x16x8xbf16>
    "tpu.trace_start"() <{level = 10 : i32, message = "bnm,bmd->bnd"}> : () -> ()
    %cst_51 = arith.constant dense<0.000000e+00> : vector<12x16x8xf32>
    %263 = tpu.matmul %261, %262, %cst_51 {dimension_numbers = #tpu.dot_dimension_numbers<[2], [1], [1], [2], [0, 0, 0, 1, 1, 2], [0], [0]>} : vector<12x16x16xbf16>, vector<12x16x8xbf16>, vector<12x16x8xf32> -> vector<12x16x8xf32>
    "tpu.trace_stop"() : () -> ()
    %264 = vector.shape_cast %263 : vector<12x16x8xf32> to vector<4x48x8xf32>
    %265 = vector.extract_strided_slice %264 {offsets = [0, 0, 0], sizes = [1, 48, 8], strides = [1, 1, 1]} : vector<4x48x8xf32> to vector<1x48x8xf32>
    %266 = vector.shape_cast %265 : vector<1x48x8xf32> to vector<48x8xf32>
    %267 = vector.extract_strided_slice %264 {offsets = [1, 0, 0], sizes = [1, 48, 8], strides = [1, 1, 1]} : vector<4x48x8xf32> to vector<1x48x8xf32>
    %268 = vector.shape_cast %267 : vector<1x48x8xf32> to vector<48x8xf32>
    %269 = vector.extract_strided_slice %264 {offsets = [2, 0, 0], sizes = [1, 48, 8], strides = [1, 1, 1]} : vector<4x48x8xf32> to vector<1x48x8xf32>
    %270 = vector.shape_cast %269 : vector<1x48x8xf32> to vector<48x8xf32>
    %271 = vector.extract_strided_slice %264 {offsets = [3, 0, 0], sizes = [1, 48, 8], strides = [1, 1, 1]} : vector<4x48x8xf32> to vector<1x48x8xf32>
    %272 = vector.shape_cast %271 : vector<1x48x8xf32> to vector<48x8xf32>
    %273 = tpu.concatenate %266, %268, %270, %272 in 1 : vector<48x8xf32>, vector<48x8xf32>, vector<48x8xf32>, vector<48x8xf32> -> vector<48x32xf32>
    %274 = arith.truncf %273 : vector<48x32xf32> to vector<48x32xbf16>
    %275 = arith.truncf %182 : vector<32x32xf32> to vector<32x32xbf16>
    %cst_52 = arith.constant dense<0.000000e+00> : vector<48x32xf32>
    %276 = tpu.matmul %274, %275, %cst_52 {dimension_numbers = #tpu.dot_dimension_numbers<[1], [0], [0], [1], [0, 0, 1, 1], [], []>} : vector<48x32xbf16>, vector<32x32xbf16>, vector<48x32xf32> -> vector<48x32xf32>
    %277 = arith.addf %172, %276 : vector<48x32xf32>
    %278 = vector.broadcast %176 : vector<1x32xf32> to vector<48x32xf32>
    %279 = arith.addf %277, %278 : vector<48x32xf32>
    %cst_53 = arith.constant dense<0.000000e+00> : vector<48xf32>
    %280 = vector.multi_reduction <add>, %279, %cst_53 [1] : vector<48x32xf32> to vector<48xf32>
    %281 = vector.shape_cast %280 : vector<48xf32> to vector<48x1xf32>
    %cst_54 = arith.constant 3.200000e+01 : f32
    %282 = vector.broadcast %cst_54 : f32 to vector<48x1xf32>
    %283 = arith.divf %281, %282 : vector<48x1xf32>
    %284 = vector.broadcast %283 : vector<48x1xf32> to vector<48x32xf32>
    %285 = arith.subf %279, %284 : vector<48x32xf32>
    %286 = arith.mulf %285, %285 : vector<48x32xf32>
    %cst_55 = arith.constant dense<0.000000e+00> : vector<48xf32>
    %287 = vector.multi_reduction <add>, %286, %cst_55 [1] : vector<48x32xf32> to vector<48xf32>
    %288 = vector.shape_cast %287 : vector<48xf32> to vector<48x1xf32>
    %cst_56 = arith.constant 3.200000e+01 : f32
    %289 = vector.broadcast %cst_56 : f32 to vector<48x1xf32>
    %290 = arith.divf %288, %289 : vector<48x1xf32>
    %291 = vector.broadcast %283 : vector<48x1xf32> to vector<48x32xf32>
    %292 = arith.subf %279, %291 : vector<48x32xf32>
    %cst_57 = arith.constant 9.99999974E-6 : f32
    %293 = vector.broadcast %cst_57 : f32 to vector<48x1xf32>
    %294 = arith.addf %290, %293 : vector<48x1xf32>
    %295 = math.rsqrt %294 : vector<48x1xf32>
    %296 = vector.broadcast %295 : vector<48x1xf32> to vector<48x32xf32>
    %297 = arith.mulf %292, %296 : vector<48x32xf32>
    %298 = vector.broadcast %177 : vector<1x32xf32> to vector<48x32xf32>
    %299 = arith.mulf %297, %298 : vector<48x32xf32>
    %300 = vector.broadcast %178 : vector<1x32xf32> to vector<48x32xf32>
    %301 = arith.addf %299, %300 : vector<48x32xf32>
    %302 = arith.truncf %301 : vector<48x32xf32> to vector<48x32xbf16>
    %303 = arith.truncf %184 : vector<32x64xf32> to vector<32x64xbf16>
    %cst_58 = arith.constant dense<0.000000e+00> : vector<48x64xf32>
    %304 = tpu.matmul %302, %303, %cst_58 {dimension_numbers = #tpu.dot_dimension_numbers<[1], [0], [0], [1], [0, 0, 1, 1], [], []>} : vector<48x32xbf16>, vector<32x64xbf16>, vector<48x64xf32> -> vector<48x64xf32>
    %305 = vector.broadcast %179 : vector<1x64xf32> to vector<48x64xf32>
    %306 = arith.addf %304, %305 : vector<48x64xf32>
    %cst_59 = arith.constant 0.000000e+00 : f32
    %307 = vector.broadcast %cst_59 : f32 to vector<48x64xf32>
    %308 = arith.maximumf %306, %307 : vector<48x64xf32>
    %309 = arith.truncf %308 : vector<48x64xf32> to vector<48x64xbf16>
    %310 = arith.truncf %186 : vector<64x32xf32> to vector<64x32xbf16>
    %cst_60 = arith.constant dense<0.000000e+00> : vector<48x32xf32>
    %311 = tpu.matmul %309, %310, %cst_60 {dimension_numbers = #tpu.dot_dimension_numbers<[1], [0], [0], [1], [0, 0, 1, 1], [], []>} : vector<48x64xbf16>, vector<64x32xbf16>, vector<48x32xf32> -> vector<48x32xf32>
    %312 = arith.addf %279, %311 : vector<48x32xf32>
    %313 = vector.broadcast %180 : vector<1x32xf32> to vector<48x32xf32>
    %314 = arith.addf %312, %313 : vector<48x32xf32>
    %315 = vector.extract_strided_slice %0 {offsets = [20, 0], sizes = [1, 32], strides = [1, 1]} : vector<41x96xf32> to vector<1x32xf32>
    %316 = vector.extract_strided_slice %0 {offsets = [21, 0], sizes = [1, 32], strides = [1, 1]} : vector<41x96xf32> to vector<1x32xf32>
    %317 = vector.extract_strided_slice %0 {offsets = [22, 0], sizes = [1, 96], strides = [1, 1]} : vector<41x96xf32> to vector<1x96xf32>
    %318 = vector.extract_strided_slice %0 {offsets = [23, 0], sizes = [1, 32], strides = [1, 1]} : vector<41x96xf32> to vector<1x32xf32>
    %319 = vector.extract_strided_slice %0 {offsets = [24, 0], sizes = [1, 32], strides = [1, 1]} : vector<41x96xf32> to vector<1x32xf32>
    %320 = vector.extract_strided_slice %0 {offsets = [25, 0], sizes = [1, 32], strides = [1, 1]} : vector<41x96xf32> to vector<1x32xf32>
    %321 = vector.extract_strided_slice %0 {offsets = [26, 0], sizes = [1, 64], strides = [1, 1]} : vector<41x96xf32> to vector<1x64xf32>
    %322 = vector.extract_strided_slice %0 {offsets = [27, 0], sizes = [1, 32], strides = [1, 1]} : vector<41x96xf32> to vector<1x32xf32>
    %323 = vector.extract_strided_slice %2 {offsets = [3, 0, 0], sizes = [1, 32, 32], strides = [1, 1, 1]} : vector<6x32x32xf32> to vector<1x32x32xf32>
    %324 = vector.shape_cast %323 : vector<1x32x32xf32> to vector<32x32xf32>
    %325 = vector.extract_strided_slice %3 {offsets = [2, 0, 0], sizes = [1, 32, 64], strides = [1, 1, 1]} : vector<4x32x64xf32> to vector<1x32x64xf32>
    %326 = vector.shape_cast %325 : vector<1x32x64xf32> to vector<32x64xf32>
    %327 = vector.extract_strided_slice %4 {offsets = [2, 0, 0], sizes = [1, 64, 32], strides = [1, 1, 1]} : vector<4x64x32xf32> to vector<1x64x32xf32>
    %328 = vector.shape_cast %327 : vector<1x64x32xf32> to vector<64x32xf32>
    %cst_61 = arith.constant dense<0.000000e+00> : vector<48xf32>
    %329 = vector.multi_reduction <add>, %314, %cst_61 [1] : vector<48x32xf32> to vector<48xf32>
    %330 = vector.shape_cast %329 : vector<48xf32> to vector<48x1xf32>
    %cst_62 = arith.constant 3.200000e+01 : f32
    %331 = vector.broadcast %cst_62 : f32 to vector<48x1xf32>
    %332 = arith.divf %330, %331 : vector<48x1xf32>
    %333 = vector.broadcast %332 : vector<48x1xf32> to vector<48x32xf32>
    %334 = arith.subf %314, %333 : vector<48x32xf32>
    %335 = arith.mulf %334, %334 : vector<48x32xf32>
    %cst_63 = arith.constant dense<0.000000e+00> : vector<48xf32>
    %336 = vector.multi_reduction <add>, %335, %cst_63 [1] : vector<48x32xf32> to vector<48xf32>
    %337 = vector.shape_cast %336 : vector<48xf32> to vector<48x1xf32>
    %cst_64 = arith.constant 3.200000e+01 : f32
    %338 = vector.broadcast %cst_64 : f32 to vector<48x1xf32>
    %339 = arith.divf %337, %338 : vector<48x1xf32>
    %340 = vector.broadcast %332 : vector<48x1xf32> to vector<48x32xf32>
    %341 = arith.subf %314, %340 : vector<48x32xf32>
    %cst_65 = arith.constant 9.99999974E-6 : f32
    %342 = vector.broadcast %cst_65 : f32 to vector<48x1xf32>
    %343 = arith.addf %339, %342 : vector<48x1xf32>
    %344 = math.rsqrt %343 : vector<48x1xf32>
    %345 = vector.broadcast %344 : vector<48x1xf32> to vector<48x32xf32>
    %346 = arith.mulf %341, %345 : vector<48x32xf32>
    %347 = vector.broadcast %315 : vector<1x32xf32> to vector<48x32xf32>
    %348 = arith.mulf %346, %347 : vector<48x32xf32>
    %349 = vector.broadcast %316 : vector<1x32xf32> to vector<48x32xf32>
    %350 = arith.addf %348, %349 : vector<48x32xf32>
    %351 = vector.extract_strided_slice %1 {offsets = [2, 0, 0], sizes = [1, 32, 96], strides = [1, 1, 1]} : vector<4x32x96xf32> to vector<1x32x96xf32>
    %352 = vector.shape_cast %351 : vector<1x32x96xf32> to vector<32x96xf32>
    %353 = arith.truncf %350 : vector<48x32xf32> to vector<48x32xbf16>
    %354 = arith.truncf %352 : vector<32x96xf32> to vector<32x96xbf16>
    %cst_66 = arith.constant dense<0.000000e+00> : vector<48x96xf32>
    %355 = tpu.matmul %353, %354, %cst_66 {dimension_numbers = #tpu.dot_dimension_numbers<[1], [0], [0], [1], [0, 0, 1, 1], [], []>} : vector<48x32xbf16>, vector<32x96xbf16>, vector<48x96xf32> -> vector<48x96xf32>
    %356 = vector.broadcast %317 : vector<1x96xf32> to vector<48x96xf32>
    %357 = arith.addf %355, %356 : vector<48x96xf32>
    %358 = vector.extract_strided_slice %357 {offsets = [0, 0], sizes = [48, 8], strides = [1, 1]} : vector<48x96xf32> to vector<48x8xf32>
    %359 = vector.shape_cast %358 : vector<48x8xf32> to vector<3x16x8xf32>
    %360 = vector.extract_strided_slice %357 {offsets = [0, 8], sizes = [48, 8], strides = [1, 1]} : vector<48x96xf32> to vector<48x8xf32>
    %361 = vector.shape_cast %360 : vector<48x8xf32> to vector<3x16x8xf32>
    %362 = vector.extract_strided_slice %357 {offsets = [0, 16], sizes = [48, 8], strides = [1, 1]} : vector<48x96xf32> to vector<48x8xf32>
    %363 = vector.shape_cast %362 : vector<48x8xf32> to vector<3x16x8xf32>
    %364 = vector.extract_strided_slice %357 {offsets = [0, 24], sizes = [48, 8], strides = [1, 1]} : vector<48x96xf32> to vector<48x8xf32>
    %365 = vector.shape_cast %364 : vector<48x8xf32> to vector<3x16x8xf32>
    %366 = tpu.concatenate %359, %361, %363, %365 in 0 : vector<3x16x8xf32>, vector<3x16x8xf32>, vector<3x16x8xf32>, vector<3x16x8xf32> -> vector<12x16x8xf32>
    %367 = vector.extract_strided_slice %357 {offsets = [0, 32], sizes = [48, 8], strides = [1, 1]} : vector<48x96xf32> to vector<48x8xf32>
    %368 = vector.shape_cast %367 : vector<48x8xf32> to vector<3x16x8xf32>
    %369 = vector.extract_strided_slice %357 {offsets = [0, 40], sizes = [48, 8], strides = [1, 1]} : vector<48x96xf32> to vector<48x8xf32>
    %370 = vector.shape_cast %369 : vector<48x8xf32> to vector<3x16x8xf32>
    %371 = vector.extract_strided_slice %357 {offsets = [0, 48], sizes = [48, 8], strides = [1, 1]} : vector<48x96xf32> to vector<48x8xf32>
    %372 = vector.shape_cast %371 : vector<48x8xf32> to vector<3x16x8xf32>
    %373 = vector.extract_strided_slice %357 {offsets = [0, 56], sizes = [48, 8], strides = [1, 1]} : vector<48x96xf32> to vector<48x8xf32>
    %374 = vector.shape_cast %373 : vector<48x8xf32> to vector<3x16x8xf32>
    %375 = tpu.concatenate %368, %370, %372, %374 in 0 : vector<3x16x8xf32>, vector<3x16x8xf32>, vector<3x16x8xf32>, vector<3x16x8xf32> -> vector<12x16x8xf32>
    %376 = vector.extract_strided_slice %357 {offsets = [0, 64], sizes = [48, 8], strides = [1, 1]} : vector<48x96xf32> to vector<48x8xf32>
    %377 = vector.shape_cast %376 : vector<48x8xf32> to vector<3x16x8xf32>
    %378 = vector.extract_strided_slice %357 {offsets = [0, 72], sizes = [48, 8], strides = [1, 1]} : vector<48x96xf32> to vector<48x8xf32>
    %379 = vector.shape_cast %378 : vector<48x8xf32> to vector<3x16x8xf32>
    %380 = vector.extract_strided_slice %357 {offsets = [0, 80], sizes = [48, 8], strides = [1, 1]} : vector<48x96xf32> to vector<48x8xf32>
    %381 = vector.shape_cast %380 : vector<48x8xf32> to vector<3x16x8xf32>
    %382 = vector.extract_strided_slice %357 {offsets = [0, 88], sizes = [48, 8], strides = [1, 1]} : vector<48x96xf32> to vector<48x8xf32>
    %383 = vector.shape_cast %382 : vector<48x8xf32> to vector<3x16x8xf32>
    %384 = tpu.concatenate %377, %379, %381, %383 in 0 : vector<3x16x8xf32>, vector<3x16x8xf32>, vector<3x16x8xf32>, vector<3x16x8xf32> -> vector<12x16x8xf32>
    %385 = arith.truncf %366 : vector<12x16x8xf32> to vector<12x16x8xbf16>
    %386 = arith.truncf %375 : vector<12x16x8xf32> to vector<12x16x8xbf16>
    "tpu.trace_start"() <{level = 10 : i32, message = "bnd,bmd->bnm"}> : () -> ()
    %cst_67 = arith.constant dense<0.000000e+00> : vector<12x16x16xf32>
    %387 = tpu.matmul %385, %386, %cst_67 {dimension_numbers = #tpu.dot_dimension_numbers<[2], [2], [1], [1], [0, 0, 0, 1, 1, 1], [0], [0]>} : vector<12x16x8xbf16>, vector<12x16x8xbf16>, vector<12x16x16xf32> -> vector<12x16x16xf32>
    "tpu.trace_stop"() : () -> ()
    %cst_68 = arith.constant 0.353553385 : f32
    %388 = vector.broadcast %cst_68 : f32 to vector<12x16x16xf32>
    %389 = arith.mulf %387, %388 : vector<12x16x16xf32>
    %390 = vector.shape_cast %28 : vector<16x16xf32> to vector<1x16x16xf32>
    %391 = vector.broadcast %390 : vector<1x16x16xf32> to vector<12x16x16xf32>
    %392 = arith.addf %389, %391 : vector<12x16x16xf32>
    %cst_69 = arith.constant dense<0xFF800000> : vector<12x16xf32>
    %393 = vector.multi_reduction <maximumf>, %392, %cst_69 [2] : vector<12x16x16xf32> to vector<12x16xf32>
    %394 = vector.shape_cast %393 : vector<12x16xf32> to vector<12x16x1xf32>
    %395 = vector.broadcast %394 : vector<12x16x1xf32> to vector<12x16x16xf32>
    %396 = arith.subf %392, %395 : vector<12x16x16xf32>
    %397 = math.exp %396 : vector<12x16x16xf32>
    %cst_70 = arith.constant dense<0.000000e+00> : vector<12x16xf32>
    %398 = vector.multi_reduction <add>, %397, %cst_70 [2] : vector<12x16x16xf32> to vector<12x16xf32>
    %399 = vector.shape_cast %398 : vector<12x16xf32> to vector<12x16x1xf32>
    %400 = tpu.reciprocal %399 {approx = true} : vector<12x16x1xf32> -> vector<12x16x1xf32>
    %401 = vector.broadcast %400 : vector<12x16x1xf32> to vector<12x16x16xf32>
    %402 = arith.mulf %397, %401 : vector<12x16x16xf32>
    %403 = arith.truncf %402 : vector<12x16x16xf32> to vector<12x16x16xbf16>
    %404 = arith.truncf %384 : vector<12x16x8xf32> to vector<12x16x8xbf16>
    "tpu.trace_start"() <{level = 10 : i32, message = "bnm,bmd->bnd"}> : () -> ()
    %cst_71 = arith.constant dense<0.000000e+00> : vector<12x16x8xf32>
    %405 = tpu.matmul %403, %404, %cst_71 {dimension_numbers = #tpu.dot_dimension_numbers<[2], [1], [1], [2], [0, 0, 0, 1, 1, 2], [0], [0]>} : vector<12x16x16xbf16>, vector<12x16x8xbf16>, vector<12x16x8xf32> -> vector<12x16x8xf32>
    "tpu.trace_stop"() : () -> ()
    %406 = vector.shape_cast %405 : vector<12x16x8xf32> to vector<4x48x8xf32>
    %407 = vector.extract_strided_slice %406 {offsets = [0, 0, 0], sizes = [1, 48, 8], strides = [1, 1, 1]} : vector<4x48x8xf32> to vector<1x48x8xf32>
    %408 = vector.shape_cast %407 : vector<1x48x8xf32> to vector<48x8xf32>
    %409 = vector.extract_strided_slice %406 {offsets = [1, 0, 0], sizes = [1, 48, 8], strides = [1, 1, 1]} : vector<4x48x8xf32> to vector<1x48x8xf32>
    %410 = vector.shape_cast %409 : vector<1x48x8xf32> to vector<48x8xf32>
    %411 = vector.extract_strided_slice %406 {offsets = [2, 0, 0], sizes = [1, 48, 8], strides = [1, 1, 1]} : vector<4x48x8xf32> to vector<1x48x8xf32>
    %412 = vector.shape_cast %411 : vector<1x48x8xf32> to vector<48x8xf32>
    %413 = vector.extract_strided_slice %406 {offsets = [3, 0, 0], sizes = [1, 48, 8], strides = [1, 1, 1]} : vector<4x48x8xf32> to vector<1x48x8xf32>
    %414 = vector.shape_cast %413 : vector<1x48x8xf32> to vector<48x8xf32>
    %415 = tpu.concatenate %408, %410, %412, %414 in 1 : vector<48x8xf32>, vector<48x8xf32>, vector<48x8xf32>, vector<48x8xf32> -> vector<48x32xf32>
    %416 = arith.truncf %415 : vector<48x32xf32> to vector<48x32xbf16>
    %417 = arith.truncf %324 : vector<32x32xf32> to vector<32x32xbf16>
    %cst_72 = arith.constant dense<0.000000e+00> : vector<48x32xf32>
    %418 = tpu.matmul %416, %417, %cst_72 {dimension_numbers = #tpu.dot_dimension_numbers<[1], [0], [0], [1], [0, 0, 1, 1], [], []>} : vector<48x32xbf16>, vector<32x32xbf16>, vector<48x32xf32> -> vector<48x32xf32>
    %419 = arith.addf %314, %418 : vector<48x32xf32>
    %420 = vector.broadcast %318 : vector<1x32xf32> to vector<48x32xf32>
    %421 = arith.addf %419, %420 : vector<48x32xf32>
    %cst_73 = arith.constant dense<0.000000e+00> : vector<48xf32>
    %422 = vector.multi_reduction <add>, %421, %cst_73 [1] : vector<48x32xf32> to vector<48xf32>
    %423 = vector.shape_cast %422 : vector<48xf32> to vector<48x1xf32>
    %cst_74 = arith.constant 3.200000e+01 : f32
    %424 = vector.broadcast %cst_74 : f32 to vector<48x1xf32>
    %425 = arith.divf %423, %424 : vector<48x1xf32>
    %426 = vector.broadcast %425 : vector<48x1xf32> to vector<48x32xf32>
    %427 = arith.subf %421, %426 : vector<48x32xf32>
    %428 = arith.mulf %427, %427 : vector<48x32xf32>
    %cst_75 = arith.constant dense<0.000000e+00> : vector<48xf32>
    %429 = vector.multi_reduction <add>, %428, %cst_75 [1] : vector<48x32xf32> to vector<48xf32>
    %430 = vector.shape_cast %429 : vector<48xf32> to vector<48x1xf32>
    %cst_76 = arith.constant 3.200000e+01 : f32
    %431 = vector.broadcast %cst_76 : f32 to vector<48x1xf32>
    %432 = arith.divf %430, %431 : vector<48x1xf32>
    %433 = vector.broadcast %425 : vector<48x1xf32> to vector<48x32xf32>
    %434 = arith.subf %421, %433 : vector<48x32xf32>
    %cst_77 = arith.constant 9.99999974E-6 : f32
    %435 = vector.broadcast %cst_77 : f32 to vector<48x1xf32>
    %436 = arith.addf %432, %435 : vector<48x1xf32>
    %437 = math.rsqrt %436 : vector<48x1xf32>
    %438 = vector.broadcast %437 : vector<48x1xf32> to vector<48x32xf32>
    %439 = arith.mulf %434, %438 : vector<48x32xf32>
    %440 = vector.broadcast %319 : vector<1x32xf32> to vector<48x32xf32>
    %441 = arith.mulf %439, %440 : vector<48x32xf32>
    %442 = vector.broadcast %320 : vector<1x32xf32> to vector<48x32xf32>
    %443 = arith.addf %441, %442 : vector<48x32xf32>
    %444 = arith.truncf %443 : vector<48x32xf32> to vector<48x32xbf16>
    %445 = arith.truncf %326 : vector<32x64xf32> to vector<32x64xbf16>
    %cst_78 = arith.constant dense<0.000000e+00> : vector<48x64xf32>
    %446 = tpu.matmul %444, %445, %cst_78 {dimension_numbers = #tpu.dot_dimension_numbers<[1], [0], [0], [1], [0, 0, 1, 1], [], []>} : vector<48x32xbf16>, vector<32x64xbf16>, vector<48x64xf32> -> vector<48x64xf32>
    %447 = vector.broadcast %321 : vector<1x64xf32> to vector<48x64xf32>
    %448 = arith.addf %446, %447 : vector<48x64xf32>
    %cst_79 = arith.constant 0.000000e+00 : f32
    %449 = vector.broadcast %cst_79 : f32 to vector<48x64xf32>
    %450 = arith.maximumf %448, %449 : vector<48x64xf32>
    %451 = arith.truncf %450 : vector<48x64xf32> to vector<48x64xbf16>
    %452 = arith.truncf %328 : vector<64x32xf32> to vector<64x32xbf16>
    %cst_80 = arith.constant dense<0.000000e+00> : vector<48x32xf32>
    %453 = tpu.matmul %451, %452, %cst_80 {dimension_numbers = #tpu.dot_dimension_numbers<[1], [0], [0], [1], [0, 0, 1, 1], [], []>} : vector<48x64xbf16>, vector<64x32xbf16>, vector<48x32xf32> -> vector<48x32xf32>
    %454 = arith.addf %421, %453 : vector<48x32xf32>
    %455 = vector.broadcast %322 : vector<1x32xf32> to vector<48x32xf32>
    %456 = arith.addf %454, %455 : vector<48x32xf32>
    %457 = vector.extract_strided_slice %0 {offsets = [28, 0], sizes = [1, 32], strides = [1, 1]} : vector<41x96xf32> to vector<1x32xf32>
    %458 = vector.extract_strided_slice %0 {offsets = [29, 0], sizes = [1, 32], strides = [1, 1]} : vector<41x96xf32> to vector<1x32xf32>
    %459 = vector.extract_strided_slice %0 {offsets = [30, 0], sizes = [1, 96], strides = [1, 1]} : vector<41x96xf32> to vector<1x96xf32>
    %460 = vector.extract_strided_slice %0 {offsets = [31, 0], sizes = [1, 32], strides = [1, 1]} : vector<41x96xf32> to vector<1x32xf32>
    %461 = vector.extract_strided_slice %0 {offsets = [32, 0], sizes = [1, 32], strides = [1, 1]} : vector<41x96xf32> to vector<1x32xf32>
    %462 = vector.extract_strided_slice %0 {offsets = [33, 0], sizes = [1, 32], strides = [1, 1]} : vector<41x96xf32> to vector<1x32xf32>
    %463 = vector.extract_strided_slice %0 {offsets = [34, 0], sizes = [1, 64], strides = [1, 1]} : vector<41x96xf32> to vector<1x64xf32>
    %464 = vector.extract_strided_slice %0 {offsets = [35, 0], sizes = [1, 32], strides = [1, 1]} : vector<41x96xf32> to vector<1x32xf32>
    %465 = vector.extract_strided_slice %2 {offsets = [4, 0, 0], sizes = [1, 32, 32], strides = [1, 1, 1]} : vector<6x32x32xf32> to vector<1x32x32xf32>
    %466 = vector.shape_cast %465 : vector<1x32x32xf32> to vector<32x32xf32>
    %467 = vector.extract_strided_slice %3 {offsets = [3, 0, 0], sizes = [1, 32, 64], strides = [1, 1, 1]} : vector<4x32x64xf32> to vector<1x32x64xf32>
    %468 = vector.shape_cast %467 : vector<1x32x64xf32> to vector<32x64xf32>
    %469 = vector.extract_strided_slice %4 {offsets = [3, 0, 0], sizes = [1, 64, 32], strides = [1, 1, 1]} : vector<4x64x32xf32> to vector<1x64x32xf32>
    %470 = vector.shape_cast %469 : vector<1x64x32xf32> to vector<64x32xf32>
    %cst_81 = arith.constant dense<0.000000e+00> : vector<48xf32>
    %471 = vector.multi_reduction <add>, %456, %cst_81 [1] : vector<48x32xf32> to vector<48xf32>
    %472 = vector.shape_cast %471 : vector<48xf32> to vector<48x1xf32>
    %cst_82 = arith.constant 3.200000e+01 : f32
    %473 = vector.broadcast %cst_82 : f32 to vector<48x1xf32>
    %474 = arith.divf %472, %473 : vector<48x1xf32>
    %475 = vector.broadcast %474 : vector<48x1xf32> to vector<48x32xf32>
    %476 = arith.subf %456, %475 : vector<48x32xf32>
    %477 = arith.mulf %476, %476 : vector<48x32xf32>
    %cst_83 = arith.constant dense<0.000000e+00> : vector<48xf32>
    %478 = vector.multi_reduction <add>, %477, %cst_83 [1] : vector<48x32xf32> to vector<48xf32>
    %479 = vector.shape_cast %478 : vector<48xf32> to vector<48x1xf32>
    %cst_84 = arith.constant 3.200000e+01 : f32
    %480 = vector.broadcast %cst_84 : f32 to vector<48x1xf32>
    %481 = arith.divf %479, %480 : vector<48x1xf32>
    %482 = vector.broadcast %474 : vector<48x1xf32> to vector<48x32xf32>
    %483 = arith.subf %456, %482 : vector<48x32xf32>
    %cst_85 = arith.constant 9.99999974E-6 : f32
    %484 = vector.broadcast %cst_85 : f32 to vector<48x1xf32>
    %485 = arith.addf %481, %484 : vector<48x1xf32>
    %486 = math.rsqrt %485 : vector<48x1xf32>
    %487 = vector.broadcast %486 : vector<48x1xf32> to vector<48x32xf32>
    %488 = arith.mulf %483, %487 : vector<48x32xf32>
    %489 = vector.broadcast %457 : vector<1x32xf32> to vector<48x32xf32>
    %490 = arith.mulf %488, %489 : vector<48x32xf32>
    %491 = vector.broadcast %458 : vector<1x32xf32> to vector<48x32xf32>
    %492 = arith.addf %490, %491 : vector<48x32xf32>
    %493 = vector.extract_strided_slice %1 {offsets = [3, 0, 0], sizes = [1, 32, 96], strides = [1, 1, 1]} : vector<4x32x96xf32> to vector<1x32x96xf32>
    %494 = vector.shape_cast %493 : vector<1x32x96xf32> to vector<32x96xf32>
    %495 = arith.truncf %492 : vector<48x32xf32> to vector<48x32xbf16>
    %496 = arith.truncf %494 : vector<32x96xf32> to vector<32x96xbf16>
    %cst_86 = arith.constant dense<0.000000e+00> : vector<48x96xf32>
    %497 = tpu.matmul %495, %496, %cst_86 {dimension_numbers = #tpu.dot_dimension_numbers<[1], [0], [0], [1], [0, 0, 1, 1], [], []>} : vector<48x32xbf16>, vector<32x96xbf16>, vector<48x96xf32> -> vector<48x96xf32>
    %498 = vector.broadcast %459 : vector<1x96xf32> to vector<48x96xf32>
    %499 = arith.addf %497, %498 : vector<48x96xf32>
    %500 = vector.extract_strided_slice %499 {offsets = [0, 0], sizes = [48, 8], strides = [1, 1]} : vector<48x96xf32> to vector<48x8xf32>
    %501 = vector.shape_cast %500 : vector<48x8xf32> to vector<3x16x8xf32>
    %502 = vector.extract_strided_slice %499 {offsets = [0, 8], sizes = [48, 8], strides = [1, 1]} : vector<48x96xf32> to vector<48x8xf32>
    %503 = vector.shape_cast %502 : vector<48x8xf32> to vector<3x16x8xf32>
    %504 = vector.extract_strided_slice %499 {offsets = [0, 16], sizes = [48, 8], strides = [1, 1]} : vector<48x96xf32> to vector<48x8xf32>
    %505 = vector.shape_cast %504 : vector<48x8xf32> to vector<3x16x8xf32>
    %506 = vector.extract_strided_slice %499 {offsets = [0, 24], sizes = [48, 8], strides = [1, 1]} : vector<48x96xf32> to vector<48x8xf32>
    %507 = vector.shape_cast %506 : vector<48x8xf32> to vector<3x16x8xf32>
    %508 = tpu.concatenate %501, %503, %505, %507 in 0 : vector<3x16x8xf32>, vector<3x16x8xf32>, vector<3x16x8xf32>, vector<3x16x8xf32> -> vector<12x16x8xf32>
    %509 = vector.extract_strided_slice %499 {offsets = [0, 32], sizes = [48, 8], strides = [1, 1]} : vector<48x96xf32> to vector<48x8xf32>
    %510 = vector.shape_cast %509 : vector<48x8xf32> to vector<3x16x8xf32>
    %511 = vector.extract_strided_slice %499 {offsets = [0, 40], sizes = [48, 8], strides = [1, 1]} : vector<48x96xf32> to vector<48x8xf32>
    %512 = vector.shape_cast %511 : vector<48x8xf32> to vector<3x16x8xf32>
    %513 = vector.extract_strided_slice %499 {offsets = [0, 48], sizes = [48, 8], strides = [1, 1]} : vector<48x96xf32> to vector<48x8xf32>
    %514 = vector.shape_cast %513 : vector<48x8xf32> to vector<3x16x8xf32>
    %515 = vector.extract_strided_slice %499 {offsets = [0, 56], sizes = [48, 8], strides = [1, 1]} : vector<48x96xf32> to vector<48x8xf32>
    %516 = vector.shape_cast %515 : vector<48x8xf32> to vector<3x16x8xf32>
    %517 = tpu.concatenate %510, %512, %514, %516 in 0 : vector<3x16x8xf32>, vector<3x16x8xf32>, vector<3x16x8xf32>, vector<3x16x8xf32> -> vector<12x16x8xf32>
    %518 = vector.extract_strided_slice %499 {offsets = [0, 64], sizes = [48, 8], strides = [1, 1]} : vector<48x96xf32> to vector<48x8xf32>
    %519 = vector.shape_cast %518 : vector<48x8xf32> to vector<3x16x8xf32>
    %520 = vector.extract_strided_slice %499 {offsets = [0, 72], sizes = [48, 8], strides = [1, 1]} : vector<48x96xf32> to vector<48x8xf32>
    %521 = vector.shape_cast %520 : vector<48x8xf32> to vector<3x16x8xf32>
    %522 = vector.extract_strided_slice %499 {offsets = [0, 80], sizes = [48, 8], strides = [1, 1]} : vector<48x96xf32> to vector<48x8xf32>
    %523 = vector.shape_cast %522 : vector<48x8xf32> to vector<3x16x8xf32>
    %524 = vector.extract_strided_slice %499 {offsets = [0, 88], sizes = [48, 8], strides = [1, 1]} : vector<48x96xf32> to vector<48x8xf32>
    %525 = vector.shape_cast %524 : vector<48x8xf32> to vector<3x16x8xf32>
    %526 = tpu.concatenate %519, %521, %523, %525 in 0 : vector<3x16x8xf32>, vector<3x16x8xf32>, vector<3x16x8xf32>, vector<3x16x8xf32> -> vector<12x16x8xf32>
    %527 = arith.truncf %508 : vector<12x16x8xf32> to vector<12x16x8xbf16>
    %528 = arith.truncf %517 : vector<12x16x8xf32> to vector<12x16x8xbf16>
    "tpu.trace_start"() <{level = 10 : i32, message = "bnd,bmd->bnm"}> : () -> ()
    %cst_87 = arith.constant dense<0.000000e+00> : vector<12x16x16xf32>
    %529 = tpu.matmul %527, %528, %cst_87 {dimension_numbers = #tpu.dot_dimension_numbers<[2], [2], [1], [1], [0, 0, 0, 1, 1, 1], [0], [0]>} : vector<12x16x8xbf16>, vector<12x16x8xbf16>, vector<12x16x16xf32> -> vector<12x16x16xf32>
    "tpu.trace_stop"() : () -> ()
    %cst_88 = arith.constant 0.353553385 : f32
    %530 = vector.broadcast %cst_88 : f32 to vector<12x16x16xf32>
    %531 = arith.mulf %529, %530 : vector<12x16x16xf32>
    %532 = vector.shape_cast %30 : vector<16x16xf32> to vector<1x16x16xf32>
    %533 = vector.broadcast %532 : vector<1x16x16xf32> to vector<12x16x16xf32>
    %534 = arith.addf %531, %533 : vector<12x16x16xf32>
    %cst_89 = arith.constant dense<0xFF800000> : vector<12x16xf32>
    %535 = vector.multi_reduction <maximumf>, %534, %cst_89 [2] : vector<12x16x16xf32> to vector<12x16xf32>
    %536 = vector.shape_cast %535 : vector<12x16xf32> to vector<12x16x1xf32>
    %537 = vector.broadcast %536 : vector<12x16x1xf32> to vector<12x16x16xf32>
    %538 = arith.subf %534, %537 : vector<12x16x16xf32>
    %539 = math.exp %538 : vector<12x16x16xf32>
    %cst_90 = arith.constant dense<0.000000e+00> : vector<12x16xf32>
    %540 = vector.multi_reduction <add>, %539, %cst_90 [2] : vector<12x16x16xf32> to vector<12x16xf32>
    %541 = vector.shape_cast %540 : vector<12x16xf32> to vector<12x16x1xf32>
    %542 = tpu.reciprocal %541 {approx = true} : vector<12x16x1xf32> -> vector<12x16x1xf32>
    %543 = vector.broadcast %542 : vector<12x16x1xf32> to vector<12x16x16xf32>
    %544 = arith.mulf %539, %543 : vector<12x16x16xf32>
    %545 = arith.truncf %544 : vector<12x16x16xf32> to vector<12x16x16xbf16>
    %546 = arith.truncf %526 : vector<12x16x8xf32> to vector<12x16x8xbf16>
    "tpu.trace_start"() <{level = 10 : i32, message = "bnm,bmd->bnd"}> : () -> ()
    %cst_91 = arith.constant dense<0.000000e+00> : vector<12x16x8xf32>
    %547 = tpu.matmul %545, %546, %cst_91 {dimension_numbers = #tpu.dot_dimension_numbers<[2], [1], [1], [2], [0, 0, 0, 1, 1, 2], [0], [0]>} : vector<12x16x16xbf16>, vector<12x16x8xbf16>, vector<12x16x8xf32> -> vector<12x16x8xf32>
    "tpu.trace_stop"() : () -> ()
    %548 = vector.shape_cast %547 : vector<12x16x8xf32> to vector<4x48x8xf32>
    %549 = vector.extract_strided_slice %548 {offsets = [0, 0, 0], sizes = [1, 48, 8], strides = [1, 1, 1]} : vector<4x48x8xf32> to vector<1x48x8xf32>
    %550 = vector.shape_cast %549 : vector<1x48x8xf32> to vector<48x8xf32>
    %551 = vector.extract_strided_slice %548 {offsets = [1, 0, 0], sizes = [1, 48, 8], strides = [1, 1, 1]} : vector<4x48x8xf32> to vector<1x48x8xf32>
    %552 = vector.shape_cast %551 : vector<1x48x8xf32> to vector<48x8xf32>
    %553 = vector.extract_strided_slice %548 {offsets = [2, 0, 0], sizes = [1, 48, 8], strides = [1, 1, 1]} : vector<4x48x8xf32> to vector<1x48x8xf32>
    %554 = vector.shape_cast %553 : vector<1x48x8xf32> to vector<48x8xf32>
    %555 = vector.extract_strided_slice %548 {offsets = [3, 0, 0], sizes = [1, 48, 8], strides = [1, 1, 1]} : vector<4x48x8xf32> to vector<1x48x8xf32>
    %556 = vector.shape_cast %555 : vector<1x48x8xf32> to vector<48x8xf32>
    %557 = tpu.concatenate %550, %552, %554, %556 in 1 : vector<48x8xf32>, vector<48x8xf32>, vector<48x8xf32>, vector<48x8xf32> -> vector<48x32xf32>
    %558 = arith.truncf %557 : vector<48x32xf32> to vector<48x32xbf16>
    %559 = arith.truncf %466 : vector<32x32xf32> to vector<32x32xbf16>
    %cst_92 = arith.constant dense<0.000000e+00> : vector<48x32xf32>
    %560 = tpu.matmul %558, %559, %cst_92 {dimension_numbers = #tpu.dot_dimension_numbers<[1], [0], [0], [1], [0, 0, 1, 1], [], []>} : vector<48x32xbf16>, vector<32x32xbf16>, vector<48x32xf32> -> vector<48x32xf32>
    %561 = arith.addf %456, %560 : vector<48x32xf32>
    %562 = vector.broadcast %460 : vector<1x32xf32> to vector<48x32xf32>
    %563 = arith.addf %561, %562 : vector<48x32xf32>
    %cst_93 = arith.constant dense<0.000000e+00> : vector<48xf32>
    %564 = vector.multi_reduction <add>, %563, %cst_93 [1] : vector<48x32xf32> to vector<48xf32>
    %565 = vector.shape_cast %564 : vector<48xf32> to vector<48x1xf32>
    %cst_94 = arith.constant 3.200000e+01 : f32
    %566 = vector.broadcast %cst_94 : f32 to vector<48x1xf32>
    %567 = arith.divf %565, %566 : vector<48x1xf32>
    %568 = vector.broadcast %567 : vector<48x1xf32> to vector<48x32xf32>
    %569 = arith.subf %563, %568 : vector<48x32xf32>
    %570 = arith.mulf %569, %569 : vector<48x32xf32>
    %cst_95 = arith.constant dense<0.000000e+00> : vector<48xf32>
    %571 = vector.multi_reduction <add>, %570, %cst_95 [1] : vector<48x32xf32> to vector<48xf32>
    %572 = vector.shape_cast %571 : vector<48xf32> to vector<48x1xf32>
    %cst_96 = arith.constant 3.200000e+01 : f32
    %573 = vector.broadcast %cst_96 : f32 to vector<48x1xf32>
    %574 = arith.divf %572, %573 : vector<48x1xf32>
    %575 = vector.broadcast %567 : vector<48x1xf32> to vector<48x32xf32>
    %576 = arith.subf %563, %575 : vector<48x32xf32>
    %cst_97 = arith.constant 9.99999974E-6 : f32
    %577 = vector.broadcast %cst_97 : f32 to vector<48x1xf32>
    %578 = arith.addf %574, %577 : vector<48x1xf32>
    %579 = math.rsqrt %578 : vector<48x1xf32>
    %580 = vector.broadcast %579 : vector<48x1xf32> to vector<48x32xf32>
    %581 = arith.mulf %576, %580 : vector<48x32xf32>
    %582 = vector.broadcast %461 : vector<1x32xf32> to vector<48x32xf32>
    %583 = arith.mulf %581, %582 : vector<48x32xf32>
    %584 = vector.broadcast %462 : vector<1x32xf32> to vector<48x32xf32>
    %585 = arith.addf %583, %584 : vector<48x32xf32>
    %586 = arith.truncf %585 : vector<48x32xf32> to vector<48x32xbf16>
    %587 = arith.truncf %468 : vector<32x64xf32> to vector<32x64xbf16>
    %cst_98 = arith.constant dense<0.000000e+00> : vector<48x64xf32>
    %588 = tpu.matmul %586, %587, %cst_98 {dimension_numbers = #tpu.dot_dimension_numbers<[1], [0], [0], [1], [0, 0, 1, 1], [], []>} : vector<48x32xbf16>, vector<32x64xbf16>, vector<48x64xf32> -> vector<48x64xf32>
    %589 = vector.broadcast %463 : vector<1x64xf32> to vector<48x64xf32>
    %590 = arith.addf %588, %589 : vector<48x64xf32>
    %cst_99 = arith.constant 0.000000e+00 : f32
    %591 = vector.broadcast %cst_99 : f32 to vector<48x64xf32>
    %592 = arith.maximumf %590, %591 : vector<48x64xf32>
    %593 = arith.truncf %592 : vector<48x64xf32> to vector<48x64xbf16>
    %594 = arith.truncf %470 : vector<64x32xf32> to vector<64x32xbf16>
    %cst_100 = arith.constant dense<0.000000e+00> : vector<48x32xf32>
    %595 = tpu.matmul %593, %594, %cst_100 {dimension_numbers = #tpu.dot_dimension_numbers<[1], [0], [0], [1], [0, 0, 1, 1], [], []>} : vector<48x64xbf16>, vector<64x32xbf16>, vector<48x32xf32> -> vector<48x32xf32>
    %596 = arith.addf %563, %595 : vector<48x32xf32>
    %597 = vector.broadcast %464 : vector<1x32xf32> to vector<48x32xf32>
    %598 = arith.addf %596, %597 : vector<48x32xf32>
    %599 = vector.extract_strided_slice %0 {offsets = [36, 0], sizes = [1, 32], strides = [1, 1]} : vector<41x96xf32> to vector<1x32xf32>
    %600 = vector.extract_strided_slice %0 {offsets = [37, 0], sizes = [1, 32], strides = [1, 1]} : vector<41x96xf32> to vector<1x32xf32>
    %cst_101 = arith.constant dense<0.000000e+00> : vector<48xf32>
    %601 = vector.multi_reduction <add>, %598, %cst_101 [1] : vector<48x32xf32> to vector<48xf32>
    %602 = vector.shape_cast %601 : vector<48xf32> to vector<48x1xf32>
    %cst_102 = arith.constant 3.200000e+01 : f32
    %603 = vector.broadcast %cst_102 : f32 to vector<48x1xf32>
    %604 = arith.divf %602, %603 : vector<48x1xf32>
    %605 = vector.broadcast %604 : vector<48x1xf32> to vector<48x32xf32>
    %606 = arith.subf %598, %605 : vector<48x32xf32>
    %607 = arith.mulf %606, %606 : vector<48x32xf32>
    %cst_103 = arith.constant dense<0.000000e+00> : vector<48xf32>
    %608 = vector.multi_reduction <add>, %607, %cst_103 [1] : vector<48x32xf32> to vector<48xf32>
    %609 = vector.shape_cast %608 : vector<48xf32> to vector<48x1xf32>
    %cst_104 = arith.constant 3.200000e+01 : f32
    %610 = vector.broadcast %cst_104 : f32 to vector<48x1xf32>
    %611 = arith.divf %609, %610 : vector<48x1xf32>
    %612 = vector.broadcast %604 : vector<48x1xf32> to vector<48x32xf32>
    %613 = arith.subf %598, %612 : vector<48x32xf32>
    %cst_105 = arith.constant 9.99999974E-6 : f32
    %614 = vector.broadcast %cst_105 : f32 to vector<48x1xf32>
    %615 = arith.addf %611, %614 : vector<48x1xf32>
    %616 = math.rsqrt %615 : vector<48x1xf32>
    %617 = vector.broadcast %616 : vector<48x1xf32> to vector<48x32xf32>
    %618 = arith.mulf %613, %617 : vector<48x32xf32>
    %619 = vector.broadcast %599 : vector<1x32xf32> to vector<48x32xf32>
    %620 = arith.mulf %618, %619 : vector<48x32xf32>
    %621 = vector.broadcast %600 : vector<1x32xf32> to vector<48x32xf32>
    %622 = arith.addf %620, %621 : vector<48x32xf32>
    %623 = vector.extract_strided_slice %2 {offsets = [5, 0, 0], sizes = [1, 32, 32], strides = [1, 1, 1]} : vector<6x32x32xf32> to vector<1x32x32xf32>
    %624 = vector.shape_cast %623 : vector<1x32x32xf32> to vector<32x32xf32>
    %625 = arith.truncf %622 : vector<48x32xf32> to vector<48x32xbf16>
    %626 = arith.truncf %624 : vector<32x32xf32> to vector<32x32xbf16>
    %cst_106 = arith.constant dense<0.000000e+00> : vector<48x32xf32>
    %627 = tpu.matmul %625, %626, %cst_106 {dimension_numbers = #tpu.dot_dimension_numbers<[1], [0], [0], [1], [0, 0, 1, 1], [], []>} : vector<48x32xbf16>, vector<32x32xbf16>, vector<48x32xf32> -> vector<48x32xf32>
    %628 = vector.extract_strided_slice %0 {offsets = [38, 0], sizes = [1, 32], strides = [1, 1]} : vector<41x96xf32> to vector<1x32xf32>
    %629 = vector.broadcast %628 : vector<1x32xf32> to vector<48x32xf32>
    %630 = arith.addf %627, %629 : vector<48x32xf32>
    %cst_107 = arith.constant 0.000000e+00 : f32
    %631 = vector.broadcast %cst_107 : f32 to vector<48x32xf32>
    %632 = arith.maximumf %630, %631 : vector<48x32xf32>
    %cst_108 = arith.constant dense<0.000000e+00> : vector<32xf32>
    %633 = vector.multi_reduction <add>, %632, %cst_108 [0] : vector<48x32xf32> to vector<32xf32>
    %634 = vector.shape_cast %633 : vector<32xf32> to vector<1x32xf32>
    %cst_109 = arith.constant 4.800000e+01 : f32
    %635 = vector.broadcast %cst_109 : f32 to vector<1x32xf32>
    %636 = arith.divf %634, %635 : vector<1x32xf32>
    %637 = vector.broadcast %636 : vector<1x32xf32> to vector<48x32xf32>
    %638 = arith.subf %632, %637 : vector<48x32xf32>
    %639 = arith.mulf %638, %638 : vector<48x32xf32>
    %cst_110 = arith.constant dense<0.000000e+00> : vector<32xf32>
    %640 = vector.multi_reduction <add>, %639, %cst_110 [0] : vector<48x32xf32> to vector<32xf32>
    %641 = vector.shape_cast %640 : vector<32xf32> to vector<1x32xf32>
    %cst_111 = arith.constant 4.800000e+01 : f32
    %642 = vector.broadcast %cst_111 : f32 to vector<1x32xf32>
    %643 = arith.divf %641, %642 : vector<1x32xf32>
    %644 = vector.broadcast %636 : vector<1x32xf32> to vector<48x32xf32>
    %645 = arith.subf %632, %644 : vector<48x32xf32>
    %cst_112 = arith.constant 9.99999974E-6 : f32
    %646 = vector.broadcast %cst_112 : f32 to vector<1x32xf32>
    %647 = arith.addf %643, %646 : vector<1x32xf32>
    %648 = math.rsqrt %647 : vector<1x32xf32>
    %649 = vector.broadcast %648 : vector<1x32xf32> to vector<48x32xf32>
    %650 = arith.mulf %645, %649 : vector<48x32xf32>
    %651 = vector.extract_strided_slice %0 {offsets = [39, 0], sizes = [1, 32], strides = [1, 1]} : vector<41x96xf32> to vector<1x32xf32>
    %652 = vector.broadcast %651 : vector<1x32xf32> to vector<48x32xf32>
    %653 = arith.mulf %650, %652 : vector<48x32xf32>
    %654 = vector.extract_strided_slice %0 {offsets = [40, 0], sizes = [1, 32], strides = [1, 1]} : vector<41x96xf32> to vector<1x32xf32>
    %655 = vector.broadcast %654 : vector<1x32xf32> to vector<48x32xf32>
    %656 = arith.addf %653, %655 : vector<48x32xf32>
    %cst_113 = arith.constant 0.000000e+00 : f32
    %657 = vector.broadcast %cst_113 : f32 to vector<48x32xf32>
    %658 = arith.maximumf %656, %657 : vector<48x32xf32>
    %659 = math.absf %656 : vector<48x32xf32>
    %cst_114 = arith.constant 0.000000e+00 : f32
    %660 = vector.broadcast %cst_114 : f32 to vector<48x32xf32>
    %661 = arith.subf %660, %659 : vector<48x32xf32>
    %662 = math.exp %661 : vector<48x32xf32>
    %cst_115 = arith.constant 1.000000e+00 : f32
    %663 = vector.broadcast %cst_115 : f32 to vector<48x32xf32>
    %664 = arith.addf %663, %662 : vector<48x32xf32>
    %665 = math.log %664 : vector<48x32xf32>
    %666 = arith.addf %658, %665 : vector<48x32xf32>
    %667 = vector.extract_strided_slice %666 {offsets = [0, 0], sizes = [48, 4], strides = [1, 1]} : vector<48x32xf32> to vector<48x4xf32>
    %c0_116 = arith.constant 0 : index
    %c0_117 = arith.constant 0 : index
    %c0_118 = arith.constant 0 : index
    %668 = vector.load %arg8[%c0_116, %c0_117, %c0_118] : memref<1x48x4xf32, #tpu.memory_space<vmem>>, vector<1x48x4xf32>
    %669 = vector.shape_cast %668 : vector<1x48x4xf32> to vector<48x4xf32>
    %670 = vector.shape_cast %667 : vector<48x4xf32> to vector<1x48x4xf32>
    tpu.vector_store %arg8[%c0_116, %c0_117, %c0_118], %670 {strides = array<i32>} : memref<1x48x4xf32, #tpu.memory_space<vmem>>, vector<1x48x4xf32>,
    return
  }
  func.func @transform_0(%arg0: i32) -> (i32, i32, i32) {
    %c0_i32 = arith.constant 0 : i32
    %c0_i32_0 = arith.constant 0 : i32
    %c0_i32_1 = arith.constant 0 : i32
    return %arg0, %c0_i32, %c0_i32_0 : i32, i32, i32
  }
  func.func @transform_1(%arg0: i32) -> (i32, i32, i32, i32) {
    %c0_i32 = arith.constant 0 : i32
    %c0_i32_0 = arith.constant 0 : i32
    %c0_i32_1 = arith.constant 0 : i32
    %c0_i32_2 = arith.constant 0 : i32
    return %arg0, %c0_i32, %c0_i32_0, %c0_i32_1 : i32, i32, i32, i32
  }
  func.func @transform_2(%arg0: i32) -> (i32, i32, i32) {
    %c0_i32 = arith.constant 0 : i32
    %c0_i32_0 = arith.constant 0 : i32
    %c0_i32_1 = arith.constant 0 : i32
    %c0_i32_2 = arith.constant 0 : i32
    return %c0_i32, %c0_i32_0, %c0_i32_1 : i32, i32, i32
  }
  func.func @transform_3(%arg0: i32) -> (i32, i32, i32) {
    %c0_i32 = arith.constant 0 : i32
    %c0_i32_0 = arith.constant 0 : i32
    %c0_i32_1 = arith.constant 0 : i32
    %c0_i32_2 = arith.constant 0 : i32
    return %c0_i32, %c0_i32_0, %c0_i32_1 : i32, i32, i32
  }
  func.func @transform_4(%arg0: i32) -> (i32, i32, i32) {
    %c0_i32 = arith.constant 0 : i32
    %c0_i32_0 = arith.constant 0 : i32
    %c0_i32_1 = arith.constant 0 : i32
    %c0_i32_2 = arith.constant 0 : i32
    return %c0_i32, %c0_i32_0, %c0_i32_1 : i32, i32, i32
  }
  func.func @transform_5(%arg0: i32) -> (i32, i32, i32) {
    %c0_i32 = arith.constant 0 : i32
    %c0_i32_0 = arith.constant 0 : i32
    %c0_i32_1 = arith.constant 0 : i32
    %c0_i32_2 = arith.constant 0 : i32
    return %c0_i32, %c0_i32_0, %c0_i32_1 : i32, i32, i32
  }
  func.func @transform_6(%arg0: i32) -> (i32, i32) {
    %c0_i32 = arith.constant 0 : i32
    %c0_i32_0 = arith.constant 0 : i32
    %c0_i32_1 = arith.constant 0 : i32
    return %c0_i32, %c0_i32_0 : i32, i32
  }
  func.func @transform_7(%arg0: i32) -> (i32, i32, i32) {
    %c0_i32 = arith.constant 0 : i32
    %c0_i32_0 = arith.constant 0 : i32
    %c0_i32_1 = arith.constant 0 : i32
    return %arg0, %c0_i32, %c0_i32_0 : i32, i32, i32
  }
}

</mosaic_0001>

<bundles_post_ra>
// kernel: decoder_forward.1
= control target key start
LH: loop header
LB: loop body
LE: loop exit
PB: predicated region body
PF: predicated region fallthrough
CT: control target
= control target key end

     0   :  { %12 = vsyncpa [#allocation3], 0  ;;  %s11520_s24 = smov [#allocation2]   ;;  %s14786_s0 = inlined_call_operand.hbm [shape: f32[1,16,32], index: 0, kind: input, shape index: {}]   ;;  %s14787_s1 = inlined_call_operand.vmem [shape: f32[1,2,16,16], index: 1, kind: input, shape index: {}]   ;;  %s14788_s2 = inlined_call_operand.vmem [shape: f32[4,32,96], index: 2, kind: input, shape index: {}]   ;;  %s14789_s3 = inlined_call_operand.vmem [shape: f32[6,32,32], index: 3, kind: input, shape index: {}]   ;;  %s14790_s4 = inlined_call_operand.vmem [shape: f32[4,32,64], index: 4, kind: input, shape index: {}]   ;;  %s14791_s5 = inlined_call_operand.vmem [shape: f32[4,64,32], index: 5, kind: input, shape index: {}]   ;;  %s14792_s6 = inlined_call_operand.vmem [shape: f32[41,96], index: 6, kind: input, shape index: {}]   ;;  %s14793_s7 = inlined_call_operand.vmem [shape: f32[1,48,4], index: 7, kind: output, shape index: {}]  }
   0x1   :  { %s18_s25 = sshll.u32 %s11520_s24, 4  ;;  %s19_s25 = int_to_ptr.vmem [resolvable:$true] %s18_s25 }
   0x2   :  { %s11506_s26 = scalar_lea.vmem %s19_s25, 256  ;;  %p11511_p1 = scmp.lt.s32.totalorder %s19_s25, %s19_s25 }
   0x3   :  { %p11507_p0 = scmp.ne.s32.totalorder %s19_s25, %s11506_s26  ;;  %p11512_p2 = scmp.lt.s32.totalorder %s11506_s26, %s11506_s26 }
   0x5   :  { %p11513_p3 = por %p11512_p2, %p11511_p1 }
   0x7   :  { %p11514_p4 = pnand %p11513_p3, %p11507_p0 }
   0x9   :  { %11517 = shalt.err (!%p11514_p4)
}
   0xa   :  { %s11521_s27 = smov 128   ;;  %s11522_s28 = smov 8  }
   0xb   :  { %24 = dma.hbm_to_vmem [thread:$0]  %s14786_s0, 256, %s19_s25, [#allocation3], %s11521_s27, %s11521_s27, %s11522_s28  }
   0xc   :  { %11518 = dma.done.wait [#allocation3], 256  }
   0xd   :  { %11519 = vsyncadd [#allocation3], 4294967040  ;;  %v11523_v0 = vmov 0.0   ;;  %vm11524_vm0 = vmmov 0   ;;  %v65_v1 = vld [vmem:[%s14789_s3 + $0x10] sm:$0xff]  ;;  %v66_v2 = vld [vmem:[%s14789_s3 + $0x18] sm:$0xff]  ;;  %v193_v12 = vlaneseq }
   0xe   :  { %9727 = vmatprep.subr.bf16.mxu0 %v11523_v0  ;;  %9731 = vmatprep.mubr.msk.bf16.mxu0 %vm11524_vm0, %v11523_v0  ;;  %v63_v3 = vld [vmem:[%s14789_s3] sm:$0xff]  ;;  %v143_v4 = vpack.c.bf16 %v66_v2, %v65_v1  ;;  %v64_v5 = vld [vmem:[%s14789_s3 + $0x8] sm:$0xff]  ;;  %vm144_vm1 = vcmask 261120   ;;  %v11525_v10 = vmov 1966171168   ;;  %s11526_s25 = smov 120  }
   0xf   :  { %9735 = vmatprep.subr.bf16.mxu1 %v11523_v0  ;;  %9739 = vmatprep.mubr.msk.bf16.mxu1 %vm11524_vm0, %v11523_v0  ;;  %v142_v6 = vpack.c.bf16 %v64_v5, %v63_v3  ;;  %v139_v7 = vld [vmem:[#allocation2] sm:$0xff]  ;;  %v140_v8 = vld [vmem:[#allocation2 + $0x8] sm:$0xff]  ;;  %v191_v11 = vunpack.c.l.s4 %v11525_v10  ;;  %v11600_v14 = vshrl.u32 %v193_v12, 7  ;;  %s11527_s26 = smov 112   ;;  %s11528_s27 = smov 104   ;;  %vm500_vm2 = vcmask 64512  }
  0x10   :  { %9728 = vmatpush3.bf16.msra.mxu0 %v143_v4  ;;  %v141_v9 = vpack.c.bf16 %v140_v8, %v139_v7  ;;  %v11606_v16 = vld [vmem:[%s14792_s6] sm:$0xff]  ;;  %s11529_s29 = smov 96   ;;  %s11530_s30 = smov 64   ;;  %vm1146_vm3 = vcmask 130048   ;;  %vm2071_vm4 = vcmask 195584   ;;  %vm2351_vm5 = vcmask 523264  }
  0x11   :  { %9729 = vmatprep.subr.bf16.mxu0 %v11523_v0  ;;  %v192_v13 = vunpack.c.0.s8 %v191_v11  ;;  %v11610_v22 = vsub.s32 0, %v11600_v14  ;;  %s11531_s19 = smov 16   ;;  %s11532_s20 = smov 24   ;;  %vm9278_vm6 = vcmask 31744  }
  0x13   :  { %v195_v15 = vsub.s32 %v192_v13, %v11600_v14  ;;  %v238_v26 = vrot.slane %v11606_v16, %v11610_v22 }
  0x14   :  { %9730 = vmatpush3.bf16.msra.mxu0 %v142_v6 }
  0x15   :  { %9751 = vmatprep.subr.bf16.mxu0 %v11523_v0  ;;  %v196_v17 = vrot.slane %v11606_v16, %v195_v15 }
  0x17   :  { %9732 = vmatmul.mubr.msk.bf16.vlgmr.msra.gmra.mxu0 %vm144_vm1, %v141_v9  ;;  %v197_v18 = vcombine.high %v196_v17, %v196_v17  ;;  %v204_v19 = vrot.slane %v196_v17, %v195_v15 }
  0x18   :  { %9753 = vmatprep.mubr.msk.bf16.mxu0 %vm11524_vm0, %v11523_v0 }
  0x19   :  { %v211_v20 = vrot.slane %v197_v18, %v195_v15  ;;  %v212_v21 = vcombine.high %v204_v19, %v204_v19 }
  0x1b   :  { %v213_v23 = vcombine.high %v211_v20, %v211_v20  ;;  %v217_v24 = vrot.slane %v211_v20, %v11610_v22  ;;  %v221_v25 = vrot.slane %v212_v21, %v11610_v22 }
  0x1d   :  { %v225_v28 = vrot.slane %v213_v23, %v11610_v22 }
  0xd7   :  { %v182_v27 = vpop.f32.mrf.mxu0 }
  0xd8   :  { %v229_v29 = vadd.f32 %v217_v24, %v182_v27  ;;  %v231_v30 = vadd.f32 %v221_v25, %v182_v27  ;;  %v233_v34 = vadd.f32 %v225_v28, %v182_v27  ;;  %v50_v27 = vld [vmem:[%s14788_s2 + $0x18] sm:$0xff] }
  0xd9   :  { %v9733_v31 = vpop.f32.mrf.mxu0 }
  0xda   :  { %v241_v32 = vadd.f32 %v238_v26, %v231_v30  ;;  %v239_v33 = vadd.f32 %v238_v26, %v229_v29  ;;  %v243_v47 = vadd.f32 %v238_v26, %v233_v34  ;;  %v48_v30 = vld [vmem:[%s14788_s2 + $0x8] sm:$0xff] }
  0xdb   :  { %v185_v35 = vpop.f32.mrf.mxu0 }
  0xdc   :  { %v230_v36 = vadd.f32 %v217_v24, %v185_v35  ;;  %v232_v37 = vadd.f32 %v221_v25, %v185_v35  ;;  %v234_v38 = vadd.f32 %v225_v28, %v185_v35  ;;  %v11617_v39 = vmax.f32 %v241_v32, 0.0  ;;  %v47_v28 = vld [vmem:[%s14788_s2] sm:$0xff] }
  0xdd   :  { %v9734_v40 = vpop.f32.mrf.mxu0  ;;  %v11619_v41 = vmax.f32 %v239_v33, 0.0  ;;  %v11635_v53 = vmax.f32 %v243_v47, 0.0  ;;  %v353_v31 = vpack.c.bf16 %v48_v30, %v47_v28 }
  0xde   :  { %v257_v42 = vsel %vm144_vm1, %v11617_v39, 0.0  ;;  %v242_v43 = vadd.f32 %v238_v26, %v232_v37  ;;  %v240_v44 = vadd.f32 %v238_v26, %v230_v36  ;;  %v244_v45 = vadd.f32 %v238_v26, %v234_v38  ;;  %v49_v26 = vld [vmem:[%s14788_s2 + $0x10] sm:$0xff] }
  0xdf   :  { %258 = vadd.xlane.f32.xlu1 %v257_v42  ;;  %v251_v46 = vsel %vm144_vm1, %v11619_v41, 0.0  ;;  %v263_v55 = vsel %vm144_vm1, %v11635_v53, 0.0  ;;  %v354_v29 = vpack.c.bf16 %v50_v27, %v49_v26 }
  0xe0   :  { %252 = vadd.xlane.f32.xlu0 %v251_v46  ;;  %v11625_v48 = vmax.f32 %v242_v43, 0.0  ;;  %v11627_v49 = vmax.f32 %v240_v44, 0.0  ;;  %v11633_v52 = vmax.f32 %v244_v45, 0.0 }
  0xe1   :  { %9736 = vmatpush3.bf16.msra.mxu1 %v354_v29 }
  0xe2   :  { %v260_v50 = vsel %vm144_vm1, %v11625_v48, 0.0  ;;  %v254_v51 = vsel %vm144_vm1, %v11627_v49, 0.0  ;;  %v266_v54 = vsel %vm144_vm1, %v11633_v52, 0.0  ;;  %9737 = vmatprep.subr.bf16.mxu1 %v11523_v0 }
  0xe3   :  { %261 = vadd.xlane.f32.xlu1 %v260_v50 }
  0xe4   :  { %255 = vadd.xlane.f32.xlu0 %v254_v51 }
  0xe5   :  { %9738 = vmatpush3.bf16.msra.mxu1 %v353_v31 }
  0xe6   :  { %9769 = vmatprep.subr.bf16.mxu1 %v11523_v0 }
  0xe7   :  { %267 = vadd.xlane.f32.xlu1 %v266_v54  ;;  %v11692_v54 = vsub.s32 4, %v11600_v14 }
  0xe8   :  { %264 = vadd.xlane.f32.xlu0 %v263_v55 }
 0x168   :  { %v259_v56 = vpop.xlane.xlu1 %258 }
 0x169   :  { %v272_v57 = vmul.f32 0.03125, %v259_v56  ;;  %v253_v58 = vpop.xlane.xlu0 %252 }
 0x16a   :  { %v270_v59 = vmul.f32 0.03125, %v253_v58  ;;  %v333_v58 = vrot.slane %v11606_v16, %v11692_v54 }
 0x16b   :  { %v11642_v60 = vsub.f32 %v11617_v39, %v272_v57 }
 0x16c   :  { %v11645_v61 = vsub.f32 %v11619_v41, %v270_v59  ;;  %v262_v62 = vpop.xlane.xlu1 %261 }
 0x16d   :  { %v273_v63 = vmul.f32 0.03125, %v262_v62  ;;  %v256_v1 = vpop.xlane.xlu0 %255  ;;  %v284_v4 = vmul.f32 %v11642_v60, %v11642_v60  ;;  %v11698_v62 = vsub.s32 5, %v11600_v14 }
 0x16e   :  { %v271_v2 = vmul.f32 0.03125, %v256_v1  ;;  %v282_v3 = vmul.f32 %v11645_v61, %v11645_v61 }
 0x16f   :  { %v11652_v5 = vsub.f32 %v11625_v48, %v273_v63  ;;  %v294_v13 = vsel %vm144_vm1, %v284_v4, 0.0 }
 0x170   :  { %v11655_v6 = vsub.f32 %v11627_v49, %v271_v2  ;;  %v268_v7 = vpop.xlane.xlu1 %267  ;;  %v288_v8 = vsel %vm144_vm1, %v282_v3, 0.0  ;;  %v343_v3 = vrot.slane %v11606_v16, %v11698_v62 }
 0x171   :  { %v275_v9 = vmul.f32 0.03125, %v268_v7  ;;  %289 = vadd.xlane.f32.xlu0 %v288_v8  ;;  %v265_v10 = vpop.xlane.xlu0 %264  ;;  %v285_v19 = vmul.f32 %v11652_v5, %v11652_v5 }
 0x172   :  { %v274_v11 = vmul.f32 0.03125, %v265_v10  ;;  %v283_v12 = vmul.f32 %v11655_v6, %v11655_v6 }
 0x173   :  { %v11662_v15 = vsub.f32 %v11633_v52, %v275_v9  ;;  %v297_v21 = vsel %vm144_vm1, %v285_v19, 0.0 }
 0x174   :  { %v11665_v17 = vsub.f32 %v11635_v53, %v274_v11  ;;  %v291_v18 = vsel %vm144_vm1, %v283_v12, 0.0 }
 0x175   :  { %292 = vadd.xlane.f32.xlu1 %v291_v18  ;;  %295 = vadd.xlane.f32.xlu0 %v294_v13  ;;  %v287_v24 = vmul.f32 %v11662_v15, %v11662_v15 }
 0x176   :  { %v286_v20 = vmul.f32 %v11665_v17, %v11665_v17 }
 0x177   :  { %v303_v25 = vsel %vm144_vm1, %v287_v24, 0.0 }
 0x178   :  { %v300_v23 = vsel %vm144_vm1, %v286_v20, 0.0 }
 0x179   :  { %298 = vadd.xlane.f32.xlu1 %v297_v21  ;;  %301 = vadd.xlane.f32.xlu0 %v300_v23 }
 0x17d   :  { %304 = vadd.xlane.f32.xlu1 %v303_v25 }
 0x1fa   :  { %v290_v32 = vpop.xlane.xlu0 %289 }
 0x1fb   :  { %v306_v33 = vmul.f32 0.03125, %v290_v32 }
 0x1fd   :  { %v312_v34 = vadd.f32 1e-05, %v306_v33 }
 0x1fe   :  { %v293_v35 = vpop.xlane.xlu1 %292  ;;  %v296_v36 = vpop.xlane.xlu0 %295 }
 0x1ff   :  { %10972 = vrsqrt.f32 %v312_v34  ;;  %v307_v37 = vmul.f32 0.03125, %v293_v35  ;;  %v308_v38 = vmul.f32 0.03125, %v296_v36 }
 0x201   :  { %v313_v40 = vadd.f32 1e-05, %v307_v37  ;;  %v314_v42 = vadd.f32 1e-05, %v308_v38 }
 0x202   :  { %v299_v43 = vpop.xlane.xlu1 %298  ;;  %v302_v44 = vpop.xlane.xlu0 %301 }
 0x203   :  { %10974 = vrsqrt.f32 %v313_v40  ;;  %v309_v45 = vmul.f32 0.03125, %v299_v43  ;;  %v310_v47 = vmul.f32 0.03125, %v302_v44 }
 0x204   :  { %10976 = vrsqrt.f32 %v314_v42 }
 0x205   :  { %v315_v46 = vadd.f32 1e-05, %v309_v45  ;;  %v316_v55 = vadd.f32 1e-05, %v310_v47 }
 0x206   :  { %v305_v50 = vpop.xlane.xlu1 %304 }
 0x207   :  { %10978 = vrsqrt.f32 %v315_v46  ;;  %v311_v51 = vmul.f32 0.03125, %v305_v50 }
 0x209   :  { %v317_v56 = vadd.f32 1e-05, %v311_v51 }
 0x20b   :  { %10980 = vrsqrt.f32 %v317_v56 }
 0x20c   :  { %v10973_v57 = vpop.eup %10972  ;;  %10982 = vrsqrt.f32 %v316_v55 }
 0x20d   :  { %v324_v59 = vmul.f32 %v10973_v57, %v11645_v61 }
 0x20f   :  { %v334_v2 = vmul.f32 %v333_v58, %v324_v59 }
 0x210   :  { %v10975_v63 = vpop.eup %10974 }
 0x211   :  { %v325_v1 = vmul.f32 %v10975_v63, %v11655_v6  ;;  %v10977_v4 = vpop.eup %10976  ;;  %v344_v9 = vadd.f32 %v343_v3, %v334_v2 }
 0x212   :  { %v326_v11 = vmul.f32 %v10977_v4, %v11642_v60 }
 0x213   :  { %v335_v7 = vmul.f32 %v333_v58, %v325_v1 }
 0x214   :  { %v10979_v8 = vpop.eup %10978  ;;  %v336_v19 = vmul.f32 %v333_v58, %v326_v11 }
 0x215   :  { %v345_v10 = vadd.f32 %v343_v3, %v335_v7  ;;  %v327_v12 = vmul.f32 %v10979_v8, %v11652_v5 }
 0x216   :  { %v346_v23 = vadd.f32 %v343_v3, %v336_v19 }
 0x217   :  { %v350_v61 = vpack.c.bf16 %v345_v10, %v344_v9  ;;  %v337_v13 = vmul.f32 %v333_v58, %v327_v12 }
 0x218   :  { %v10981_v18 = vpop.eup %10980 }
 0x219   :  { %9740 = vmatmul.mubr.msk.bf16.vlgmr.msra.gmra.mxu1 %vm144_vm1, %v350_v61  ;;  %v10983_v6 = vpop.eup %10982  ;;  %v347_v20 = vadd.f32 %v343_v3, %v337_v13  ;;  %v329_v21 = vmul.f32 %v10981_v18, %v11662_v15  ;;  %v11717_v15 = vsub.s32 6, %v11600_v14 }
 0x21a   :  { %9743 = vmatprep.mubr.msk.bf16.mxu1 %vm11524_vm0, %v11523_v0  ;;  %v328_v24 = vmul.f32 %v10983_v6, %v11665_v17 }
 0x21b   :  { %v351_v25 = vpack.c.bf16 %v347_v20, %v346_v23  ;;  %v339_v60 = vmul.f32 %v333_v58, %v329_v21  ;;  %v358_v29 = vrot.slane %v11606_v16, %v11717_v15 }
 0x21c   :  { %v338_v5 = vmul.f32 %v333_v58, %v328_v24 }
 0x21d   :  { %v349_v26 = vadd.f32 %v343_v3, %v339_v60 }
 0x21e   :  { %v348_v27 = vadd.f32 %v343_v3, %v338_v5 }
 0x220   :  { %v352_v28 = vpack.c.bf16 %v349_v26, %v348_v27 }
 0x221   :  { %9744 = vmatmul.mubr.msk.bf16.gmra.mxu1 %vm144_vm1, %v351_v25 }
 0x222   :  { %9747 = vmatprep.mubr.msk.bf16.mxu1 %vm11524_vm0, %v11523_v0 }
 0x229   :  { %9748 = vmatmul.mubr.msk.bf16.gmra.mxu1 %vm144_vm1, %v352_v28 }
 0x22a   :  { %9771 = vmatprep.mubr.msk.bf16.mxu1 %vm11524_vm0, %v11523_v0 }
 0x2d9   :  { %v402_v17 = vpop.f32.mrf.mxu1 }
 0x2da   :  { %v403_v32 = vadd.f32 %v402_v17, %v358_v29 }
 0x2db   :  { %v9741_v30 = vpop.f32.mrf.mxu1 }
 0x2dd   :  { %v405_v31 = vpop.f32.mrf.mxu1 }
 0x2de   :  { %v406_v33 = vadd.f32 %v405_v31, %v358_v29 }
 0x2df   :  { %v9742_v34 = vpop.f32.mrf.mxu1 }
 0x2e0   :  { %v10612_v35 = vpack.i.bf16 %v406_v33, %v403_v32  ;;  %v485_v57 = vpack.c.bf16 %v406_v33, %v403_v32 }
 0x2e1   :  { %v410_v36 = vpop.f32.mrf.mxu1 }
 0x2e2   :  { %10613 = vrot.lane.b32.xlu0 %v10612_v35, %s11526_s25  ;;  %v411_v40 = vadd.f32 %v410_v36, %v358_v29 }
 0x2e3   :  { %v9745_v37 = vpop.f32.mrf.mxu1 }
 0x2e5   :  { %v413_v38 = vpop.f32.mrf.mxu1 }
 0x2e6   :  { %v414_v42 = vadd.f32 %v413_v38, %v358_v29 }
 0x2e7   :  { %v9746_v43 = vpop.f32.mrf.mxu1 }
 0x2e8   :  { %v10632_v44 = vpack.i.bf16 %v414_v42, %v411_v40  ;;  %v11727_v56 = vpack.c.bf16 %v414_v42, %v411_v40 }
 0x2e9   :  { %v418_v45 = vpop.f32.mrf.mxu1 }
 0x2ea   :  { %10633 = vrot.lane.b32.xlu0 %v10632_v44, %s11527_s26  ;;  %10618 = vrot.lane.b32.xlu1 %v10632_v44, %s11526_s25  ;;  %v419_v47 = vadd.f32 %v418_v45, %v358_v29 }
 0x2eb   :  { %v9749_v16 = vpop.f32.mrf.mxu1 }
 0x2ed   :  { %v421_v46 = vpop.f32.mrf.mxu1 }
 0x2ee   :  { %v422_v50 = vadd.f32 %v421_v46, %v358_v29  ;;  %10643 = vrot.lane.b32.xlu0 %v10612_v35, %s11528_s27 }
 0x2ef   :  { %v9750_v51 = vpop.f32.mrf.mxu1 }
 0x2f0   :  { %v10652_v55 = vpack.i.bf16 %v422_v50, %v419_v47  ;;  %v11735_v58 = vpack.c.bf16 %v422_v50, %v419_v47 }
 0x2f2   :  { %10653 = vrot.lane.b32.xlu0 %v10652_v55, %s11528_s27  ;;  %10623 = vrot.lane.b32.xlu1 %v10652_v55, %s11526_s25 }
 0x2f6   :  { %549 = vrot.lane.b32.xlu0 %v11727_v56, %s11529_s29  ;;  %10628 = vrot.lane.b32.xlu1 %v10612_v35, %s11527_s26 }
 0x2fa   :  { %10638 = vrot.lane.b32.xlu1 %v10652_v55, %s11527_s26 }
 0x2fe   :  { %10648 = vrot.lane.b32.xlu1 %v10632_v44, %s11528_s27 }
 0x302   :  { %498 = vrot.lane.b32.xlu1 %v485_v57, %s11529_s29 }
 0x306   :  { %599 = vrot.lane.b32.xlu1 %v11735_v58, %s11529_s29 }
 0x354   :  { %v10614_v59 = vpop.permute.xlu0 %10613 }
 0x355   :  { %v10616_v63 = vunpack.i.h.bf16 %v10614_v59  ;;  %v10615_v1 = vunpack.i.l.bf16 %v10614_v59 }
 0x357   :  { %v11739_v2 = vpack.c.bf16 %v10616_v63, %v10615_v1 }
 0x359   :  { %649 = vrot.lane.b32.xlu0 %v11739_v2, %s11529_s29 }
 0x35c   :  { %v10619_v3 = vpop.permute.xlu1 %10618  ;;  %v10634_v9 = vpop.permute.xlu0 %10633 }
 0x35d   :  { %v10621_v4 = vunpack.i.h.bf16 %v10619_v3  ;;  %v10620_v7 = vunpack.i.l.bf16 %v10619_v3  ;;  %v10636_v13 = vunpack.i.h.bf16 %v10634_v9  ;;  %v10635_v18 = vunpack.i.l.bf16 %v10634_v9 }
 0x35f   :  { %v11743_v8 = vpack.c.bf16 %v10621_v4, %v10620_v7  ;;  %v11753_v60 = vpack.c.bf16 %v10636_v13, %v10635_v18 }
 0x360   :  { %v10644_v61 = vpop.permute.xlu0 %10643 }
 0x361   :  { %699 = vrot.lane.b32.xlu1 %v11743_v8, %s11529_s29  ;;  %v10646_v23 = vunpack.i.h.bf16 %v10644_v61  ;;  %v10645_v24 = vunpack.i.l.bf16 %v10644_v61 }
 0x363   :  { %v11761_v31 = vpack.c.bf16 %v10646_v23, %v10645_v24 }
 0x364   :  { %v10624_v10 = vpop.permute.xlu1 %10623  ;;  %v10654_v5 = vpop.permute.xlu0 %10653 }
 0x365   :  { %v10626_v11 = vunpack.i.h.bf16 %v10624_v10  ;;  %v10625_v12 = vunpack.i.l.bf16 %v10624_v10  ;;  %v10656_v17 = vunpack.i.h.bf16 %v10654_v5  ;;  %v10655_v29 = vunpack.i.l.bf16 %v10654_v5 }
 0x367   :  { %v11747_v19 = vpack.c.bf16 %v10626_v11, %v10625_v12  ;;  %v11769_v36 = vpack.c.bf16 %v10656_v17, %v10655_v29  ;;  %v11864_v12 = vld [vmem:[%s14787_s1] sm:$0xff] }
 0x368   :  { %v10629_v6 = vpop.permute.xlu1 %10628  ;;  %v550_v40 = vpop.permute.xlu0 %549 }
 0x369   :  { %v10631_v20 = vunpack.i.h.bf16 %v10629_v6  ;;  %v10630_v21 = vunpack.i.l.bf16 %v10629_v6  ;;  %749 = vrot.lane.b32.xlu0 %v11747_v19, %s11529_s29  ;;  %v555_v42 = vsel %vm500_vm2, %v550_v40, 0  ;;  %v11872_v6 = vld [vmem:[%s14787_s1 + $0x8] sm:$0xff] }
 0x36b   :  { %v11751_v25 = vpack.c.bf16 %v10631_v20, %v10630_v21 }
 0x36c   :  { %v10639_v26 = vpop.permute.xlu1 %10638 }
 0x36d   :  { %v10641_v27 = vunpack.i.h.bf16 %v10639_v26  ;;  %v10640_v28 = vunpack.i.l.bf16 %v10639_v26  ;;  %799 = vrot.lane.b32.xlu1 %v11751_v25, %s11529_s29  ;;  %849 = vrot.lane.b32.xlu0 %v11753_v60, %s11529_s29 }
 0x36f   :  { %v11759_v30 = vpack.c.bf16 %v10641_v27, %v10640_v28 }
 0x370   :  { %v10649_v32 = vpop.permute.xlu1 %10648 }
 0x371   :  { %v10651_v33 = vunpack.i.h.bf16 %v10649_v32  ;;  %v10650_v34 = vunpack.i.l.bf16 %v10649_v32  ;;  %899 = vrot.lane.b32.xlu1 %v11759_v30, %s11529_s29  ;;  %949 = vrot.lane.b32.xlu0 %v11761_v31, %s11529_s29 }
 0x373   :  { %v11767_v35 = vpack.c.bf16 %v10651_v33, %v10650_v34 }
 0x374   :  { %v499_v37 = vpop.permute.xlu1 %498 }
 0x375   :  { %v505_v38 = vsel %vm500_vm2, %v499_v37, 0  ;;  %999 = vrot.lane.b32.xlu1 %v11767_v35, %s11529_s29  ;;  %1049 = vrot.lane.b32.xlu0 %v11769_v36, %s11529_s29 }
 0x376   :  { %9752 = vmatpush3.bf16.xpose.msra.mxu0 %v505_v38 }
 0x377   :  { %9757 = vmatprep.subr.bf16.mxu0 %v11523_v0 }
 0x378   :  { %v600_v43 = vpop.permute.xlu1 %599 }
 0x379   :  { %1423 = vrot.lane.b32.xlu1 %v485_v57, %s11530_s30  ;;  %1470 = vrot.lane.b32.xlu0 %v11727_v56, %s11530_s30  ;;  %v605_v44 = vsel %vm500_vm2, %v600_v43, 0 }
 0x37d   :  { %9754 = vmatmul.mubr.msk.bf16.vlgmr.msra.gmra.mxu0 %vm500_vm2, %v485_v57  ;;  %1517 = vrot.lane.b32.xlu1 %v11735_v58, %s11530_s30 }
 0x37e   :  { %1564 = vrot.lane.b32.xlu0 %v11739_v2, %s11530_s30  ;;  %9758 = vmatpush3.bf16.xpose.msra.mxu0 %v555_v42 }
 0x37f   :  { %9759 = vmatprep.mubr.msk.bf16.mxu0 %vm11524_vm0, %v11523_v0  ;;  %9763 = vmatprep.subr.bf16.mxu0 %v11523_v0 }
 0x381   :  { %1611 = vrot.lane.b32.xlu1 %v11743_v8, %s11530_s30 }
 0x382   :  { %1658 = vrot.lane.b32.xlu0 %v11747_v19, %s11530_s30 }
 0x385   :  { %1705 = vrot.lane.b32.xlu1 %v11751_v25, %s11530_s30  ;;  %9760 = vmatmul.mubr.msk.bf16.vlgmr.msra.gmra.mxu0 %vm500_vm2, %v11727_v56 }
 0x386   :  { %9764 = vmatpush3.bf16.xpose.msra.mxu0 %v605_v44  ;;  %9765 = vmatprep.mubr.msk.bf16.mxu0 %vm11524_vm0, %v11523_v0 }
 0x387   :  { %9775 = vmatprep.subr.bf16.mxu0 %v11523_v0 }
 0x38d   :  { %9766 = vmatmul.mubr.msk.bf16.vlgmr.msra.gmra.mxu0 %vm500_vm2, %v11735_v58 }
 0x38e   :  { %9777 = vmatprep.mubr.msk.bf16.mxu0 %vm11524_vm0, %v11523_v0 }
 0x3cb   :  { %v650_v45 = vpop.permute.xlu0 %649 }
 0x3cc   :  { %v655_v16 = vsel %vm500_vm2, %v650_v45, 0 }
 0x3cd   :  { %9770 = vmatpush3.bf16.xpose.msra.mxu1 %v655_v16 }
 0x3ce   :  { %9781 = vmatprep.subr.bf16.mxu1 %v11523_v0 }
 0x3d3   :  { %v700_v46 = vpop.permute.xlu1 %699 }
 0x3d4   :  { %v705_v47 = vsel %vm500_vm2, %v700_v46, 0  ;;  %9772 = vmatmul.mubr.msk.bf16.vlgmr.msra.gmra.mxu1 %vm500_vm2, %v11739_v2 }
 0x3d5   :  { %9776 = vmatpush3.bf16.xpose.msra.mxu0 %v705_v47  ;;  %9783 = vmatprep.mubr.msk.bf16.mxu1 %vm11524_vm0, %v11523_v0 }
 0x3d6   :  { %9787 = vmatprep.subr.bf16.mxu0 %v11523_v0 }
 0x3db   :  { %v750_v50 = vpop.permute.xlu0 %749 }
 0x3dc   :  { %v755_v51 = vsel %vm500_vm2, %v750_v50, 0  ;;  %9778 = vmatmul.mubr.msk.bf16.vlgmr.msra.gmra.mxu0 %vm500_vm2, %v11743_v8 }
 0x3dd   :  { %9782 = vmatpush3.bf16.xpose.msra.mxu1 %v755_v51  ;;  %9789 = vmatprep.mubr.msk.bf16.mxu0 %vm11524_vm0, %v11523_v0 }
 0x3de   :  { %9793 = vmatprep.subr.bf16.mxu1 %v11523_v0 }
 0x3df   :  { %v800_v55 = vpop.permute.xlu1 %799  ;;  %v850_v57 = vpop.permute.xlu0 %849 }
 0x3e0   :  { %v805_v56 = vsel %vm500_vm2, %v800_v55, 0  ;;  %v855_v58 = vsel %vm500_vm2, %v850_v57, 0 }
 0x3e1   :  { %9788 = vmatpush3.bf16.xpose.msra.mxu0 %v805_v56 }
 0x3e2   :  { %9799 = vmatprep.subr.bf16.mxu0 %v11523_v0 }
 0x3e3   :  { %v900_v59 = vpop.permute.xlu1 %899  ;;  %v950_v1 = vpop.permute.xlu0 %949 }
 0x3e4   :  { %9784 = vmatmul.mubr.msk.bf16.vlgmr.msra.gmra.mxu1 %vm500_vm2, %v11747_v19  ;;  %v905_v63 = vsel %vm500_vm2, %v900_v59, 0  ;;  %v955_v2 = vsel %vm500_vm2, %v950_v1, 0 }
 0x3e5   :  { %9794 = vmatpush3.bf16.xpose.msra.mxu1 %v855_v58  ;;  %9795 = vmatprep.mubr.msk.bf16.mxu1 %vm11524_vm0, %v11523_v0 }
 0x3e6   :  { %9805 = vmatprep.subr.bf16.mxu1 %v11523_v0 }
 0x3e7   :  { %v1000_v3 = vpop.permute.xlu1 %999  ;;  %v1050_v7 = vpop.permute.xlu0 %1049 }
 0x3e8   :  { %9790 = vmatmul.mubr.msk.bf16.vlgmr.msra.gmra.mxu0 %vm500_vm2, %v11751_v25  ;;  %v1005_v4 = vsel %vm500_vm2, %v1000_v3, 0  ;;  %v1055_v8 = vsel %vm500_vm2, %v1050_v7, 0 }
 0x3e9   :  { %9800 = vmatpush3.bf16.xpose.msra.mxu0 %v905_v63  ;;  %9801 = vmatprep.mubr.msk.bf16.mxu0 %vm11524_vm0, %v11523_v0 }
 0x3ea   :  { %9811 = vmatprep.subr.bf16.mxu0 %v11523_v0 }
 0x3eb   :  { %v1424_v9 = vpop.permute.xlu1 %1423  ;;  %v1471_v10 = vpop.permute.xlu0 %1470 }
 0x3ec   :  { %9796 = vmatmul.mubr.msk.bf16.vlgmr.msra.gmra.mxu1 %vm500_vm2, %v11753_v60 }
 0x3ed   :  { %9806 = vmatpush3.bf16.xpose.msra.mxu1 %v955_v2  ;;  %9807 = vmatprep.mubr.msk.bf16.mxu1 %vm11524_vm0, %v11523_v0 }
 0x3ee   :  { %9817 = vmatprep.subr.bf16.mxu1 %v11523_v0 }
 0x3f0   :  { %9802 = vmatmul.mubr.msk.bf16.vlgmr.msra.gmra.mxu0 %vm500_vm2, %v11759_v30 }
 0x3f1   :  { %9812 = vmatpush3.bf16.xpose.msra.mxu0 %v1005_v4  ;;  %9813 = vmatprep.mubr.msk.bf16.mxu0 %vm11524_vm0, %v11523_v0 }
 0x3f2   :  { %9823 = vmatprep.subr.bf16.mxu0 %v11523_v0 }
 0x3f4   :  { %9808 = vmatmul.mubr.msk.bf16.vlgmr.msra.gmra.mxu1 %vm500_vm2, %v11761_v31 }
 0x3f5   :  { %9818 = vmatpush3.bf16.xpose.msra.mxu1 %v1055_v8  ;;  %9819 = vmatprep.mubr.msk.bf16.mxu1 %vm11524_vm0, %v11523_v0 }
 0x3f6   :  { %9829 = vmatprep.subr.bf16.mxu1 %v11523_v0 }
 0x3f8   :  { %9814 = vmatmul.mubr.msk.bf16.vlgmr.msra.gmra.mxu0 %vm500_vm2, %v11767_v35 }
 0x3f9   :  { %9824 = vmatpush3.bf16.msra.mxu0 %v1424_v9  ;;  %9825 = vmatprep.mubr.msk.bf16.mxu0 %vm11524_vm0, %v11523_v0 }
 0x3fa   :  { %9835 = vmatprep.subr.bf16.mxu0 %v11523_v0 }
 0x3fc   :  { %9820 = vmatmul.mubr.msk.bf16.vlgmr.msra.gmra.mxu1 %vm500_vm2, %v11769_v36 }
 0x3fd   :  { %9830 = vmatpush3.bf16.msra.mxu1 %v1471_v10  ;;  %9831 = vmatprep.mubr.msk.bf16.mxu1 %vm11524_vm0, %v11523_v0 }
 0x3fe   :  { %9841 = vmatprep.subr.bf16.mxu1 %v11523_v0 }
 0x43d   :  { %v541_v11 = vpop.f32.mrf.mxu0 }
 0x43e   :  { %v1098_v61 = vmul.f32 0.35355338, %v541_v11 }
 0x43f   :  { %v9755_v13 = vpop.f32.mrf.mxu0 }
 0x440   :  { %v11867_v18 = vadd.f32 %v1098_v61, %v11864_v12 }
 0x441   :  { %v544_v19 = vpop.f32.mrf.mxu0 }
 0x442   :  { %v1099_v20 = vmul.f32 0.35355338, %v544_v19  ;;  %v1147_v21 = vsel %vm1146_vm3, %v11867_v18, -inf }
 0x443   :  { %v9756_v23 = vpop.f32.mrf.mxu0  ;;  %1148 = vmax.xlane.f32.xlu1 %v1147_v21 }
 0x444   :  { %v11877_v24 = vadd.f32 %v1099_v20, %v11872_v6 }
 0x445   :  { %v591_v25 = vpop.f32.mrf.mxu0 }
 0x446   :  { %v1100_v5 = vmul.f32 0.35355338, %v591_v25  ;;  %v1150_v26 = vsel %vm1146_vm3, %v11877_v24, -inf }
 0x447   :  { %v9761_v27 = vpop.f32.mrf.mxu0  ;;  %1151 = vmax.xlane.f32.xlu0 %v1150_v26 }
 0x448   :  { %v11882_v28 = vadd.f32 %v1100_v5, %v11864_v12 }
 0x449   :  { %v594_v17 = vpop.f32.mrf.mxu0 }
 0x44a   :  { %v1101_v29 = vmul.f32 0.35355338, %v594_v17  ;;  %v1153_v32 = vsel %vm1146_vm3, %v11882_v28, -inf }
 0x44b   :  { %v9762_v33 = vpop.f32.mrf.mxu0  ;;  %1154 = vmax.xlane.f32.xlu0 %v1153_v32 }
 0x44c   :  { %v11887_v34 = vadd.f32 %v1101_v29, %v11872_v6 }
 0x44d   :  { %v641_v37 = vpop.f32.mrf.mxu0 }
 0x44e   :  { %v1102_v38 = vmul.f32 0.35355338, %v641_v37  ;;  %v1156_v40 = vsel %vm1146_vm3, %v11887_v34, -inf }
 0x44f   :  { %v9767_v42 = vpop.f32.mrf.mxu0  ;;  %1157 = vmax.xlane.f32.xlu0 %v1156_v40 }
 0x450   :  { %v11892_v43 = vadd.f32 %v1102_v38, %v11864_v12 }
 0x451   :  { %v644_v44 = vpop.f32.mrf.mxu0 }
 0x452   :  { %v1103_v45 = vmul.f32 0.35355338, %v644_v44  ;;  %v1159_v16 = vsel %vm1146_vm3, %v11892_v43, -inf }
 0x453   :  { %1160 = vmax.xlane.f32.xlu1 %v1159_v16  ;;  %v9768_v46 = vpop.f32.mrf.mxu0 }
 0x454   :  { %v11897_v47 = vadd.f32 %v1103_v45, %v11872_v6 }
 0x456   :  { %v1162_v50 = vsel %vm1146_vm3, %v11897_v47, -inf }
 0x457   :  { %1163 = vmax.xlane.f32.xlu0 %v1162_v50 }
 0x494   :  { %v691_v51 = vpop.f32.mrf.mxu1 }
 0x495   :  { %v1104_v55 = vmul.f32 0.35355338, %v691_v51 }
 0x496   :  { %v9773_v56 = vpop.f32.mrf.mxu1 }
 0x497   :  { %v11902_v57 = vadd.f32 %v1104_v55, %v11864_v12 }
 0x498   :  { %v694_v58 = vpop.f32.mrf.mxu1 }
 0x499   :  { %v1105_v59 = vmul.f32 0.35355338, %v694_v58  ;;  %v1165_v63 = vsel %vm1146_vm3, %v11902_v57, -inf }
 0x49a   :  { %1166 = vmax.xlane.f32.xlu1 %v1165_v63  ;;  %v9774_v1 = vpop.f32.mrf.mxu1 }
 0x49b   :  { %v11907_v2 = vadd.f32 %v1105_v59, %v11872_v6 }
 0x49c   :  { %v741_v3 = vpop.f32.mrf.mxu0 }
 0x49d   :  { %v1106_v4 = vmul.f32 0.35355338, %v741_v3  ;;  %v1168_v7 = vsel %vm1146_vm3, %v11907_v2, -inf }
 0x49e   :  { %v9779_v8 = vpop.f32.mrf.mxu0  ;;  %1169 = vmax.xlane.f32.xlu0 %v1168_v7 }
 0x49f   :  { %v11912_v9 = vadd.f32 %v1106_v4, %v11864_v12 }
 0x4a0   :  { %v744_v10 = vpop.f32.mrf.mxu0 }
 0x4a1   :  { %v1107_v11 = vmul.f32 0.35355338, %v744_v10  ;;  %v1171_v61 = vsel %vm1146_vm3, %v11912_v9, -inf }
 0x4a2   :  { %v9780_v13 = vpop.f32.mrf.mxu0  ;;  %1172 = vmax.xlane.f32.xlu1 %v1171_v61 }
 0x4a3   :  { %v11917_v19 = vadd.f32 %v1107_v11, %v11872_v6 }
 0x4a4   :  { %v791_v20 = vpop.f32.mrf.mxu1 }
 0x4a5   :  { %v1108_v21 = vmul.f32 0.35355338, %v791_v20  ;;  %v1174_v23 = vsel %vm1146_vm3, %v11917_v19, -inf }
 0x4a6   :  { %1175 = vmax.xlane.f32.xlu0 %v1174_v23  ;;  %v9785_v25 = vpop.f32.mrf.mxu1 }
 0x4a7   :  { %v11922_v5 = vadd.f32 %v1108_v21, %v11864_v12 }
 0x4a8   :  { %v794_v26 = vpop.f32.mrf.mxu1  ;;  %v841_v27 = vpop.f32.mrf.mxu0 }
 0x4a9   :  { %v1109_v17 = vmul.f32 0.35355338, %v794_v26  ;;  %v1110_v29 = vmul.f32 0.35355338, %v841_v27  ;;  %v1177_v32 = vsel %vm1146_vm3, %v11922_v5, -inf }
 0x4aa   :  { %v9791_v33 = vpop.f32.mrf.mxu0  ;;  %1178 = vmax.xlane.f32.xlu1 %v1177_v32  ;;  %v9786_v37 = vpop.f32.mrf.mxu1 }
 0x4ab   :  { %v11927_v38 = vadd.f32 %v1110_v29, %v11864_v12  ;;  %v11930_v40 = vadd.f32 %v1109_v17, %v11872_v6 }
 0x4ac   :  { %v844_v42 = vpop.f32.mrf.mxu0  ;;  %v891_v44 = vpop.f32.mrf.mxu1 }
 0x4ad   :  { %v1111_v45 = vmul.f32 0.35355338, %v844_v42  ;;  %v1112_v16 = vmul.f32 0.35355338, %v891_v44  ;;  %v1183_v46 = vsel %vm1146_vm3, %v11927_v38, -inf  ;;  %v1180_v50 = vsel %vm1146_vm3, %v11930_v40, -inf }
 0x4ae   :  { %v9792_v51 = vpop.f32.mrf.mxu0  ;;  %1184 = vmax.xlane.f32.xlu1 %v1183_v46  ;;  %1181 = vmax.xlane.f32.xlu0 %v1180_v50  ;;  %v9797_v55 = vpop.f32.mrf.mxu1 }
 0x4af   :  { %v11937_v56 = vadd.f32 %v1111_v45, %v11872_v6  ;;  %v11940_v58 = vadd.f32 %v1112_v16, %v11864_v12  ;;  %v11966_v51 = vpop.permute.xlu1 %1517 }
 0x4b0   :  { %v894_v59 = vpop.f32.mrf.mxu1  ;;  %v941_v63 = vpop.f32.mrf.mxu0 }
 0x4b1   :  { %v1113_v1 = vmul.f32 0.35355338, %v894_v59  ;;  %v1114_v3 = vmul.f32 0.35355338, %v941_v63  ;;  %v1186_v4 = vsel %vm1146_vm3, %v11937_v56, -inf  ;;  %v1189_v7 = vsel %vm1146_vm3, %v11940_v58, -inf }
 0x4b2   :  { %v9803_v8 = vpop.f32.mrf.mxu0  ;;  %1187 = vmax.xlane.f32.xlu0 %v1186_v4  ;;  %1190 = vmax.xlane.f32.xlu1 %v1189_v7  ;;  %v9798_v10 = vpop.f32.mrf.mxu1 }
 0x4b3   :  { %v11947_v11 = vadd.f32 %v1114_v3, %v11864_v12  ;;  %v11950_v61 = vadd.f32 %v1113_v1, %v11872_v6 }
 0x4b4   :  { %v944_v13 = vpop.f32.mrf.mxu0  ;;  %v991_v20 = vpop.f32.mrf.mxu1 }
 0x4b5   :  { %v1115_v21 = vmul.f32 0.35355338, %v944_v13  ;;  %v1116_v23 = vmul.f32 0.35355338, %v991_v20  ;;  %v1195_v25 = vsel %vm1146_vm3, %v11947_v11, -inf  ;;  %v1192_v26 = vsel %vm1146_vm3, %v11950_v61, -inf }
 0x4b6   :  { %v9804_v27 = vpop.f32.mrf.mxu0  ;;  %1196 = vmax.xlane.f32.xlu1 %v1195_v25  ;;  %1193 = vmax.xlane.f32.xlu0 %v1192_v26  ;;  %v9809_v17 = vpop.f32.mrf.mxu1 }
 0x4b7   :  { %v11957_v29 = vadd.f32 %v1115_v21, %v11872_v6  ;;  %v11960_v32 = vadd.f32 %v1116_v23, %v11864_v12  ;;  %v11988_v17 = vpop.permute.xlu1 %1611 }
 0x4b8   :  { %v994_v33 = vpop.f32.mrf.mxu1  ;;  %v1041_v37 = vpop.f32.mrf.mxu0 }
 0x4b9   :  { %v1117_v42 = vmul.f32 0.35355338, %v994_v33  ;;  %v1118_v44 = vmul.f32 0.35355338, %v1041_v37  ;;  %v1198_v45 = vsel %vm1146_vm3, %v11957_v29, -inf  ;;  %v1201_v16 = vsel %vm1146_vm3, %v11960_v32, -inf }
 0x4ba   :  { %v9815_v46 = vpop.f32.mrf.mxu0  ;;  %1199 = vmax.xlane.f32.xlu0 %v1198_v45  ;;  %1202 = vmax.xlane.f32.xlu1 %v1201_v16  ;;  %v9810_v50 = vpop.f32.mrf.mxu1 }
 0x4bb   :  { %v11969_v55 = vadd.f32 %v1118_v44, %v11864_v12  ;;  %v11972_v59 = vadd.f32 %v1117_v42, %v11872_v6  ;;  %v11995_v42 = vpop.permute.xlu0 %1564  ;;  %v11997_v44 = vpop.permute.xlu1 %1705 }
 0x4bc   :  { %v1044_v63 = vpop.f32.mrf.mxu0  ;;  %v1091_v1 = vpop.f32.mrf.mxu1 }
 0x4bd   :  { %v1119_v3 = vmul.f32 0.35355338, %v1044_v63  ;;  %v1120_v4 = vmul.f32 0.35355338, %v1091_v1  ;;  %v1207_v7 = vsel %vm1146_vm3, %v11969_v55, -inf  ;;  %v1204_v8 = vsel %vm1146_vm3, %v11972_v59, -inf }
 0x4be   :  { %v9816_v10 = vpop.f32.mrf.mxu0  ;;  %1208 = vmax.xlane.f32.xlu1 %v1207_v7  ;;  %1205 = vmax.xlane.f32.xlu0 %v1204_v8  ;;  %v9821_v13 = vpop.f32.mrf.mxu1 }
 0x4bf   :  { %v11979_v20 = vadd.f32 %v1119_v3, %v11872_v6  ;;  %v11982_v21 = vadd.f32 %v1120_v4, %v11864_v12  ;;  %v11999_v45 = vpop.permute.xlu0 %1658 }
 0x4c0   :  { %v1094_v23 = vpop.f32.mrf.mxu1 }
 0x4c1   :  { %v1121_v25 = vmul.f32 0.35355338, %v1094_v23  ;;  %v1210_v26 = vsel %vm1146_vm3, %v11979_v20, -inf  ;;  %v1213_v27 = vsel %vm1146_vm3, %v11982_v21, -inf }
 0x4c2   :  { %1211 = vmax.xlane.f32.xlu0 %v1210_v26  ;;  %1214 = vmax.xlane.f32.xlu1 %v1213_v27  ;;  %v9822_v33 = vpop.f32.mrf.mxu1 }
 0x4c3   :  { %v11991_v37 = vadd.f32 %v1121_v25, %v11872_v6 }
 0x4c5   :  { %v1216_v12 = vsel %vm1146_vm3, %v11991_v37, -inf }
 0x4c6   :  { %1217 = vmax.xlane.f32.xlu0 %v1216_v12 }
 0x4cc   :  { %v1149_v16 = vpop.xlane.xlu1 %1148 }
 0x4cd   :  { %v1219_v46 = vsub.f32 %v11867_v18, %v1149_v16 }
 0x4cf   :  { %v1243_v50 = vmul.f32 1.442695, %v1219_v46 }
 0x4d0   :  { %v1152_v63 = vpop.xlane.xlu0 %1151 }
 0x4d1   :  { %10984 = vpow2.f32 %v1243_v50  ;;  %v1220_v1 = vsub.f32 %v11877_v24, %v1152_v63 }
 0x4d3   :  { %v1245_v6 = vmul.f32 1.442695, %v1220_v1 }
 0x4d4   :  { %v1155_v3 = vpop.xlane.xlu0 %1154 }
 0x4d5   :  { %10986 = vpow2.f32 %v1245_v6  ;;  %v1221_v4 = vsub.f32 %v11882_v28, %v1155_v3 }
 0x4d7   :  { %v1247_v7 = vmul.f32 1.442695, %v1221_v4 }
 0x4d8   :  { %v1158_v8 = vpop.xlane.xlu0 %1157 }
 0x4d9   :  { %10988 = vpow2.f32 %v1247_v7  ;;  %v1222_v10 = vsub.f32 %v11887_v34, %v1158_v8 }
 0x4db   :  { %v1249_v13 = vmul.f32 1.442695, %v1222_v10 }
 0x4dc   :  { %v1161_v23 = vpop.xlane.xlu1 %1160 }
 0x4dd   :  { %10990 = vpow2.f32 %v1249_v13  ;;  %v1223_v18 = vsub.f32 %v11892_v43, %v1161_v23 }
 0x4de   :  { %v12006_v25 = vpop.eup %10984 }
 0x4df   :  { %v1251_v26 = vmul.f32 1.442695, %v1223_v18  ;;  %v1291_v24 = vsel %vm1146_vm3, %v12006_v25, 0.0 }
 0x4e0   :  { %1292 = vadd.xlane.f32.xlu1 %v1291_v24  ;;  %v1164_v27 = vpop.xlane.xlu0 %1163 }
 0x4e1   :  { %10992 = vpow2.f32 %v1251_v26  ;;  %v1224_v28 = vsub.f32 %v11897_v47, %v1164_v27 }
 0x4e2   :  { %v12011_v33 = vpop.eup %10986 }
 0x4e3   :  { %v1253_v12 = vmul.f32 1.442695, %v1224_v28  ;;  %v1294_v34 = vsel %vm1146_vm3, %v12011_v33, 0.0 }
 0x4e4   :  { %1295 = vadd.xlane.f32.xlu0 %v1294_v34 }
 0x4e5   :  { %10994 = vpow2.f32 %v1253_v12 }
 0x4e6   :  { %v12015_v43 = vpop.eup %10988 }
 0x4e7   :  { %v1297_v16 = vsel %vm1146_vm3, %v12015_v43, 0.0 }
 0x4e8   :  { %1298 = vadd.xlane.f32.xlu1 %v1297_v16 }
 0x4ea   :  { %v12019_v46 = vpop.eup %10990 }
 0x4eb   :  { %v1300_v50 = vsel %vm1146_vm3, %v12019_v46, 0.0 }
 0x4ec   :  { %1301 = vadd.xlane.f32.xlu0 %v1300_v50 }
 0x4ee   :  { %v12023_v47 = vpop.eup %10992 }
 0x4ef   :  { %v1303_v63 = vsel %vm1146_vm3, %v12023_v47, 0.0 }
 0x4f0   :  { %1304 = vadd.xlane.f32.xlu1 %v1303_v63 }
 0x4f2   :  { %v12027_v1 = vpop.eup %10994 }
 0x4f3   :  { %v1306_v6 = vsel %vm1146_vm3, %v12027_v1, 0.0 }
 0x4f4   :  { %1307 = vadd.xlane.f32.xlu0 %v1306_v6 }
 0x523   :  { %v1167_v3 = vpop.xlane.xlu1 %1166 }
 0x524   :  { %v1225_v4 = vsub.f32 %v11902_v57, %v1167_v3 }
 0x526   :  { %v1255_v7 = vmul.f32 1.442695, %v1225_v4 }
 0x527   :  { %v1170_v8 = vpop.xlane.xlu0 %1169 }
 0x528   :  { %10996 = vpow2.f32 %v1255_v7  ;;  %v1226_v10 = vsub.f32 %v11907_v2, %v1170_v8 }
 0x52a   :  { %v1257_v13 = vmul.f32 1.442695, %v1226_v10 }
 0x52b   :  { %v1173_v23 = vpop.xlane.xlu1 %1172 }
 0x52c   :  { %10998 = vpow2.f32 %v1257_v13  ;;  %v1227_v18 = vsub.f32 %v11912_v9, %v1173_v23 }
 0x52e   :  { %v1259_v26 = vmul.f32 1.442695, %v1227_v18 }
 0x52f   :  { %v1176_v24 = vpop.xlane.xlu0 %1175 }
 0x530   :  { %11000 = vpow2.f32 %v1259_v26  ;;  %v1228_v27 = vsub.f32 %v11917_v19, %v1176_v24 }
 0x532   :  { %v1261_v28 = vmul.f32 1.442695, %v1228_v27 }
 0x533   :  { %v1179_v12 = vpop.xlane.xlu1 %1178 }
 0x534   :  { %11002 = vpow2.f32 %v1261_v28  ;;  %v1229_v57 = vsub.f32 %v11922_v5, %v1179_v12 }
 0x535   :  { %v12036_v34 = vpop.eup %10996 }
 0x536   :  { %v1263_v16 = vmul.f32 1.442695, %v1229_v57  ;;  %v1309_v2 = vsel %vm1146_vm3, %v12036_v34, 0.0 }
 0x537   :  { %v1185_v50 = vpop.xlane.xlu1 %1184  ;;  %1310 = vadd.xlane.f32.xlu1 %v1309_v2  ;;  %v1182_v63 = vpop.xlane.xlu0 %1181 }
 0x538   :  { %11004 = vpow2.f32 %v1263_v16  ;;  %v1231_v9 = vsub.f32 %v11927_v38, %v1185_v50  ;;  %v1230_v6 = vsub.f32 %v11930_v40, %v1182_v63 }
 0x539   :  { %v12042_v19 = vpop.eup %10998 }
 0x53a   :  { %v1267_v3 = vmul.f32 1.442695, %v1231_v9  ;;  %v1265_v4 = vmul.f32 1.442695, %v1230_v6  ;;  %v1312_v5 = vsel %vm1146_vm3, %v12042_v19, 0.0 }
 0x53b   :  { %v1191_v7 = vpop.xlane.xlu1 %1190  ;;  %1313 = vadd.xlane.f32.xlu0 %v1312_v5  ;;  %v1188_v8 = vpop.xlane.xlu0 %1187 }
 0x53c   :  { %11006 = vpow2.f32 %v1267_v3  ;;  %v1233_v10 = vsub.f32 %v11940_v58, %v1191_v7  ;;  %v1232_v13 = vsub.f32 %v11937_v56, %v1188_v8 }
 0x53d   :  { %v12048_v23 = vpop.eup %11000  ;;  %11008 = vpow2.f32 %v1265_v4 }
 0x53e   :  { %v1271_v38 = vmul.f32 1.442695, %v1233_v10  ;;  %v1269_v40 = vmul.f32 1.442695, %v1232_v13  ;;  %v1315_v18 = vsel %vm1146_vm3, %v12048_v23, 0.0 }
 0x53f   :  { %v1197_v26 = vpop.xlane.xlu1 %1196  ;;  %1316 = vadd.xlane.f32.xlu1 %v1315_v18  ;;  %v1194_v24 = vpop.xlane.xlu0 %1193 }
 0x540   :  { %11010 = vpow2.f32 %v1271_v38  ;;  %v1235_v27 = vsub.f32 %v11947_v11, %v1197_v26  ;;  %v1234_v28 = vsub.f32 %v11950_v61, %v1194_v24 }
 0x541   :  { %v12054_v12 = vpop.eup %11002  ;;  %11012 = vpow2.f32 %v1269_v40 }
 0x542   :  { %v1275_v56 = vmul.f32 1.442695, %v1235_v27  ;;  %v1273_v58 = vmul.f32 1.442695, %v1234_v28  ;;  %v1318_v57 = vsel %vm1146_vm3, %v12054_v12, 0.0 }
 0x543   :  { %v1203_v16 = vpop.xlane.xlu1 %1202  ;;  %1319 = vadd.xlane.f32.xlu0 %v1318_v57  ;;  %v1200_v2 = vpop.xlane.xlu0 %1199 }
 0x544   :  { %11014 = vpow2.f32 %v1275_v56  ;;  %v1237_v50 = vsub.f32 %v11960_v32, %v1203_v16  ;;  %v1236_v63 = vsub.f32 %v11957_v29, %v1200_v2 }
 0x545   :  { %v12060_v9 = vpop.eup %11004  ;;  %11016 = vpow2.f32 %v1273_v58 }
 0x546   :  { %v1279_v11 = vmul.f32 1.442695, %v1237_v50  ;;  %v1277_v61 = vmul.f32 1.442695, %v1236_v63  ;;  %v1321_v6 = vsel %vm1146_vm3, %v12060_v9, 0.0 }
 0x547   :  { %v1209_v3 = vpop.xlane.xlu1 %1208  ;;  %1322 = vadd.xlane.f32.xlu1 %v1321_v6  ;;  %v1206_v4 = vpop.xlane.xlu0 %1205 }
 0x548   :  { %11018 = vpow2.f32 %v1279_v11  ;;  %v1239_v5 = vsub.f32 %v11969_v55, %v1209_v3  ;;  %v1238_v7 = vsub.f32 %v11972_v59, %v1206_v4 }
 0x549   :  { %v12066_v8 = vpop.eup %11006  ;;  %11020 = vpow2.f32 %v1277_v61 }
 0x54a   :  { %v12068_v29 = vpop.eup %11008  ;;  %v1283_v32 = vmul.f32 1.442695, %v1239_v5  ;;  %v1281_v10 = vmul.f32 1.442695, %v1238_v7  ;;  %v1327_v13 = vsel %vm1146_vm3, %v12066_v8, 0.0 }
 0x54b   :  { %1328 = vadd.xlane.f32.xlu1 %v1327_v13  ;;  %v1324_v38 = vsel %vm1146_vm3, %v12068_v29, 0.0  ;;  %v1212_v61 = vpop.xlane.xlu0 %1211  ;;  %v1215_v6 = vpop.xlane.xlu1 %1214 }
 0x54c   :  { %11022 = vpow2.f32 %v1283_v32  ;;  %1325 = vadd.xlane.f32.xlu0 %v1324_v38 }
 0x54d   :  { %v12074_v40 = vpop.eup %11010  ;;  %11024 = vpow2.f32 %v1281_v10  ;;  %v1240_v10 = vsub.f32 %v11979_v20, %v1212_v61 }
 0x54e   :  { %v12076_v55 = vpop.eup %11012  ;;  %v1333_v59 = vsel %vm1146_vm3, %v12074_v40, 0.0 }
 0x54f   :  { %1334 = vadd.xlane.f32.xlu1 %v1333_v59  ;;  %v1330_v18 = vsel %vm1146_vm3, %v12076_v55, 0.0  ;;  %v1218_v3 = vpop.xlane.xlu0 %1217 }
 0x550   :  { %1331 = vadd.xlane.f32.xlu0 %v1330_v18  ;;  %v1241_v18 = vsub.f32 %v11982_v21, %v1215_v6 }
 0x551   :  { %v12082_v26 = vpop.eup %11014 }
 0x552   :  { %v12084_v24 = vpop.eup %11016  ;;  %v1339_v27 = vsel %vm1146_vm3, %v12082_v26, 0.0 }
 0x553   :  { %1340 = vadd.xlane.f32.xlu1 %v1339_v27  ;;  %v1336_v28 = vsel %vm1146_vm3, %v12084_v24, 0.0  ;;  %v1242_v27 = vsub.f32 %v11991_v37, %v1218_v3 }
 0x554   :  { %1337 = vadd.xlane.f32.xlu0 %v1336_v28 }
 0x555   :  { %v12090_v56 = vpop.eup %11018 }
 0x556   :  { %v12092_v58 = vpop.eup %11020  ;;  %v1345_v57 = vsel %vm1146_vm3, %v12090_v56, 0.0 }
 0x557   :  { %1346 = vadd.xlane.f32.xlu1 %v1345_v57  ;;  %v1342_v16 = vsel %vm1146_vm3, %v12092_v58, 0.0 }
 0x558   :  { %1343 = vadd.xlane.f32.xlu0 %v1342_v16  ;;  %v1287_v16 = vmul.f32 1.442695, %v1241_v18 }
 0x559   :  { %v12098_v2 = vpop.eup %11022 }
 0x55a   :  { %v12100_v50 = vpop.eup %11024  ;;  %v1351_v63 = vsel %vm1146_vm3, %v12098_v2, 0.0 }
 0x55b   :  { %1352 = vadd.xlane.f32.xlu1 %v1351_v63  ;;  %v1348_v11 = vsel %vm1146_vm3, %v12100_v50, 0.0  ;;  %v1289_v63 = vmul.f32 1.442695, %v1242_v27 }
 0x55c   :  { %1349 = vadd.xlane.f32.xlu0 %v1348_v11 }
 0x569   :  { %v1293_v4 = vpop.xlane.xlu1 %1292 }
 0x56a   :  { %11026 = vrcp.f32 %v1293_v4 }
 0x56c   :  { %1799 = vrot.lane.b32.xlu1 %v11759_v30, %s11530_s30  ;;  %v1285_v30 = vmul.f32 1.442695, %v1240_v10 }
 0x56d   :  { %v1296_v5 = vpop.xlane.xlu0 %1295 }
 0x56e   :  { %11028 = vrcp.f32 %v1296_v5 }
 0x570   :  { %1846 = vrot.lane.b32.xlu1 %v11761_v31, %s11530_s30 }
 0x571   :  { %v1299_v7 = vpop.xlane.xlu1 %1298 }
 0x572   :  { %1752 = vrot.lane.b32.xlu0 %v11753_v60, %s11530_s30  ;;  %11030 = vrcp.f32 %v1299_v7 }
 0x575   :  { %v1302_v32 = vpop.xlane.xlu0 %1301 }
 0x576   :  { %11032 = vrcp.f32 %v1302_v32 }
 0x577   :  { %v11027_v13 = vpop.eup %11026 }
 0x578   :  { %v1387_v31 = vmul.f32 %v11027_v13, %v12006_v25 }
 0x579   :  { %v1305_v38 = vpop.xlane.xlu1 %1304 }
 0x57a   :  { %11034 = vrcp.f32 %v1305_v38 }
 0x57b   :  { %v11029_v59 = vpop.eup %11028 }
 0x57c   :  { %v1388_v28 = vmul.f32 %v11029_v59, %v12011_v33 }
 0x57d   :  { %v1308_v57 = vpop.xlane.xlu0 %1307 }
 0x57e   :  { %11036 = vrcp.f32 %v1308_v57  ;;  %v1411_v60 = vpack.c.bf16 %v1388_v28, %v1387_v31 }
 0x57f   :  { %11038 = vpow2.f32 %v1285_v30  ;;  %v11031_v20 = vpop.eup %11030 }
 0x580   :  { %9826 = vmatmul.mubr.msk.bf16.vlgmr.msra.gmra.mxu0 %vm1146_vm3, %v1411_v60  ;;  %11040 = vpow2.f32 %v1287_v16  ;;  %v1389_v37 = vmul.f32 %v11031_v20, %v12015_v43 }
 0x581   :  { %9836 = vmatpush3.bf16.msra.mxu0 %v11966_v51  ;;  %9837 = vmatprep.mubr.msk.bf16.mxu0 %vm11524_vm0, %v11523_v0  ;;  %11042 = vpow2.f32 %v1289_v63 }
 0x582   :  { %9847 = vmatprep.subr.bf16.mxu0 %v11523_v0 }
 0x583   :  { %v11033_v21 = vpop.eup %11032 }
 0x584   :  { %v1390_v25 = vmul.f32 %v11033_v21, %v12019_v46 }
 0x586   :  { %v1412_v33 = vpack.c.bf16 %v1390_v25, %v1389_v37 }
 0x587   :  { %v11035_v11 = vpop.eup %11034 }
 0x588   :  { %9832 = vmatmul.mubr.msk.bf16.vlgmr.msra.gmra.mxu1 %vm1146_vm3, %v1412_v33  ;;  %v1391_v61 = vmul.f32 %v11035_v11, %v12023_v47 }
 0x589   :  { %9842 = vmatpush3.bf16.msra.mxu1 %v11995_v42  ;;  %9843 = vmatprep.mubr.msk.bf16.mxu1 %vm11524_vm0, %v11523_v0 }
 0x58a   :  { %9853 = vmatprep.subr.bf16.mxu1 %v11523_v0 }
 0x58b   :  { %v11037_v51 = vpop.eup %11036 }
 0x58c   :  { %v1392_v6 = vmul.f32 %v11037_v51, %v12027_v1  ;;  %v12131_v3 = vpop.eup %11038 }
 0x58d   :  { %v12133_v46 = vpop.eup %11040  ;;  %v1354_v4 = vsel %vm1146_vm3, %v12131_v3, 0.0 }
 0x58e   :  { %v1413_v43 = vpack.c.bf16 %v1392_v6, %v1391_v61  ;;  %v12138_v42 = vpop.eup %11042  ;;  %v1357_v47 = vsel %vm1146_vm3, %v12133_v46, 0.0 }
 0x58f   :  { %v1360_v1 = vsel %vm1146_vm3, %v12138_v42, 0.0 }
 0x590   :  { %9838 = vmatmul.mubr.msk.bf16.vlgmr.msra.gmra.mxu0 %vm1146_vm3, %v1413_v43 }
 0x591   :  { %1355 = vadd.xlane.f32.xlu0 %v1354_v4  ;;  %9848 = vmatpush3.bf16.msra.mxu0 %v11988_v17 }
 0x592   :  { %9849 = vmatprep.mubr.msk.bf16.mxu0 %vm11524_vm0, %v11523_v0  ;;  %9859 = vmatprep.subr.bf16.mxu0 %v11523_v0 }
 0x594   :  { %1358 = vadd.xlane.f32.xlu1 %v1357_v47 }
 0x595   :  { %1361 = vadd.xlane.f32.xlu0 %v1360_v1 }
 0x5a5   :  { %1893 = vrot.lane.b32.xlu1 %v11767_v35, %s11530_s30 }
 0x5ab   :  { %1940 = vrot.lane.b32.xlu0 %v11769_v36, %s11530_s30 }
 0x5c0   :  { %v1311_v17 = vpop.xlane.xlu1 %1310 }
 0x5c1   :  { %11044 = vrcp.f32 %v1311_v17 }
 0x5c4   :  { %v1314_v5 = vpop.xlane.xlu0 %1313 }
 0x5c5   :  { %11046 = vrcp.f32 %v1314_v5 }
 0x5c8   :  { %v1317_v7 = vpop.xlane.xlu1 %1316 }
 0x5c9   :  { %11048 = vrcp.f32 %v1317_v7 }
 0x5cc   :  { %v1320_v32 = vpop.xlane.xlu0 %1319 }
 0x5cd   :  { %11050 = vrcp.f32 %v1320_v32 }
 0x5ce   :  { %v11045_v10 = vpop.eup %11044 }
 0x5cf   :  { %v1393_v59 = vmul.f32 %v11045_v10, %v12036_v34 }
 0x5d0   :  { %v1323_v13 = vpop.xlane.xlu1 %1322 }
 0x5d1   :  { %11052 = vrcp.f32 %v1323_v13 }
 0x5d2   :  { %v11047_v38 = vpop.eup %11046 }
 0x5d3   :  { %v1394_v18 = vmul.f32 %v11047_v38, %v12042_v19 }
 0x5d4   :  { %v1329_v35 = vpop.xlane.xlu1 %1328 }
 0x5d5   :  { %v1326_v30 = vpop.xlane.xlu0 %1325  ;;  %v1414_v27 = vpack.c.bf16 %v1394_v18, %v1393_v59 }
 0x5d6   :  { %11054 = vrcp.f32 %v1326_v30  ;;  %v11049_v36 = vpop.eup %11048 }
 0x5d7   :  { %9844 = vmatmul.mubr.msk.bf16.vlgmr.msra.gmra.mxu1 %vm1146_vm3, %v1414_v27  ;;  %11056 = vrcp.f32 %v1329_v35  ;;  %v1395_v19 = vmul.f32 %v11049_v36, %v12048_v23 }
 0x5d8   :  { %9854 = vmatpush3.bf16.msra.mxu1 %v11999_v45  ;;  %v1335_v31 = vpop.xlane.xlu1 %1334  ;;  %9855 = vmatprep.mubr.msk.bf16.mxu1 %vm11524_vm0, %v11523_v0 }
 0x5d9   :  { %v1332_v28 = vpop.xlane.xlu0 %1331  ;;  %9865 = vmatprep.subr.bf16.mxu1 %v11523_v0 }
 0x5da   :  { %v11051_v34 = vpop.eup %11050  ;;  %11058 = vrcp.f32 %v1332_v28 }
 0x5db   :  { %v1396_v57 = vmul.f32 %v11051_v34, %v12054_v12  ;;  %11060 = vrcp.f32 %v1335_v31 }
 0x5dc   :  { %v1341_v60 = vpop.xlane.xlu1 %1340 }
 0x5dd   :  { %v1338_v16 = vpop.xlane.xlu0 %1337  ;;  %v1415_v63 = vpack.c.bf16 %v1396_v57, %v1395_v19 }
 0x5de   :  { %11062 = vrcp.f32 %v1338_v16  ;;  %v11053_v20 = vpop.eup %11052 }
 0x5df   :  { %9850 = vmatmul.mubr.msk.bf16.vlgmr.msra.gmra.mxu0 %vm1146_vm3, %v1415_v63  ;;  %11064 = vrcp.f32 %v1341_v60  ;;  %v1397_v37 = vmul.f32 %v11053_v20, %v12060_v9 }
 0x5e0   :  { %9860 = vmatpush3.bf16.msra.mxu0 %v11997_v44  ;;  %v1347_v45 = vpop.xlane.xlu1 %1346  ;;  %9861 = vmatprep.mubr.msk.bf16.mxu0 %vm11524_vm0, %v11523_v0 }
 0x5e1   :  { %v1344_v21 = vpop.xlane.xlu0 %1343  ;;  %9871 = vmatprep.subr.bf16.mxu0 %v11523_v0 }
 0x5e2   :  { %11066 = vrcp.f32 %v1344_v21 }
 0x5e3   :  { %v11055_v23 = vpop.eup %11054  ;;  %11068 = vrcp.f32 %v1347_v45 }
 0x5e4   :  { %v1353_v12 = vpop.xlane.xlu1 %1352  ;;  %v1398_v25 = vmul.f32 %v11055_v23, %v12068_v29  ;;  %v11057_v33 = vpop.eup %11056 }
 0x5e5   :  { %v1350_v11 = vpop.xlane.xlu0 %1349  ;;  %v1399_v61 = vmul.f32 %v11057_v33, %v12066_v8 }
 0x5e6   :  { %11070 = vrcp.f32 %v1350_v11  ;;  %v1416_v44 = vpack.c.bf16 %v1398_v25, %v1397_v37 }
 0x5e7   :  { %v11059_v51 = vpop.eup %11058  ;;  %11072 = vrcp.f32 %v1353_v12 }
 0x5e8   :  { %9856 = vmatmul.mubr.msk.bf16.vlgmr.msra.gmra.mxu1 %vm1146_vm3, %v1416_v44  ;;  %v1400_v6 = vmul.f32 %v11059_v51, %v12076_v55  ;;  %v11061_v43 = vpop.eup %11060  ;;  %v1800_v47 = vpop.permute.xlu1 %1799 }
 0x5e9   :  { %v1753_v4 = vpop.permute.xlu0 %1752  ;;  %9867 = vmatprep.mubr.msk.bf16.mxu1 %vm11524_vm0, %v11523_v0  ;;  %v1401_v1 = vmul.f32 %v11061_v43, %v12074_v40 }
 0x5ea   :  { %9866 = vmatpush3.bf16.msra.mxu1 %v1753_v4  ;;  %v1417_v9 = vpack.c.bf16 %v1400_v6, %v1399_v61 }
 0x5eb   :  { %v11063_v29 = vpop.eup %11062  ;;  %9877 = vmatprep.subr.bf16.mxu1 %v11523_v0 }
 0x5ec   :  { %9862 = vmatmul.mubr.msk.bf16.vlgmr.msra.gmra.mxu0 %vm1146_vm3, %v1417_v9  ;;  %v1402_v17 = vmul.f32 %v11063_v29, %v12084_v24  ;;  %v11065_v8 = vpop.eup %11064  ;;  %v1847_v7 = vpop.permute.xlu1 %1846 }
 0x5ed   :  { %9872 = vmatpush3.bf16.msra.mxu0 %v1800_v47  ;;  %9873 = vmatprep.mubr.msk.bf16.mxu0 %vm11524_vm0, %v11523_v0  ;;  %v1403_v32 = vmul.f32 %v11065_v8, %v12082_v26  ;;  %v69_v8 = vld [vmem:[%s14789_s3 + $0x30] sm:$0xff] }
 0x5ee   :  { %v1418_v55 = vpack.c.bf16 %v1402_v17, %v1401_v1  ;;  %9883 = vmatprep.subr.bf16.mxu0 %v11523_v0 }
 0x5ef   :  { %v11067_v5 = vpop.eup %11066 }
 0x5f0   :  { %9868 = vmatmul.mubr.msk.bf16.vlgmr.msra.gmra.mxu1 %vm1146_vm3, %v1418_v55  ;;  %v1404_v10 = vmul.f32 %v11067_v5, %v12092_v58  ;;  %v11069_v13 = vpop.eup %11068  ;;  %v70_v55 = vld [vmem:[%s14789_s3 + $0x38] sm:$0xff] }
 0x5f1   :  { %9878 = vmatpush3.bf16.msra.mxu1 %v1847_v7  ;;  %9879 = vmatprep.mubr.msk.bf16.mxu1 %vm11524_vm0, %v11523_v0  ;;  %v1405_v38 = vmul.f32 %v11069_v13, %v12090_v56  ;;  %v2082_v5 = vpack.c.bf16 %v70_v55, %v69_v8 }
 0x5f2   :  { %v1419_v40 = vpack.c.bf16 %v1404_v10, %v1403_v32  ;;  %9889 = vmatprep.subr.bf16.mxu1 %v11523_v0 }
 0x5f3   :  { %v11071_v24 = vpop.eup %11070 }
 0x5f4   :  { %9874 = vmatmul.mubr.msk.bf16.vlgmr.msra.gmra.mxu0 %vm1146_vm3, %v1419_v40  ;;  %v1406_v59 = vmul.f32 %v11071_v24, %v12100_v50  ;;  %v11073_v50 = vpop.eup %11072 }
 0x5f5   :  { %9885 = vmatprep.mubr.msk.bf16.mxu0 %vm11524_vm0, %v11523_v0  ;;  %v1407_v36 = vmul.f32 %v11073_v50, %v12098_v2 }
 0x5f6   :  { %v1420_v26 = vpack.c.bf16 %v1406_v59, %v1405_v38  ;;  %v67_v59 = vld [vmem:[%s14789_s3 + $0x20] sm:$0xff] }
 0x5f8   :  { %9880 = vmatmul.mubr.msk.bf16.vlgmr.msra.gmra.mxu1 %vm1146_vm3, %v1420_v26  ;;  %v68_v26 = vld [vmem:[%s14789_s3 + $0x28] sm:$0xff] }
 0x5f9   :  { %9891 = vmatprep.mubr.msk.bf16.mxu1 %vm11524_vm0, %v11523_v0 }
 0x61a   :  { %v1356_v58 = vpop.xlane.xlu0 %1355 }
 0x61b   :  { %11074 = vrcp.f32 %v1356_v58  ;;  %v2081_v58 = vpack.c.bf16 %v68_v26, %v67_v59 }
 0x61d   :  { %v1359_v18 = vpop.xlane.xlu1 %1358 }
 0x61e   :  { %11076 = vrcp.f32 %v1359_v18  ;;  %v1362_v35 = vpop.xlane.xlu0 %1361 }
 0x61f   :  { %11078 = vrcp.f32 %v1362_v35 }
 0x621   :  { %v1894_v30 = vpop.permute.xlu1 %1893 }
 0x622   :  { %v1941_v56 = vpop.permute.xlu0 %1940  ;;  %9884 = vmatpush3.bf16.msra.mxu0 %v1894_v30 }
 0x623   :  { %9890 = vmatpush3.bf16.msra.mxu1 %v1941_v56  ;;  %9895 = vmatprep.subr.bf16.mxu0 %v11523_v0 }
 0x624   :  { %9911 = vmatprep.subr.bf16.mxu1 %v11523_v0 }
 0x628   :  { %v11075_v27 = vpop.eup %11074 }
 0x629   :  { %v1408_v31 = vmul.f32 %v11075_v27, %v12131_v3 }
 0x62b   :  { %v11077_v28 = vpop.eup %11076  ;;  %v1421_v34 = vpack.c.bf16 %v1408_v31, %v1407_v36 }
 0x62c   :  { %v11079_v19 = vpop.eup %11078  ;;  %v1409_v57 = vmul.f32 %v11077_v28, %v12133_v46 }
 0x62d   :  { %9886 = vmatmul.mubr.msk.bf16.vlgmr.msra.gmra.mxu0 %vm1146_vm3, %v1421_v34  ;;  %v1410_v60 = vmul.f32 %v11079_v19, %v12138_v42 }
 0x62e   :  { %9899 = vmatprep.mubr.msk.bf16.mxu0 %vm11524_vm0, %v11523_v0  ;;  %9896 = vmatpush3.bf16.msra.mxu0 %v2082_v5 }
 0x62f   :  { %v1422_v16 = vpack.c.bf16 %v1410_v60, %v1409_v57  ;;  %9897 = vmatprep.subr.bf16.mxu0 %v11523_v0 }
 0x631   :  { %9892 = vmatmul.mubr.msk.bf16.vlgmr.msra.gmra.mxu1 %vm1146_vm3, %v1422_v16 }
 0x632   :  { %9915 = vmatprep.mubr.msk.bf16.mxu1 %vm11524_vm0, %v11523_v0  ;;  %9898 = vmatpush3.bf16.msra.mxu0 %v2081_v58 }
 0x633   :  { %9927 = vmatprep.subr.bf16.mxu0 %v11523_v0 }
 0x640   :  { %v12206_v2 = vpop.f32.mrf.mxu0 }
 0x642   :  { %v9827_v3 = vpop.f32.mrf.mxu0 }
 0x644   :  { %v12208_v63 = vpop.f32.mrf.mxu0 }
 0x646   :  { %v9828_v45 = vpop.f32.mrf.mxu0 }
 0x648   :  { %v12210_v46 = vpop.f32.mrf.mxu1 }
 0x64a   :  { %v9833_v20 = vpop.f32.mrf.mxu1 }
 0x64c   :  { %v12212_v21 = vpop.f32.mrf.mxu1 }
 0x64e   :  { %v9834_v42 = vpop.f32.mrf.mxu1 }
 0x650   :  { %v12214_v23 = vpop.f32.mrf.mxu0 }
 0x652   :  { %v9839_v12 = vpop.f32.mrf.mxu0 }
 0x654   :  { %v12216_v37 = vpop.f32.mrf.mxu0 }
 0x656   :  { %v9840_v25 = vpop.f32.mrf.mxu0 }
 0x697   :  { %v1604_v33 = vpop.f32.mrf.mxu1 }
 0x699   :  { %v9845_v11 = vpop.f32.mrf.mxu1 }
 0x69b   :  { %v1607_v44 = vpop.f32.mrf.mxu1 }
 0x69c   :  { %v10657_v51 = vpack.i.bf16 %v1607_v44, %v1604_v33 }
 0x69d   :  { %v9846_v61 = vpop.f32.mrf.mxu1 }
 0x69e   :  { %10658 = vrot.lane.b32.xlu1 %v10657_v51, %s11522_s28 }
 0x69f   :  { %v1651_v6 = vpop.f32.mrf.mxu0 }
 0x6a1   :  { %v9851_v43 = vpop.f32.mrf.mxu0 }
 0x6a3   :  { %v1654_v4 = vpop.f32.mrf.mxu0 }
 0x6a4   :  { %v10672_v30 = vpack.i.bf16 %v1654_v4, %v1651_v6 }
 0x6a5   :  { %v9852_v47 = vpop.f32.mrf.mxu0 }
 0x6a8   :  { %v1698_v9 = vpop.f32.mrf.mxu1 }
 0x6aa   :  { %v9857_v29 = vpop.f32.mrf.mxu1 }
 0x6ac   :  { %v1701_v1 = vpop.f32.mrf.mxu1  ;;  %v1745_v17 = vpop.f32.mrf.mxu0 }
 0x6ad   :  { %v10687_v16 = vpack.i.bf16 %v1701_v1, %v1698_v9 }
 0x6ae   :  { %v9858_v7 = vpop.f32.mrf.mxu1  ;;  %v9863_v32 = vpop.f32.mrf.mxu0 }
 0x6b0   :  { %v1748_v10 = vpop.f32.mrf.mxu0  ;;  %v1792_v13 = vpop.f32.mrf.mxu1 }
 0x6b1   :  { %v10662_v40 = vpack.i.bf16 %v1748_v10, %v1745_v17 }
 0x6b2   :  { %v9864_v24 = vpop.f32.mrf.mxu0  ;;  %v9869_v38 = vpop.f32.mrf.mxu1 }
 0x6b3   :  { %10663 = vrot.lane.b32.xlu0 %v10662_v40, %s11531_s19 }
 0x6b4   :  { %v1795_v18 = vpop.f32.mrf.mxu1  ;;  %v1839_v35 = vpop.f32.mrf.mxu0 }
 0x6b5   :  { %v10677_v60 = vpack.i.bf16 %v1795_v18, %v1792_v13 }
 0x6b6   :  { %v9870_v56 = vpop.f32.mrf.mxu1  ;;  %v9875_v50 = vpop.f32.mrf.mxu0 }
 0x6b7   :  { %10673 = vrot.lane.b32.xlu0 %v10672_v30, %s11522_s28 }
 0x6b8   :  { %v1842_v27 = vpop.f32.mrf.mxu0  ;;  %v1886_v36 = vpop.f32.mrf.mxu1 }
 0x6b9   :  { %v10692_v44 = vpack.i.bf16 %v1842_v27, %v1839_v35 }
 0x6ba   :  { %v9876_v31 = vpop.f32.mrf.mxu0  ;;  %v9881_v28 = vpop.f32.mrf.mxu1 }
 0x6bc   :  { %v1889_v34 = vpop.f32.mrf.mxu1 }
 0x6bd   :  { %v10667_v19 = vpack.i.bf16 %v1889_v34, %v1886_v36 }
 0x6be   :  { %v9882_v57 = vpop.f32.mrf.mxu1 }
 0x6bf   :  { %10668 = vrot.lane.b32.xlu1 %v10667_v19, %s11532_s20 }
 0x6c3   :  { %10678 = vrot.lane.b32.xlu1 %v10677_v60, %s11531_s19 }
 0x6c7   :  { %10688 = vrot.lane.b32.xlu1 %v10687_v16, %s11522_s28 }
 0x6ed   :  { %v1933_v3 = vpop.f32.mrf.mxu0 }
 0x6ef   :  { %v9887_v45 = vpop.f32.mrf.mxu0 }
 0x6f1   :  { %v1936_v20 = vpop.f32.mrf.mxu0  ;;  %v1980_v42 = vpop.f32.mrf.mxu1 }
 0x6f2   :  { %v10682_v12 = vpack.i.bf16 %v1936_v20, %v1933_v3 }
 0x6f3   :  { %v9888_v25 = vpop.f32.mrf.mxu0  ;;  %v9893_v33 = vpop.f32.mrf.mxu1 }
 0x6f4   :  { %10683 = vrot.lane.b32.xlu0 %v10682_v12, %s11532_s20 }
 0x6f5   :  { %v1983_v11 = vpop.f32.mrf.mxu1 }
 0x6f6   :  { %v10697_v51 = vpack.i.bf16 %v1983_v11, %v1980_v42 }
 0x6f7   :  { %v9894_v61 = vpop.f32.mrf.mxu1 }
 0x6f8   :  { %10693 = vrot.lane.b32.xlu0 %v10692_v44, %s11531_s19  ;;  %10698 = vrot.lane.b32.xlu1 %v10697_v51, %s11532_s20 }
 0x710   :  { %v10659_v6 = vpop.permute.xlu1 %10658 }
 0x711   :  { %v10661_v4 = vunpack.i.h.bf16 %v10659_v6  ;;  %v10660_v47 = vunpack.i.l.bf16 %v10659_v6 }
 0x713   :  { %v2060_v17 = vsel %vm500_vm2, %v12208_v63, %v10661_v4  ;;  %v2059_v8 = vsel %vm500_vm2, %v12206_v2, %v10660_v47 }
 0x725   :  { %v10664_v43 = vpop.permute.xlu0 %10663 }
 0x726   :  { %v10666_v9 = vunpack.i.h.bf16 %v10664_v43  ;;  %v10665_v29 = vunpack.i.l.bf16 %v10664_v43 }
 0x728   :  { %v2066_v7 = vsel %vm1146_vm3, %v2060_v17, %v10666_v9  ;;  %v2065_v32 = vsel %vm1146_vm3, %v2059_v8, %v10665_v29 }
 0x729   :  { %v10674_v24 = vpop.permute.xlu0 %10673 }
 0x72a   :  { %v10676_v38 = vunpack.i.h.bf16 %v10674_v24  ;;  %v10675_v2 = vunpack.i.l.bf16 %v10674_v24 }
 0x72c   :  { %v2062_v35 = vsel %vm500_vm2, %v12212_v21, %v10676_v38  ;;  %v2061_v30 = vsel %vm500_vm2, %v12210_v46, %v10675_v2 }
 0x731   :  { %v10669_v1 = vpop.permute.xlu1 %10668 }
 0x732   :  { %v10671_v55 = vunpack.i.h.bf16 %v10669_v1  ;;  %v10670_v5 = vunpack.i.l.bf16 %v10669_v1 }
 0x734   :  { %v2072_v10 = vsel %vm2071_vm4, %v2065_v32, %v10670_v5  ;;  %v2073_v13 = vsel %vm2071_vm4, %v2066_v7, %v10671_v55 }
 0x735   :  { %v2078_v40 = vpack.c.bf16 %v2073_v13, %v2072_v10  ;;  %v10679_v63 = vpop.permute.xlu1 %10678 }
 0x736   :  { %v10681_v59 = vunpack.i.h.bf16 %v10679_v63  ;;  %v10680_v26 = vunpack.i.l.bf16 %v10679_v63 }
 0x737   :  { %9900 = vmatmul.mubr.msk.bf16.vlgmr.msra.gmra.mxu0 %vm144_vm1, %v2078_v40 }
 0x738   :  { %9903 = vmatprep.mubr.msk.bf16.mxu0 %vm11524_vm0, %v11523_v0  ;;  %v2067_v27 = vsel %vm1146_vm3, %v2061_v30, %v10680_v26  ;;  %v2068_v36 = vsel %vm1146_vm3, %v2062_v35, %v10681_v59 }
 0x739   :  { %v10689_v58 = vpop.permute.xlu1 %10688 }
 0x73a   :  { %v10691_v31 = vunpack.i.h.bf16 %v10689_v58  ;;  %v10690_v28 = vunpack.i.l.bf16 %v10689_v58 }
 0x73c   :  { %v2064_v46 = vsel %vm500_vm2, %v12216_v37, %v10691_v31  ;;  %v2063_v42 = vsel %vm500_vm2, %v12214_v23, %v10690_v28  ;;  %v12275_v23 = vsub.s32 7, %v11600_v14  ;;  %v11490_v37 = vld [vmem:[%s14792_s6] sm:$0xff] }
 0x73e   :  { %v2158_v51 = vrot.slane %v11490_v37, %v12275_v23 }
 0x766   :  { %v10684_v18 = vpop.permute.xlu0 %10683 }
 0x767   :  { %v10686_v56 = vunpack.i.h.bf16 %v10684_v18  ;;  %v10685_v50 = vunpack.i.l.bf16 %v10684_v18 }
 0x769   :  { %v2074_v34 = vsel %vm2071_vm4, %v2067_v27, %v10685_v50  ;;  %v2075_v19 = vsel %vm2071_vm4, %v2068_v36, %v10686_v56 }
 0x76a   :  { %v10699_v57 = vpop.permute.xlu1 %10698  ;;  %v10694_v60 = vpop.permute.xlu0 %10693  ;;  %v2079_v16 = vpack.c.bf16 %v2075_v19, %v2074_v34  ;;  %v89_v19 = vld [vmem:[%s14790_s4 + $0x10] sm:$0xff] }
 0x76b   :  { %v10701_v3 = vunpack.i.h.bf16 %v10699_v57  ;;  %v10700_v21 = vunpack.i.l.bf16 %v10699_v57  ;;  %v10696_v45 = vunpack.i.h.bf16 %v10694_v60  ;;  %v10695_v20 = vunpack.i.l.bf16 %v10694_v60  ;;  %v90_v57 = vld [vmem:[%s14790_s4 + $0x18] sm:$0xff] }
 0x76c   :  { %9904 = vmatmul.mubr.msk.bf16.gmra.mxu0 %vm144_vm1, %v2079_v16  ;;  %v2267_v60 = vpack.c.bf16 %v90_v57, %v89_v19  ;;  %v87_v16 = vld [vmem:[%s14790_s4] sm:$0xff] }
 0x76d   :  { %v2070_v12 = vsel %vm1146_vm3, %v2064_v46, %v10696_v45  ;;  %v2069_v25 = vsel %vm1146_vm3, %v2063_v42, %v10695_v20  ;;  %9907 = vmatprep.mubr.msk.bf16.mxu0 %vm11524_vm0, %v11523_v0 }
 0x76e   :  { %v2076_v33 = vsel %vm2071_vm4, %v2069_v25, %v10700_v21  ;;  %v2077_v11 = vsel %vm2071_vm4, %v2070_v12, %v10701_v3  ;;  %v88_v3 = vld [vmem:[%s14790_s4 + $0x8] sm:$0xff]  ;;  %9912 = vmatpush3.bf16.msra.mxu1 %v2267_v60 }
 0x76f   :  { %v2080_v44 = vpack.c.bf16 %v2077_v11, %v2076_v33  ;;  %v2266_v21 = vpack.c.bf16 %v88_v3, %v87_v16  ;;  %9913 = vmatprep.subr.bf16.mxu1 %v11523_v0 }
 0x772   :  { %9914 = vmatpush3.bf16.msra.mxu1 %v2266_v21 }
 0x773   :  { %9947 = vmatprep.subr.bf16.mxu1 %v11523_v0 }
 0x774   :  { %9908 = vmatmul.mubr.msk.bf16.gmra.mxu0 %vm144_vm1, %v2080_v44 }
 0x775   :  { %9935 = vmatprep.mubr.msk.bf16.mxu0 %vm11524_vm0, %v11523_v0 }
 0x7f7   :  { %v2126_v61 = vpop.f32.mrf.mxu0 }
 0x7f8   :  { %v2149_v6 = vadd.f32 %v2126_v61, %v11619_v41 }
 0x7f9   :  { %v9901_v43 = vpop.f32.mrf.mxu0 }
 0x7fa   :  { %v12282_v4 = vadd.f32 %v2158_v51, %v2149_v6 }
 0x7fb   :  { %v2129_v47 = vpop.f32.mrf.mxu0 }
 0x7fc   :  { %v2150_v9 = vadd.f32 %v2129_v47, %v11627_v49  ;;  %v2165_v29 = vsel %vm144_vm1, %v12282_v4, 0.0 }
 0x7fd   :  { %2166 = vadd.xlane.f32.xlu0 %v2165_v29  ;;  %v9902_v1 = vpop.f32.mrf.mxu0 }
 0x7fe   :  { %v12287_v17 = vadd.f32 %v2158_v51, %v2150_v9 }
 0x800   :  { %v2168_v8 = vsel %vm144_vm1, %v12287_v17, 0.0 }
 0x801   :  { %2169 = vadd.xlane.f32.xlu1 %v2168_v8 }
 0x82c   :  { %v2134_v55 = vpop.f32.mrf.mxu0 }
 0x82d   :  { %v2151_v41 = vadd.f32 %v2134_v55, %v11617_v39 }
 0x82e   :  { %v9905_v5 = vpop.f32.mrf.mxu0 }
 0x82f   :  { %v12292_v7 = vadd.f32 %v2158_v51, %v2151_v41  ;;  %v109_v41 = vld [vmem:[%s14791_s5 + $0x30] sm:$0xff]  ;;  %v110_v5 = vld [vmem:[%s14791_s5 + $0x38] sm:$0xff] }
 0x830   :  { %v2137_v32 = vpop.f32.mrf.mxu0 }
 0x831   :  { %v2152_v49 = vadd.f32 %v2137_v32, %v11625_v48  ;;  %v2171_v10 = vsel %vm144_vm1, %v12292_v7, 0.0  ;;  %v2350_v32 = vpack.c.bf16 %v110_v5, %v109_v41 }
 0x832   :  { %2172 = vadd.xlane.f32.xlu0 %v2171_v10  ;;  %v9906_v13 = vpop.f32.mrf.mxu0 }
 0x833   :  { %v12297_v40 = vadd.f32 %v2158_v51, %v2152_v49  ;;  %9928 = vmatpush3.bf16.msra.mxu0 %v2350_v32 }
 0x834   :  { %v2142_v63 = vpop.f32.mrf.mxu0  ;;  %9929 = vmatprep.subr.bf16.mxu0 %v11523_v0 }
 0x835   :  { %v2153_v24 = vadd.f32 %v2142_v63, %v11635_v53  ;;  %v2174_v38 = vsel %vm144_vm1, %v12297_v40, 0.0 }
 0x836   :  { %2175 = vadd.xlane.f32.xlu0 %v2174_v38  ;;  %v9909_v39 = vpop.f32.mrf.mxu0 }
 0x837   :  { %v12302_v2 = vadd.f32 %v2158_v51, %v2153_v24  ;;  %v12363_v39 = vld [vmem:[%s14792_s6 + $0x8] sm:$0xff] }
 0x838   :  { %v2145_v59 = vpop.f32.mrf.mxu0 }
 0x839   :  { %v2154_v48 = vadd.f32 %v2145_v59, %v11633_v52  ;;  %v2177_v26 = vsel %vm144_vm1, %v12302_v2, 0.0 }
 0x83a   :  { %2178 = vadd.xlane.f32.xlu0 %v2177_v26  ;;  %v9910_v58 = vpop.f32.mrf.mxu0  ;;  %v2246_v26 = vrot.slane %v12363_v39, %v11610_v22 }
 0x83b   :  { %v12307_v18 = vadd.f32 %v2158_v51, %v2154_v48  ;;  %v12368_v58 = vsub.s32 1, %v11600_v14 }
 0x83d   :  { %v2180_v53 = vsel %vm144_vm1, %v12307_v18, 0.0 }
 0x83e   :  { %2181 = vadd.xlane.f32.xlu1 %v2180_v53 }
 0x886   :  { %v2167_v35 = vpop.xlane.xlu0 %2166 }
 0x887   :  { %v2183_v30 = vmul.f32 0.03125, %v2167_v35 }
 0x889   :  { %v2189_v56 = vsub.f32 %v12282_v4, %v2183_v30 }
 0x88a   :  { %v2170_v50 = vpop.xlane.xlu1 %2169 }
 0x88b   :  { %v2184_v27 = vmul.f32 0.03125, %v2170_v50  ;;  %v2195_v36 = vmul.f32 %v2189_v56, %v2189_v56  ;;  %v2256_v50 = vrot.slane %v12363_v39, %v12368_v58 }
 0x88d   :  { %v2190_v52 = vsub.f32 %v12287_v17, %v2184_v27  ;;  %v2201_v31 = vsel %vm144_vm1, %v2195_v36, 0.0 }
 0x88e   :  { %2202 = vadd.xlane.f32.xlu0 %v2201_v31 }
 0x88f   :  { %v2196_v28 = vmul.f32 %v2190_v52, %v2190_v52 }
 0x891   :  { %v2204_v34 = vsel %vm144_vm1, %v2196_v28, 0.0 }
 0x892   :  { %2205 = vadd.xlane.f32.xlu1 %v2204_v34 }
 0x8bb   :  { %v2173_v45 = vpop.xlane.xlu0 %2172 }
 0x8bc   :  { %v2185_v20 = vmul.f32 0.03125, %v2173_v45 }
 0x8be   :  { %v12330_v46 = vsub.f32 %v12292_v7, %v2185_v20 }
 0x8bf   :  { %v2176_v42 = vpop.xlane.xlu0 %2175 }
 0x8c0   :  { %v2186_v12 = vmul.f32 0.03125, %v2176_v42  ;;  %v2197_v25 = vmul.f32 %v12330_v46, %v12330_v46 }
 0x8c2   :  { %v12335_v33 = vsub.f32 %v12297_v40, %v2186_v12  ;;  %v2207_v11 = vsel %vm144_vm1, %v2197_v25, 0.0 }
 0x8c3   :  { %2208 = vadd.xlane.f32.xlu0 %v2207_v11  ;;  %v2179_v44 = vpop.xlane.xlu0 %2178 }
 0x8c4   :  { %v2187_v37 = vmul.f32 0.03125, %v2179_v44  ;;  %v2198_v51 = vmul.f32 %v12335_v33, %v12335_v33 }
 0x8c6   :  { %v12341_v61 = vsub.f32 %v12302_v2, %v2187_v37  ;;  %v2210_v6 = vsel %vm144_vm1, %v2198_v51, 0.0 }
 0x8c7   :  { %2211 = vadd.xlane.f32.xlu1 %v2210_v6  ;;  %v2182_v43 = vpop.xlane.xlu1 %2181 }
 0x8c8   :  { %v2188_v47 = vmul.f32 0.03125, %v2182_v43  ;;  %v2199_v9 = vmul.f32 %v12341_v61, %v12341_v61 }
 0x8ca   :  { %v12347_v29 = vsub.f32 %v12307_v18, %v2188_v47  ;;  %v2213_v1 = vsel %vm144_vm1, %v2199_v9, 0.0 }
 0x8cb   :  { %2214 = vadd.xlane.f32.xlu0 %v2213_v1 }
 0x8cc   :  { %v2200_v8 = vmul.f32 %v12347_v29, %v12347_v29 }
 0x8ce   :  { %v2216_v55 = vsel %vm144_vm1, %v2200_v8, 0.0 }
 0x8cf   :  { %2217 = vadd.xlane.f32.xlu1 %v2216_v55 }
 0x917   :  { %v2203_v49 = vpop.xlane.xlu0 %2202 }
 0x918   :  { %v2219_v10 = vmul.f32 0.03125, %v2203_v49  ;;  %v108_v49 = vld [vmem:[%s14791_s5 + $0x28] sm:$0xff] }
 0x91a   :  { %v2225_v13 = vadd.f32 1e-05, %v2219_v10  ;;  %v105_v10 = vld [vmem:[%s14791_s5 + $0x10] sm:$0xff] }
 0x91b   :  { %v2206_v63 = vpop.xlane.xlu1 %2205 }
 0x91c   :  { %11080 = vrsqrt.f32 %v2225_v13  ;;  %v2220_v24 = vmul.f32 0.03125, %v2206_v63  ;;  %v106_v13 = vld [vmem:[%s14791_s5 + $0x18] sm:$0xff] }
 0x91d   :  { %v2348_v63 = vpack.c.bf16 %v106_v13, %v105_v10 }
 0x91e   :  { %v2226_v38 = vadd.f32 1e-05, %v2220_v24  ;;  %v103_v24 = vld [vmem:[%s14791_s5] sm:$0xff] }
 0x920   :  { %11082 = vrsqrt.f32 %v2226_v38  ;;  %v104_v38 = vld [vmem:[%s14791_s5 + $0x8] sm:$0xff] }
 0x929   :  { %v11081_v59 = vpop.eup %11080 }
 0x92a   :  { %v2237_v48 = vmul.f32 %v11081_v59, %v2189_v56  ;;  %v2347_v59 = vpack.c.bf16 %v104_v38, %v103_v24 }
 0x92c   :  { %v2247_v30 = vmul.f32 %v2246_v26, %v2237_v48  ;;  %v12407_v48 = vsub.s32 2, %v11600_v14 }
 0x92d   :  { %v11083_v53 = vpop.eup %11082 }
 0x92e   :  { %v2238_v35 = vmul.f32 %v11083_v53, %v2190_v52  ;;  %v2257_v36 = vadd.f32 %v2256_v50, %v2247_v30 }
 0x930   :  { %v2248_v27 = vmul.f32 %v2246_v26, %v2238_v35 }
 0x932   :  { %v2258_v31 = vadd.f32 %v2256_v50, %v2248_v27 }
 0x934   :  { %v2263_v28 = vpack.c.bf16 %v2258_v31, %v2257_v36 }
 0x936   :  { %9916 = vmatmul.mubr.msk.bf16.vlgmr.msra.gmra.mxu1 %vm144_vm1, %v2263_v28 }
 0x937   :  { %9919 = vmatprep.mubr.msk.bf16.mxu1 %vm11524_vm0, %v11523_v0 }
 0x94c   :  { %v2209_v56 = vpop.xlane.xlu0 %2208 }
 0x94d   :  { %v2221_v34 = vmul.f32 0.03125, %v2209_v56 }
 0x94f   :  { %v2227_v19 = vadd.f32 1e-05, %v2221_v34 }
 0x950   :  { %v2212_v57 = vpop.xlane.xlu1 %2211 }
 0x951   :  { %11084 = vrsqrt.f32 %v2227_v19  ;;  %v2222_v60 = vmul.f32 0.03125, %v2212_v57 }
 0x953   :  { %v2228_v52 = vadd.f32 1e-05, %v2222_v60 }
 0x954   :  { %v2215_v16 = vpop.xlane.xlu0 %2214 }
 0x955   :  { %11086 = vrsqrt.f32 %v2228_v52  ;;  %v2223_v3 = vmul.f32 0.03125, %v2215_v16 }
 0x957   :  { %v2229_v21 = vadd.f32 1e-05, %v2223_v3 }
 0x958   :  { %v2218_v45 = vpop.xlane.xlu1 %2217 }
 0x959   :  { %11088 = vrsqrt.f32 %v2229_v21  ;;  %v2224_v20 = vmul.f32 0.03125, %v2218_v45 }
 0x95b   :  { %v2230_v42 = vadd.f32 1e-05, %v2224_v20 }
 0x95d   :  { %11090 = vrsqrt.f32 %v2230_v42 }
 0x95e   :  { %v11085_v12 = vpop.eup %11084 }
 0x95f   :  { %v2239_v25 = vmul.f32 %v11085_v12, %v12330_v46 }
 0x961   :  { %v2249_v37 = vmul.f32 %v2246_v26, %v2239_v25 }
 0x962   :  { %v11087_v11 = vpop.eup %11086 }
 0x963   :  { %v2240_v44 = vmul.f32 %v11087_v11, %v12335_v33  ;;  %v2259_v43 = vadd.f32 %v2256_v50, %v2249_v37 }
 0x965   :  { %v2250_v51 = vmul.f32 %v2246_v26, %v2240_v44 }
 0x966   :  { %v11089_v6 = vpop.eup %11088 }
 0x967   :  { %v2260_v47 = vadd.f32 %v2256_v50, %v2250_v51  ;;  %v2241_v9 = vmul.f32 %v11089_v6, %v12341_v61  ;;  %v107_v61 = vld [vmem:[%s14791_s5 + $0x20] sm:$0xff] }
 0x969   :  { %v2264_v1 = vpack.c.bf16 %v2260_v47, %v2259_v43  ;;  %v2251_v41 = vmul.f32 %v2246_v26, %v2241_v9  ;;  %v12421_v43 = vsub.s32 3, %v11600_v14 }
 0x96a   :  { %v11091_v8 = vpop.eup %11090 }
 0x96b   :  { %9920 = vmatmul.mubr.msk.bf16.gmra.mxu1 %vm144_vm1, %v2264_v1  ;;  %v2242_v55 = vmul.f32 %v11091_v8, %v12347_v29  ;;  %v2261_v5 = vadd.f32 %v2256_v50, %v2251_v41  ;;  %v2349_v29 = vpack.c.bf16 %v108_v49, %v107_v61  ;;  %v2427_v47 = vrot.slane %v12363_v39, %v12421_v43 }
 0x96c   :  { %9923 = vmatprep.mubr.msk.bf16.mxu1 %vm11524_vm0, %v11523_v0 }
 0x96d   :  { %v2252_v46 = vmul.f32 %v2246_v26, %v2242_v55  ;;  %9930 = vmatpush3.bf16.msra.mxu0 %v2349_v29  ;;  %v2271_v26 = vrot.slane %v12363_v39, %v12407_v48 }
 0x96e   :  { %9931 = vmatprep.subr.bf16.mxu0 %v11523_v0 }
 0x96f   :  { %v2262_v33 = vadd.f32 %v2256_v50, %v2252_v46 }
 0x971   :  { %v2265_v32 = vpack.c.bf16 %v2262_v33, %v2261_v5  ;;  %9932 = vmatpush3.bf16.msra.mxu0 %v2348_v63 }
 0x972   :  { %9933 = vmatprep.subr.bf16.mxu0 %v11523_v0 }
 0x973   :  { %9924 = vmatmul.mubr.msk.bf16.gmra.mxu1 %vm144_vm1, %v2265_v32 }
 0x974   :  { %9951 = vmatprep.mubr.msk.bf16.mxu1 %vm11524_vm0, %v11523_v0 }
 0x975   :  { %9934 = vmatpush3.bf16.msra.mxu0 %v2347_v59 }
 0x976   :  { %9963 = vmatprep.subr.bf16.mxu0 %v11523_v0 }
 0x9f6   :  { %v2315_v53 = vpop.f32.mrf.mxu1 }
 0x9f7   :  { %v2316_v30 = vadd.f32 %v2315_v53, %v2271_v26 }
 0x9f8   :  { %v9917_v35 = vpop.f32.mrf.mxu1 }
 0x9f9   :  { %v2338_v31 = vmax.f32 %v2316_v30, 0.0 }
 0x9fa   :  { %v2318_v50 = vpop.f32.mrf.mxu1 }
 0x9fb   :  { %v2319_v27 = vadd.f32 %v2318_v50, %v2271_v26 }
 0x9fc   :  { %v9918_v36 = vpop.f32.mrf.mxu1 }
 0x9fd   :  { %v2339_v28 = vmax.f32 %v2319_v27, 0.0 }
 0x9ff   :  { %v2344_v56 = vpack.c.bf16 %v2339_v28, %v2338_v31 }
 0xa01   :  { %9936 = vmatmul.mubr.msk.bf16.vlgmr.msra.gmra.mxu0 %vm2351_vm5, %v2344_v56 }
 0xa02   :  { %9939 = vmatprep.mubr.msk.bf16.mxu0 %vm11524_vm0, %v11523_v0 }
 0xa2b   :  { %v2323_v34 = vpop.f32.mrf.mxu1 }
 0xa2c   :  { %v2324_v57 = vadd.f32 %v2323_v34, %v2271_v26 }
 0xa2d   :  { %v9921_v19 = vpop.f32.mrf.mxu1 }
 0xa2e   :  { %v2340_v3 = vmax.f32 %v2324_v57, 0.0 }
 0xa2f   :  { %v2326_v60 = vpop.f32.mrf.mxu1 }
 0xa30   :  { %v2327_v52 = vadd.f32 %v2326_v60, %v2271_v26 }
 0xa31   :  { %v9922_v16 = vpop.f32.mrf.mxu1 }
 0xa32   :  { %v2341_v21 = vmax.f32 %v2327_v52, 0.0  ;;  %v53_v16 = vld [vmem:[%s14788_s2 + $0x30] sm:$0xff] }
 0xa33   :  { %v2331_v45 = vpop.f32.mrf.mxu1 }
 0xa34   :  { %v2345_v20 = vpack.c.bf16 %v2341_v21, %v2340_v3  ;;  %v2332_v12 = vadd.f32 %v2331_v45, %v2271_v26  ;;  %v54_v3 = vld [vmem:[%s14788_s2 + $0x38] sm:$0xff]  ;;  %v51_v45 = vld [vmem:[%s14788_s2 + $0x20] sm:$0xff] }
 0xa35   :  { %v9925_v42 = vpop.f32.mrf.mxu1  ;;  %v2536_v21 = vpack.c.bf16 %v54_v3, %v53_v16 }
 0xa36   :  { %9940 = vmatmul.mubr.msk.bf16.gmra.mxu0 %vm2351_vm5, %v2345_v20  ;;  %v2342_v37 = vmax.f32 %v2332_v12, 0.0  ;;  %v52_v20 = vld [vmem:[%s14788_s2 + $0x28] sm:$0xff] }
 0xa37   :  { %v2334_v25 = vpop.f32.mrf.mxu1  ;;  %9943 = vmatprep.mubr.msk.bf16.mxu0 %vm11524_vm0, %v11523_v0  ;;  %9948 = vmatpush3.bf16.msra.mxu1 %v2536_v21  ;;  %v2535_v42 = vpack.c.bf16 %v52_v20, %v51_v45 }
 0xa38   :  { %v2335_v11 = vadd.f32 %v2334_v25, %v2271_v26  ;;  %9949 = vmatprep.subr.bf16.mxu1 %v11523_v0 }
 0xa39   :  { %v9926_v44 = vpop.f32.mrf.mxu1 }
 0xa3a   :  { %v2343_v51 = vmax.f32 %v2335_v11, 0.0 }
 0xa3b   :  { %9950 = vmatpush3.bf16.msra.mxu1 %v2535_v42 }
 0xa3c   :  { %v2346_v6 = vpack.c.bf16 %v2343_v51, %v2342_v37  ;;  %9969 = vmatprep.subr.bf16.mxu1 %v11523_v0 }
 0xa3e   :  { %9944 = vmatmul.mubr.msk.bf16.gmra.mxu0 %vm2351_vm5, %v2346_v6 }
 0xa3f   :  { %9965 = vmatprep.mubr.msk.bf16.mxu0 %vm11524_vm0, %v11523_v0 }
 0xac1   :  { %v2395_v9 = vpop.f32.mrf.mxu0 }
 0xac2   :  { %v2418_v1 = vadd.f32 %v2395_v9, %v12282_v4 }
 0xac3   :  { %v9937_v8 = vpop.f32.mrf.mxu0 }
 0xac4   :  { %v12426_v55 = vadd.f32 %v2427_v47, %v2418_v1 }
 0xac5   :  { %v2398_v41 = vpop.f32.mrf.mxu0 }
 0xac6   :  { %v2419_v46 = vadd.f32 %v2398_v41, %v12287_v17  ;;  %v2434_v5 = vsel %vm144_vm1, %v12426_v55, 0.0 }
 0xac7   :  { %2435 = vadd.xlane.f32.xlu0 %v2434_v5  ;;  %v9938_v33 = vpop.f32.mrf.mxu0 }
 0xac8   :  { %v12431_v32 = vadd.f32 %v2427_v47, %v2419_v46 }
 0xaca   :  { %v2437_v14 = vsel %vm144_vm1, %v12431_v32, 0.0 }
 0xacb   :  { %2438 = vadd.xlane.f32.xlu1 %v2437_v14 }
 0xaf6   :  { %v2403_v61 = vpop.f32.mrf.mxu0 }
 0xaf7   :  { %v2420_v4 = vadd.f32 %v2403_v61, %v12292_v7 }
 0xaf8   :  { %v9941_v49 = vpop.f32.mrf.mxu0 }
 0xaf9   :  { %v12436_v29 = vadd.f32 %v2427_v47, %v2420_v4 }
 0xafa   :  { %v2406_v10 = vpop.f32.mrf.mxu0 }
 0xafb   :  { %v2421_v17 = vadd.f32 %v2406_v10, %v12297_v40  ;;  %v2440_v13 = vsel %vm144_vm1, %v12436_v29, 0.0 }
 0xafc   :  { %2441 = vadd.xlane.f32.xlu0 %v2440_v13  ;;  %v9942_v63 = vpop.f32.mrf.mxu0 }
 0xafd   :  { %v12441_v24 = vadd.f32 %v2427_v47, %v2421_v17 }
 0xafe   :  { %v2411_v38 = vpop.f32.mrf.mxu0 }
 0xaff   :  { %v2422_v59 = vadd.f32 %v2411_v38, %v12302_v2  ;;  %v2443_v26 = vsel %vm144_vm1, %v12441_v24, 0.0 }
 0xb00   :  { %2444 = vadd.xlane.f32.xlu1 %v2443_v26  ;;  %v9945_v7 = vpop.f32.mrf.mxu0 }
 0xb01   :  { %v12446_v53 = vadd.f32 %v2427_v47, %v2422_v59 }
 0xb02   :  { %v2414_v35 = vpop.f32.mrf.mxu0 }
 0xb03   :  { %v2423_v40 = vadd.f32 %v2414_v35, %v12307_v18  ;;  %v2446_v30 = vsel %vm144_vm1, %v12446_v53, 0.0  ;;  %v2515_v35 = vrot.slane %v12363_v39, %v11692_v54 }
 0xb04   :  { %2447 = vadd.xlane.f32.xlu0 %v2446_v30  ;;  %v9946_v50 = vpop.f32.mrf.mxu0 }
 0xb05   :  { %v12451_v27 = vadd.f32 %v2427_v47, %v2423_v40 }
 0xb07   :  { %v2449_v2 = vsel %vm144_vm1, %v12451_v27, 0.0 }
 0xb08   :  { %2450 = vadd.xlane.f32.xlu1 %v2449_v2 }
 0xb50   :  { %v2436_v36 = vpop.xlane.xlu0 %2435 }
 0xb51   :  { %v2452_v31 = vmul.f32 0.03125, %v2436_v36  ;;  %v2525_v36 = vrot.slane %v12363_v39, %v11698_v62 }
 0xb53   :  { %v2458_v28 = vsub.f32 %v12426_v55, %v2452_v31 }
 0xb54   :  { %v2439_v56 = vpop.xlane.xlu1 %2438 }
 0xb55   :  { %v2453_v34 = vmul.f32 0.03125, %v2439_v56  ;;  %v2464_v19 = vmul.f32 %v2458_v28, %v2458_v28 }
 0xb57   :  { %v2459_v18 = vsub.f32 %v12431_v32, %v2453_v34  ;;  %v2470_v57 = vsel %vm144_vm1, %v2464_v19, 0.0 }
 0xb58   :  { %2471 = vadd.xlane.f32.xlu0 %v2470_v57 }
 0xb59   :  { %v2465_v60 = vmul.f32 %v2459_v18, %v2459_v18 }
 0xb5b   :  { %v2473_v52 = vsel %vm144_vm1, %v2465_v60, 0.0 }
 0xb5c   :  { %2474 = vadd.xlane.f32.xlu1 %v2473_v52 }
 0xb85   :  { %v2442_v12 = vpop.xlane.xlu0 %2441 }
 0xb86   :  { %v2454_v25 = vmul.f32 0.03125, %v2442_v12 }
 0xb88   :  { %v2460_v11 = vsub.f32 %v12436_v29, %v2454_v25 }
 0xb89   :  { %v2445_v44 = vpop.xlane.xlu1 %2444 }
 0xb8a   :  { %v2455_v37 = vmul.f32 0.03125, %v2445_v44  ;;  %v2466_v51 = vmul.f32 %v2460_v11, %v2460_v11 }
 0xb8c   :  { %v2461_v6 = vsub.f32 %v12441_v24, %v2455_v37  ;;  %v2476_v47 = vsel %vm144_vm1, %v2466_v51, 0.0 }
 0xb8d   :  { %2477 = vadd.xlane.f32.xlu0 %v2476_v47  ;;  %v2448_v9 = vpop.xlane.xlu0 %2447 }
 0xb8e   :  { %v2456_v1 = vmul.f32 0.03125, %v2448_v9  ;;  %v2467_v8 = vmul.f32 %v2461_v6, %v2461_v6 }
 0xb90   :  { %v2462_v41 = vsub.f32 %v12446_v53, %v2456_v1  ;;  %v2479_v46 = vsel %vm144_vm1, %v2467_v8, 0.0 }
 0xb91   :  { %2480 = vadd.xlane.f32.xlu1 %v2479_v46  ;;  %v2451_v5 = vpop.xlane.xlu1 %2450 }
 0xb92   :  { %v2457_v33 = vmul.f32 0.03125, %v2451_v5  ;;  %v2468_v14 = vmul.f32 %v2462_v41, %v2462_v41 }
 0xb94   :  { %v2463_v61 = vsub.f32 %v12451_v27, %v2457_v33  ;;  %v2482_v4 = vsel %vm144_vm1, %v2468_v14, 0.0 }
 0xb95   :  { %2483 = vadd.xlane.f32.xlu0 %v2482_v4 }
 0xb96   :  { %v2469_v49 = vmul.f32 %v2463_v61, %v2463_v61 }
 0xb98   :  { %v2485_v10 = vsel %vm144_vm1, %v2469_v49, 0.0 }
 0xb99   :  { %2486 = vadd.xlane.f32.xlu1 %v2485_v10 }
 0xbe1   :  { %v2472_v17 = vpop.xlane.xlu0 %2471 }
 0xbe2   :  { %v2488_v13 = vmul.f32 0.03125, %v2472_v17 }
 0xbe4   :  { %v2494_v63 = vadd.f32 1e-05, %v2488_v13 }
 0xbe5   :  { %v2475_v38 = vpop.xlane.xlu1 %2474 }
 0xbe6   :  { %11092 = vrsqrt.f32 %v2494_v63  ;;  %v2489_v59 = vmul.f32 0.03125, %v2475_v38 }
 0xbe8   :  { %v2495_v26 = vadd.f32 1e-05, %v2489_v59 }
 0xbea   :  { %11094 = vrsqrt.f32 %v2495_v26 }
 0xbf3   :  { %v11093_v7 = vpop.eup %11092 }
 0xbf4   :  { %v2506_v40 = vmul.f32 %v11093_v7, %v2458_v28 }
 0xbf6   :  { %v2516_v50 = vmul.f32 %v2515_v35, %v2506_v40 }
 0xbf7   :  { %v11095_v30 = vpop.eup %11094 }
 0xbf8   :  { %v2507_v2 = vmul.f32 %v11095_v30, %v2459_v18  ;;  %v2526_v56 = vadd.f32 %v2525_v36, %v2516_v50 }
 0xbfa   :  { %v2517_v31 = vmul.f32 %v2515_v35, %v2507_v2 }
 0xbfc   :  { %v2527_v34 = vadd.f32 %v2525_v36, %v2517_v31 }
 0xbfe   :  { %v2532_v19 = vpack.c.bf16 %v2527_v34, %v2526_v56 }
 0xc00   :  { %9952 = vmatmul.mubr.msk.bf16.vlgmr.msra.gmra.mxu1 %vm144_vm1, %v2532_v19 }
 0xc01   :  { %9955 = vmatprep.mubr.msk.bf16.mxu1 %vm11524_vm0, %v11523_v0 }
 0xc16   :  { %v2478_v57 = vpop.xlane.xlu0 %2477 }
 0xc17   :  { %v2490_v60 = vmul.f32 0.03125, %v2478_v57 }
 0xc19   :  { %v2496_v52 = vadd.f32 1e-05, %v2490_v60 }
 0xc1a   :  { %v2481_v16 = vpop.xlane.xlu1 %2480 }
 0xc1b   :  { %11096 = vrsqrt.f32 %v2496_v52  ;;  %v2491_v28 = vmul.f32 0.03125, %v2481_v16 }
 0xc1d   :  { %v2497_v3 = vadd.f32 1e-05, %v2491_v28 }
 0xc1e   :  { %v2484_v18 = vpop.xlane.xlu0 %2483 }
 0xc1f   :  { %11098 = vrsqrt.f32 %v2497_v3  ;;  %v2492_v21 = vmul.f32 0.03125, %v2484_v18 }
 0xc21   :  { %v2498_v45 = vadd.f32 1e-05, %v2492_v21 }
 0xc22   :  { %v2487_v20 = vpop.xlane.xlu1 %2486 }
 0xc23   :  { %11100 = vrsqrt.f32 %v2498_v45  ;;  %v2493_v42 = vmul.f32 0.03125, %v2487_v20 }
 0xc25   :  { %v2499_v12 = vadd.f32 1e-05, %v2493_v42 }
 0xc27   :  { %11102 = vrsqrt.f32 %v2499_v12 }
 0xc28   :  { %v11097_v25 = vpop.eup %11096 }
 0xc29   :  { %v2508_v44 = vmul.f32 %v11097_v25, %v2460_v11 }
 0xc2b   :  { %v2518_v47 = vmul.f32 %v2515_v35, %v2508_v44 }
 0xc2c   :  { %v11099_v37 = vpop.eup %11098 }
 0xc2d   :  { %v2509_v51 = vmul.f32 %v11099_v37, %v2461_v6  ;;  %v2528_v8 = vadd.f32 %v2525_v36, %v2518_v47 }
 0xc2f   :  { %v2519_v9 = vmul.f32 %v2515_v35, %v2509_v51 }
 0xc30   :  { %v11101_v1 = vpop.eup %11100 }
 0xc31   :  { %v2529_v46 = vadd.f32 %v2525_v36, %v2519_v9  ;;  %v2510_v5 = vmul.f32 %v11101_v1, %v2462_v41  ;;  %v2540_v41 = vrot.slane %v12363_v39, %v11717_v15 }
 0xc33   :  { %v2533_v33 = vpack.c.bf16 %v2529_v46, %v2528_v8  ;;  %v2520_v49 = vmul.f32 %v2515_v35, %v2510_v5 }
 0xc34   :  { %v11103_v14 = vpop.eup %11102 }
 0xc35   :  { %9956 = vmatmul.mubr.msk.bf16.gmra.mxu1 %vm144_vm1, %v2533_v33  ;;  %v2511_v4 = vmul.f32 %v11103_v14, %v2463_v61  ;;  %v2530_v17 = vadd.f32 %v2525_v36, %v2520_v49 }
 0xc36   :  { %9959 = vmatprep.mubr.msk.bf16.mxu1 %vm11524_vm0, %v11523_v0 }
 0xc37   :  { %v2521_v10 = vmul.f32 %v2515_v35, %v2511_v4 }
 0xc39   :  { %v2531_v11 = vadd.f32 %v2525_v36, %v2521_v10 }
 0xc3b   :  { %v2534_v13 = vpack.c.bf16 %v2531_v11, %v2530_v17 }
 0xc3d   :  { %9960 = vmatmul.mubr.msk.bf16.gmra.mxu1 %vm144_vm1, %v2534_v13 }
 0xc3e   :  { %9971 = vmatprep.mubr.msk.bf16.mxu1 %vm11524_vm0, %v11523_v0 }
 0xcc0   :  { %v2584_v6 = vpop.f32.mrf.mxu1 }
 0xcc1   :  { %v2585_v61 = vadd.f32 %v2584_v6, %v2540_v41 }
 0xcc2   :  { %v9953_v63 = vpop.f32.mrf.mxu1 }
 0xcc4   :  { %v2587_v38 = vpop.f32.mrf.mxu1 }
 0xcc5   :  { %v2588_v59 = vadd.f32 %v2587_v38, %v2540_v41 }
 0xcc6   :  { %v9954_v26 = vpop.f32.mrf.mxu1 }
 0xcc7   :  { %v10702_v7 = vpack.i.bf16 %v2588_v59, %v2585_v61  ;;  %v12496_v40 = vpack.c.bf16 %v2588_v59, %v2585_v61 }
 0xcc9   :  { %10703 = vrot.lane.b32.xlu0 %v10702_v7, %s11526_s25 }
 0xcf5   :  { %v2592_v35 = vpop.f32.mrf.mxu1 }
 0xcf6   :  { %v2593_v2 = vadd.f32 %v2592_v35, %v2540_v41 }
 0xcf7   :  { %v9957_v30 = vpop.f32.mrf.mxu1 }
 0xcf9   :  { %v2595_v50 = vpop.f32.mrf.mxu1 }
 0xcfa   :  { %v2596_v36 = vadd.f32 %v2595_v50, %v2540_v41 }
 0xcfb   :  { %v9958_v31 = vpop.f32.mrf.mxu1 }
 0xcfc   :  { %v10722_v56 = vpack.i.bf16 %v2596_v36, %v2593_v2  ;;  %v2668_v28 = vpack.c.bf16 %v2596_v36, %v2593_v2 }
 0xcfd   :  { %v2600_v34 = vpop.f32.mrf.mxu1 }
 0xcfe   :  { %10723 = vrot.lane.b32.xlu0 %v10722_v56, %s11527_s26  ;;  %10708 = vrot.lane.b32.xlu1 %v10722_v56, %s11526_s25  ;;  %v2601_v57 = vadd.f32 %v2600_v34, %v2540_v41 }
 0xcff   :  { %v9961_v39 = vpop.f32.mrf.mxu1 }
 0xd01   :  { %v2603_v19 = vpop.f32.mrf.mxu1 }
 0xd02   :  { %v2604_v60 = vadd.f32 %v2603_v19, %v2540_v41  ;;  %10733 = vrot.lane.b32.xlu0 %v10702_v7, %s11528_s27 }
 0xd03   :  { %v9962_v52 = vpop.f32.mrf.mxu1 }
 0xd04   :  { %v10742_v16 = vpack.i.bf16 %v2604_v60, %v2601_v57  ;;  %v12510_v3 = vpack.c.bf16 %v2604_v60, %v2601_v57 }
 0xd06   :  { %10743 = vrot.lane.b32.xlu0 %v10742_v16, %s11528_s27  ;;  %10713 = vrot.lane.b32.xlu1 %v10742_v16, %s11526_s25 }
 0xd0a   :  { %2730 = vrot.lane.b32.xlu0 %v2668_v28, %s11529_s29  ;;  %10718 = vrot.lane.b32.xlu1 %v10702_v7, %s11527_s26 }
 0xd0e   :  { %10728 = vrot.lane.b32.xlu1 %v10742_v16, %s11527_s26 }
 0xd12   :  { %10738 = vrot.lane.b32.xlu1 %v10722_v56, %s11528_s27 }
 0xd16   :  { %2680 = vrot.lane.b32.xlu1 %v12496_v40, %s11529_s29 }
 0xd1a   :  { %2780 = vrot.lane.b32.xlu1 %v12510_v3, %s11529_s29 }
 0xd3b   :  { %v10704_v18 = vpop.permute.xlu0 %10703 }
 0xd3c   :  { %v10706_v21 = vunpack.i.h.bf16 %v10704_v18  ;;  %v10705_v45 = vunpack.i.l.bf16 %v10704_v18 }
 0xd3e   :  { %v12514_v20 = vpack.c.bf16 %v10706_v21, %v10705_v45 }
 0xd40   :  { %2830 = vrot.lane.b32.xlu0 %v12514_v20, %s11529_s29 }
 0xd70   :  { %v10724_v42 = vpop.permute.xlu0 %10723  ;;  %v10709_v12 = vpop.permute.xlu1 %10708 }
 0xd71   :  { %v10711_v25 = vunpack.i.h.bf16 %v10709_v12  ;;  %v10710_v44 = vunpack.i.l.bf16 %v10709_v12  ;;  %v10726_v46 = vunpack.i.h.bf16 %v10724_v42  ;;  %v10725_v5 = vunpack.i.l.bf16 %v10724_v42 }
 0xd73   :  { %v12518_v37 = vpack.c.bf16 %v10711_v25, %v10710_v44  ;;  %v12527_v11 = vpack.c.bf16 %v10726_v46, %v10725_v5 }
 0xd74   :  { %v10734_v51 = vpop.permute.xlu0 %10733 }
 0xd75   :  { %2880 = vrot.lane.b32.xlu1 %v12518_v37, %s11529_s29  ;;  %v10736_v13 = vunpack.i.h.bf16 %v10734_v51  ;;  %v10735_v6 = vunpack.i.l.bf16 %v10734_v51 }
 0xd77   :  { %v12536_v59 = vpack.c.bf16 %v10736_v13, %v10735_v6 }
 0xd78   :  { %v10744_v47 = vpop.permute.xlu0 %10743  ;;  %v10714_v9 = vpop.permute.xlu1 %10713 }
 0xd79   :  { %v10716_v1 = vunpack.i.h.bf16 %v10714_v9  ;;  %v10715_v8 = vunpack.i.l.bf16 %v10714_v9  ;;  %v10746_v26 = vunpack.i.h.bf16 %v10744_v47  ;;  %v10745_v7 = vunpack.i.l.bf16 %v10744_v47 }
 0xd7b   :  { %v12522_v33 = vpack.c.bf16 %v10716_v1, %v10715_v8  ;;  %v12547_v36 = vpack.c.bf16 %v10746_v26, %v10745_v7 }
 0xd7c   :  { %v2731_v14 = vpop.permute.xlu0 %2730  ;;  %v10719_v4 = vpop.permute.xlu1 %10718 }
 0xd7d   :  { %v2736_v49 = vsel %vm500_vm2, %v2731_v14, 0  ;;  %v10721_v10 = vunpack.i.h.bf16 %v10719_v4  ;;  %v10720_v17 = vunpack.i.l.bf16 %v10719_v4  ;;  %2930 = vrot.lane.b32.xlu0 %v12522_v33, %s11529_s29 }
 0xd7e   :  { %9970 = vmatpush3.bf16.xpose.msra.mxu1 %v2736_v49  ;;  %v12639_v49 = vld [vmem:[%s14787_s1 + $0x10] sm:$0xff] }
 0xd7f   :  { %v12529_v41 = vpack.c.bf16 %v10721_v10, %v10720_v17  ;;  %9981 = vmatprep.subr.bf16.mxu1 %v11523_v0 }
 0xd80   :  { %v10729_v63 = vpop.permute.xlu1 %10728 }
 0xd81   :  { %v10731_v38 = vunpack.i.h.bf16 %v10729_v63  ;;  %v10730_v61 = vunpack.i.l.bf16 %v10729_v63  ;;  %3030 = vrot.lane.b32.xlu0 %v12527_v11, %s11529_s29  ;;  %2980 = vrot.lane.b32.xlu1 %v12529_v41, %s11529_s29 }
 0xd83   :  { %v12538_v35 = vpack.c.bf16 %v10731_v38, %v10730_v61  ;;  %v12649_v38 = vld [vmem:[%s14787_s1 + $0x18] sm:$0xff] }
 0xd84   :  { %v10739_v30 = vpop.permute.xlu1 %10738 }
 0xd85   :  { %v10741_v50 = vunpack.i.h.bf16 %v10739_v30  ;;  %v10740_v2 = vunpack.i.l.bf16 %v10739_v30  ;;  %9972 = vmatmul.mubr.msk.bf16.vlgmr.msra.gmra.mxu1 %vm500_vm2, %v2668_v28  ;;  %3130 = vrot.lane.b32.xlu0 %v12536_v59, %s11529_s29 }
 0xd86   :  { %3080 = vrot.lane.b32.xlu1 %v12538_v35, %s11529_s29  ;;  %9983 = vmatprep.mubr.msk.bf16.mxu1 %vm11524_vm0, %v11523_v0 }
 0xd87   :  { %v12549_v31 = vpack.c.bf16 %v10741_v50, %v10740_v2 }
 0xd88   :  { %v2681_v56 = vpop.permute.xlu1 %2680 }
 0xd89   :  { %v2686_v34 = vsel %vm500_vm2, %v2681_v56, 0  ;;  %3230 = vrot.lane.b32.xlu0 %v12547_v36, %s11529_s29 }
 0xd8a   :  { %3180 = vrot.lane.b32.xlu1 %v12549_v31, %s11529_s29  ;;  %9964 = vmatpush3.bf16.xpose.msra.mxu0 %v2686_v34 }
 0xd8b   :  { %9975 = vmatprep.subr.bf16.mxu0 %v11523_v0 }
 0xd8c   :  { %v2781_v39 = vpop.permute.xlu1 %2780 }
 0xd8d   :  { %3650 = vrot.lane.b32.xlu0 %v2668_v28, %s11530_s30  ;;  %v2786_v19 = vsel %vm500_vm2, %v2781_v39, 0 }
 0xd8e   :  { %3603 = vrot.lane.b32.xlu1 %v12496_v40, %s11530_s30 }
 0xd91   :  { %9966 = vmatmul.mubr.msk.bf16.vlgmr.msra.gmra.mxu0 %vm500_vm2, %v12496_v40  ;;  %3744 = vrot.lane.b32.xlu0 %v12514_v20, %s11530_s30 }
 0xd92   :  { %3697 = vrot.lane.b32.xlu1 %v12510_v3, %s11530_s30  ;;  %9976 = vmatpush3.bf16.xpose.msra.mxu0 %v2786_v19 }
 0xd93   :  { %9977 = vmatprep.mubr.msk.bf16.mxu0 %vm11524_vm0, %v11523_v0  ;;  %9987 = vmatprep.subr.bf16.mxu0 %v11523_v0 }
 0xd95   :  { %3838 = vrot.lane.b32.xlu0 %v12522_v33, %s11530_s30 }
 0xd96   :  { %3791 = vrot.lane.b32.xlu1 %v12518_v37, %s11530_s30 }
 0xd99   :  { %9978 = vmatmul.mubr.msk.bf16.vlgmr.msra.gmra.mxu0 %vm500_vm2, %v12510_v3 }
 0xd9a   :  { %3885 = vrot.lane.b32.xlu1 %v12529_v41, %s11530_s30  ;;  %9989 = vmatprep.mubr.msk.bf16.mxu0 %vm11524_vm0, %v11523_v0 }
 0xdb2   :  { %v2831_v40 = vpop.permute.xlu0 %2830 }
 0xdb3   :  { %v2836_v57 = vsel %vm500_vm2, %v2831_v40, 0 }
 0xdb4   :  { %9982 = vmatpush3.bf16.xpose.msra.mxu1 %v2836_v57 }
 0xdb5   :  { %9993 = vmatprep.subr.bf16.mxu1 %v11523_v0 }
 0xdbb   :  { %9984 = vmatmul.mubr.msk.bf16.vlgmr.msra.gmra.mxu1 %vm500_vm2, %v12514_v20 }
 0xdbc   :  { %9995 = vmatprep.mubr.msk.bf16.mxu1 %vm11524_vm0, %v11523_v0 }
 0xde7   :  { %v2881_v60 = vpop.permute.xlu1 %2880 }
 0xde8   :  { %v2886_v52 = vsel %vm500_vm2, %v2881_v60, 0 }
 0xde9   :  { %9988 = vmatpush3.bf16.xpose.msra.mxu0 %v2886_v52 }
 0xdea   :  { %9999 = vmatprep.subr.bf16.mxu0 %v11523_v0 }
 0xdef   :  { %v2931_v16 = vpop.permute.xlu0 %2930 }
 0xdf0   :  { %v2936_v28 = vsel %vm500_vm2, %v2931_v16, 0  ;;  %9990 = vmatmul.mubr.msk.bf16.vlgmr.msra.gmra.mxu0 %vm500_vm2, %v12518_v37 }
 0xdf1   :  { %9994 = vmatpush3.bf16.xpose.msra.mxu1 %v2936_v28  ;;  %10001 = vmatprep.mubr.msk.bf16.mxu0 %vm11524_vm0, %v11523_v0 }
 0xdf2   :  { %10005 = vmatprep.subr.bf16.mxu1 %v11523_v0 }
 0xdf3   :  { %v2981_v3 = vpop.permute.xlu1 %2980  ;;  %v3031_v21 = vpop.permute.xlu0 %3030 }
 0xdf4   :  { %v2986_v18 = vsel %vm500_vm2, %v2981_v3, 0  ;;  %v3036_v45 = vsel %vm500_vm2, %v3031_v21, 0 }
 0xdf5   :  { %10000 = vmatpush3.bf16.xpose.msra.mxu0 %v2986_v18 }
 0xdf6   :  { %10011 = vmatprep.subr.bf16.mxu0 %v11523_v0 }
 0xdf7   :  { %v3131_v12 = vpop.permute.xlu0 %3130 }
 0xdf8   :  { %9996 = vmatmul.mubr.msk.bf16.vlgmr.msra.gmra.mxu1 %vm500_vm2, %v12522_v33  ;;  %v3081_v20 = vpop.permute.xlu1 %3080  ;;  %v3136_v25 = vsel %vm500_vm2, %v3131_v12, 0 }
 0xdf9   :  { %10006 = vmatpush3.bf16.xpose.msra.mxu1 %v3036_v45  ;;  %10007 = vmatprep.mubr.msk.bf16.mxu1 %vm11524_vm0, %v11523_v0  ;;  %v3086_v42 = vsel %vm500_vm2, %v3081_v20, 0 }
 0xdfa   :  { %10017 = vmatprep.subr.bf16.mxu1 %v11523_v0 }
 0xdfb   :  { %v3231_v51 = vpop.permute.xlu0 %3230 }
 0xdfc   :  { %10002 = vmatmul.mubr.msk.bf16.vlgmr.msra.gmra.mxu0 %vm500_vm2, %v12529_v41  ;;  %v3181_v44 = vpop.permute.xlu1 %3180  ;;  %v3236_v47 = vsel %vm500_vm2, %v3231_v51, 0 }
 0xdfd   :  { %10012 = vmatpush3.bf16.xpose.msra.mxu0 %v3086_v42  ;;  %10013 = vmatprep.mubr.msk.bf16.mxu0 %vm11524_vm0, %v11523_v0  ;;  %v3186_v37 = vsel %vm500_vm2, %v3181_v44, 0 }
 0xdfe   :  { %10023 = vmatprep.subr.bf16.mxu0 %v11523_v0 }
 0xdff   :  { %v3651_v1 = vpop.permute.xlu0 %3650 }
 0xe00   :  { %10008 = vmatmul.mubr.msk.bf16.vlgmr.msra.gmra.mxu1 %vm500_vm2, %v12527_v11  ;;  %v3604_v9 = vpop.permute.xlu1 %3603 }
 0xe01   :  { %10018 = vmatpush3.bf16.xpose.msra.mxu1 %v3136_v25  ;;  %10019 = vmatprep.mubr.msk.bf16.mxu1 %vm11524_vm0, %v11523_v0 }
 0xe02   :  { %10029 = vmatprep.subr.bf16.mxu1 %v11523_v0 }
 0xe04   :  { %10014 = vmatmul.mubr.msk.bf16.vlgmr.msra.gmra.mxu0 %vm500_vm2, %v12538_v35 }
 0xe05   :  { %10024 = vmatpush3.bf16.xpose.msra.mxu0 %v3186_v37  ;;  %10025 = vmatprep.mubr.msk.bf16.mxu0 %vm11524_vm0, %v11523_v0 }
 0xe06   :  { %10035 = vmatprep.subr.bf16.mxu0 %v11523_v0 }
 0xe08   :  { %10020 = vmatmul.mubr.msk.bf16.vlgmr.msra.gmra.mxu1 %vm500_vm2, %v12536_v59 }
 0xe09   :  { %10030 = vmatpush3.bf16.xpose.msra.mxu1 %v3236_v47  ;;  %10031 = vmatprep.mubr.msk.bf16.mxu1 %vm11524_vm0, %v11523_v0 }
 0xe0a   :  { %10041 = vmatprep.subr.bf16.mxu1 %v11523_v0 }
 0xe0c   :  { %10026 = vmatmul.mubr.msk.bf16.vlgmr.msra.gmra.mxu0 %vm500_vm2, %v12549_v31 }
 0xe0d   :  { %10036 = vmatpush3.bf16.msra.mxu0 %v3604_v9  ;;  %10037 = vmatprep.mubr.msk.bf16.mxu0 %vm11524_vm0, %v11523_v0 }
 0xe0e   :  { %10047 = vmatprep.subr.bf16.mxu0 %v11523_v0 }
 0xe10   :  { %10032 = vmatmul.mubr.msk.bf16.vlgmr.msra.gmra.mxu1 %vm500_vm2, %v12547_v36 }
 0xe11   :  { %10042 = vmatpush3.bf16.msra.mxu1 %v3651_v1  ;;  %10043 = vmatprep.mubr.msk.bf16.mxu1 %vm11524_vm0, %v11523_v0 }
 0xe12   :  { %10053 = vmatprep.subr.bf16.mxu1 %v11523_v0 }
 0xe45   :  { %v2772_v8 = vpop.f32.mrf.mxu1 }
 0xe46   :  { %v3281_v6 = vmul.f32 0.35355338, %v2772_v8 }
 0xe47   :  { %v9973_v46 = vpop.f32.mrf.mxu1 }
 0xe48   :  { %v12655_v30 = vadd.f32 %v3281_v6, %v12639_v49 }
 0xe49   :  { %v2775_v5 = vpop.f32.mrf.mxu1 }
 0xe4a   :  { %v3282_v50 = vmul.f32 0.35355338, %v2775_v5  ;;  %v3333_v60 = vsel %vm1146_vm3, %v12655_v30, -inf }
 0xe4b   :  { %v9974_v33 = vpop.f32.mrf.mxu1 }
 0xe4c   :  { %v12663_v40 = vadd.f32 %v3282_v50, %v12649_v38 }
 0xe4e   :  { %v3336_v3 = vsel %vm1146_vm3, %v12663_v40, -inf }
 0xe51   :  { %v2722_v14 = vpop.f32.mrf.mxu0 }
 0xe52   :  { %v3279_v4 = vmul.f32 0.35355338, %v2722_v14 }
 0xe53   :  { %v9967_v10 = vpop.f32.mrf.mxu0 }
 0xe54   :  { %v12642_v17 = vadd.f32 %v3279_v4, %v12639_v49 }
 0xe55   :  { %v2725_v13 = vpop.f32.mrf.mxu0 }
 0xe56   :  { %v3280_v41 = vmul.f32 0.35355338, %v2725_v13  ;;  %v3327_v63 = vsel %vm1146_vm3, %v12642_v17, -inf }
 0xe57   :  { %3328 = vmax.xlane.f32.xlu1 %v3327_v63  ;;  %v9968_v61 = vpop.f32.mrf.mxu0 }
 0xe58   :  { %v12652_v26 = vadd.f32 %v3280_v41, %v12649_v38 }
 0xe59   :  { %v2822_v7 = vpop.f32.mrf.mxu0 }
 0xe5a   :  { %v3283_v2 = vmul.f32 0.35355338, %v2822_v7  ;;  %v3330_v56 = vsel %vm1146_vm3, %v12652_v26, -inf }
 0xe5b   :  { %3331 = vmax.xlane.f32.xlu0 %v3330_v56  ;;  %v9979_v34 = vpop.f32.mrf.mxu0 }
 0xe5c   :  { %v12660_v39 = vadd.f32 %v3283_v2, %v12639_v49 }
 0xe5d   :  { %v2825_v19 = vpop.f32.mrf.mxu0 }
 0xe5e   :  { %v3284_v57 = vmul.f32 0.35355338, %v2825_v19  ;;  %v3339_v52 = vsel %vm1146_vm3, %v12660_v39, -inf }
 0xe5f   :  { %3334 = vmax.xlane.f32.xlu0 %v3333_v60  ;;  %3340 = vmax.xlane.f32.xlu1 %v3339_v52  ;;  %v9980_v16 = vpop.f32.mrf.mxu0 }
 0xe60   :  { %v12670_v28 = vadd.f32 %v3284_v57, %v12649_v38 }
 0xe62   :  { %v3342_v18 = vsel %vm1146_vm3, %v12670_v28, -inf }
 0xe63   :  { %3337 = vmax.xlane.f32.xlu0 %v3336_v3 }
 0xe67   :  { %3343 = vmax.xlane.f32.xlu0 %v3342_v18 }
 0xe7b   :  { %v2872_v21 = vpop.f32.mrf.mxu1 }
 0xe7c   :  { %v3285_v45 = vmul.f32 0.35355338, %v2872_v21 }
 0xe7d   :  { %v9985_v20 = vpop.f32.mrf.mxu1 }
 0xe7e   :  { %v12677_v42 = vadd.f32 %v3285_v45, %v12639_v49 }
 0xe7f   :  { %v2875_v12 = vpop.f32.mrf.mxu1 }
 0xe80   :  { %v3286_v25 = vmul.f32 0.35355338, %v2875_v12  ;;  %v3345_v44 = vsel %vm1146_vm3, %v12677_v42, -inf }
 0xe81   :  { %v9986_v37 = vpop.f32.mrf.mxu1  ;;  %3346 = vmax.xlane.f32.xlu1 %v3345_v44 }
 0xe82   :  { %v12682_v51 = vadd.f32 %v3286_v25, %v12649_v38 }
 0xe84   :  { %v3348_v47 = vsel %vm1146_vm3, %v12682_v51, -inf }
 0xe85   :  { %3349 = vmax.xlane.f32.xlu0 %v3348_v47 }
 0xeb0   :  { %v2922_v9 = vpop.f32.mrf.mxu0 }
 0xeb1   :  { %v3287_v1 = vmul.f32 0.35355338, %v2922_v9 }
 0xeb2   :  { %v9991_v8 = vpop.f32.mrf.mxu0 }
 0xeb3   :  { %v12687_v46 = vadd.f32 %v3287_v1, %v12639_v49 }
 0xeb4   :  { %v2925_v5 = vpop.f32.mrf.mxu0 }
 0xeb5   :  { %v3288_v33 = vmul.f32 0.35355338, %v2925_v5  ;;  %v3351_v14 = vsel %vm1146_vm3, %v12687_v46, -inf }
 0xeb6   :  { %3352 = vmax.xlane.f32.xlu1 %v3351_v14  ;;  %v9992_v4 = vpop.f32.mrf.mxu0 }
 0xeb7   :  { %v12692_v10 = vadd.f32 %v3288_v33, %v12649_v38 }
 0xeb8   :  { %v2972_v13 = vpop.f32.mrf.mxu1 }
 0xeb9   :  { %v3289_v6 = vmul.f32 0.35355338, %v2972_v13  ;;  %v3354_v41 = vsel %vm1146_vm3, %v12692_v10, -inf }
 0xeba   :  { %v9997_v63 = vpop.f32.mrf.mxu1  ;;  %3355 = vmax.xlane.f32.xlu0 %v3354_v41 }
 0xebb   :  { %v12697_v61 = vadd.f32 %v3289_v6, %v12639_v49 }
 0xebc   :  { %v2975_v7 = vpop.f32.mrf.mxu1  ;;  %v3022_v50 = vpop.f32.mrf.mxu0 }
 0xebd   :  { %v3290_v2 = vmul.f32 0.35355338, %v2975_v7  ;;  %v3291_v56 = vmul.f32 0.35355338, %v3022_v50  ;;  %v3357_v34 = vsel %vm1146_vm3, %v12697_v61, -inf }
 0xebe   :  { %v9998_v19 = vpop.f32.mrf.mxu1  ;;  %3358 = vmax.xlane.f32.xlu1 %v3357_v34  ;;  %v10003_v57 = vpop.f32.mrf.mxu0 }
 0xebf   :  { %v12702_v60 = vadd.f32 %v3290_v2, %v12649_v38  ;;  %v12705_v52 = vadd.f32 %v3291_v56, %v12639_v49 }
 0xec0   :  { %v3025_v16 = vpop.f32.mrf.mxu0  ;;  %v3072_v3 = vpop.f32.mrf.mxu1 }
 0xec1   :  { %v3292_v18 = vmul.f32 0.35355338, %v3025_v16  ;;  %v3293_v21 = vmul.f32 0.35355338, %v3072_v3  ;;  %v3360_v45 = vsel %vm1146_vm3, %v12702_v60, -inf  ;;  %v3363_v20 = vsel %vm1146_vm3, %v12705_v52, -inf }
 0xec2   :  { %v10009_v12 = vpop.f32.mrf.mxu1  ;;  %3361 = vmax.xlane.f32.xlu0 %v3360_v45  ;;  %3364 = vmax.xlane.f32.xlu1 %v3363_v20  ;;  %v10004_v25 = vpop.f32.mrf.mxu0 }
 0xec3   :  { %v12712_v44 = vadd.f32 %v3292_v18, %v12649_v38  ;;  %v12715_v37 = vadd.f32 %v3293_v21, %v12639_v49 }
 0xec4   :  { %v3075_v47 = vpop.f32.mrf.mxu1  ;;  %v3122_v9 = vpop.f32.mrf.mxu0 }
 0xec5   :  { %v3294_v1 = vmul.f32 0.35355338, %v3075_v47  ;;  %v3295_v8 = vmul.f32 0.35355338, %v3122_v9  ;;  %v3369_v5 = vsel %vm1146_vm3, %v12715_v37, -inf  ;;  %v3366_v33 = vsel %vm1146_vm3, %v12712_v44, -inf  ;;  %v12741_v9 = vpop.permute.xlu1 %3697 }
 0xec6   :  { %v10010_v14 = vpop.f32.mrf.mxu1  ;;  %3370 = vmax.xlane.f32.xlu1 %v3369_v5  ;;  %3367 = vmax.xlane.f32.xlu0 %v3366_v33  ;;  %v10015_v4 = vpop.f32.mrf.mxu0 }
 0xec7   :  { %v12722_v13 = vadd.f32 %v3294_v1, %v12649_v38  ;;  %v12725_v6 = vadd.f32 %v3295_v8, %v12639_v49 }
 0xec8   :  { %v3125_v41 = vpop.f32.mrf.mxu0  ;;  %v3172_v63 = vpop.f32.mrf.mxu1 }
 0xec9   :  { %v3296_v7 = vmul.f32 0.35355338, %v3125_v41  ;;  %v3297_v50 = vmul.f32 0.35355338, %v3172_v63  ;;  %v3372_v2 = vsel %vm1146_vm3, %v12722_v13, -inf  ;;  %v3375_v56 = vsel %vm1146_vm3, %v12725_v6, -inf }
 0xeca   :  { %v10021_v34 = vpop.f32.mrf.mxu1  ;;  %3373 = vmax.xlane.f32.xlu0 %v3372_v2  ;;  %3376 = vmax.xlane.f32.xlu1 %v3375_v56  ;;  %v10016_v19 = vpop.f32.mrf.mxu0 }
 0xecb   :  { %v12732_v57 = vadd.f32 %v3296_v7, %v12649_v38  ;;  %v12735_v16 = vadd.f32 %v3297_v50, %v12639_v49 }
 0xecc   :  { %v3175_v3 = vpop.f32.mrf.mxu1  ;;  %v3222_v18 = vpop.f32.mrf.mxu0 }
 0xecd   :  { %v3298_v21 = vmul.f32 0.35355338, %v3175_v3  ;;  %v3299_v45 = vmul.f32 0.35355338, %v3222_v18  ;;  %v3381_v20 = vsel %vm1146_vm3, %v12735_v16, -inf  ;;  %v3378_v12 = vsel %vm1146_vm3, %v12732_v57, -inf }
 0xece   :  { %v10022_v25 = vpop.f32.mrf.mxu1  ;;  %3382 = vmax.xlane.f32.xlu1 %v3381_v20  ;;  %3379 = vmax.xlane.f32.xlu0 %v3378_v12  ;;  %v10027_v47 = vpop.f32.mrf.mxu0 }
 0xecf   :  { %v12744_v1 = vadd.f32 %v3298_v21, %v12649_v38  ;;  %v12747_v8 = vadd.f32 %v3299_v45, %v12639_v49  ;;  %v12763_v21 = vpop.permute.xlu1 %3791  ;;  %v12770_v12 = vpop.permute.xlu0 %3744 }
 0xed0   :  { %v3225_v5 = vpop.f32.mrf.mxu0  ;;  %v3272_v33 = vpop.f32.mrf.mxu1 }
 0xed1   :  { %v3300_v14 = vmul.f32 0.35355338, %v3225_v5  ;;  %v3301_v4 = vmul.f32 0.35355338, %v3272_v33  ;;  %v3384_v41 = vsel %vm1146_vm3, %v12744_v1, -inf  ;;  %v3387_v63 = vsel %vm1146_vm3, %v12747_v8, -inf }
 0xed2   :  { %v10033_v7 = vpop.f32.mrf.mxu1  ;;  %3385 = vmax.xlane.f32.xlu0 %v3384_v41  ;;  %3388 = vmax.xlane.f32.xlu1 %v3387_v63  ;;  %v10028_v50 = vpop.f32.mrf.mxu0 }
 0xed3   :  { %v12754_v2 = vadd.f32 %v3300_v14, %v12649_v38  ;;  %v12757_v56 = vadd.f32 %v3301_v4, %v12639_v49  ;;  %v12772_v25 = vpop.permute.xlu1 %3885  ;;  %v12774_v47 = vpop.permute.xlu0 %3838 }
 0xed4   :  { %v3275_v34 = vpop.f32.mrf.mxu1 }
 0xed5   :  { %v3302_v19 = vmul.f32 0.35355338, %v3275_v34  ;;  %v3393_v3 = vsel %vm1146_vm3, %v12757_v56, -inf  ;;  %v3390_v18 = vsel %vm1146_vm3, %v12754_v2, -inf }
 0xed6   :  { %v10034_v45 = vpop.f32.mrf.mxu1  ;;  %3394 = vmax.xlane.f32.xlu1 %v3393_v3  ;;  %3391 = vmax.xlane.f32.xlu0 %v3390_v18 }
 0xed7   :  { %v12766_v20 = vadd.f32 %v3302_v19, %v12649_v38 }
 0xed9   :  { %v3396_v49 = vsel %vm1146_vm3, %v12766_v20, -inf }
 0xeda   :  { %3397 = vmax.xlane.f32.xlu0 %v3396_v49 }
 0xee0   :  { %v3329_v5 = vpop.xlane.xlu1 %3328 }
 0xee1   :  { %v3399_v33 = vsub.f32 %v12642_v17, %v3329_v5 }
 0xee3   :  { %v3423_v14 = vmul.f32 1.442695, %v3399_v33 }
 0xee4   :  { %v3332_v4 = vpop.xlane.xlu0 %3331 }
 0xee5   :  { %11104 = vpow2.f32 %v3423_v14  ;;  %v3400_v41 = vsub.f32 %v12652_v26, %v3332_v4 }
 0xee7   :  { %v3425_v38 = vmul.f32 1.442695, %v3400_v41 }
 0xee8   :  { %v3335_v63 = vpop.xlane.xlu0 %3334  ;;  %v3341_v7 = vpop.xlane.xlu1 %3340 }
 0xee9   :  { %11106 = vpow2.f32 %v3425_v38  ;;  %v3401_v50 = vsub.f32 %v12655_v30, %v3335_v63  ;;  %v3403_v34 = vsub.f32 %v12660_v39, %v3341_v7 }
 0xeeb   :  { %v3427_v19 = vmul.f32 1.442695, %v3401_v50  ;;  %v3431_v3 = vmul.f32 1.442695, %v3403_v34 }
 0xeec   :  { %v3338_v18 = vpop.xlane.xlu0 %3337 }
 0xeed   :  { %11108 = vpow2.f32 %v3427_v19  ;;  %v3402_v45 = vsub.f32 %v12663_v40, %v3338_v18 }
 0xeee   :  { %11110 = vpow2.f32 %v3431_v3 }
 0xeef   :  { %v3429_v17 = vmul.f32 1.442695, %v3402_v45 }
 0xef0   :  { %v3344_v49 = vpop.xlane.xlu0 %3343 }
 0xef1   :  { %11112 = vpow2.f32 %v3429_v17  ;;  %v3404_v26 = vsub.f32 %v12670_v28, %v3344_v49 }
 0xef2   :  { %v12782_v5 = vpop.eup %11104 }
 0xef3   :  { %v3433_v33 = vmul.f32 1.442695, %v3404_v26  ;;  %v3471_v30 = vsel %vm1146_vm3, %v12782_v5, 0.0 }
 0xef4   :  { %3472 = vadd.xlane.f32.xlu1 %v3471_v30 }
 0xef5   :  { %11114 = vpow2.f32 %v3433_v33 }
 0xef6   :  { %v12786_v39 = vpop.eup %11106 }
 0xef7   :  { %v3474_v14 = vsel %vm1146_vm3, %v12786_v39, 0.0 }
 0xef8   :  { %3475 = vadd.xlane.f32.xlu0 %v3474_v14 }
 0xefa   :  { %v12790_v40 = vpop.eup %11108 }
 0xefb   :  { %v3477_v4 = vsel %vm1146_vm3, %v12790_v40, 0.0  ;;  %v12794_v28 = vpop.eup %11110 }
 0xefc   :  { %3478 = vadd.xlane.f32.xlu1 %v3477_v4  ;;  %v3483_v38 = vsel %vm1146_vm3, %v12794_v28, 0.0 }
 0xefe   :  { %v12796_v41 = vpop.eup %11112 }
 0xeff   :  { %v3480_v63 = vsel %vm1146_vm3, %v12796_v41, 0.0 }
 0xf00   :  { %3484 = vadd.xlane.f32.xlu1 %v3483_v38  ;;  %3481 = vadd.xlane.f32.xlu0 %v3480_v63 }
 0xf02   :  { %v12802_v7 = vpop.eup %11114 }
 0xf03   :  { %v3486_v50 = vsel %vm1146_vm3, %v12802_v7, 0.0 }
 0xf04   :  { %3487 = vadd.xlane.f32.xlu0 %v3486_v50 }
 0xf0a   :  { %v3347_v34 = vpop.xlane.xlu1 %3346 }
 0xf0b   :  { %v3405_v19 = vsub.f32 %v12677_v42, %v3347_v34 }
 0xf0d   :  { %v3435_v3 = vmul.f32 1.442695, %v3405_v19 }
 0xf0e   :  { %v3350_v18 = vpop.xlane.xlu0 %3349 }
 0xf0f   :  { %11116 = vpow2.f32 %v3435_v3  ;;  %v3406_v45 = vsub.f32 %v12682_v51, %v3350_v18 }
 0xf11   :  { %v3437_v17 = vmul.f32 1.442695, %v3406_v45 }
 0xf13   :  { %11118 = vpow2.f32 %v3437_v17 }
 0xf1c   :  { %v12808_v49 = vpop.eup %11116 }
 0xf1d   :  { %v3489_v26 = vsel %vm1146_vm3, %v12808_v49, 0.0 }
 0xf1e   :  { %3490 = vadd.xlane.f32.xlu1 %v3489_v26 }
 0xf20   :  { %v12812_v33 = vpop.eup %11118 }
 0xf21   :  { %v3492_v30 = vsel %vm1146_vm3, %v12812_v33, 0.0 }
 0xf22   :  { %3493 = vadd.xlane.f32.xlu0 %v3492_v30 }
 0xf3f   :  { %v3353_v42 = vpop.xlane.xlu1 %3352 }
 0xf40   :  { %v3407_v14 = vsub.f32 %v12687_v46, %v3353_v42 }
 0xf42   :  { %v3439_v4 = vmul.f32 1.442695, %v3407_v14 }
 0xf43   :  { %v3356_v38 = vpop.xlane.xlu0 %3355 }
 0xf44   :  { %11120 = vpow2.f32 %v3439_v4  ;;  %v3408_v51 = vsub.f32 %v12692_v10, %v3356_v38 }
 0xf46   :  { %v3441_v63 = vmul.f32 1.442695, %v3408_v51 }
 0xf47   :  { %v3359_v50 = vpop.xlane.xlu1 %3358 }
 0xf48   :  { %11122 = vpow2.f32 %v3441_v63  ;;  %v3409_v34 = vsub.f32 %v12697_v61, %v3359_v50 }
 0xf4a   :  { %v3443_v19 = vmul.f32 1.442695, %v3409_v34 }
 0xf4b   :  { %v3362_v3 = vpop.xlane.xlu0 %3361  ;;  %v3365_v18 = vpop.xlane.xlu1 %3364 }
 0xf4c   :  { %11124 = vpow2.f32 %v3443_v19  ;;  %v3410_v45 = vsub.f32 %v12702_v60, %v3362_v3  ;;  %v3411_v17 = vsub.f32 %v12705_v52, %v3365_v18 }
 0xf4e   :  { %v3445_v26 = vmul.f32 1.442695, %v3410_v45  ;;  %v3447_v46 = vmul.f32 1.442695, %v3411_v17 }
 0xf4f   :  { %v3371_v30 = vpop.xlane.xlu1 %3370  ;;  %v3368_v42 = vpop.xlane.xlu0 %3367 }
 0xf50   :  { %11126 = vpow2.f32 %v3445_v26  ;;  %v3413_v10 = vsub.f32 %v12715_v37, %v3371_v30  ;;  %v3412_v14 = vsub.f32 %v12712_v44, %v3368_v42 }
 0xf51   :  { %v12823_v4 = vpop.eup %11120  ;;  %11128 = vpow2.f32 %v3447_v46 }
 0xf52   :  { %v3451_v61 = vmul.f32 1.442695, %v3413_v10  ;;  %v3449_v38 = vmul.f32 1.442695, %v3412_v14  ;;  %v3495_v51 = vsel %vm1146_vm3, %v12823_v4, 0.0 }
 0xf53   :  { %v3374_v60 = vpop.xlane.xlu0 %3373  ;;  %v3377_v63 = vpop.xlane.xlu1 %3376  ;;  %3496 = vadd.xlane.f32.xlu1 %v3495_v51 }
 0xf54   :  { %11130 = vpow2.f32 %v3451_v61  ;;  %v3414_v52 = vsub.f32 %v12722_v13, %v3374_v60  ;;  %v3415_v50 = vsub.f32 %v12725_v6, %v3377_v63 }
 0xf55   :  { %v12829_v34 = vpop.eup %11122  ;;  %11132 = vpow2.f32 %v3449_v38 }
 0xf56   :  { %v3453_v44 = vmul.f32 1.442695, %v3414_v52  ;;  %v3455_v37 = vmul.f32 1.442695, %v3415_v50  ;;  %v3498_v19 = vsel %vm1146_vm3, %v12829_v34, 0.0 }
 0xf57   :  { %v3383_v3 = vpop.xlane.xlu1 %3382  ;;  %v3380_v18 = vpop.xlane.xlu0 %3379  ;;  %3499 = vadd.xlane.f32.xlu0 %v3498_v19 }
 0xf58   :  { %11134 = vpow2.f32 %v3453_v44  ;;  %v3417_v45 = vsub.f32 %v12735_v16, %v3383_v3  ;;  %v3416_v17 = vsub.f32 %v12732_v57, %v3380_v18 }
 0xf59   :  { %v12835_v26 = vpop.eup %11124  ;;  %11136 = vpow2.f32 %v3455_v37 }
 0xf5a   :  { %v3459_v13 = vmul.f32 1.442695, %v3417_v45  ;;  %v3457_v6 = vmul.f32 1.442695, %v3416_v17  ;;  %v3501_v46 = vsel %vm1146_vm3, %v12835_v26, 0.0 }
 0xf5b   :  { %v3386_v30 = vpop.xlane.xlu0 %3385  ;;  %3502 = vadd.xlane.f32.xlu1 %v3501_v46  ;;  %v3389_v42 = vpop.xlane.xlu1 %3388 }
 0xf5c   :  { %11138 = vpow2.f32 %v3459_v13  ;;  %v3418_v10 = vsub.f32 %v12744_v1, %v3386_v30  ;;  %v3419_v14 = vsub.f32 %v12747_v8, %v3389_v42 }
 0xf5d   :  { %v12841_v61 = vpop.eup %11126  ;;  %11140 = vpow2.f32 %v3457_v6 }
 0xf5e   :  { %v12843_v57 = vpop.eup %11128  ;;  %v3461_v16 = vmul.f32 1.442695, %v3418_v10  ;;  %v3463_v38 = vmul.f32 1.442695, %v3419_v14  ;;  %v3504_v51 = vsel %vm1146_vm3, %v12841_v61, 0.0 }
 0xf5f   :  { %v3507_v60 = vsel %vm1146_vm3, %v12843_v57, 0.0  ;;  %3505 = vadd.xlane.f32.xlu0 %v3504_v51  ;;  %v3392_v42 = vpop.xlane.xlu0 %3391  ;;  %v3395_v10 = vpop.xlane.xlu1 %3394 }
 0xf60   :  { %11142 = vpow2.f32 %v3461_v16  ;;  %3508 = vadd.xlane.f32.xlu1 %v3507_v60 }
 0xf61   :  { %v12849_v63 = vpop.eup %11130  ;;  %11144 = vpow2.f32 %v3463_v38 }
 0xf62   :  { %v12851_v1 = vpop.eup %11132  ;;  %v3513_v8 = vsel %vm1146_vm3, %v12849_v63, 0.0 }
 0xf63   :  { %v3510_v52 = vsel %vm1146_vm3, %v12851_v1, 0.0  ;;  %v3398_v14 = vpop.xlane.xlu0 %3397 }
 0xf64   :  { %3514 = vadd.xlane.f32.xlu1 %v3513_v8  ;;  %3511 = vadd.xlane.f32.xlu0 %v3510_v52  ;;  %v3420_v52 = vsub.f32 %v12754_v2, %v3392_v42 }
 0xf65   :  { %v12857_v50 = vpop.eup %11134 }
 0xf66   :  { %v12859_v44 = vpop.eup %11136  ;;  %v3516_v37 = vsel %vm1146_vm3, %v12857_v50, 0.0 }
 0xf67   :  { %v3519_v19 = vsel %vm1146_vm3, %v12859_v44, 0.0 }
 0xf68   :  { %3520 = vadd.xlane.f32.xlu1 %v3519_v19  ;;  %3517 = vadd.xlane.f32.xlu0 %v3516_v37 }
 0xf69   :  { %v12865_v3 = vpop.eup %11138 }
 0xf6a   :  { %v12867_v18 = vpop.eup %11140  ;;  %v3525_v45 = vsel %vm1146_vm3, %v12865_v3, 0.0 }
 0xf6b   :  { %v3522_v17 = vsel %vm1146_vm3, %v12867_v18, 0.0 }
 0xf6c   :  { %3526 = vadd.xlane.f32.xlu1 %v3525_v45  ;;  %3523 = vadd.xlane.f32.xlu0 %v3522_v17  ;;  %v3421_v45 = vsub.f32 %v12757_v56, %v3395_v10  ;;  %v3465_v17 = vmul.f32 1.442695, %v3420_v52 }
 0xf6d   :  { %v12873_v13 = vpop.eup %11142 }
 0xf6e   :  { %v12875_v6 = vpop.eup %11144  ;;  %v3528_v46 = vsel %vm1146_vm3, %v12873_v13, 0.0 }
 0xf6f   :  { %v3531_v30 = vsel %vm1146_vm3, %v12875_v6, 0.0 }
 0xf70   :  { %3532 = vadd.xlane.f32.xlu1 %v3531_v30  ;;  %3529 = vadd.xlane.f32.xlu0 %v3528_v46 }
 0xf7d   :  { %v3473_v16 = vpop.xlane.xlu1 %3472 }
 0xf7e   :  { %11146 = vrcp.f32 %v3473_v16  ;;  %v3467_v16 = vmul.f32 1.442695, %v3421_v45 }
 0xf81   :  { %3979 = vrot.lane.b32.xlu1 %v12538_v35, %s11530_s30  ;;  %v3476_v38 = vpop.xlane.xlu0 %3475 }
 0xf82   :  { %11148 = vrcp.f32 %v3476_v38 }
 0xf85   :  { %4026 = vrot.lane.b32.xlu1 %v12536_v59, %s11530_s30  ;;  %v3479_v51 = vpop.xlane.xlu1 %3478  ;;  %v3422_v59 = vsub.f32 %v12766_v20, %v3398_v14 }
 0xf86   :  { %3932 = vrot.lane.b32.xlu0 %v12527_v11, %s11530_s30  ;;  %11150 = vrcp.f32 %v3479_v51 }
 0xf87   :  { %v3469_v38 = vmul.f32 1.442695, %v3422_v59 }
 0xf89   :  { %v3485_v60 = vpop.xlane.xlu1 %3484  ;;  %v3482_v8 = vpop.xlane.xlu0 %3481 }
 0xf8a   :  { %11152 = vrcp.f32 %v3482_v8 }
 0xf8b   :  { %11154 = vrcp.f32 %v3485_v60  ;;  %v11147_v37 = vpop.eup %11146 }
 0xf8c   :  { %v3567_v46 = vmul.f32 %v11147_v37, %v12782_v5 }
 0xf8d   :  { %v3488_v19 = vpop.xlane.xlu0 %3487 }
 0xf8e   :  { %11156 = vrcp.f32 %v3488_v19 }
 0xf8f   :  { %v11149_v35 = vpop.eup %11148  ;;  %11158 = vpow2.f32 %v3465_v17 }
 0xf90   :  { %v3568_v11 = vmul.f32 %v11149_v35, %v12786_v39  ;;  %11160 = vpow2.f32 %v3467_v16 }
 0xf91   :  { %11162 = vpow2.f32 %v3469_v38 }
 0xf92   :  { %v3591_v30 = vpack.c.bf16 %v3568_v11, %v3567_v46 }
 0xf93   :  { %v11151_v2 = vpop.eup %11150 }
 0xf94   :  { %10038 = vmatmul.mubr.msk.bf16.vlgmr.msra.gmra.mxu0 %vm1146_vm3, %v3591_v30  ;;  %v3569_v5 = vmul.f32 %v11151_v2, %v12790_v40 }
 0xf95   :  { %10048 = vmatpush3.bf16.msra.mxu0 %v12741_v9  ;;  %10049 = vmatprep.mubr.msk.bf16.mxu0 %vm11524_vm0, %v11523_v0 }
 0xf96   :  { %10059 = vmatprep.subr.bf16.mxu0 %v11523_v0 }
 0xf97   :  { %v11153_v56 = vpop.eup %11152 }
 0xf98   :  { %v11155_v20 = vpop.eup %11154  ;;  %v3570_v39 = vmul.f32 %v11153_v56, %v12796_v41 }
 0xf99   :  { %v3571_v14 = vmul.f32 %v11155_v20, %v12794_v28 }
 0xf9a   :  { %v3592_v10 = vpack.c.bf16 %v3570_v39, %v3569_v5 }
 0xf9b   :  { %v11157_v42 = vpop.eup %11156 }
 0xf9c   :  { %v3572_v9 = vmul.f32 %v11157_v42, %v12802_v7  ;;  %10044 = vmatmul.mubr.msk.bf16.vlgmr.msra.gmra.mxu1 %vm1146_vm3, %v3592_v10  ;;  %v12907_v40 = vpop.eup %11158 }
 0xf9d   :  { %10054 = vmatpush3.bf16.msra.mxu1 %v12770_v12  ;;  %10055 = vmatprep.mubr.msk.bf16.mxu1 %vm11524_vm0, %v11523_v0  ;;  %v12913_v28 = vpop.eup %11160  ;;  %v3534_v12 = vsel %vm1146_vm3, %v12907_v40, 0.0 }
 0xf9e   :  { %v3593_v51 = vpack.c.bf16 %v3572_v9, %v3571_v14  ;;  %10065 = vmatprep.subr.bf16.mxu1 %v11523_v0  ;;  %v12917_v41 = vpop.eup %11162  ;;  %v3537_v60 = vsel %vm1146_vm3, %v12913_v28, 0.0 }
 0xfa0   :  { %10050 = vmatmul.mubr.msk.bf16.vlgmr.msra.gmra.mxu0 %vm1146_vm3, %v3593_v51 }
 0xfa1   :  { %10060 = vmatpush3.bf16.msra.mxu0 %v12763_v21  ;;  %10061 = vmatprep.mubr.msk.bf16.mxu0 %vm11524_vm0, %v11523_v0  ;;  %v3540_v21 = vsel %vm1146_vm3, %v12917_v41, 0.0 }
 0xfa2   :  { %10071 = vmatprep.subr.bf16.mxu0 %v11523_v0 }
 0xfa5   :  { %3535 = vadd.xlane.f32.xlu0 %v3534_v12 }
 0xfa7   :  { %v3491_v7 = vpop.xlane.xlu1 %3490 }
 0xfa8   :  { %11164 = vrcp.f32 %v3491_v7 }
 0xfa9   :  { %3538 = vadd.xlane.f32.xlu1 %v3537_v60  ;;  %3541 = vadd.xlane.f32.xlu0 %v3540_v21 }
 0xfab   :  { %v3494_v8 = vpop.xlane.xlu0 %3493 }
 0xfac   :  { %11166 = vrcp.f32 %v3494_v8 }
 0xfb5   :  { %v11165_v52 = vpop.eup %11164 }
 0xfb6   :  { %v3573_v19 = vmul.f32 %v11165_v52, %v12808_v49 }
 0xfb9   :  { %v11167_v37 = vpop.eup %11166 }
 0xfba   :  { %4073 = vrot.lane.b32.xlu1 %v12549_v31, %s11530_s30  ;;  %v3574_v35 = vmul.f32 %v11167_v37, %v12812_v33 }
 0xfbc   :  { %v3594_v45 = vpack.c.bf16 %v3574_v35, %v3573_v19 }
 0xfbe   :  { %10056 = vmatmul.mubr.msk.bf16.vlgmr.msra.gmra.mxu1 %vm1146_vm3, %v3594_v45 }
 0xfbf   :  { %4120 = vrot.lane.b32.xlu0 %v12547_v36, %s11530_s30  ;;  %10066 = vmatpush3.bf16.msra.mxu1 %v12774_v47 }
 0xfc0   :  { %10067 = vmatprep.mubr.msk.bf16.mxu1 %vm11524_vm0, %v11523_v0  ;;  %10077 = vmatprep.subr.bf16.mxu1 %v11523_v0 }
 0xfdc   :  { %v3497_v17 = vpop.xlane.xlu1 %3496 }
 0xfdd   :  { %11168 = vrcp.f32 %v3497_v17 }
 0xfe0   :  { %v3500_v31 = vpop.xlane.xlu0 %3499 }
 0xfe1   :  { %11170 = vrcp.f32 %v3500_v31 }
 0xfe4   :  { %v3503_v49 = vpop.xlane.xlu1 %3502 }
 0xfe5   :  { %11172 = vrcp.f32 %v3503_v49 }
 0xfe8   :  { %v3506_v33 = vpop.xlane.xlu0 %3505 }
 0xfe9   :  { %v3509_v59 = vpop.xlane.xlu1 %3508  ;;  %11174 = vrcp.f32 %v3506_v33 }
 0xfea   :  { %v11169_v46 = vpop.eup %11168  ;;  %11176 = vrcp.f32 %v3509_v59 }
 0xfeb   :  { %v3575_v47 = vmul.f32 %v11169_v46, %v12823_v4 }
 0xfed   :  { %v3515_v11 = vpop.xlane.xlu1 %3514  ;;  %v3512_v36 = vpop.xlane.xlu0 %3511 }
 0xfee   :  { %v11171_v30 = vpop.eup %11170  ;;  %11178 = vrcp.f32 %v3512_v36 }
 0xfef   :  { %v3576_v16 = vmul.f32 %v11171_v30, %v12829_v34  ;;  %11180 = vrcp.f32 %v3515_v11 }
 0xff1   :  { %v3521_v38 = vpop.xlane.xlu1 %3520  ;;  %v3518_v2 = vpop.xlane.xlu0 %3517  ;;  %v3595_v56 = vpack.c.bf16 %v3576_v16, %v3575_v47 }
 0xff2   :  { %11182 = vrcp.f32 %v3518_v2  ;;  %v11173_v20 = vpop.eup %11172 }
 0xff3   :  { %10062 = vmatmul.mubr.msk.bf16.vlgmr.msra.gmra.mxu0 %vm1146_vm3, %v3595_v56  ;;  %11184 = vrcp.f32 %v3521_v38  ;;  %v3577_v34 = vmul.f32 %v11173_v20, %v12835_v26 }
 0xff4   :  { %10072 = vmatpush3.bf16.msra.mxu0 %v12772_v25  ;;  %10073 = vmatprep.mubr.msk.bf16.mxu0 %vm11524_vm0, %v11523_v0 }
 0xff5   :  { %v3527_v5 = vpop.xlane.xlu1 %3526  ;;  %v3524_v39 = vpop.xlane.xlu0 %3523  ;;  %10083 = vmatprep.subr.bf16.mxu0 %v11523_v0 }
 0xff6   :  { %v11175_v4 = vpop.eup %11174  ;;  %11186 = vrcp.f32 %v3524_v39 }
 0xff7   :  { %v3578_v42 = vmul.f32 %v11175_v4, %v12841_v61  ;;  %11188 = vrcp.f32 %v3527_v5  ;;  %v11177_v51 = vpop.eup %11176 }
 0xff8   :  { %v3579_v12 = vmul.f32 %v11177_v51, %v12843_v57 }
 0xff9   :  { %v3533_v10 = vpop.xlane.xlu1 %3532  ;;  %v3530_v14 = vpop.xlane.xlu0 %3529  ;;  %v3596_v9 = vpack.c.bf16 %v3578_v42, %v3577_v34 }
 0xffa   :  { %11190 = vrcp.f32 %v3530_v14 }
 0xffb   :  { %10068 = vmatmul.mubr.msk.bf16.vlgmr.msra.gmra.mxu1 %vm1146_vm3, %v3596_v9  ;;  %v11179_v25 = vpop.eup %11178  ;;  %11192 = vrcp.f32 %v3533_v10 }
 0xffc   :  { %10079 = vmatprep.mubr.msk.bf16.mxu1 %vm11524_vm0, %v11523_v0  ;;  %v3580_v7 = vmul.f32 %v11179_v25, %v12851_v1  ;;  %v11181_v60 = vpop.eup %11180 }
 0xffd   :  { %v3933_v26 = vpop.permute.xlu0 %3932  ;;  %v3980_v61 = vpop.permute.xlu1 %3979  ;;  %v3581_v52 = vmul.f32 %v11181_v60, %v12849_v63 }
 0xffe   :  { %10078 = vmatpush3.bf16.msra.mxu1 %v3933_v26  ;;  %v3597_v21 = vpack.c.bf16 %v3580_v7, %v3579_v12 }
 0xfff   :  { %10089 = vmatprep.subr.bf16.mxu1 %v11523_v0  ;;  %v11183_v8 = vpop.eup %11182 }
0x1000   :  { %v3582_v37 = vmul.f32 %v11183_v8, %v12857_v50  ;;  %10074 = vmatmul.mubr.msk.bf16.vlgmr.msra.gmra.mxu0 %vm1146_vm3, %v3597_v21  ;;  %v11185_v19 = vpop.eup %11184 }
0x1001   :  { %10084 = vmatpush3.bf16.msra.mxu0 %v3980_v61  ;;  %10085 = vmatprep.mubr.msk.bf16.mxu0 %vm11524_vm0, %v11523_v0  ;;  %v3583_v35 = vmul.f32 %v11185_v19, %v12859_v44  ;;  %v4027_v17 = vpop.permute.xlu1 %4026 }
0x1002   :  { %v3598_v57 = vpack.c.bf16 %v3582_v37, %v3581_v52  ;;  %10095 = vmatprep.subr.bf16.mxu0 %v11523_v0 }
0x1003   :  { %v11187_v1 = vpop.eup %11186 }
0x1004   :  { %v3584_v45 = vmul.f32 %v11187_v1, %v12867_v18  ;;  %10080 = vmatmul.mubr.msk.bf16.vlgmr.msra.gmra.mxu1 %vm1146_vm3, %v3598_v57  ;;  %v11189_v63 = vpop.eup %11188 }
0x1005   :  { %10090 = vmatpush3.bf16.msra.mxu1 %v4027_v17  ;;  %10091 = vmatprep.mubr.msk.bf16.mxu1 %vm11524_vm0, %v11523_v0  ;;  %v3585_v49 = vmul.f32 %v11189_v63, %v12865_v3  ;;  %v74_v17 = vld [vmem:[%s14789_s3 + $0x58] sm:$0xff] }
0x1006   :  { %v3599_v50 = vpack.c.bf16 %v3584_v45, %v3583_v35  ;;  %10101 = vmatprep.subr.bf16.mxu1 %v11523_v0  ;;  %v73_v45 = vld [vmem:[%s14789_s3 + $0x50] sm:$0xff] }
0x1007   :  { %v11191_v31 = vpop.eup %11190  ;;  %v4261_v63 = vpack.c.bf16 %v74_v17, %v73_v45 }
0x1008   :  { %v3586_v33 = vmul.f32 %v11191_v31, %v12873_v13  ;;  %10086 = vmatmul.mubr.msk.bf16.vlgmr.msra.gmra.mxu0 %vm1146_vm3, %v3599_v50  ;;  %v11193_v11 = vpop.eup %11192 }
0x1009   :  { %10097 = vmatprep.mubr.msk.bf16.mxu0 %vm11524_vm0, %v11523_v0  ;;  %v3587_v30 = vmul.f32 %v11193_v11, %v12875_v6 }
0x100a   :  { %v3600_v44 = vpack.c.bf16 %v3586_v33, %v3585_v49 }
0x100c   :  { %10092 = vmatmul.mubr.msk.bf16.vlgmr.msra.gmra.mxu1 %vm1146_vm3, %v3600_v44 }
0x100d   :  { %10103 = vmatprep.mubr.msk.bf16.mxu1 %vm11524_vm0, %v11523_v0 }
0x102e   :  { %v3536_v18 = vpop.xlane.xlu0 %3535 }
0x102f   :  { %11194 = vrcp.f32 %v3536_v18 }
0x1032   :  { %v3539_v59 = vpop.xlane.xlu1 %3538  ;;  %v3542_v46 = vpop.xlane.xlu0 %3541 }
0x1033   :  { %11196 = vrcp.f32 %v3539_v59  ;;  %v71_v59 = vld [vmem:[%s14789_s3 + $0x40] sm:$0xff] }
0x1034   :  { %11198 = vrcp.f32 %v3542_v46  ;;  %v72_v46 = vld [vmem:[%s14789_s3 + $0x48] sm:$0xff] }
0x1036   :  { %v4074_v3 = vpop.permute.xlu1 %4073  ;;  %v4121_v13 = vpop.permute.xlu0 %4120 }
0x1037   :  { %10096 = vmatpush3.bf16.msra.mxu0 %v4074_v3  ;;  %10102 = vmatpush3.bf16.msra.mxu1 %v4121_v13  ;;  %v4260_v3 = vpack.c.bf16 %v72_v46, %v71_v59 }
0x1038   :  { %10107 = vmatprep.subr.bf16.mxu0 %v11523_v0  ;;  %10123 = vmatprep.subr.bf16.mxu1 %v11523_v0 }
0x103c   :  { %v11195_v36 = vpop.eup %11194 }
0x103d   :  { %v3588_v47 = vmul.f32 %v11195_v36, %v12907_v40 }
0x103f   :  { %v3601_v16 = vpack.c.bf16 %v3588_v47, %v3587_v30 }
0x1040   :  { %v11197_v38 = vpop.eup %11196 }
0x1041   :  { %v11199_v2 = vpop.eup %11198  ;;  %v3589_v56 = vmul.f32 %v11197_v38, %v12913_v28  ;;  %10098 = vmatmul.mubr.msk.bf16.vlgmr.msra.gmra.mxu0 %vm1146_vm3, %v3601_v16 }
0x1042   :  { %v3590_v20 = vmul.f32 %v11199_v2, %v12917_v41  ;;  %10111 = vmatprep.mubr.msk.bf16.mxu0 %vm11524_vm0, %v11523_v0  ;;  %10108 = vmatpush3.bf16.msra.mxu0 %v4261_v63 }
0x1043   :  { %10109 = vmatprep.subr.bf16.mxu0 %v11523_v0 }
0x1044   :  { %v3602_v5 = vpack.c.bf16 %v3590_v20, %v3589_v56 }
0x1046   :  { %10104 = vmatmul.mubr.msk.bf16.vlgmr.msra.gmra.mxu1 %vm1146_vm3, %v3602_v5  ;;  %10110 = vmatpush3.bf16.msra.mxu0 %v4260_v3 }
0x1047   :  { %10127 = vmatprep.mubr.msk.bf16.mxu1 %vm11524_vm0, %v11523_v0  ;;  %10139 = vmatprep.subr.bf16.mxu0 %v11523_v0 }
0x1054   :  { %v12981_v6 = vpop.f32.mrf.mxu0 }
0x1056   :  { %v10039_v40 = vpop.f32.mrf.mxu0 }
0x1058   :  { %v12983_v39 = vpop.f32.mrf.mxu0 }
0x105a   :  { %v10040_v4 = vpop.f32.mrf.mxu0 }
0x105c   :  { %v12985_v28 = vpop.f32.mrf.mxu1 }
0x105e   :  { %v10045_v34 = vpop.f32.mrf.mxu1 }
0x1060   :  { %v12987_v42 = vpop.f32.mrf.mxu0  ;;  %v12989_v41 = vpop.f32.mrf.mxu1 }
0x1062   :  { %v10051_v10 = vpop.f32.mrf.mxu0  ;;  %v10046_v14 = vpop.f32.mrf.mxu1 }
0x1064   :  { %v12991_v9 = vpop.f32.mrf.mxu0 }
0x1066   :  { %v10052_v51 = vpop.f32.mrf.mxu0 }
0x107e   :  { %v3784_v25 = vpop.f32.mrf.mxu1 }
0x1080   :  { %v10057_v12 = vpop.f32.mrf.mxu1 }
0x1082   :  { %v3787_v7 = vpop.f32.mrf.mxu1 }
0x1083   :  { %v10747_v26 = vpack.i.bf16 %v3787_v7, %v3784_v25 }
0x1084   :  { %v10058_v60 = vpop.f32.mrf.mxu1 }
0x1085   :  { %10748 = vrot.lane.b32.xlu1 %v10747_v26, %s11522_s28 }
0x10b3   :  { %v3831_v61 = vpop.f32.mrf.mxu0 }
0x10b5   :  { %v10063_v21 = vpop.f32.mrf.mxu0 }
0x10b7   :  { %v3834_v8 = vpop.f32.mrf.mxu0 }
0x10b8   :  { %v10762_v36 = vpack.i.bf16 %v3834_v8, %v3831_v61 }
0x10b9   :  { %v10064_v52 = vpop.f32.mrf.mxu0 }
0x10bb   :  { %v3878_v37 = vpop.f32.mrf.mxu1 }
0x10bd   :  { %v10069_v19 = vpop.f32.mrf.mxu1 }
0x10bf   :  { %v3881_v57 = vpop.f32.mrf.mxu1 }
0x10c0   :  { %v3925_v1 = vpop.f32.mrf.mxu0  ;;  %v10777_v34 = vpack.i.bf16 %v3881_v57, %v3878_v37 }
0x10c1   :  { %v10070_v35 = vpop.f32.mrf.mxu1 }
0x10c2   :  { %v10075_v50 = vpop.f32.mrf.mxu0 }
0x10c4   :  { %v3928_v31 = vpop.f32.mrf.mxu0  ;;  %v3972_v49 = vpop.f32.mrf.mxu1 }
0x10c5   :  { %v10752_v33 = vpack.i.bf16 %v3928_v31, %v3925_v1 }
0x10c6   :  { %v10076_v44 = vpop.f32.mrf.mxu0  ;;  %v10081_v18 = vpop.f32.mrf.mxu1 }
0x10c7   :  { %10753 = vrot.lane.b32.xlu0 %v10752_v33, %s11531_s19 }
0x10c8   :  { %v3975_v13 = vpop.f32.mrf.mxu1  ;;  %v4019_v11 = vpop.f32.mrf.mxu0 }
0x10c9   :  { %v10767_v4 = vpack.i.bf16 %v3975_v13, %v3972_v49 }
0x10ca   :  { %v10082_v30 = vpop.f32.mrf.mxu1  ;;  %v10087_v47 = vpop.f32.mrf.mxu0 }
0x10cb   :  { %10763 = vrot.lane.b32.xlu0 %v10762_v36, %s11522_s28 }
0x10cc   :  { %v4022_v16 = vpop.f32.mrf.mxu0  ;;  %v4066_v38 = vpop.f32.mrf.mxu1 }
0x10cd   :  { %v10782_v60 = vpack.i.bf16 %v4022_v16, %v4019_v11 }
0x10ce   :  { %v10088_v2 = vpop.f32.mrf.mxu0  ;;  %v10093_v56 = vpop.f32.mrf.mxu1 }
0x10d0   :  { %v4069_v20 = vpop.f32.mrf.mxu1 }
0x10d1   :  { %v10757_v5 = vpack.i.bf16 %v4069_v20, %v4066_v38 }
0x10d2   :  { %v10094_v40 = vpop.f32.mrf.mxu1 }
0x10d3   :  { %10758 = vrot.lane.b32.xlu1 %v10757_v5, %s11532_s20 }
0x10d7   :  { %10768 = vrot.lane.b32.xlu1 %v10767_v4, %s11531_s19 }
0x10db   :  { %10778 = vrot.lane.b32.xlu1 %v10777_v34, %s11522_s28 }
0x10f7   :  { %v10749_v52 = vpop.permute.xlu1 %10748 }
0x10f8   :  { %v10751_v19 = vunpack.i.h.bf16 %v10749_v52  ;;  %v10750_v57 = vunpack.i.l.bf16 %v10749_v52 }
0x10fa   :  { %v4239_v17 = vsel %vm500_vm2, %v12981_v6, %v10750_v57  ;;  %v4240_v63 = vsel %vm500_vm2, %v12983_v39, %v10751_v19 }
0x1101   :  { %v4113_v10 = vpop.f32.mrf.mxu0 }
0x1103   :  { %v10099_v14 = vpop.f32.mrf.mxu0 }
0x1105   :  { %v4116_v51 = vpop.f32.mrf.mxu0 }
0x1106   :  { %v10772_v25 = vpack.i.bf16 %v4116_v51, %v4113_v10  ;;  %v4160_v12 = vpop.f32.mrf.mxu1 }
0x1107   :  { %v10100_v7 = vpop.f32.mrf.mxu0 }
0x1108   :  { %v10105_v26 = vpop.f32.mrf.mxu1  ;;  %10773 = vrot.lane.b32.xlu0 %v10772_v25, %s11532_s20 }
0x110a   :  { %v4163_v61 = vpop.f32.mrf.mxu1 }
0x110b   :  { %v10787_v21 = vpack.i.bf16 %v4163_v61, %v4160_v12 }
0x110c   :  { %v10106_v8 = vpop.f32.mrf.mxu1  ;;  %10783 = vrot.lane.b32.xlu0 %v10782_v60, %s11531_s19 }
0x110d   :  { %10788 = vrot.lane.b32.xlu1 %v10787_v21, %s11532_s20 }
0x1139   :  { %v10754_v37 = vpop.permute.xlu0 %10753 }
0x113a   :  { %v10756_v1 = vunpack.i.h.bf16 %v10754_v37  ;;  %v10755_v35 = vunpack.i.l.bf16 %v10754_v37 }
0x113c   :  { %v4246_v49 = vsel %vm1146_vm3, %v4240_v63, %v10756_v1  ;;  %v4245_v33 = vsel %vm1146_vm3, %v4239_v17, %v10755_v35 }
0x113d   :  { %v10764_v46 = vpop.permute.xlu0 %10763 }
0x113e   :  { %v10766_v3 = vunpack.i.h.bf16 %v10764_v46  ;;  %v10765_v39 = vunpack.i.l.bf16 %v10764_v46 }
0x1140   :  { %v4242_v47 = vsel %vm500_vm2, %v12989_v41, %v10766_v3  ;;  %v4241_v16 = vsel %vm500_vm2, %v12985_v28, %v10765_v39 }
0x1145   :  { %v10759_v45 = vpop.permute.xlu1 %10758 }
0x1146   :  { %v10761_v50 = vunpack.i.h.bf16 %v10759_v45  ;;  %v10760_v31 = vunpack.i.l.bf16 %v10759_v45 }
0x1148   :  { %v4251_v44 = vsel %vm2071_vm4, %v4245_v33, %v10760_v31  ;;  %v4252_v18 = vsel %vm2071_vm4, %v4246_v49, %v10761_v50 }
0x1149   :  { %v4257_v59 = vpack.c.bf16 %v4252_v18, %v4251_v44  ;;  %v10769_v6 = vpop.permute.xlu1 %10768 }
0x114a   :  { %v10771_v13 = vunpack.i.h.bf16 %v10769_v6  ;;  %v10770_v11 = vunpack.i.l.bf16 %v10769_v6 }
0x114b   :  { %10112 = vmatmul.mubr.msk.bf16.vlgmr.msra.gmra.mxu0 %vm144_vm1, %v4257_v59 }
0x114c   :  { %10115 = vmatprep.mubr.msk.bf16.mxu0 %vm11524_vm0, %v11523_v0  ;;  %v4247_v56 = vsel %vm1146_vm3, %v4241_v16, %v10770_v11  ;;  %v4248_v20 = vsel %vm1146_vm3, %v4242_v47, %v10771_v13 }
0x114d   :  { %v10779_v36 = vpop.permute.xlu1 %10778 }
0x114e   :  { %v10781_v5 = vunpack.i.h.bf16 %v10779_v36  ;;  %v10780_v40 = vunpack.i.l.bf16 %v10779_v36 }
0x1150   :  { %v4243_v28 = vsel %vm500_vm2, %v12987_v42, %v10780_v40  ;;  %v4244_v12 = vsel %vm500_vm2, %v12991_v9, %v10781_v5  ;;  %v11491_v42 = vld [vmem:[%s14792_s6 + $0x8] sm:$0xff] }
0x1151   :  { %v4337_v9 = vrot.slane %v11491_v42, %v12275_v23 }
0x117a   :  { %v10774_v30 = vpop.permute.xlu0 %10773 }
0x117b   :  { %v10776_v38 = vunpack.i.h.bf16 %v10774_v30  ;;  %v10775_v2 = vunpack.i.l.bf16 %v10774_v30 }
0x117d   :  { %v4254_v4 = vsel %vm2071_vm4, %v4248_v20, %v10776_v38  ;;  %v4253_v34 = vsel %vm2071_vm4, %v4247_v56, %v10775_v2 }
0x117e   :  { %v4258_v10 = vpack.c.bf16 %v4254_v4, %v4253_v34  ;;  %v10784_v14 = vpop.permute.xlu0 %10783 }
0x117f   :  { %v10789_v51 = vpop.permute.xlu1 %10788  ;;  %v10786_v25 = vunpack.i.h.bf16 %v10784_v14  ;;  %v10785_v41 = vunpack.i.l.bf16 %v10784_v14  ;;  %v93_v14 = vld [vmem:[%s14790_s4 + $0x30] sm:$0xff] }
0x1180   :  { %v10791_v7 = vunpack.i.h.bf16 %v10789_v51  ;;  %v10790_v26 = vunpack.i.l.bf16 %v10789_v51  ;;  %10116 = vmatmul.mubr.msk.bf16.gmra.mxu0 %vm144_vm1, %v4258_v10  ;;  %v94_v51 = vld [vmem:[%s14790_s4 + $0x38] sm:$0xff] }
0x1181   :  { %v4250_v60 = vsel %vm1146_vm3, %v4244_v12, %v10786_v25  ;;  %v4249_v61 = vsel %vm1146_vm3, %v4243_v28, %v10785_v41  ;;  %10119 = vmatprep.mubr.msk.bf16.mxu0 %vm11524_vm0, %v11523_v0  ;;  %v4446_v25 = vpack.c.bf16 %v94_v51, %v93_v14  ;;  %v91_v41 = vld [vmem:[%s14790_s4 + $0x20] sm:$0xff]  ;;  %v92_v28 = vld [vmem:[%s14790_s4 + $0x28] sm:$0xff] }
0x1182   :  { %v4256_v21 = vsel %vm2071_vm4, %v4250_v60, %v10791_v7  ;;  %v4255_v8 = vsel %vm2071_vm4, %v4249_v61, %v10790_v26  ;;  %v4445_v12 = vpack.c.bf16 %v92_v28, %v91_v41 }
0x1183   :  { %v4259_v52 = vpack.c.bf16 %v4256_v21, %v4255_v8  ;;  %10124 = vmatpush3.bf16.msra.mxu1 %v4446_v25 }
0x1184   :  { %10125 = vmatprep.subr.bf16.mxu1 %v11523_v0 }
0x1187   :  { %10126 = vmatpush3.bf16.msra.mxu1 %v4445_v12 }
0x1188   :  { %10120 = vmatmul.mubr.msk.bf16.gmra.mxu0 %vm144_vm1, %v4259_v52  ;;  %10159 = vmatprep.subr.bf16.mxu1 %v11523_v0 }
0x1189   :  { %10147 = vmatprep.mubr.msk.bf16.mxu0 %vm11524_vm0, %v11523_v0 }
0x120b   :  { %v4305_v37 = vpop.f32.mrf.mxu0 }
0x120c   :  { %v4328_v19 = vadd.f32 %v4305_v37, %v12426_v55 }
0x120d   :  { %v10113_v57 = vpop.f32.mrf.mxu0 }
0x120e   :  { %v13054_v1 = vadd.f32 %v4337_v9, %v4328_v19 }
0x120f   :  { %v4308_v35 = vpop.f32.mrf.mxu0 }
0x1210   :  { %v4329_v45 = vadd.f32 %v4308_v35, %v12431_v32  ;;  %v4344_v17 = vsel %vm144_vm1, %v13054_v1, 0.0 }
0x1211   :  { %4345 = vadd.xlane.f32.xlu0 %v4344_v17  ;;  %v10114_v63 = vpop.f32.mrf.mxu0 }
0x1212   :  { %v13059_v50 = vadd.f32 %v4337_v9, %v4329_v45 }
0x1214   :  { %v4347_v31 = vsel %vm144_vm1, %v13059_v50, 0.0 }
0x1215   :  { %4348 = vadd.xlane.f32.xlu1 %v4347_v31 }
0x1240   :  { %v4313_v49 = vpop.f32.mrf.mxu0 }
0x1241   :  { %v4330_v55 = vadd.f32 %v4313_v49, %v12436_v29 }
0x1242   :  { %v10117_v33 = vpop.f32.mrf.mxu0 }
0x1243   :  { %v13064_v44 = vadd.f32 %v4337_v9, %v4330_v55 }
0x1244   :  { %v4316_v18 = vpop.f32.mrf.mxu0 }
0x1245   :  { %v4331_v32 = vadd.f32 %v4316_v18, %v12441_v24  ;;  %v4350_v59 = vsel %vm144_vm1, %v13064_v44, 0.0  ;;  %v117_v18 = vld [vmem:[%s14791_s5 + $0x70] sm:$0xff] }
0x1246   :  { %4351 = vadd.xlane.f32.xlu0 %v4350_v59  ;;  %v10118_v6 = vpop.f32.mrf.mxu0 }
0x1247   :  { %v13069_v46 = vadd.f32 %v4337_v9, %v4331_v32  ;;  %v118_v32 = vld [vmem:[%s14791_s5 + $0x78] sm:$0xff] }
0x1248   :  { %v4321_v3 = vpop.f32.mrf.mxu0  ;;  %v4529_v59 = vpack.c.bf16 %v118_v32, %v117_v18 }
0x1249   :  { %v4332_v39 = vadd.f32 %v4321_v3, %v12446_v53  ;;  %v4353_v13 = vsel %vm144_vm1, %v13069_v46, 0.0 }
0x124a   :  { %4354 = vadd.xlane.f32.xlu0 %v4353_v13  ;;  %v10121_v29 = vpop.f32.mrf.mxu0  ;;  %10140 = vmatpush3.bf16.msra.mxu0 %v4529_v59 }
0x124b   :  { %v13074_v11 = vadd.f32 %v4337_v9, %v4332_v39  ;;  %10141 = vmatprep.subr.bf16.mxu0 %v11523_v0 }
0x124c   :  { %v4324_v36 = vpop.f32.mrf.mxu0 }
0x124d   :  { %v4333_v24 = vadd.f32 %v4324_v36, %v12451_v27  ;;  %v4356_v30 = vsel %vm144_vm1, %v13074_v11, 0.0 }
0x124e   :  { %4357 = vadd.xlane.f32.xlu0 %v4356_v30  ;;  %v10122_v47 = vpop.f32.mrf.mxu0 }
0x124f   :  { %v13079_v16 = vadd.f32 %v4337_v9, %v4333_v24  ;;  %v13127_v24 = vld [vmem:[%s14792_s6 + $0x10] sm:$0xff] }
0x1250   :  { %v4425_v47 = vrot.slane %v13127_v24, %v11610_v22 }
0x1251   :  { %v4359_v53 = vsel %vm144_vm1, %v13079_v16, 0.0 }
0x1252   :  { %4360 = vadd.xlane.f32.xlu1 %v4359_v53 }
0x129a   :  { %v4346_v38 = vpop.xlane.xlu0 %4345 }
0x129b   :  { %v4362_v2 = vmul.f32 0.03125, %v4346_v38 }
0x129d   :  { %v4368_v56 = vsub.f32 %v13054_v1, %v4362_v2 }
0x129e   :  { %v4349_v20 = vpop.xlane.xlu1 %4348 }
0x129f   :  { %v4363_v5 = vmul.f32 0.03125, %v4349_v20  ;;  %v4374_v40 = vmul.f32 %v4368_v56, %v4368_v56 }
0x12a1   :  { %v4369_v27 = vsub.f32 %v13059_v50, %v4363_v5  ;;  %v4380_v4 = vsel %vm144_vm1, %v4374_v40, 0.0  ;;  %v4435_v5 = vrot.slane %v13127_v24, %v12368_v58 }
0x12a2   :  { %4381 = vadd.xlane.f32.xlu0 %v4380_v4 }
0x12a3   :  { %v4375_v34 = vmul.f32 %v4369_v27, %v4369_v27 }
0x12a5   :  { %v4383_v10 = vsel %vm144_vm1, %v4375_v34, 0.0 }
0x12a6   :  { %4384 = vadd.xlane.f32.xlu1 %v4383_v10 }
0x12cf   :  { %v4352_v7 = vpop.xlane.xlu0 %4351 }
0x12d0   :  { %v4364_v26 = vmul.f32 0.03125, %v4352_v7 }
0x12d2   :  { %v13102_v60 = vsub.f32 %v13064_v44, %v4364_v26 }
0x12d3   :  { %v4355_v61 = vpop.xlane.xlu0 %4354 }
0x12d4   :  { %v4365_v21 = vmul.f32 0.03125, %v4355_v61  ;;  %v4376_v8 = vmul.f32 %v13102_v60, %v13102_v60 }
0x12d6   :  { %v13107_v52 = vsub.f32 %v13069_v46, %v4365_v21  ;;  %v4386_v42 = vsel %vm144_vm1, %v4376_v8, 0.0 }
0x12d7   :  { %4387 = vadd.xlane.f32.xlu0 %v4386_v42  ;;  %v4358_v9 = vpop.xlane.xlu0 %4357 }
0x12d8   :  { %v4366_v37 = vmul.f32 0.03125, %v4358_v9  ;;  %v4377_v19 = vmul.f32 %v13107_v52, %v13107_v52 }
0x12da   :  { %v4372_v57 = vsub.f32 %v13074_v11, %v4366_v37  ;;  %v4389_v35 = vsel %vm144_vm1, %v4377_v19, 0.0 }
0x12db   :  { %4390 = vadd.xlane.f32.xlu1 %v4389_v35  ;;  %v4361_v45 = vpop.xlane.xlu1 %4360 }
0x12dc   :  { %v4367_v17 = vmul.f32 0.03125, %v4361_v45  ;;  %v4378_v63 = vmul.f32 %v4372_v57, %v4372_v57 }
0x12de   :  { %v4373_v31 = vsub.f32 %v13079_v16, %v4367_v17  ;;  %v4392_v49 = vsel %vm144_vm1, %v4378_v63, 0.0 }
0x12df   :  { %4393 = vadd.xlane.f32.xlu0 %v4392_v49 }
0x12e0   :  { %v4379_v55 = vmul.f32 %v4373_v31, %v4373_v31 }
0x12e2   :  { %v4395_v33 = vsel %vm144_vm1, %v4379_v55, 0.0 }
0x12e3   :  { %4396 = vadd.xlane.f32.xlu1 %v4395_v33 }
0x132b   :  { %v4382_v6 = vpop.xlane.xlu0 %4381 }
0x132c   :  { %v4398_v3 = vmul.f32 0.03125, %v4382_v6 }
0x132e   :  { %v4404_v39 = vadd.f32 1e-05, %v4398_v3 }
0x132f   :  { %v4385_v13 = vpop.xlane.xlu1 %4384 }
0x1330   :  { %11200 = vrsqrt.f32 %v4404_v39  ;;  %v4399_v29 = vmul.f32 0.03125, %v4385_v13  ;;  %v113_v39 = vld [vmem:[%s14791_s5 + $0x50] sm:$0xff]  ;;  %v114_v13 = vld [vmem:[%s14791_s5 + $0x58] sm:$0xff] }
0x1332   :  { %v4405_v36 = vadd.f32 1e-05, %v4399_v29  ;;  %v4527_v29 = vpack.c.bf16 %v114_v13, %v113_v39 }
0x1334   :  { %11202 = vrsqrt.f32 %v4405_v36  ;;  %v111_v36 = vld [vmem:[%s14791_s5 + $0x40] sm:$0xff] }
0x133d   :  { %v11201_v30 = vpop.eup %11200 }
0x133e   :  { %v4416_v53 = vmul.f32 %v11201_v30, %v4368_v56  ;;  %v112_v30 = vld [vmem:[%s14791_s5 + $0x48] sm:$0xff] }
0x1340   :  { %v4426_v2 = vmul.f32 %v4425_v47, %v4416_v53  ;;  %v4450_v53 = vrot.slane %v13127_v24, %v12407_v48 }
0x1341   :  { %v11203_v38 = vpop.eup %11202 }
0x1342   :  { %v4417_v20 = vmul.f32 %v11203_v38, %v4369_v27  ;;  %v4436_v4 = vadd.f32 %v4435_v5, %v4426_v2 }
0x1344   :  { %v4427_v40 = vmul.f32 %v4425_v47, %v4417_v20 }
0x1346   :  { %v4437_v34 = vadd.f32 %v4435_v5, %v4427_v40 }
0x1348   :  { %v4442_v10 = vpack.c.bf16 %v4437_v34, %v4436_v4 }
0x134a   :  { %10128 = vmatmul.mubr.msk.bf16.vlgmr.msra.gmra.mxu1 %vm144_vm1, %v4442_v10 }
0x134b   :  { %10131 = vmatprep.mubr.msk.bf16.mxu1 %vm11524_vm0, %v11523_v0 }
0x1360   :  { %v4388_v14 = vpop.xlane.xlu0 %4387 }
0x1361   :  { %v4400_v51 = vmul.f32 0.03125, %v4388_v14 }
0x1363   :  { %v4406_v25 = vadd.f32 1e-05, %v4400_v51 }
0x1364   :  { %v4391_v41 = vpop.xlane.xlu1 %4390 }
0x1365   :  { %11204 = vrsqrt.f32 %v4406_v25  ;;  %v4401_v56 = vmul.f32 0.03125, %v4391_v41 }
0x1367   :  { %v4407_v28 = vadd.f32 1e-05, %v4401_v56 }
0x1368   :  { %v4394_v27 = vpop.xlane.xlu0 %4393 }
0x1369   :  { %11206 = vrsqrt.f32 %v4407_v28  ;;  %v4402_v12 = vmul.f32 0.03125, %v4394_v27 }
0x136b   :  { %v4408_v7 = vadd.f32 1e-05, %v4402_v12 }
0x136c   :  { %v4397_v26 = vpop.xlane.xlu1 %4396 }
0x136d   :  { %11208 = vrsqrt.f32 %v4408_v7  ;;  %v4403_v61 = vmul.f32 0.03125, %v4397_v26 }
0x136f   :  { %v4409_v21 = vadd.f32 1e-05, %v4403_v61 }
0x1371   :  { %11210 = vrsqrt.f32 %v4409_v21 }
0x1372   :  { %v11205_v8 = vpop.eup %11204 }
0x1373   :  { %v4418_v42 = vmul.f32 %v11205_v8, %v13102_v60 }
0x1375   :  { %v4428_v19 = vmul.f32 %v4425_v47, %v4418_v42 }
0x1376   :  { %v11207_v9 = vpop.eup %11206 }
0x1377   :  { %v4419_v37 = vmul.f32 %v11207_v9, %v13107_v52  ;;  %v4438_v63 = vadd.f32 %v4435_v5, %v4428_v19  ;;  %v115_v52 = vld [vmem:[%s14791_s5 + $0x60] sm:$0xff] }
0x1379   :  { %v4429_v35 = vmul.f32 %v4425_v47, %v4419_v37 }
0x137a   :  { %v11209_v45 = vpop.eup %11208 }
0x137b   :  { %v4420_v17 = vmul.f32 %v11209_v45, %v4372_v57  ;;  %v4439_v49 = vadd.f32 %v4435_v5, %v4429_v35  ;;  %v116_v57 = vld [vmem:[%s14791_s5 + $0x68] sm:$0xff] }
0x137d   :  { %v4443_v55 = vpack.c.bf16 %v4439_v49, %v4438_v63  ;;  %v4430_v32 = vmul.f32 %v4425_v47, %v4420_v17  ;;  %v4605_v17 = vrot.slane %v13127_v24, %v12421_v43 }
0x137e   :  { %v11211_v33 = vpop.eup %11210 }
0x137f   :  { %v4421_v18 = vmul.f32 %v11211_v33, %v4373_v31  ;;  %10132 = vmatmul.mubr.msk.bf16.gmra.mxu1 %vm144_vm1, %v4443_v55  ;;  %v4440_v60 = vadd.f32 %v4435_v5, %v4430_v32  ;;  %v4528_v31 = vpack.c.bf16 %v116_v57, %v115_v52 }
0x1380   :  { %10135 = vmatprep.mubr.msk.bf16.mxu1 %vm11524_vm0, %v11523_v0 }
0x1381   :  { %v4431_v59 = vmul.f32 %v4425_v47, %v4421_v18  ;;  %10142 = vmatpush3.bf16.msra.mxu0 %v4528_v31  ;;  %v4526_v47 = vpack.c.bf16 %v112_v30, %v111_v36 }
0x1382   :  { %10143 = vmatprep.subr.bf16.mxu0 %v11523_v0 }
0x1383   :  { %v4441_v6 = vadd.f32 %v4435_v5, %v4431_v59 }
0x1385   :  { %v4444_v3 = vpack.c.bf16 %v4441_v6, %v4440_v60  ;;  %10144 = vmatpush3.bf16.msra.mxu0 %v4527_v29 }
0x1386   :  { %10145 = vmatprep.subr.bf16.mxu0 %v11523_v0 }
0x1387   :  { %10136 = vmatmul.mubr.msk.bf16.gmra.mxu1 %vm144_vm1, %v4444_v3 }
0x1388   :  { %10163 = vmatprep.mubr.msk.bf16.mxu1 %vm11524_vm0, %v11523_v0 }
0x1389   :  { %10146 = vmatpush3.bf16.msra.mxu0 %v4526_v47 }
0x138a   :  { %10175 = vmatprep.subr.bf16.mxu0 %v11523_v0 }
0x140a   :  { %v4494_v38 = vpop.f32.mrf.mxu1 }
0x140b   :  { %v4495_v20 = vadd.f32 %v4494_v38, %v4450_v53 }
0x140c   :  { %v10129_v2 = vpop.f32.mrf.mxu1 }
0x140d   :  { %v4517_v34 = vmax.f32 %v4495_v20, 0.0 }
0x140e   :  { %v4497_v5 = vpop.f32.mrf.mxu1 }
0x140f   :  { %v4498_v40 = vadd.f32 %v4497_v5, %v4450_v53 }
0x1410   :  { %v10130_v4 = vpop.f32.mrf.mxu1 }
0x1411   :  { %v4518_v10 = vmax.f32 %v4498_v40, 0.0 }
0x1413   :  { %v4523_v14 = vpack.c.bf16 %v4518_v10, %v4517_v34 }
0x1415   :  { %10148 = vmatmul.mubr.msk.bf16.vlgmr.msra.gmra.mxu0 %vm2351_vm5, %v4523_v14 }
0x1416   :  { %10151 = vmatprep.mubr.msk.bf16.mxu0 %vm11524_vm0, %v11523_v0 }
0x143f   :  { %v4502_v51 = vpop.f32.mrf.mxu1 }
0x1440   :  { %v4503_v41 = vadd.f32 %v4502_v51, %v4450_v53 }
0x1441   :  { %v10133_v25 = vpop.f32.mrf.mxu1 }
0x1442   :  { %v4519_v12 = vmax.f32 %v4503_v41, 0.0 }
0x1443   :  { %v4505_v56 = vpop.f32.mrf.mxu1 }
0x1444   :  { %v4506_v28 = vadd.f32 %v4505_v56, %v4450_v53 }
0x1445   :  { %v10134_v27 = vpop.f32.mrf.mxu1 }
0x1446   :  { %v4520_v7 = vmax.f32 %v4506_v28, 0.0  ;;  %v57_v27 = vld [vmem:[%s14788_s2 + $0x50] sm:$0xff] }
0x1447   :  { %v4510_v26 = vpop.f32.mrf.mxu1 }
0x1448   :  { %v4524_v61 = vpack.c.bf16 %v4520_v7, %v4519_v12  ;;  %v4511_v8 = vadd.f32 %v4510_v26, %v4450_v53  ;;  %v58_v12 = vld [vmem:[%s14788_s2 + $0x58] sm:$0xff]  ;;  %v55_v26 = vld [vmem:[%s14788_s2 + $0x40] sm:$0xff] }
0x1449   :  { %v10137_v21 = vpop.f32.mrf.mxu1  ;;  %v4714_v7 = vpack.c.bf16 %v58_v12, %v57_v27 }
0x144a   :  { %10152 = vmatmul.mubr.msk.bf16.gmra.mxu0 %vm2351_vm5, %v4524_v61  ;;  %v4521_v19 = vmax.f32 %v4511_v8, 0.0  ;;  %v56_v61 = vld [vmem:[%s14788_s2 + $0x48] sm:$0xff] }
0x144b   :  { %v4513_v42 = vpop.f32.mrf.mxu1  ;;  %10155 = vmatprep.mubr.msk.bf16.mxu0 %vm11524_vm0, %v11523_v0  ;;  %10160 = vmatpush3.bf16.msra.mxu1 %v4714_v7  ;;  %v4713_v21 = vpack.c.bf16 %v56_v61, %v55_v26 }
0x144c   :  { %v4514_v9 = vadd.f32 %v4513_v42, %v4450_v53  ;;  %10161 = vmatprep.subr.bf16.mxu1 %v11523_v0 }
0x144d   :  { %v10138_v37 = vpop.f32.mrf.mxu1 }
0x144e   :  { %v4522_v35 = vmax.f32 %v4514_v9, 0.0 }
0x144f   :  { %10162 = vmatpush3.bf16.msra.mxu1 %v4713_v21 }
0x1450   :  { %v4525_v45 = vpack.c.bf16 %v4522_v35, %v4521_v19  ;;  %10181 = vmatprep.subr.bf16.mxu1 %v11523_v0 }
0x1452   :  { %10156 = vmatmul.mubr.msk.bf16.gmra.mxu0 %vm2351_vm5, %v4525_v45 }
0x1453   :  { %10177 = vmatprep.mubr.msk.bf16.mxu0 %vm11524_vm0, %v11523_v0 }
0x14d5   :  { %v4573_v63 = vpop.f32.mrf.mxu0 }
0x14d6   :  { %v4596_v49 = vadd.f32 %v4573_v63, %v13054_v1 }
0x14d7   :  { %v10149_v55 = vpop.f32.mrf.mxu0 }
0x14d8   :  { %v13179_v33 = vadd.f32 %v4605_v17, %v4596_v49 }
0x14d9   :  { %v4576_v18 = vpop.f32.mrf.mxu0 }
0x14da   :  { %v4597_v32 = vadd.f32 %v4576_v18, %v13059_v50  ;;  %v4612_v59 = vsel %vm144_vm1, %v13179_v33, 0.0 }
0x14db   :  { %4613 = vadd.xlane.f32.xlu0 %v4612_v59  ;;  %v10150_v60 = vpop.f32.mrf.mxu0 }
0x14dc   :  { %v13184_v6 = vadd.f32 %v4605_v17, %v4597_v32 }
0x14de   :  { %v4615_v3 = vsel %vm144_vm1, %v13184_v6, 0.0 }
0x14df   :  { %4616 = vadd.xlane.f32.xlu1 %v4615_v3 }
0x150a   :  { %v4581_v52 = vpop.f32.mrf.mxu0 }
0x150b   :  { %v4598_v1 = vadd.f32 %v4581_v52, %v13064_v44 }
0x150c   :  { %v10153_v57 = vpop.f32.mrf.mxu0 }
0x150d   :  { %v13189_v31 = vadd.f32 %v4605_v17, %v4598_v1 }
0x150e   :  { %v4584_v39 = vpop.f32.mrf.mxu0 }
0x150f   :  { %v4599_v50 = vadd.f32 %v4584_v39, %v13069_v46  ;;  %v4618_v13 = vsel %vm144_vm1, %v13189_v31, 0.0 }
0x1510   :  { %4619 = vadd.xlane.f32.xlu0 %v4618_v13  ;;  %v10154_v29 = vpop.f32.mrf.mxu0 }
0x1511   :  { %v13194_v36 = vadd.f32 %v4605_v17, %v4599_v50 }
0x1512   :  { %v4589_v30 = vpop.f32.mrf.mxu0 }
0x1513   :  { %v4600_v47 = vadd.f32 %v4589_v30, %v13074_v11  ;;  %v4621_v53 = vsel %vm144_vm1, %v13194_v36, 0.0 }
0x1514   :  { %4622 = vadd.xlane.f32.xlu1 %v4621_v53  ;;  %v10157_v44 = vpop.f32.mrf.mxu0 }
0x1515   :  { %v13199_v38 = vadd.f32 %v4605_v17, %v4600_v47 }
0x1516   :  { %v4592_v2 = vpop.f32.mrf.mxu0 }
0x1517   :  { %v4601_v46 = vadd.f32 %v4592_v2, %v13079_v16  ;;  %v4624_v20 = vsel %vm144_vm1, %v13199_v38, 0.0  ;;  %v4693_v2 = vrot.slane %v13127_v24, %v11692_v54 }
0x1518   :  { %4625 = vadd.xlane.f32.xlu0 %v4624_v20  ;;  %v10158_v5 = vpop.f32.mrf.mxu0 }
0x1519   :  { %v13204_v40 = vadd.f32 %v4605_v17, %v4601_v46  ;;  %v4703_v5 = vrot.slane %v13127_v24, %v11698_v62 }
0x151b   :  { %v4627_v11 = vsel %vm144_vm1, %v13204_v40, 0.0 }
0x151c   :  { %4628 = vadd.xlane.f32.xlu1 %v4627_v11 }
0x1564   :  { %v4614_v4 = vpop.xlane.xlu0 %4613 }
0x1565   :  { %v4630_v34 = vmul.f32 0.03125, %v4614_v4 }
0x1567   :  { %v4636_v10 = vsub.f32 %v13179_v33, %v4630_v34 }
0x1568   :  { %v4617_v14 = vpop.xlane.xlu1 %4616 }
0x1569   :  { %v4631_v51 = vmul.f32 0.03125, %v4617_v14  ;;  %v4642_v25 = vmul.f32 %v4636_v10, %v4636_v10 }
0x156b   :  { %v4637_v16 = vsub.f32 %v13184_v6, %v4631_v51  ;;  %v4648_v41 = vsel %vm144_vm1, %v4642_v25, 0.0 }
0x156c   :  { %4649 = vadd.xlane.f32.xlu0 %v4648_v41 }
0x156d   :  { %v4643_v56 = vmul.f32 %v4637_v16, %v4637_v16 }
0x156f   :  { %v4651_v28 = vsel %vm144_vm1, %v4643_v56, 0.0 }
0x1570   :  { %4652 = vadd.xlane.f32.xlu1 %v4651_v28 }
0x1599   :  { %v4620_v8 = vpop.xlane.xlu0 %4619 }
0x159a   :  { %v4632_v42 = vmul.f32 0.03125, %v4620_v8 }
0x159c   :  { %v4638_v9 = vsub.f32 %v13189_v31, %v4632_v42 }
0x159d   :  { %v4623_v37 = vpop.xlane.xlu1 %4622 }
0x159e   :  { %v4633_v19 = vmul.f32 0.03125, %v4623_v37  ;;  %v4644_v35 = vmul.f32 %v4638_v9, %v4638_v9 }
0x15a0   :  { %v4639_v45 = vsub.f32 %v13194_v36, %v4633_v19  ;;  %v4654_v17 = vsel %vm144_vm1, %v4644_v35, 0.0 }
0x15a1   :  { %4655 = vadd.xlane.f32.xlu0 %v4654_v17  ;;  %v4626_v63 = vpop.xlane.xlu0 %4625 }
0x15a2   :  { %v4634_v49 = vmul.f32 0.03125, %v4626_v63  ;;  %v4645_v55 = vmul.f32 %v4639_v45, %v4639_v45 }
0x15a4   :  { %v4640_v18 = vsub.f32 %v13199_v38, %v4634_v49  ;;  %v4657_v32 = vsel %vm144_vm1, %v4645_v55, 0.0 }
0x15a5   :  { %4658 = vadd.xlane.f32.xlu1 %v4657_v32  ;;  %v4629_v59 = vpop.xlane.xlu1 %4628 }
0x15a6   :  { %v4635_v60 = vmul.f32 0.03125, %v4629_v59  ;;  %v4646_v3 = vmul.f32 %v4640_v18, %v4640_v18 }
0x15a8   :  { %v4641_v52 = vsub.f32 %v13204_v40, %v4635_v60  ;;  %v4660_v1 = vsel %vm144_vm1, %v4646_v3, 0.0 }
0x15a9   :  { %4661 = vadd.xlane.f32.xlu0 %v4660_v1 }
0x15aa   :  { %v4647_v57 = vmul.f32 %v4641_v52, %v4641_v52 }
0x15ac   :  { %v4663_v39 = vsel %vm144_vm1, %v4647_v57, 0.0 }
0x15ad   :  { %4664 = vadd.xlane.f32.xlu1 %v4663_v39 }
0x15f5   :  { %v4650_v50 = vpop.xlane.xlu0 %4649 }
0x15f6   :  { %v4666_v13 = vmul.f32 0.03125, %v4650_v50 }
0x15f8   :  { %v4672_v29 = vadd.f32 1e-05, %v4666_v13 }
0x15f9   :  { %v4653_v30 = vpop.xlane.xlu1 %4652 }
0x15fa   :  { %11212 = vrsqrt.f32 %v4672_v29  ;;  %v4667_v47 = vmul.f32 0.03125, %v4653_v30 }
0x15fc   :  { %v4673_v53 = vadd.f32 1e-05, %v4667_v47 }
0x15fe   :  { %11214 = vrsqrt.f32 %v4673_v53 }
0x1607   :  { %v11213_v44 = vpop.eup %11212 }
0x1608   :  { %v4684_v46 = vmul.f32 %v11213_v44, %v4636_v10 }
0x160a   :  { %v4694_v11 = vmul.f32 %v4693_v2, %v4684_v46 }
0x160b   :  { %v11215_v20 = vpop.eup %11214 }
0x160c   :  { %v4685_v4 = vmul.f32 %v11215_v20, %v4637_v16  ;;  %v4704_v14 = vadd.f32 %v4703_v5, %v4694_v11 }
0x160e   :  { %v4695_v34 = vmul.f32 %v4693_v2, %v4685_v4 }
0x1610   :  { %v4705_v51 = vadd.f32 %v4703_v5, %v4695_v34 }
0x1612   :  { %v4710_v25 = vpack.c.bf16 %v4705_v51, %v4704_v14 }
0x1614   :  { %10164 = vmatmul.mubr.msk.bf16.vlgmr.msra.gmra.mxu1 %vm144_vm1, %v4710_v25 }
0x1615   :  { %10167 = vmatprep.mubr.msk.bf16.mxu1 %vm11524_vm0, %v11523_v0 }
0x162a   :  { %v4656_v41 = vpop.xlane.xlu0 %4655 }
0x162b   :  { %v4668_v56 = vmul.f32 0.03125, %v4656_v41 }
0x162d   :  { %v4674_v28 = vadd.f32 1e-05, %v4668_v56 }
0x162e   :  { %v4659_v27 = vpop.xlane.xlu1 %4658 }
0x162f   :  { %11216 = vrsqrt.f32 %v4674_v28  ;;  %v4669_v10 = vmul.f32 0.03125, %v4659_v27 }
0x1631   :  { %v4675_v12 = vadd.f32 1e-05, %v4669_v10 }
0x1632   :  { %v4662_v7 = vpop.xlane.xlu0 %4661 }
0x1633   :  { %11218 = vrsqrt.f32 %v4675_v12  ;;  %v4670_v26 = vmul.f32 0.03125, %v4662_v7 }
0x1635   :  { %v4676_v16 = vadd.f32 1e-05, %v4670_v26 }
0x1636   :  { %v4665_v61 = vpop.xlane.xlu1 %4664 }
0x1637   :  { %11220 = vrsqrt.f32 %v4676_v16  ;;  %v4671_v21 = vmul.f32 0.03125, %v4665_v61 }
0x1639   :  { %v4677_v8 = vadd.f32 1e-05, %v4671_v21 }
0x163b   :  { %11222 = vrsqrt.f32 %v4677_v8 }
0x163c   :  { %v11217_v42 = vpop.eup %11216 }
0x163d   :  { %v4686_v37 = vmul.f32 %v11217_v42, %v4638_v9 }
0x163f   :  { %v4696_v17 = vmul.f32 %v4693_v2, %v4686_v37 }
0x1640   :  { %v11219_v19 = vpop.eup %11218 }
0x1641   :  { %v4687_v35 = vmul.f32 %v11219_v19, %v4639_v45  ;;  %v4706_v32 = vadd.f32 %v4703_v5, %v4696_v17 }
0x1643   :  { %v4697_v63 = vmul.f32 %v4693_v2, %v4687_v35 }
0x1644   :  { %v11221_v49 = vpop.eup %11220 }
0x1645   :  { %v4688_v55 = vmul.f32 %v11221_v49, %v4640_v18  ;;  %v4707_v59 = vadd.f32 %v4703_v5, %v4697_v63  ;;  %v4718_v18 = vrot.slane %v13127_v24, %v11717_v15 }
0x1647   :  { %v4711_v60 = vpack.c.bf16 %v4707_v59, %v4706_v32  ;;  %v4698_v57 = vmul.f32 %v4693_v2, %v4688_v55 }
0x1648   :  { %v11223_v3 = vpop.eup %11222 }
0x1649   :  { %v4689_v1 = vmul.f32 %v11223_v3, %v4641_v52  ;;  %10168 = vmatmul.mubr.msk.bf16.gmra.mxu1 %vm144_vm1, %v4711_v60  ;;  %v4708_v50 = vadd.f32 %v4703_v5, %v4698_v57 }
0x164a   :  { %10171 = vmatprep.mubr.msk.bf16.mxu1 %vm11524_vm0, %v11523_v0 }
0x164b   :  { %v4699_v39 = vmul.f32 %v4693_v2, %v4689_v1 }
0x164d   :  { %v4709_v9 = vadd.f32 %v4703_v5, %v4699_v39 }
0x164f   :  { %v4712_v13 = vpack.c.bf16 %v4709_v9, %v4708_v50 }
0x1651   :  { %10172 = vmatmul.mubr.msk.bf16.gmra.mxu1 %vm144_vm1, %v4712_v13 }
0x1652   :  { %10183 = vmatprep.mubr.msk.bf16.mxu1 %vm11524_vm0, %v11523_v0 }
0x16d4   :  { %v4762_v45 = vpop.f32.mrf.mxu1 }
0x16d5   :  { %v4763_v30 = vadd.f32 %v4762_v45, %v4718_v18 }
0x16d6   :  { %v10165_v52 = vpop.f32.mrf.mxu1 }
0x16d8   :  { %v4765_v29 = vpop.f32.mrf.mxu1 }
0x16d9   :  { %v4766_v47 = vadd.f32 %v4765_v29, %v4718_v18 }
0x16da   :  { %v10166_v53 = vpop.f32.mrf.mxu1 }
0x16db   :  { %v10792_v44 = vpack.i.bf16 %v4766_v47, %v4763_v30  ;;  %v13249_v46 = vpack.c.bf16 %v4766_v47, %v4763_v30 }
0x16dd   :  { %10793 = vrot.lane.b32.xlu0 %v10792_v44, %s11526_s25 }
0x1709   :  { %v4770_v2 = vpop.f32.mrf.mxu1 }
0x170a   :  { %v4771_v11 = vadd.f32 %v4770_v2, %v4718_v18 }
0x170b   :  { %v10169_v20 = vpop.f32.mrf.mxu1 }
0x170d   :  { %v4773_v5 = vpop.f32.mrf.mxu1 }
0x170e   :  { %v4774_v4 = vadd.f32 %v4773_v5, %v4718_v18 }
0x170f   :  { %v10170_v34 = vpop.f32.mrf.mxu1 }
0x1710   :  { %v10812_v14 = vpack.i.bf16 %v4774_v4, %v4771_v11  ;;  %v4846_v10 = vpack.c.bf16 %v4774_v4, %v4771_v11 }
0x1711   :  { %v4778_v51 = vpop.f32.mrf.mxu1 }
0x1712   :  { %10813 = vrot.lane.b32.xlu0 %v10812_v14, %s11527_s26  ;;  %10798 = vrot.lane.b32.xlu1 %v10812_v14, %s11526_s25  ;;  %v4779_v41 = vadd.f32 %v4778_v51, %v4718_v18 }
0x1713   :  { %v10173_v24 = vpop.f32.mrf.mxu1 }
0x1715   :  { %v4781_v25 = vpop.f32.mrf.mxu1 }
0x1716   :  { %v4782_v56 = vadd.f32 %v4781_v25, %v4718_v18  ;;  %10823 = vrot.lane.b32.xlu0 %v10792_v44, %s11528_s27 }
0x1717   :  { %v10174_v28 = vpop.f32.mrf.mxu1 }
0x1718   :  { %v10832_v27 = vpack.i.bf16 %v4782_v56, %v4779_v41  ;;  %v13263_v12 = vpack.c.bf16 %v4782_v56, %v4779_v41 }
0x171a   :  { %10833 = vrot.lane.b32.xlu0 %v10832_v27, %s11528_s27  ;;  %10803 = vrot.lane.b32.xlu1 %v10832_v27, %s11526_s25 }
0x171e   :  { %4908 = vrot.lane.b32.xlu0 %v4846_v10, %s11529_s29  ;;  %10808 = vrot.lane.b32.xlu1 %v10792_v44, %s11527_s26 }
0x1722   :  { %10818 = vrot.lane.b32.xlu1 %v10832_v27, %s11527_s26 }
0x1726   :  { %10828 = vrot.lane.b32.xlu1 %v10812_v14, %s11528_s27 }
0x172a   :  { %4858 = vrot.lane.b32.xlu1 %v13249_v46, %s11529_s29 }
0x172e   :  { %4958 = vrot.lane.b32.xlu1 %v13263_v12, %s11529_s29 }
0x174f   :  { %v10794_v7 = vpop.permute.xlu0 %10793 }
0x1750   :  { %v10796_v26 = vunpack.i.h.bf16 %v10794_v7  ;;  %v10795_v16 = vunpack.i.l.bf16 %v10794_v7 }
0x1752   :  { %v13267_v61 = vpack.c.bf16 %v10796_v26, %v10795_v16 }
0x1754   :  { %5008 = vrot.lane.b32.xlu0 %v13267_v61, %s11529_s29 }
0x1784   :  { %v10814_v21 = vpop.permute.xlu0 %10813  ;;  %v10799_v8 = vpop.permute.xlu1 %10798 }
0x1785   :  { %v10801_v42 = vunpack.i.h.bf16 %v10799_v8  ;;  %v10800_v37 = vunpack.i.l.bf16 %v10799_v8  ;;  %v10816_v32 = vunpack.i.h.bf16 %v10814_v21  ;;  %v10815_v59 = vunpack.i.l.bf16 %v10814_v21 }
0x1787   :  { %v13271_v19 = vpack.c.bf16 %v10801_v42, %v10800_v37  ;;  %v13280_v9 = vpack.c.bf16 %v10816_v32, %v10815_v59 }
0x1788   :  { %v10824_v35 = vpop.permute.xlu0 %10823 }
0x1789   :  { %5058 = vrot.lane.b32.xlu1 %v13271_v19, %s11529_s29  ;;  %v10826_v13 = vunpack.i.h.bf16 %v10824_v35  ;;  %v10825_v45 = vunpack.i.l.bf16 %v10824_v35 }
0x178b   :  { %v13289_v47 = vpack.c.bf16 %v10826_v13, %v10825_v45 }
0x178c   :  { %v10834_v17 = vpop.permute.xlu0 %10833  ;;  %v10804_v63 = vpop.permute.xlu1 %10803 }
0x178d   :  { %v10806_v49 = vunpack.i.h.bf16 %v10804_v63  ;;  %v10805_v55 = vunpack.i.l.bf16 %v10804_v63  ;;  %v10836_v53 = vunpack.i.h.bf16 %v10834_v17  ;;  %v10835_v44 = vunpack.i.l.bf16 %v10834_v17 }
0x178f   :  { %v13275_v60 = vpack.c.bf16 %v10806_v49, %v10805_v55  ;;  %v13300_v4 = vpack.c.bf16 %v10836_v53, %v10835_v44 }
0x1790   :  { %v4909_v3 = vpop.permute.xlu0 %4908  ;;  %v10809_v1 = vpop.permute.xlu1 %10808 }
0x1791   :  { %v4914_v57 = vsel %vm500_vm2, %v4909_v3, 0  ;;  %v10811_v39 = vunpack.i.h.bf16 %v10809_v1  ;;  %v10810_v50 = vunpack.i.l.bf16 %v10809_v1  ;;  %5108 = vrot.lane.b32.xlu0 %v13275_v60, %s11529_s29 }
0x1792   :  { %10182 = vmatpush3.bf16.xpose.msra.mxu1 %v4914_v57 }
0x1793   :  { %v13282_v18 = vpack.c.bf16 %v10811_v39, %v10810_v50  ;;  %10193 = vmatprep.subr.bf16.mxu1 %v11523_v0  ;;  %v13392_v39 = vld [vmem:[%s14787_s1] sm:$0xff] }
0x1794   :  { %v10819_v52 = vpop.permute.xlu1 %10818 }
0x1795   :  { %v10821_v29 = vunpack.i.h.bf16 %v10819_v52  ;;  %v10820_v30 = vunpack.i.l.bf16 %v10819_v52  ;;  %5208 = vrot.lane.b32.xlu0 %v13280_v9, %s11529_s29  ;;  %5158 = vrot.lane.b32.xlu1 %v13282_v18, %s11529_s29 }
0x1797   :  { %v13291_v2 = vpack.c.bf16 %v10821_v29, %v10820_v30  ;;  %v13402_v30 = vld [vmem:[%s14787_s1 + $0x8] sm:$0xff] }
0x1798   :  { %v10829_v20 = vpop.permute.xlu1 %10828 }
0x1799   :  { %v10831_v5 = vunpack.i.h.bf16 %v10829_v20  ;;  %v10830_v11 = vunpack.i.l.bf16 %v10829_v20  ;;  %10184 = vmatmul.mubr.msk.bf16.vlgmr.msra.gmra.mxu1 %vm500_vm2, %v4846_v10  ;;  %5308 = vrot.lane.b32.xlu0 %v13289_v47, %s11529_s29 }
0x179a   :  { %5258 = vrot.lane.b32.xlu1 %v13291_v2, %s11529_s29  ;;  %10195 = vmatprep.mubr.msk.bf16.mxu1 %vm11524_vm0, %v11523_v0 }
0x179b   :  { %v13302_v34 = vpack.c.bf16 %v10831_v5, %v10830_v11 }
0x179c   :  { %v4859_v14 = vpop.permute.xlu1 %4858 }
0x179d   :  { %v4864_v51 = vsel %vm500_vm2, %v4859_v14, 0  ;;  %5408 = vrot.lane.b32.xlu0 %v13300_v4, %s11529_s29 }
0x179e   :  { %5358 = vrot.lane.b32.xlu1 %v13302_v34, %s11529_s29  ;;  %10176 = vmatpush3.bf16.xpose.msra.mxu0 %v4864_v51 }
0x179f   :  { %10187 = vmatprep.subr.bf16.mxu0 %v11523_v0 }
0x17a0   :  { %v4959_v24 = vpop.permute.xlu1 %4958 }
0x17a1   :  { %5828 = vrot.lane.b32.xlu0 %v4846_v10, %s11530_s30  ;;  %v4964_v25 = vsel %vm500_vm2, %v4959_v24, 0 }
0x17a2   :  { %5781 = vrot.lane.b32.xlu1 %v13249_v46, %s11530_s30 }
0x17a5   :  { %10178 = vmatmul.mubr.msk.bf16.vlgmr.msra.gmra.mxu0 %vm500_vm2, %v13249_v46  ;;  %5922 = vrot.lane.b32.xlu0 %v13267_v61, %s11530_s30 }
0x17a6   :  { %5875 = vrot.lane.b32.xlu1 %v13263_v12, %s11530_s30  ;;  %10188 = vmatpush3.bf16.xpose.msra.mxu0 %v4964_v25 }
0x17a7   :  { %10189 = vmatprep.mubr.msk.bf16.mxu0 %vm11524_vm0, %v11523_v0  ;;  %10199 = vmatprep.subr.bf16.mxu0 %v11523_v0 }
0x17a9   :  { %6016 = vrot.lane.b32.xlu0 %v13275_v60, %s11530_s30 }
0x17aa   :  { %5969 = vrot.lane.b32.xlu1 %v13271_v19, %s11530_s30 }
0x17ad   :  { %10190 = vmatmul.mubr.msk.bf16.vlgmr.msra.gmra.mxu0 %vm500_vm2, %v13263_v12 }
0x17ae   :  { %6063 = vrot.lane.b32.xlu1 %v13282_v18, %s11530_s30  ;;  %10201 = vmatprep.mubr.msk.bf16.mxu0 %vm11524_vm0, %v11523_v0 }
0x17c6   :  { %v5009_v46 = vpop.permute.xlu0 %5008 }
0x17c7   :  { %v5014_v41 = vsel %vm500_vm2, %v5009_v46, 0 }
0x17c8   :  { %10194 = vmatpush3.bf16.xpose.msra.mxu1 %v5014_v41 }
0x17c9   :  { %10205 = vmatprep.subr.bf16.mxu1 %v11523_v0 }
0x17cf   :  { %10196 = vmatmul.mubr.msk.bf16.vlgmr.msra.gmra.mxu1 %vm500_vm2, %v13267_v61 }
0x17d0   :  { %10207 = vmatprep.mubr.msk.bf16.mxu1 %vm11524_vm0, %v11523_v0 }
0x17fb   :  { %v5059_v56 = vpop.permute.xlu1 %5058 }
0x17fc   :  { %v5064_v28 = vsel %vm500_vm2, %v5059_v56, 0 }
0x17fd   :  { %10200 = vmatpush3.bf16.xpose.msra.mxu0 %v5064_v28 }
0x17fe   :  { %10211 = vmatprep.subr.bf16.mxu0 %v11523_v0 }
0x1803   :  { %v5109_v27 = vpop.permute.xlu0 %5108 }
0x1804   :  { %v5114_v10 = vsel %vm500_vm2, %v5109_v27, 0  ;;  %10202 = vmatmul.mubr.msk.bf16.vlgmr.msra.gmra.mxu0 %vm500_vm2, %v13271_v19 }
0x1805   :  { %10206 = vmatpush3.bf16.xpose.msra.mxu1 %v5114_v10  ;;  %10213 = vmatprep.mubr.msk.bf16.mxu0 %vm11524_vm0, %v11523_v0 }
0x1806   :  { %10217 = vmatprep.subr.bf16.mxu1 %v11523_v0 }
0x1807   :  { %v5159_v12 = vpop.permute.xlu1 %5158  ;;  %v5209_v26 = vpop.permute.xlu0 %5208 }
0x1808   :  { %v5164_v7 = vsel %vm500_vm2, %v5159_v12, 0  ;;  %v5214_v16 = vsel %vm500_vm2, %v5209_v26, 0 }
0x1809   :  { %10212 = vmatpush3.bf16.xpose.msra.mxu0 %v5164_v7 }
0x180a   :  { %10223 = vmatprep.subr.bf16.mxu0 %v11523_v0 }
0x180b   :  { %v5309_v8 = vpop.permute.xlu0 %5308 }
0x180c   :  { %10208 = vmatmul.mubr.msk.bf16.vlgmr.msra.gmra.mxu1 %vm500_vm2, %v13275_v60  ;;  %v5259_v61 = vpop.permute.xlu1 %5258  ;;  %v5314_v42 = vsel %vm500_vm2, %v5309_v8, 0 }
0x180d   :  { %10218 = vmatpush3.bf16.xpose.msra.mxu1 %v5214_v16  ;;  %10219 = vmatprep.mubr.msk.bf16.mxu1 %vm11524_vm0, %v11523_v0  ;;  %v5264_v21 = vsel %vm500_vm2, %v5259_v61, 0 }
0x180e   :  { %10229 = vmatprep.subr.bf16.mxu1 %v11523_v0 }
0x180f   :  { %v5409_v35 = vpop.permute.xlu0 %5408 }
0x1810   :  { %10214 = vmatmul.mubr.msk.bf16.vlgmr.msra.gmra.mxu0 %vm500_vm2, %v13282_v18  ;;  %v5359_v37 = vpop.permute.xlu1 %5358  ;;  %v5414_v17 = vsel %vm500_vm2, %v5409_v35, 0 }
0x1811   :  { %10224 = vmatpush3.bf16.xpose.msra.mxu0 %v5264_v21  ;;  %10225 = vmatprep.mubr.msk.bf16.mxu0 %vm11524_vm0, %v11523_v0  ;;  %v5364_v19 = vsel %vm500_vm2, %v5359_v37, 0 }
0x1812   :  { %10235 = vmatprep.subr.bf16.mxu0 %v11523_v0 }
0x1813   :  { %v5829_v49 = vpop.permute.xlu0 %5828 }
0x1814   :  { %10220 = vmatmul.mubr.msk.bf16.vlgmr.msra.gmra.mxu1 %vm500_vm2, %v13280_v9  ;;  %v5782_v63 = vpop.permute.xlu1 %5781 }
0x1815   :  { %10230 = vmatpush3.bf16.xpose.msra.mxu1 %v5314_v42  ;;  %10231 = vmatprep.mubr.msk.bf16.mxu1 %vm11524_vm0, %v11523_v0 }
0x1816   :  { %10241 = vmatprep.subr.bf16.mxu1 %v11523_v0 }
0x1818   :  { %10226 = vmatmul.mubr.msk.bf16.vlgmr.msra.gmra.mxu0 %vm500_vm2, %v13291_v2 }
0x1819   :  { %10236 = vmatpush3.bf16.xpose.msra.mxu0 %v5364_v19  ;;  %10237 = vmatprep.mubr.msk.bf16.mxu0 %vm11524_vm0, %v11523_v0 }
0x181a   :  { %10247 = vmatprep.subr.bf16.mxu0 %v11523_v0 }
0x181c   :  { %10232 = vmatmul.mubr.msk.bf16.vlgmr.msra.gmra.mxu1 %vm500_vm2, %v13289_v47 }
0x181d   :  { %10242 = vmatpush3.bf16.xpose.msra.mxu1 %v5414_v17  ;;  %10243 = vmatprep.mubr.msk.bf16.mxu1 %vm11524_vm0, %v11523_v0 }
0x181e   :  { %10253 = vmatprep.subr.bf16.mxu1 %v11523_v0 }
0x1820   :  { %10238 = vmatmul.mubr.msk.bf16.vlgmr.msra.gmra.mxu0 %vm500_vm2, %v13302_v34 }
0x1821   :  { %10248 = vmatpush3.bf16.msra.mxu0 %v5782_v63  ;;  %10249 = vmatprep.mubr.msk.bf16.mxu0 %vm11524_vm0, %v11523_v0 }
0x1822   :  { %10259 = vmatprep.subr.bf16.mxu0 %v11523_v0 }
0x1824   :  { %10244 = vmatmul.mubr.msk.bf16.vlgmr.msra.gmra.mxu1 %vm500_vm2, %v13300_v4 }
0x1825   :  { %10254 = vmatpush3.bf16.msra.mxu1 %v5829_v49  ;;  %10255 = vmatprep.mubr.msk.bf16.mxu1 %vm11524_vm0, %v11523_v0 }
0x1826   :  { %10265 = vmatprep.subr.bf16.mxu1 %v11523_v0 }
0x1859   :  { %v4950_v55 = vpop.f32.mrf.mxu1 }
0x185a   :  { %v5459_v45 = vmul.f32 0.35355338, %v4950_v55 }
0x185b   :  { %v10185_v32 = vpop.f32.mrf.mxu1 }
0x185c   :  { %v13408_v20 = vadd.f32 %v13392_v39, %v5459_v45 }
0x185d   :  { %v4953_v59 = vpop.f32.mrf.mxu1 }
0x185e   :  { %v5460_v5 = vmul.f32 0.35355338, %v4953_v59  ;;  %v5511_v56 = vsel %vm1146_vm3, %v13408_v20, -inf }
0x185f   :  { %v10186_v60 = vpop.f32.mrf.mxu1 }
0x1860   :  { %v13416_v46 = vadd.f32 %v13402_v30, %v5460_v5 }
0x1862   :  { %v5514_v12 = vsel %vm1146_vm3, %v13416_v46, -inf }
0x1865   :  { %v4900_v3 = vpop.f32.mrf.mxu0 }
0x1866   :  { %v5457_v1 = vmul.f32 0.35355338, %v4900_v3 }
0x1867   :  { %v10179_v57 = vpop.f32.mrf.mxu0 }
0x1868   :  { %v13395_v50 = vadd.f32 %v13392_v39, %v5457_v1 }
0x1869   :  { %v4903_v13 = vpop.f32.mrf.mxu0 }
0x186a   :  { %v5458_v18 = vmul.f32 0.35355338, %v4903_v13  ;;  %v5505_v52 = vsel %vm1146_vm3, %v13395_v50, -inf }
0x186b   :  { %5506 = vmax.xlane.f32.xlu1 %v5505_v52  ;;  %v10180_v29 = vpop.f32.mrf.mxu0 }
0x186c   :  { %v13405_v53 = vadd.f32 %v13402_v30, %v5458_v18 }
0x186d   :  { %v5000_v44 = vpop.f32.mrf.mxu0 }
0x186e   :  { %v5461_v11 = vmul.f32 0.35355338, %v5000_v44  ;;  %v5508_v14 = vsel %vm1146_vm3, %v13405_v53, -inf }
0x186f   :  { %5509 = vmax.xlane.f32.xlu0 %v5508_v14  ;;  %v10191_v51 = vpop.f32.mrf.mxu0 }
0x1870   :  { %v13413_v24 = vadd.f32 %v13392_v39, %v5461_v11 }
0x1871   :  { %v5003_v25 = vpop.f32.mrf.mxu0 }
0x1872   :  { %v5462_v41 = vmul.f32 0.35355338, %v5003_v25  ;;  %v5517_v28 = vsel %vm1146_vm3, %v13413_v24, -inf }
0x1873   :  { %5512 = vmax.xlane.f32.xlu0 %v5511_v56  ;;  %5518 = vmax.xlane.f32.xlu1 %v5517_v28  ;;  %v10192_v27 = vpop.f32.mrf.mxu0 }
0x1874   :  { %v13423_v10 = vadd.f32 %v13402_v30, %v5462_v41 }
0x1876   :  { %v5520_v7 = vsel %vm1146_vm3, %v13423_v10, -inf }
0x1877   :  { %5515 = vmax.xlane.f32.xlu0 %v5514_v12 }
0x187b   :  { %5521 = vmax.xlane.f32.xlu0 %v5520_v7 }
0x188f   :  { %v5050_v26 = vpop.f32.mrf.mxu1 }
0x1890   :  { %v5463_v16 = vmul.f32 0.35355338, %v5050_v26 }
0x1891   :  { %v10197_v61 = vpop.f32.mrf.mxu1 }
0x1892   :  { %v13430_v21 = vadd.f32 %v13392_v39, %v5463_v16 }
0x1893   :  { %v5053_v8 = vpop.f32.mrf.mxu1 }
0x1894   :  { %v5464_v42 = vmul.f32 0.35355338, %v5053_v8  ;;  %v5523_v37 = vsel %vm1146_vm3, %v13430_v21, -inf }
0x1895   :  { %v10198_v19 = vpop.f32.mrf.mxu1  ;;  %5524 = vmax.xlane.f32.xlu1 %v5523_v37 }
0x1896   :  { %v13435_v35 = vadd.f32 %v13402_v30, %v5464_v42 }
0x1898   :  { %v5526_v17 = vsel %vm1146_vm3, %v13435_v35, -inf }
0x1899   :  { %5527 = vmax.xlane.f32.xlu0 %v5526_v17 }
0x18c4   :  { %v5100_v63 = vpop.f32.mrf.mxu0 }
0x18c5   :  { %v5465_v49 = vmul.f32 0.35355338, %v5100_v63 }
0x18c6   :  { %v10203_v55 = vpop.f32.mrf.mxu0 }
0x18c7   :  { %v13440_v32 = vadd.f32 %v13392_v39, %v5465_v49 }
0x18c8   :  { %v5103_v59 = vpop.f32.mrf.mxu0 }
0x18c9   :  { %v5466_v60 = vmul.f32 0.35355338, %v5103_v59  ;;  %v5529_v3 = vsel %vm1146_vm3, %v13440_v32, -inf }
0x18ca   :  { %5530 = vmax.xlane.f32.xlu1 %v5529_v3  ;;  %v10204_v1 = vpop.f32.mrf.mxu0 }
0x18cb   :  { %v13445_v57 = vadd.f32 %v13402_v30, %v5466_v60 }
0x18cc   :  { %v5150_v13 = vpop.f32.mrf.mxu1 }
0x18cd   :  { %v5467_v45 = vmul.f32 0.35355338, %v5150_v13  ;;  %v5532_v18 = vsel %vm1146_vm3, %v13445_v57, -inf }
0x18ce   :  { %v10209_v52 = vpop.f32.mrf.mxu1  ;;  %5533 = vmax.xlane.f32.xlu0 %v5532_v18 }
0x18cf   :  { %v13450_v29 = vadd.f32 %v13392_v39, %v5467_v45 }
0x18d0   :  { %v5153_v44 = vpop.f32.mrf.mxu1  ;;  %v5200_v5 = vpop.f32.mrf.mxu0 }
0x18d1   :  { %v5468_v11 = vmul.f32 0.35355338, %v5153_v44  ;;  %v5469_v14 = vmul.f32 0.35355338, %v5200_v5  ;;  %v5535_v51 = vsel %vm1146_vm3, %v13450_v29, -inf }
0x18d2   :  { %v10210_v25 = vpop.f32.mrf.mxu1  ;;  %5536 = vmax.xlane.f32.xlu1 %v5535_v51  ;;  %v10215_v41 = vpop.f32.mrf.mxu0 }
0x18d3   :  { %v13455_v56 = vadd.f32 %v13402_v30, %v5468_v11  ;;  %v13458_v28 = vadd.f32 %v13392_v39, %v5469_v14 }
0x18d4   :  { %v5203_v27 = vpop.f32.mrf.mxu0  ;;  %v5250_v12 = vpop.f32.mrf.mxu1 }
0x18d5   :  { %v5470_v7 = vmul.f32 0.35355338, %v5203_v27  ;;  %v5471_v26 = vmul.f32 0.35355338, %v5250_v12  ;;  %v5538_v16 = vsel %vm1146_vm3, %v13455_v56, -inf  ;;  %v5541_v61 = vsel %vm1146_vm3, %v13458_v28, -inf }
0x18d6   :  { %v10221_v8 = vpop.f32.mrf.mxu1  ;;  %5539 = vmax.xlane.f32.xlu0 %v5538_v16  ;;  %5542 = vmax.xlane.f32.xlu1 %v5541_v61  ;;  %v10216_v42 = vpop.f32.mrf.mxu0 }
0x18d7   :  { %v13465_v37 = vadd.f32 %v13402_v30, %v5470_v7  ;;  %v13468_v19 = vadd.f32 %v13392_v39, %v5471_v26 }
0x18d8   :  { %v5253_v17 = vpop.f32.mrf.mxu1  ;;  %v5300_v63 = vpop.f32.mrf.mxu0 }
0x18d9   :  { %v5472_v49 = vmul.f32 0.35355338, %v5253_v17  ;;  %v5473_v55 = vmul.f32 0.35355338, %v5300_v63  ;;  %v5547_v59 = vsel %vm1146_vm3, %v13468_v19, -inf  ;;  %v5544_v60 = vsel %vm1146_vm3, %v13465_v37, -inf  ;;  %v13494_v63 = vpop.permute.xlu1 %5875 }
0x18da   :  { %v10222_v3 = vpop.f32.mrf.mxu1  ;;  %5548 = vmax.xlane.f32.xlu1 %v5547_v59  ;;  %5545 = vmax.xlane.f32.xlu0 %v5544_v60  ;;  %v10227_v1 = vpop.f32.mrf.mxu0 }
0x18db   :  { %v13475_v13 = vadd.f32 %v13402_v30, %v5472_v49  ;;  %v13478_v45 = vadd.f32 %v13392_v39, %v5473_v55 }
0x18dc   :  { %v5303_v18 = vpop.f32.mrf.mxu0  ;;  %v5350_v52 = vpop.f32.mrf.mxu1 }
0x18dd   :  { %v5474_v44 = vmul.f32 0.35355338, %v5303_v18  ;;  %v5475_v5 = vmul.f32 0.35355338, %v5350_v52  ;;  %v5550_v11 = vsel %vm1146_vm3, %v13475_v13, -inf  ;;  %v5553_v14 = vsel %vm1146_vm3, %v13478_v45, -inf }
0x18de   :  { %v10233_v51 = vpop.f32.mrf.mxu1  ;;  %5551 = vmax.xlane.f32.xlu0 %v5550_v11  ;;  %5554 = vmax.xlane.f32.xlu1 %v5553_v14  ;;  %v10228_v25 = vpop.f32.mrf.mxu0 }
0x18df   :  { %v13485_v41 = vadd.f32 %v13402_v30, %v5474_v44  ;;  %v13488_v27 = vadd.f32 %v13392_v39, %v5475_v5 }
0x18e0   :  { %v5353_v12 = vpop.f32.mrf.mxu1  ;;  %v5400_v7 = vpop.f32.mrf.mxu0 }
0x18e1   :  { %v5476_v26 = vmul.f32 0.35355338, %v5353_v12  ;;  %v5477_v16 = vmul.f32 0.35355338, %v5400_v7  ;;  %v5559_v61 = vsel %vm1146_vm3, %v13488_v27, -inf  ;;  %v5556_v8 = vsel %vm1146_vm3, %v13485_v41, -inf }
0x18e2   :  { %v10234_v42 = vpop.f32.mrf.mxu1  ;;  %5560 = vmax.xlane.f32.xlu1 %v5559_v61  ;;  %5557 = vmax.xlane.f32.xlu0 %v5556_v8  ;;  %v10239_v17 = vpop.f32.mrf.mxu0 }
0x18e3   :  { %v13497_v49 = vadd.f32 %v13402_v30, %v5476_v26  ;;  %v13500_v55 = vadd.f32 %v13392_v39, %v5477_v16  ;;  %v13516_v26 = vpop.permute.xlu1 %5969  ;;  %v13523_v8 = vpop.permute.xlu0 %5922 }
0x18e4   :  { %v5403_v59 = vpop.f32.mrf.mxu0  ;;  %v5450_v60 = vpop.f32.mrf.mxu1 }
0x18e5   :  { %v5478_v3 = vmul.f32 0.35355338, %v5403_v59  ;;  %v5479_v1 = vmul.f32 0.35355338, %v5450_v60  ;;  %v5562_v18 = vsel %vm1146_vm3, %v13497_v49, -inf  ;;  %v5565_v52 = vsel %vm1146_vm3, %v13500_v55, -inf }
0x18e6   :  { %v10245_v44 = vpop.f32.mrf.mxu1  ;;  %5563 = vmax.xlane.f32.xlu0 %v5562_v18  ;;  %5566 = vmax.xlane.f32.xlu1 %v5565_v52  ;;  %v10240_v5 = vpop.f32.mrf.mxu0 }
0x18e7   :  { %v13507_v11 = vadd.f32 %v13402_v30, %v5478_v3  ;;  %v13510_v14 = vadd.f32 %v13392_v39, %v5479_v1  ;;  %v13525_v42 = vpop.permute.xlu1 %6063  ;;  %v13527_v17 = vpop.permute.xlu0 %6016 }
0x18e8   :  { %v5453_v51 = vpop.f32.mrf.mxu1 }
0x18e9   :  { %v5480_v25 = vmul.f32 0.35355338, %v5453_v51  ;;  %v5571_v12 = vsel %vm1146_vm3, %v13510_v14, -inf  ;;  %v5568_v7 = vsel %vm1146_vm3, %v13507_v11, -inf }
0x18ea   :  { %v10246_v16 = vpop.f32.mrf.mxu1  ;;  %5572 = vmax.xlane.f32.xlu1 %v5571_v12  ;;  %5569 = vmax.xlane.f32.xlu0 %v5568_v7 }
0x18eb   :  { %v13519_v61 = vadd.f32 %v13402_v30, %v5480_v25 }
0x18ed   :  { %v5574_v39 = vsel %vm1146_vm3, %v13519_v61, -inf }
0x18ee   :  { %5575 = vmax.xlane.f32.xlu0 %v5574_v39 }
0x18f4   :  { %v5507_v59 = vpop.xlane.xlu1 %5506 }
0x18f5   :  { %v5577_v60 = vsub.f32 %v13395_v50, %v5507_v59 }
0x18f7   :  { %v5601_v3 = vmul.f32 1.442695, %v5577_v60 }
0x18f8   :  { %v5510_v1 = vpop.xlane.xlu0 %5509 }
0x18f9   :  { %11224 = vpow2.f32 %v5601_v3  ;;  %v5578_v18 = vsub.f32 %v13405_v53, %v5510_v1 }
0x18fb   :  { %v5603_v30 = vmul.f32 1.442695, %v5578_v18 }
0x18fc   :  { %v5513_v52 = vpop.xlane.xlu0 %5512  ;;  %v5519_v44 = vpop.xlane.xlu1 %5518 }
0x18fd   :  { %11226 = vpow2.f32 %v5603_v30  ;;  %v5579_v5 = vsub.f32 %v13408_v20, %v5513_v52  ;;  %v5581_v51 = vsub.f32 %v13413_v24, %v5519_v44 }
0x18ff   :  { %v5605_v25 = vmul.f32 1.442695, %v5579_v5  ;;  %v5609_v12 = vmul.f32 1.442695, %v5581_v51 }
0x1900   :  { %v5516_v7 = vpop.xlane.xlu0 %5515 }
0x1901   :  { %11228 = vpow2.f32 %v5605_v25  ;;  %v5580_v16 = vsub.f32 %v13416_v46, %v5516_v7 }
0x1902   :  { %11230 = vpow2.f32 %v5609_v12 }
0x1903   :  { %v5607_v50 = vmul.f32 1.442695, %v5580_v16 }
0x1904   :  { %v5522_v39 = vpop.xlane.xlu0 %5521 }
0x1905   :  { %11232 = vpow2.f32 %v5607_v50  ;;  %v5582_v53 = vsub.f32 %v13423_v10, %v5522_v39 }
0x1906   :  { %v13535_v59 = vpop.eup %11224 }
0x1907   :  { %v5611_v60 = vmul.f32 1.442695, %v5582_v53  ;;  %v5649_v20 = vsel %vm1146_vm3, %v13535_v59, 0.0 }
0x1908   :  { %5650 = vadd.xlane.f32.xlu1 %v5649_v20 }
0x1909   :  { %11234 = vpow2.f32 %v5611_v60 }
0x190a   :  { %v13539_v24 = vpop.eup %11226 }
0x190b   :  { %v5652_v3 = vsel %vm1146_vm3, %v13539_v24, 0.0 }
0x190c   :  { %5653 = vadd.xlane.f32.xlu0 %v5652_v3 }
0x190e   :  { %v13543_v46 = vpop.eup %11228 }
0x190f   :  { %v5655_v1 = vsel %vm1146_vm3, %v13543_v46, 0.0  ;;  %v13547_v10 = vpop.eup %11230 }
0x1910   :  { %5656 = vadd.xlane.f32.xlu1 %v5655_v1  ;;  %v5661_v30 = vsel %vm1146_vm3, %v13547_v10, 0.0 }
0x1912   :  { %v13549_v18 = vpop.eup %11232 }
0x1913   :  { %v5658_v52 = vsel %vm1146_vm3, %v13549_v18, 0.0 }
0x1914   :  { %5662 = vadd.xlane.f32.xlu1 %v5661_v30  ;;  %5659 = vadd.xlane.f32.xlu0 %v5658_v52 }
0x1916   :  { %v13555_v44 = vpop.eup %11234 }
0x1917   :  { %v5664_v5 = vsel %vm1146_vm3, %v13555_v44, 0.0 }
0x1918   :  { %5665 = vadd.xlane.f32.xlu0 %v5664_v5 }
0x191e   :  { %v5525_v51 = vpop.xlane.xlu1 %5524 }
0x191f   :  { %v5583_v25 = vsub.f32 %v13430_v21, %v5525_v51 }
0x1921   :  { %v5613_v12 = vmul.f32 1.442695, %v5583_v25 }
0x1922   :  { %v5528_v7 = vpop.xlane.xlu0 %5527 }
0x1923   :  { %11236 = vpow2.f32 %v5613_v12  ;;  %v5584_v16 = vsub.f32 %v13435_v35, %v5528_v7 }
0x1925   :  { %v5615_v50 = vmul.f32 1.442695, %v5584_v16 }
0x1927   :  { %11238 = vpow2.f32 %v5615_v50 }
0x1930   :  { %v13561_v39 = vpop.eup %11236 }
0x1931   :  { %v5667_v53 = vsel %vm1146_vm3, %v13561_v39, 0.0 }
0x1932   :  { %5668 = vadd.xlane.f32.xlu1 %v5667_v53 }
0x1934   :  { %v13565_v60 = vpop.eup %11238 }
0x1935   :  { %v5670_v20 = vsel %vm1146_vm3, %v13565_v60, 0.0 }
0x1936   :  { %5671 = vadd.xlane.f32.xlu0 %v5670_v20 }
0x1953   :  { %v5531_v21 = vpop.xlane.xlu1 %5530 }
0x1954   :  { %v5585_v3 = vsub.f32 %v13440_v32, %v5531_v21 }
0x1956   :  { %v5617_v1 = vmul.f32 1.442695, %v5585_v3 }
0x1957   :  { %v5534_v30 = vpop.xlane.xlu0 %5533 }
0x1958   :  { %11240 = vpow2.f32 %v5617_v1  ;;  %v5586_v35 = vsub.f32 %v13445_v57, %v5534_v30 }
0x195a   :  { %v5619_v52 = vmul.f32 1.442695, %v5586_v35 }
0x195b   :  { %v5537_v5 = vpop.xlane.xlu1 %5536 }
0x195c   :  { %11242 = vpow2.f32 %v5619_v52  ;;  %v5587_v51 = vsub.f32 %v13450_v29, %v5537_v5 }
0x195e   :  { %v5621_v25 = vmul.f32 1.442695, %v5587_v51 }
0x195f   :  { %v5540_v12 = vpop.xlane.xlu0 %5539  ;;  %v5543_v7 = vpop.xlane.xlu1 %5542 }
0x1960   :  { %11244 = vpow2.f32 %v5621_v25  ;;  %v5588_v16 = vsub.f32 %v13455_v56, %v5540_v12  ;;  %v5589_v50 = vsub.f32 %v13458_v28, %v5543_v7 }
0x1962   :  { %v5623_v53 = vmul.f32 1.442695, %v5588_v16  ;;  %v5625_v32 = vmul.f32 1.442695, %v5589_v50 }
0x1963   :  { %v5549_v20 = vpop.xlane.xlu1 %5548  ;;  %v5546_v21 = vpop.xlane.xlu0 %5545 }
0x1964   :  { %11246 = vpow2.f32 %v5623_v53  ;;  %v5591_v57 = vsub.f32 %v13468_v19, %v5549_v20  ;;  %v5590_v3 = vsub.f32 %v13465_v37, %v5546_v21 }
0x1965   :  { %v13576_v1 = vpop.eup %11240  ;;  %11248 = vpow2.f32 %v5625_v32 }
0x1966   :  { %v5629_v29 = vmul.f32 1.442695, %v5591_v57  ;;  %v5627_v30 = vmul.f32 1.442695, %v5590_v3  ;;  %v5673_v35 = vsel %vm1146_vm3, %v13576_v1, 0.0 }
0x1967   :  { %v5552_v56 = vpop.xlane.xlu0 %5551  ;;  %v5555_v52 = vpop.xlane.xlu1 %5554  ;;  %5674 = vadd.xlane.f32.xlu1 %v5673_v35 }
0x1968   :  { %11250 = vpow2.f32 %v5629_v29  ;;  %v5592_v28 = vsub.f32 %v13475_v13, %v5552_v56  ;;  %v5593_v5 = vsub.f32 %v13478_v45, %v5555_v52 }
0x1969   :  { %v13582_v51 = vpop.eup %11242  ;;  %11252 = vpow2.f32 %v5627_v30 }
0x196a   :  { %v5631_v37 = vmul.f32 1.442695, %v5592_v28  ;;  %v5633_v19 = vmul.f32 1.442695, %v5593_v5  ;;  %v5676_v25 = vsel %vm1146_vm3, %v13582_v51, 0.0 }
0x196b   :  { %v5561_v12 = vpop.xlane.xlu1 %5560  ;;  %v5558_v7 = vpop.xlane.xlu0 %5557  ;;  %5677 = vadd.xlane.f32.xlu0 %v5676_v25 }
0x196c   :  { %11254 = vpow2.f32 %v5631_v37  ;;  %v5595_v16 = vsub.f32 %v13488_v27, %v5561_v12  ;;  %v5594_v50 = vsub.f32 %v13485_v41, %v5558_v7 }
0x196d   :  { %v13588_v53 = vpop.eup %11244  ;;  %11256 = vpow2.f32 %v5633_v19 }
0x196e   :  { %v5637_v13 = vmul.f32 1.442695, %v5595_v16  ;;  %v5635_v45 = vmul.f32 1.442695, %v5594_v50  ;;  %v5679_v32 = vsel %vm1146_vm3, %v13588_v53, 0.0 }
0x196f   :  { %v5564_v20 = vpop.xlane.xlu0 %5563  ;;  %5680 = vadd.xlane.f32.xlu1 %v5679_v32  ;;  %v5567_v21 = vpop.xlane.xlu1 %5566 }
0x1970   :  { %11258 = vpow2.f32 %v5637_v13  ;;  %v5596_v57 = vsub.f32 %v13497_v49, %v5564_v20  ;;  %v5597_v3 = vsub.f32 %v13500_v55, %v5567_v21 }
0x1971   :  { %v13594_v29 = vpop.eup %11246  ;;  %11260 = vpow2.f32 %v5635_v45 }
0x1972   :  { %v13596_v41 = vpop.eup %11248  ;;  %v5639_v27 = vmul.f32 1.442695, %v5596_v57  ;;  %v5641_v30 = vmul.f32 1.442695, %v5597_v3  ;;  %v5682_v35 = vsel %vm1146_vm3, %v13594_v29, 0.0 }
0x1973   :  { %v5685_v56 = vsel %vm1146_vm3, %v13596_v41, 0.0  ;;  %5683 = vadd.xlane.f32.xlu0 %v5682_v35  ;;  %v5570_v21 = vpop.xlane.xlu0 %5569  ;;  %v5573_v57 = vpop.xlane.xlu1 %5572 }
0x1974   :  { %11262 = vpow2.f32 %v5639_v27  ;;  %5686 = vadd.xlane.f32.xlu1 %v5685_v56 }
0x1975   :  { %v13602_v52 = vpop.eup %11250  ;;  %11264 = vpow2.f32 %v5641_v30 }
0x1976   :  { %v13604_v49 = vpop.eup %11252  ;;  %v5691_v55 = vsel %vm1146_vm3, %v13602_v52, 0.0 }
0x1977   :  { %v5688_v28 = vsel %vm1146_vm3, %v13604_v49, 0.0  ;;  %v5576_v3 = vpop.xlane.xlu0 %5575 }
0x1978   :  { %5692 = vadd.xlane.f32.xlu1 %v5691_v55  ;;  %5689 = vadd.xlane.f32.xlu0 %v5688_v28  ;;  %v5598_v28 = vsub.f32 %v13507_v11, %v5570_v21 }
0x1979   :  { %v13610_v5 = vpop.eup %11254 }
0x197a   :  { %v13612_v37 = vpop.eup %11256  ;;  %v5694_v19 = vsel %vm1146_vm3, %v13610_v5, 0.0 }
0x197b   :  { %v5697_v25 = vsel %vm1146_vm3, %v13612_v37, 0.0 }
0x197c   :  { %5698 = vadd.xlane.f32.xlu1 %v5697_v25  ;;  %5695 = vadd.xlane.f32.xlu0 %v5694_v19 }
0x197d   :  { %v13618_v12 = vpop.eup %11258 }
0x197e   :  { %v13620_v7 = vpop.eup %11260  ;;  %v5703_v16 = vsel %vm1146_vm3, %v13618_v12, 0.0 }
0x197f   :  { %v5700_v50 = vsel %vm1146_vm3, %v13620_v7, 0.0 }
0x1980   :  { %5704 = vadd.xlane.f32.xlu1 %v5703_v16  ;;  %5701 = vadd.xlane.f32.xlu0 %v5700_v50  ;;  %v5599_v16 = vsub.f32 %v13510_v14, %v5573_v57  ;;  %v5643_v50 = vmul.f32 1.442695, %v5598_v28 }
0x1981   :  { %v13626_v13 = vpop.eup %11262 }
0x1982   :  { %v13628_v45 = vpop.eup %11264  ;;  %v5706_v32 = vsel %vm1146_vm3, %v13626_v13, 0.0 }
0x1983   :  { %v5709_v20 = vsel %vm1146_vm3, %v13628_v45, 0.0 }
0x1984   :  { %5710 = vadd.xlane.f32.xlu1 %v5709_v20  ;;  %5707 = vadd.xlane.f32.xlu0 %v5706_v32 }
0x1991   :  { %v5651_v27 = vpop.xlane.xlu1 %5650 }
0x1992   :  { %11266 = vrcp.f32 %v5651_v27  ;;  %v5645_v27 = vmul.f32 1.442695, %v5599_v16 }
0x1995   :  { %6157 = vrot.lane.b32.xlu1 %v13291_v2, %s11530_s30  ;;  %v5654_v30 = vpop.xlane.xlu0 %5653 }
0x1996   :  { %11268 = vrcp.f32 %v5654_v30 }
0x1999   :  { %6204 = vrot.lane.b32.xlu1 %v13289_v47, %s11530_s30  ;;  %v5657_v35 = vpop.xlane.xlu1 %5656  ;;  %v5600_v47 = vsub.f32 %v13519_v61, %v5576_v3 }
0x199a   :  { %6110 = vrot.lane.b32.xlu0 %v13280_v9, %s11530_s30  ;;  %11270 = vrcp.f32 %v5657_v35 }
0x199b   :  { %v5647_v30 = vmul.f32 1.442695, %v5600_v47 }
0x199d   :  { %v5663_v56 = vpop.xlane.xlu1 %5662  ;;  %v5660_v55 = vpop.xlane.xlu0 %5659 }
0x199e   :  { %11272 = vrcp.f32 %v5660_v55 }
0x199f   :  { %11274 = vrcp.f32 %v5663_v56  ;;  %v11267_v19 = vpop.eup %11266 }
0x19a0   :  { %v5745_v32 = vmul.f32 %v11267_v19, %v13535_v59 }
0x19a1   :  { %v5666_v25 = vpop.xlane.xlu0 %5665 }
0x19a2   :  { %11276 = vrcp.f32 %v5666_v25 }
0x19a3   :  { %v11269_v2 = vpop.eup %11268  ;;  %11278 = vpow2.f32 %v5643_v50 }
0x19a4   :  { %v5746_v9 = vmul.f32 %v11269_v2, %v13539_v24  ;;  %11280 = vpow2.f32 %v5645_v27 }
0x19a5   :  { %11282 = vpow2.f32 %v5647_v30 }
0x19a6   :  { %v5769_v20 = vpack.c.bf16 %v5746_v9, %v5745_v32 }
0x19a7   :  { %v11271_v11 = vpop.eup %11270 }
0x19a8   :  { %10250 = vmatmul.mubr.msk.bf16.vlgmr.msra.gmra.mxu0 %vm1146_vm3, %v5769_v20  ;;  %v5747_v59 = vmul.f32 %v11271_v11, %v13543_v46 }
0x19a9   :  { %10260 = vmatpush3.bf16.msra.mxu0 %v13494_v63  ;;  %10261 = vmatprep.mubr.msk.bf16.mxu0 %vm11524_vm0, %v11523_v0 }
0x19aa   :  { %10271 = vmatprep.subr.bf16.mxu0 %v11523_v0 }
0x19ab   :  { %v11273_v14 = vpop.eup %11272 }
0x19ac   :  { %v11275_v61 = vpop.eup %11274  ;;  %v5748_v24 = vmul.f32 %v11273_v14, %v13549_v18 }
0x19ad   :  { %v5749_v3 = vmul.f32 %v11275_v61, %v13547_v10 }
0x19ae   :  { %v5770_v57 = vpack.c.bf16 %v5748_v24, %v5747_v59 }
0x19af   :  { %v11277_v21 = vpop.eup %11276 }
0x19b0   :  { %v5750_v63 = vmul.f32 %v11277_v21, %v13555_v44  ;;  %10256 = vmatmul.mubr.msk.bf16.vlgmr.msra.gmra.mxu1 %vm1146_vm3, %v5770_v57  ;;  %v13660_v46 = vpop.eup %11278 }
0x19b1   :  { %10266 = vmatpush3.bf16.msra.mxu1 %v13523_v8  ;;  %10267 = vmatprep.mubr.msk.bf16.mxu1 %vm11524_vm0, %v11523_v0  ;;  %v13666_v10 = vpop.eup %11280  ;;  %v5712_v8 = vsel %vm1146_vm3, %v13660_v46, 0.0 }
0x19b2   :  { %v5771_v35 = vpack.c.bf16 %v5750_v63, %v5749_v3  ;;  %10277 = vmatprep.subr.bf16.mxu1 %v11523_v0  ;;  %v13670_v18 = vpop.eup %11282  ;;  %v5715_v56 = vsel %vm1146_vm3, %v13666_v10, 0.0 }
0x19b4   :  { %10262 = vmatmul.mubr.msk.bf16.vlgmr.msra.gmra.mxu0 %vm1146_vm3, %v5771_v35 }
0x19b5   :  { %10272 = vmatpush3.bf16.msra.mxu0 %v13516_v26  ;;  %10273 = vmatprep.mubr.msk.bf16.mxu0 %vm11524_vm0, %v11523_v0  ;;  %v5718_v26 = vsel %vm1146_vm3, %v13670_v18, 0.0 }
0x19b6   :  { %10283 = vmatprep.subr.bf16.mxu0 %v11523_v0 }
0x19b9   :  { %5713 = vadd.xlane.f32.xlu0 %v5712_v8 }
0x19bb   :  { %v5669_v44 = vpop.xlane.xlu1 %5668 }
0x19bc   :  { %11284 = vrcp.f32 %v5669_v44 }
0x19bd   :  { %5716 = vadd.xlane.f32.xlu1 %v5715_v56  ;;  %5719 = vadd.xlane.f32.xlu0 %v5718_v26 }
0x19bf   :  { %v5672_v55 = vpop.xlane.xlu0 %5671 }
0x19c0   :  { %11286 = vrcp.f32 %v5672_v55 }
0x19c9   :  { %v11285_v28 = vpop.eup %11284 }
0x19ca   :  { %v5751_v25 = vmul.f32 %v11285_v28, %v13561_v39 }
0x19cd   :  { %v11287_v19 = vpop.eup %11286 }
0x19ce   :  { %6251 = vrot.lane.b32.xlu1 %v13302_v34, %s11530_s30  ;;  %v5752_v2 = vmul.f32 %v11287_v19, %v13565_v60 }
0x19d0   :  { %v5772_v16 = vpack.c.bf16 %v5752_v2, %v5751_v25 }
0x19d2   :  { %10268 = vmatmul.mubr.msk.bf16.vlgmr.msra.gmra.mxu1 %vm1146_vm3, %v5772_v16 }
0x19d3   :  { %6298 = vrot.lane.b32.xlu0 %v13300_v4, %s11530_s30  ;;  %10278 = vmatpush3.bf16.msra.mxu1 %v13527_v17 }
0x19d4   :  { %10279 = vmatprep.mubr.msk.bf16.mxu1 %vm11524_vm0, %v11523_v0  ;;  %10289 = vmatprep.subr.bf16.mxu1 %v11523_v0 }
0x19f0   :  { %v5675_v50 = vpop.xlane.xlu1 %5674 }
0x19f1   :  { %11288 = vrcp.f32 %v5675_v50 }
0x19f4   :  { %v5678_v34 = vpop.xlane.xlu0 %5677 }
0x19f5   :  { %11290 = vrcp.f32 %v5678_v34 }
0x19f8   :  { %v5681_v39 = vpop.xlane.xlu1 %5680 }
0x19f9   :  { %11292 = vrcp.f32 %v5681_v39 }
0x19fc   :  { %v5684_v60 = vpop.xlane.xlu0 %5683 }
0x19fd   :  { %v5687_v47 = vpop.xlane.xlu1 %5686  ;;  %11294 = vrcp.f32 %v5684_v60 }
0x19fe   :  { %v11289_v32 = vpop.eup %11288  ;;  %11296 = vrcp.f32 %v5687_v47 }
0x19ff   :  { %v5753_v17 = vmul.f32 %v11289_v32, %v13576_v1 }
0x1a01   :  { %v5693_v4 = vpop.xlane.xlu1 %5692  ;;  %v5690_v9 = vpop.xlane.xlu0 %5689 }
0x1a02   :  { %v11291_v20 = vpop.eup %11290  ;;  %11298 = vrcp.f32 %v5690_v9 }
0x1a03   :  { %v5754_v27 = vmul.f32 %v11291_v20, %v13582_v51  ;;  %11300 = vrcp.f32 %v5693_v4 }
0x1a05   :  { %v5699_v30 = vpop.xlane.xlu1 %5698  ;;  %v5696_v11 = vpop.xlane.xlu0 %5695  ;;  %v5773_v14 = vpack.c.bf16 %v5754_v27, %v5753_v17 }
0x1a06   :  { %11302 = vrcp.f32 %v5696_v11  ;;  %v11293_v61 = vpop.eup %11292 }
0x1a07   :  { %10274 = vmatmul.mubr.msk.bf16.vlgmr.msra.gmra.mxu0 %vm1146_vm3, %v5773_v14  ;;  %11304 = vrcp.f32 %v5699_v30  ;;  %v5755_v51 = vmul.f32 %v11293_v61, %v13588_v53 }
0x1a08   :  { %10284 = vmatpush3.bf16.msra.mxu0 %v13525_v42  ;;  %10285 = vmatprep.mubr.msk.bf16.mxu0 %vm11524_vm0, %v11523_v0 }
0x1a09   :  { %v5705_v59 = vpop.xlane.xlu1 %5704  ;;  %v5702_v24 = vpop.xlane.xlu0 %5701  ;;  %10295 = vmatprep.subr.bf16.mxu0 %v11523_v0 }
0x1a0a   :  { %v11295_v1 = vpop.eup %11294  ;;  %11306 = vrcp.f32 %v5702_v24 }
0x1a0b   :  { %v5756_v21 = vmul.f32 %v11295_v1, %v13594_v29  ;;  %11308 = vrcp.f32 %v5705_v59  ;;  %v11297_v35 = vpop.eup %11296 }
0x1a0c   :  { %v5757_v8 = vmul.f32 %v11297_v35, %v13596_v41 }
0x1a0d   :  { %v5711_v57 = vpop.xlane.xlu1 %5710  ;;  %v5708_v3 = vpop.xlane.xlu0 %5707  ;;  %v5774_v63 = vpack.c.bf16 %v5756_v21, %v5755_v51 }
0x1a0e   :  { %11310 = vrcp.f32 %v5708_v3 }
0x1a0f   :  { %10280 = vmatmul.mubr.msk.bf16.vlgmr.msra.gmra.mxu1 %vm1146_vm3, %v5774_v63  ;;  %v11299_v42 = vpop.eup %11298  ;;  %11312 = vrcp.f32 %v5711_v57 }
0x1a10   :  { %10291 = vmatprep.mubr.msk.bf16.mxu1 %vm11524_vm0, %v11523_v0  ;;  %v5758_v44 = vmul.f32 %v11299_v42, %v13604_v49  ;;  %v11301_v56 = vpop.eup %11300 }
0x1a11   :  { %v6111_v53 = vpop.permute.xlu0 %6110  ;;  %v6158_v29 = vpop.permute.xlu1 %6157  ;;  %v5759_v28 = vmul.f32 %v11301_v56, %v13602_v52 }
0x1a12   :  { %10290 = vmatpush3.bf16.msra.mxu1 %v6111_v53  ;;  %v5775_v26 = vpack.c.bf16 %v5758_v44, %v5757_v8 }
0x1a13   :  { %10301 = vmatprep.subr.bf16.mxu1 %v11523_v0  ;;  %v11303_v55 = vpop.eup %11302 }
0x1a14   :  { %v5760_v19 = vmul.f32 %v11303_v55, %v13610_v5  ;;  %10286 = vmatmul.mubr.msk.bf16.vlgmr.msra.gmra.mxu0 %vm1146_vm3, %v5775_v26  ;;  %v11305_v25 = vpop.eup %11304 }
0x1a15   :  { %10296 = vmatpush3.bf16.msra.mxu0 %v6158_v29  ;;  %10297 = vmatprep.mubr.msk.bf16.mxu0 %vm11524_vm0, %v11523_v0  ;;  %v5761_v2 = vmul.f32 %v11305_v25, %v13612_v37  ;;  %v6205_v50 = vpop.permute.xlu1 %6204 }
0x1a16   :  { %v5776_v41 = vpack.c.bf16 %v5760_v19, %v5759_v28  ;;  %10307 = vmatprep.subr.bf16.mxu0 %v11523_v0 }
0x1a17   :  { %v11307_v49 = vpop.eup %11306 }
0x1a18   :  { %v5762_v16 = vmul.f32 %v11307_v49, %v13620_v7  ;;  %10292 = vmatmul.mubr.msk.bf16.vlgmr.msra.gmra.mxu1 %vm1146_vm3, %v5776_v41  ;;  %v11309_v52 = vpop.eup %11308 }
0x1a19   :  { %10302 = vmatpush3.bf16.msra.mxu1 %v6205_v50  ;;  %10303 = vmatprep.mubr.msk.bf16.mxu1 %vm11524_vm0, %v11523_v0  ;;  %v5763_v39 = vmul.f32 %v11309_v52, %v13618_v12  ;;  %v78_v50 = vld [vmem:[%s14789_s3 + $0x78] sm:$0xff] }
0x1a1a   :  { %v5777_v5 = vpack.c.bf16 %v5762_v16, %v5761_v2  ;;  %10313 = vmatprep.subr.bf16.mxu1 %v11523_v0  ;;  %v77_v16 = vld [vmem:[%s14789_s3 + $0x70] sm:$0xff] }
0x1a1b   :  { %v11311_v34 = vpop.eup %11310  ;;  %v6439_v52 = vpack.c.bf16 %v78_v50, %v77_v16 }
0x1a1c   :  { %v5764_v60 = vmul.f32 %v11311_v34, %v13626_v13  ;;  %10298 = vmatmul.mubr.msk.bf16.vlgmr.msra.gmra.mxu0 %vm1146_vm3, %v5777_v5  ;;  %v11313_v4 = vpop.eup %11312 }
0x1a1d   :  { %10309 = vmatprep.mubr.msk.bf16.mxu0 %vm11524_vm0, %v11523_v0  ;;  %v5765_v20 = vmul.f32 %v11313_v4, %v13628_v45 }
0x1a1e   :  { %v5778_v37 = vpack.c.bf16 %v5764_v60, %v5763_v39 }
0x1a20   :  { %10304 = vmatmul.mubr.msk.bf16.vlgmr.msra.gmra.mxu1 %vm1146_vm3, %v5778_v37 }
0x1a21   :  { %10315 = vmatprep.mubr.msk.bf16.mxu1 %vm11524_vm0, %v11523_v0 }
0x1a42   :  { %v5714_v7 = vpop.xlane.xlu0 %5713 }
0x1a43   :  { %11314 = vrcp.f32 %v5714_v7 }
0x1a46   :  { %v5717_v47 = vpop.xlane.xlu1 %5716  ;;  %v5720_v32 = vpop.xlane.xlu0 %5719 }
0x1a47   :  { %11316 = vrcp.f32 %v5717_v47  ;;  %v75_v47 = vld [vmem:[%s14789_s3 + $0x60] sm:$0xff] }
0x1a48   :  { %11318 = vrcp.f32 %v5720_v32  ;;  %v76_v32 = vld [vmem:[%s14789_s3 + $0x68] sm:$0xff] }
0x1a4a   :  { %v6252_v12 = vpop.permute.xlu1 %6251  ;;  %v6299_v13 = vpop.permute.xlu0 %6298 }
0x1a4b   :  { %10308 = vmatpush3.bf16.msra.mxu0 %v6252_v12  ;;  %10314 = vmatpush3.bf16.msra.mxu1 %v6299_v13  ;;  %v6438_v12 = vpack.c.bf16 %v76_v32, %v75_v47 }
0x1a4c   :  { %10319 = vmatprep.subr.bf16.mxu0 %v11523_v0  ;;  %10335 = vmatprep.subr.bf16.mxu1 %v11523_v0 }
0x1a50   :  { %v11315_v9 = vpop.eup %11314 }
0x1a51   :  { %v5766_v17 = vmul.f32 %v11315_v9, %v13660_v46 }
0x1a53   :  { %v5779_v27 = vpack.c.bf16 %v5766_v17, %v5765_v20 }
0x1a54   :  { %v11317_v30 = vpop.eup %11316 }
0x1a55   :  { %v11319_v11 = vpop.eup %11318  ;;  %v5767_v14 = vmul.f32 %v11317_v30, %v13666_v10  ;;  %10310 = vmatmul.mubr.msk.bf16.vlgmr.msra.gmra.mxu0 %vm1146_vm3, %v5779_v27 }
0x1a56   :  { %v5768_v61 = vmul.f32 %v11319_v11, %v13670_v18  ;;  %10323 = vmatprep.mubr.msk.bf16.mxu0 %vm11524_vm0, %v11523_v0  ;;  %10320 = vmatpush3.bf16.msra.mxu0 %v6439_v52 }
0x1a57   :  { %10321 = vmatprep.subr.bf16.mxu0 %v11523_v0 }
0x1a58   :  { %v5780_v59 = vpack.c.bf16 %v5768_v61, %v5767_v14 }
0x1a5a   :  { %10316 = vmatmul.mubr.msk.bf16.vlgmr.msra.gmra.mxu1 %vm1146_vm3, %v5780_v59  ;;  %10322 = vmatpush3.bf16.msra.mxu0 %v6438_v12 }
0x1a5b   :  { %10339 = vmatprep.mubr.msk.bf16.mxu1 %vm11524_vm0, %v11523_v0  ;;  %10351 = vmatprep.subr.bf16.mxu0 %v11523_v0 }
0x1a68   :  { %v13734_v45 = vpop.f32.mrf.mxu0 }
0x1a6a   :  { %v10251_v46 = vpop.f32.mrf.mxu0 }
0x1a6c   :  { %v13736_v24 = vpop.f32.mrf.mxu0 }
0x1a6e   :  { %v10252_v1 = vpop.f32.mrf.mxu0 }
0x1a70   :  { %v13738_v10 = vpop.f32.mrf.mxu1 }
0x1a72   :  { %v10257_v51 = vpop.f32.mrf.mxu1 }
0x1a74   :  { %v13740_v21 = vpop.f32.mrf.mxu0  ;;  %v13742_v18 = vpop.f32.mrf.mxu1 }
0x1a76   :  { %v10263_v57 = vpop.f32.mrf.mxu0  ;;  %v10258_v3 = vpop.f32.mrf.mxu1 }
0x1a78   :  { %v13744_v63 = vpop.f32.mrf.mxu0 }
0x1a7a   :  { %v10264_v35 = vpop.f32.mrf.mxu0 }
0x1a92   :  { %v5962_v42 = vpop.f32.mrf.mxu1 }
0x1a94   :  { %v10269_v8 = vpop.f32.mrf.mxu1 }
0x1a96   :  { %v5965_v44 = vpop.f32.mrf.mxu1 }
0x1a97   :  { %v10837_v53 = vpack.i.bf16 %v5965_v44, %v5962_v42 }
0x1a98   :  { %v10270_v56 = vpop.f32.mrf.mxu1 }
0x1a99   :  { %10838 = vrot.lane.b32.xlu1 %v10837_v53, %s11522_s28 }
0x1ac7   :  { %v6009_v29 = vpop.f32.mrf.mxu0 }
0x1ac9   :  { %v10275_v26 = vpop.f32.mrf.mxu0 }
0x1acb   :  { %v6012_v55 = vpop.f32.mrf.mxu0 }
0x1acc   :  { %v10852_v9 = vpack.i.bf16 %v6012_v55, %v6009_v29 }
0x1acd   :  { %v10276_v28 = vpop.f32.mrf.mxu0 }
0x1acf   :  { %v6056_v19 = vpop.f32.mrf.mxu1 }
0x1ad1   :  { %v10281_v25 = vpop.f32.mrf.mxu1 }
0x1ad3   :  { %v6059_v41 = vpop.f32.mrf.mxu1 }
0x1ad4   :  { %v6103_v49 = vpop.f32.mrf.mxu0  ;;  %v10867_v51 = vpack.i.bf16 %v6059_v41, %v6056_v19 }
0x1ad5   :  { %v10282_v2 = vpop.f32.mrf.mxu1 }
0x1ad6   :  { %v10287_v5 = vpop.f32.mrf.mxu0 }
0x1ad8   :  { %v6106_v34 = vpop.f32.mrf.mxu0  ;;  %v6150_v39 = vpop.f32.mrf.mxu1 }
0x1ad9   :  { %v10842_v60 = vpack.i.bf16 %v6106_v34, %v6103_v49 }
0x1ada   :  { %v10288_v37 = vpop.f32.mrf.mxu0  ;;  %v10293_v7 = vpop.f32.mrf.mxu1 }
0x1adb   :  { %10843 = vrot.lane.b32.xlu0 %v10842_v60, %s11531_s19 }
0x1adc   :  { %v6153_v13 = vpop.f32.mrf.mxu1  ;;  %v6197_v4 = vpop.f32.mrf.mxu0 }
0x1add   :  { %v10857_v1 = vpack.i.bf16 %v6153_v13, %v6150_v39 }
0x1ade   :  { %v10294_v20 = vpop.f32.mrf.mxu1  ;;  %v10299_v17 = vpop.f32.mrf.mxu0 }
0x1adf   :  { %10853 = vrot.lane.b32.xlu0 %v10852_v9, %s11522_s28 }
0x1ae0   :  { %v6200_v27 = vpop.f32.mrf.mxu0  ;;  %v6244_v30 = vpop.f32.mrf.mxu1 }
0x1ae1   :  { %v10872_v56 = vpack.i.bf16 %v6200_v27, %v6197_v4 }
0x1ae2   :  { %v10300_v11 = vpop.f32.mrf.mxu0  ;;  %v10305_v14 = vpop.f32.mrf.mxu1 }
0x1ae4   :  { %v6247_v61 = vpop.f32.mrf.mxu1 }
0x1ae5   :  { %v10847_v59 = vpack.i.bf16 %v6247_v61, %v6244_v30 }
0x1ae6   :  { %v10306_v46 = vpop.f32.mrf.mxu1 }
0x1ae7   :  { %10848 = vrot.lane.b32.xlu1 %v10847_v59, %s11532_s20 }
0x1aeb   :  { %10858 = vrot.lane.b32.xlu1 %v10857_v1, %s11531_s19 }
0x1aef   :  { %10868 = vrot.lane.b32.xlu1 %v10867_v51, %s11522_s28 }
0x1b0b   :  { %v10839_v28 = vpop.permute.xlu1 %10838 }
0x1b0c   :  { %v10841_v25 = vunpack.i.h.bf16 %v10839_v28  ;;  %v10840_v41 = vunpack.i.l.bf16 %v10839_v28 }
0x1b0e   :  { %v6417_v50 = vsel %vm500_vm2, %v13734_v45, %v10840_v41  ;;  %v6418_v52 = vsel %vm500_vm2, %v13736_v24, %v10841_v25 }
0x1b15   :  { %v6291_v57 = vpop.f32.mrf.mxu0 }
0x1b17   :  { %v10311_v3 = vpop.f32.mrf.mxu0 }
0x1b19   :  { %v6294_v35 = vpop.f32.mrf.mxu0 }
0x1b1a   :  { %v10862_v42 = vpack.i.bf16 %v6294_v35, %v6291_v57  ;;  %v6338_v8 = vpop.f32.mrf.mxu1 }
0x1b1b   :  { %v10312_v44 = vpop.f32.mrf.mxu0 }
0x1b1c   :  { %v10317_v53 = vpop.f32.mrf.mxu1  ;;  %10863 = vrot.lane.b32.xlu0 %v10862_v42, %s11532_s20 }
0x1b1e   :  { %v6341_v29 = vpop.f32.mrf.mxu1 }
0x1b1f   :  { %v10877_v26 = vpack.i.bf16 %v6341_v29, %v6338_v8 }
0x1b20   :  { %v10318_v55 = vpop.f32.mrf.mxu1  ;;  %10873 = vrot.lane.b32.xlu0 %v10872_v56, %s11531_s19 }
0x1b21   :  { %10878 = vrot.lane.b32.xlu1 %v10877_v26, %s11532_s20 }
0x1b4d   :  { %v10844_v19 = vpop.permute.xlu0 %10843 }
0x1b4e   :  { %v10846_v49 = vunpack.i.h.bf16 %v10844_v19  ;;  %v10845_v2 = vunpack.i.l.bf16 %v10844_v19 }
0x1b50   :  { %v6424_v39 = vsel %vm1146_vm3, %v6418_v52, %v10846_v49  ;;  %v6423_v60 = vsel %vm1146_vm3, %v6417_v50, %v10845_v2 }
0x1b51   :  { %v10854_v32 = vpop.permute.xlu0 %10853 }
0x1b52   :  { %v10856_v12 = vunpack.i.h.bf16 %v10854_v32  ;;  %v10855_v24 = vunpack.i.l.bf16 %v10854_v32 }
0x1b54   :  { %v6420_v17 = vsel %vm500_vm2, %v13742_v18, %v10856_v12  ;;  %v6419_v27 = vsel %vm500_vm2, %v13738_v10, %v10855_v24 }
0x1b59   :  { %v10849_v16 = vpop.permute.xlu1 %10848 }
0x1b5a   :  { %v10851_v5 = vunpack.i.h.bf16 %v10849_v16  ;;  %v10850_v34 = vunpack.i.l.bf16 %v10849_v16 }
0x1b5c   :  { %v6429_v37 = vsel %vm2071_vm4, %v6423_v60, %v10850_v34  ;;  %v6430_v7 = vsel %vm2071_vm4, %v6424_v39, %v10851_v5 }
0x1b5d   :  { %v6435_v47 = vpack.c.bf16 %v6430_v7, %v6429_v37  ;;  %v10859_v45 = vpop.permute.xlu1 %10858 }
0x1b5e   :  { %v10861_v13 = vunpack.i.h.bf16 %v10859_v45  ;;  %v10860_v4 = vunpack.i.l.bf16 %v10859_v45 }
0x1b5f   :  { %10324 = vmatmul.mubr.msk.bf16.vlgmr.msra.gmra.mxu0 %vm144_vm1, %v6435_v47 }
0x1b60   :  { %10327 = vmatprep.mubr.msk.bf16.mxu0 %vm11524_vm0, %v11523_v0  ;;  %v6425_v14 = vsel %vm1146_vm3, %v6419_v27, %v10860_v4  ;;  %v6426_v61 = vsel %vm1146_vm3, %v6420_v17, %v10861_v13 }
0x1b61   :  { %v10869_v9 = vpop.permute.xlu1 %10868 }
0x1b62   :  { %v10871_v59 = vunpack.i.h.bf16 %v10869_v9  ;;  %v10870_v46 = vunpack.i.l.bf16 %v10869_v9 }
0x1b64   :  { %v6421_v10 = vsel %vm500_vm2, %v13740_v21, %v10870_v46  ;;  %v6422_v8 = vsel %vm500_vm2, %v13744_v63, %v10871_v59  ;;  %v11494_v21 = vld [vmem:[%s14792_s6 + $0x10] sm:$0xff] }
0x1b65   :  { %v6515_v63 = vrot.slane %v11494_v21, %v12275_v23 }
0x1b8e   :  { %v10864_v20 = vpop.permute.xlu0 %10863 }
0x1b8f   :  { %v10866_v30 = vunpack.i.h.bf16 %v10864_v20  ;;  %v10865_v11 = vunpack.i.l.bf16 %v10864_v20 }
0x1b91   :  { %v6432_v1 = vsel %vm2071_vm4, %v6426_v61, %v10866_v30  ;;  %v6431_v51 = vsel %vm2071_vm4, %v6425_v14, %v10865_v11 }
0x1b92   :  { %v6436_v57 = vpack.c.bf16 %v6432_v1, %v6431_v51  ;;  %v10874_v3 = vpop.permute.xlu0 %10873 }
0x1b93   :  { %v10879_v35 = vpop.permute.xlu1 %10878  ;;  %v10876_v42 = vunpack.i.h.bf16 %v10874_v3  ;;  %v10875_v18 = vunpack.i.l.bf16 %v10874_v3  ;;  %v97_v3 = vld [vmem:[%s14790_s4 + $0x50] sm:$0xff] }
0x1b94   :  { %v10881_v44 = vunpack.i.h.bf16 %v10879_v35  ;;  %v10880_v53 = vunpack.i.l.bf16 %v10879_v35  ;;  %10328 = vmatmul.mubr.msk.bf16.gmra.mxu0 %vm144_vm1, %v6436_v57  ;;  %v98_v35 = vld [vmem:[%s14790_s4 + $0x58] sm:$0xff] }
0x1b95   :  { %v6428_v56 = vsel %vm1146_vm3, %v6422_v8, %v10876_v42  ;;  %v6427_v29 = vsel %vm1146_vm3, %v6421_v10, %v10875_v18  ;;  %10331 = vmatprep.mubr.msk.bf16.mxu0 %vm11524_vm0, %v11523_v0  ;;  %v6624_v42 = vpack.c.bf16 %v98_v35, %v97_v3  ;;  %v95_v18 = vld [vmem:[%s14790_s4 + $0x40] sm:$0xff]  ;;  %v96_v10 = vld [vmem:[%s14790_s4 + $0x48] sm:$0xff] }
0x1b96   :  { %v6434_v26 = vsel %vm2071_vm4, %v6428_v56, %v10881_v44  ;;  %v6433_v55 = vsel %vm2071_vm4, %v6427_v29, %v10880_v53  ;;  %v6623_v8 = vpack.c.bf16 %v96_v10, %v95_v18 }
0x1b97   :  { %v6437_v28 = vpack.c.bf16 %v6434_v26, %v6433_v55  ;;  %10336 = vmatpush3.bf16.msra.mxu1 %v6624_v42 }
0x1b98   :  { %10337 = vmatprep.subr.bf16.mxu1 %v11523_v0 }
0x1b9b   :  { %10338 = vmatpush3.bf16.msra.mxu1 %v6623_v8 }
0x1b9c   :  { %10332 = vmatmul.mubr.msk.bf16.gmra.mxu0 %vm144_vm1, %v6437_v28  ;;  %10371 = vmatprep.subr.bf16.mxu1 %v11523_v0 }
0x1b9d   :  { %10359 = vmatprep.mubr.msk.bf16.mxu0 %vm11524_vm0, %v11523_v0 }
0x1c1f   :  { %v6483_v19 = vpop.f32.mrf.mxu0 }
0x1c20   :  { %v6506_v25 = vadd.f32 %v6483_v19, %v13179_v33 }
0x1c21   :  { %v10325_v41 = vpop.f32.mrf.mxu0 }
0x1c22   :  { %v13807_v49 = vadd.f32 %v6515_v63, %v6506_v25 }
0x1c23   :  { %v6486_v2 = vpop.f32.mrf.mxu0 }
0x1c24   :  { %v6507_v16 = vadd.f32 %v6486_v2, %v13184_v6  ;;  %v6522_v50 = vsel %vm144_vm1, %v13807_v49, 0.0 }
0x1c25   :  { %6523 = vadd.xlane.f32.xlu0 %v6522_v50  ;;  %v10326_v52 = vpop.f32.mrf.mxu0 }
0x1c26   :  { %v13812_v5 = vadd.f32 %v6515_v63, %v6507_v16 }
0x1c28   :  { %v6525_v34 = vsel %vm144_vm1, %v13812_v5, 0.0 }
0x1c29   :  { %6526 = vadd.xlane.f32.xlu1 %v6525_v34 }
0x1c54   :  { %v6491_v39 = vpop.f32.mrf.mxu0 }
0x1c55   :  { %v6508_v33 = vadd.f32 %v6491_v39, %v13189_v31 }
0x1c56   :  { %v10329_v60 = vpop.f32.mrf.mxu0 }
0x1c57   :  { %v13817_v37 = vadd.f32 %v6515_v63, %v6508_v33 }
0x1c58   :  { %v6494_v7 = vpop.f32.mrf.mxu0 }
0x1c59   :  { %v6509_v6 = vadd.f32 %v6494_v7, %v13194_v36  ;;  %v6528_v47 = vsel %vm144_vm1, %v13817_v37, 0.0  ;;  %v125_v7 = vld [vmem:[%s14791_s5 + $0xb0] sm:$0xff] }
0x1c5a   :  { %6529 = vadd.xlane.f32.xlu0 %v6528_v47  ;;  %v10330_v45 = vpop.f32.mrf.mxu0 }
0x1c5b   :  { %v13822_v32 = vadd.f32 %v6515_v63, %v6509_v6  ;;  %v126_v6 = vld [vmem:[%s14791_s5 + $0xb8] sm:$0xff] }
0x1c5c   :  { %v6499_v12 = vpop.f32.mrf.mxu0  ;;  %v6707_v47 = vpack.c.bf16 %v126_v6, %v125_v7 }
0x1c5d   :  { %v6510_v24 = vadd.f32 %v6499_v12, %v13199_v38  ;;  %v6531_v13 = vsel %vm144_vm1, %v13822_v32, 0.0 }
0x1c5e   :  { %6532 = vadd.xlane.f32.xlu0 %v6531_v13  ;;  %v10333_v31 = vpop.f32.mrf.mxu0  ;;  %10352 = vmatpush3.bf16.msra.mxu0 %v6707_v47 }
0x1c5f   :  { %v13827_v4 = vadd.f32 %v6515_v63, %v6510_v24  ;;  %10353 = vmatprep.subr.bf16.mxu0 %v11523_v0 }
0x1c60   :  { %v6502_v9 = vpop.f32.mrf.mxu0 }
0x1c61   :  { %v6511_v36 = vadd.f32 %v6502_v9, %v13204_v40  ;;  %v6534_v20 = vsel %vm144_vm1, %v13827_v4, 0.0 }
0x1c62   :  { %6535 = vadd.xlane.f32.xlu0 %v6534_v20  ;;  %v10334_v17 = vpop.f32.mrf.mxu0 }
0x1c63   :  { %v13832_v27 = vadd.f32 %v6515_v63, %v6511_v36  ;;  %v13880_v36 = vld [vmem:[%s14792_s6 + $0x18] sm:$0xff] }
0x1c64   :  { %v6603_v17 = vrot.slane %v13880_v36, %v11610_v22 }
0x1c65   :  { %v6537_v38 = vsel %vm144_vm1, %v13832_v27, 0.0 }
0x1c66   :  { %6538 = vadd.xlane.f32.xlu1 %v6537_v38 }
0x1cae   :  { %v6524_v30 = vpop.xlane.xlu0 %6523 }
0x1caf   :  { %v6540_v11 = vmul.f32 0.03125, %v6524_v30 }
0x1cb1   :  { %v6546_v14 = vsub.f32 %v13807_v49, %v6540_v11 }
0x1cb2   :  { %v6527_v61 = vpop.xlane.xlu1 %6526 }
0x1cb3   :  { %v6541_v59 = vmul.f32 0.03125, %v6527_v61  ;;  %v6552_v46 = vmul.f32 %v6546_v14, %v6546_v14 }
0x1cb5   :  { %v6547_v40 = vsub.f32 %v13812_v5, %v6541_v59  ;;  %v6558_v1 = vsel %vm144_vm1, %v6552_v46, 0.0  ;;  %v6613_v59 = vrot.slane %v13880_v36, %v12368_v58 }
0x1cb6   :  { %6559 = vadd.xlane.f32.xlu0 %v6558_v1 }
0x1cb7   :  { %v6553_v51 = vmul.f32 %v6547_v40, %v6547_v40 }
0x1cb9   :  { %v6561_v57 = vsel %vm144_vm1, %v6553_v51, 0.0 }
0x1cba   :  { %6562 = vadd.xlane.f32.xlu1 %v6561_v57 }
0x1ce3   :  { %v6530_v44 = vpop.xlane.xlu0 %6529 }
0x1ce4   :  { %v6542_v53 = vmul.f32 0.03125, %v6530_v44 }
0x1ce6   :  { %v13855_v56 = vsub.f32 %v13817_v37, %v6542_v53 }
0x1ce7   :  { %v6533_v29 = vpop.xlane.xlu0 %6532 }
0x1ce8   :  { %v6543_v26 = vmul.f32 0.03125, %v6533_v29  ;;  %v6554_v55 = vmul.f32 %v13855_v56, %v13855_v56 }
0x1cea   :  { %v13860_v28 = vsub.f32 %v13822_v32, %v6543_v26  ;;  %v6564_v21 = vsel %vm144_vm1, %v6554_v55, 0.0 }
0x1ceb   :  { %6565 = vadd.xlane.f32.xlu0 %v6564_v21  ;;  %v6536_v63 = vpop.xlane.xlu0 %6535 }
0x1cec   :  { %v6544_v19 = vmul.f32 0.03125, %v6536_v63  ;;  %v6555_v25 = vmul.f32 %v13860_v28, %v13860_v28 }
0x1cee   :  { %v6550_v41 = vsub.f32 %v13827_v4, %v6544_v19  ;;  %v6567_v2 = vsel %vm144_vm1, %v6555_v25, 0.0 }
0x1cef   :  { %6568 = vadd.xlane.f32.xlu1 %v6567_v2  ;;  %v6539_v16 = vpop.xlane.xlu1 %6538 }
0x1cf0   :  { %v6545_v50 = vmul.f32 0.03125, %v6539_v16  ;;  %v6556_v52 = vmul.f32 %v6550_v41, %v6550_v41 }
0x1cf2   :  { %v6551_v34 = vsub.f32 %v13832_v27, %v6545_v50  ;;  %v6570_v39 = vsel %vm144_vm1, %v6556_v52, 0.0 }
0x1cf3   :  { %6571 = vadd.xlane.f32.xlu0 %v6570_v39 }
0x1cf4   :  { %v6557_v33 = vmul.f32 %v6551_v34, %v6551_v34 }
0x1cf6   :  { %v6573_v60 = vsel %vm144_vm1, %v6557_v33, 0.0 }
0x1cf7   :  { %6574 = vadd.xlane.f32.xlu1 %v6573_v60 }
0x1d3f   :  { %v6560_v45 = vpop.xlane.xlu0 %6559 }
0x1d40   :  { %v6576_v12 = vmul.f32 0.03125, %v6560_v45 }
0x1d42   :  { %v6582_v24 = vadd.f32 1e-05, %v6576_v12 }
0x1d43   :  { %v6563_v13 = vpop.xlane.xlu1 %6562 }
0x1d44   :  { %11320 = vrsqrt.f32 %v6582_v24  ;;  %v6577_v31 = vmul.f32 0.03125, %v6563_v13  ;;  %v121_v24 = vld [vmem:[%s14791_s5 + $0x90] sm:$0xff]  ;;  %v122_v13 = vld [vmem:[%s14791_s5 + $0x98] sm:$0xff] }
0x1d46   :  { %v6583_v9 = vadd.f32 1e-05, %v6577_v31  ;;  %v6705_v31 = vpack.c.bf16 %v122_v13, %v121_v24 }
0x1d48   :  { %11322 = vrsqrt.f32 %v6583_v9  ;;  %v119_v9 = vld [vmem:[%s14791_s5 + $0x80] sm:$0xff] }
0x1d51   :  { %v11321_v20 = vpop.eup %11320 }
0x1d52   :  { %v6594_v38 = vmul.f32 %v11321_v20, %v6546_v14  ;;  %v120_v20 = vld [vmem:[%s14791_s5 + $0x88] sm:$0xff] }
0x1d54   :  { %v6604_v11 = vmul.f32 %v6603_v17, %v6594_v38  ;;  %v6628_v38 = vrot.slane %v13880_v36, %v12407_v48 }
0x1d55   :  { %v11323_v30 = vpop.eup %11322 }
0x1d56   :  { %v6595_v61 = vmul.f32 %v11323_v30, %v6547_v40  ;;  %v6614_v1 = vadd.f32 %v6613_v59, %v6604_v11 }
0x1d58   :  { %v6605_v46 = vmul.f32 %v6603_v17, %v6595_v61 }
0x1d5a   :  { %v6615_v51 = vadd.f32 %v6613_v59, %v6605_v46 }
0x1d5c   :  { %v6620_v57 = vpack.c.bf16 %v6615_v51, %v6614_v1 }
0x1d5e   :  { %10340 = vmatmul.mubr.msk.bf16.vlgmr.msra.gmra.mxu1 %vm144_vm1, %v6620_v57 }
0x1d5f   :  { %10343 = vmatprep.mubr.msk.bf16.mxu1 %vm11524_vm0, %v11523_v0 }
0x1d74   :  { %v6566_v3 = vpop.xlane.xlu0 %6565 }
0x1d75   :  { %v6578_v35 = vmul.f32 0.03125, %v6566_v3 }
0x1d77   :  { %v6584_v42 = vadd.f32 1e-05, %v6578_v35 }
0x1d78   :  { %v6569_v18 = vpop.xlane.xlu1 %6568 }
0x1d79   :  { %11324 = vrsqrt.f32 %v6584_v42  ;;  %v6579_v14 = vmul.f32 0.03125, %v6569_v18 }
0x1d7b   :  { %v6585_v10 = vadd.f32 1e-05, %v6579_v14 }
0x1d7c   :  { %v6572_v40 = vpop.xlane.xlu0 %6571 }
0x1d7d   :  { %11326 = vrsqrt.f32 %v6585_v10  ;;  %v6580_v8 = vmul.f32 0.03125, %v6572_v40 }
0x1d7f   :  { %v6586_v44 = vadd.f32 1e-05, %v6580_v8 }
0x1d80   :  { %v6575_v53 = vpop.xlane.xlu1 %6574 }
0x1d81   :  { %11328 = vrsqrt.f32 %v6586_v44  ;;  %v6581_v29 = vmul.f32 0.03125, %v6575_v53 }
0x1d83   :  { %v6587_v26 = vadd.f32 1e-05, %v6581_v29 }
0x1d85   :  { %11330 = vrsqrt.f32 %v6587_v26 }
0x1d86   :  { %v11325_v55 = vpop.eup %11324 }
0x1d87   :  { %v6596_v21 = vmul.f32 %v11325_v55, %v13855_v56 }
0x1d89   :  { %v6606_v25 = vmul.f32 %v6603_v17, %v6596_v21 }
0x1d8a   :  { %v11327_v63 = vpop.eup %11326 }
0x1d8b   :  { %v6597_v19 = vmul.f32 %v11327_v63, %v13860_v28  ;;  %v6616_v52 = vadd.f32 %v6613_v59, %v6606_v25  ;;  %v123_v28 = vld [vmem:[%s14791_s5 + $0xa0] sm:$0xff] }
0x1d8d   :  { %v6607_v2 = vmul.f32 %v6603_v17, %v6597_v19 }
0x1d8e   :  { %v11329_v16 = vpop.eup %11328 }
0x1d8f   :  { %v6598_v50 = vmul.f32 %v11329_v16, %v6550_v41  ;;  %v6617_v39 = vadd.f32 %v6613_v59, %v6607_v2  ;;  %v124_v41 = vld [vmem:[%s14791_s5 + $0xa8] sm:$0xff] }
0x1d91   :  { %v6621_v33 = vpack.c.bf16 %v6617_v39, %v6616_v52  ;;  %v6608_v6 = vmul.f32 %v6603_v17, %v6598_v50  ;;  %v6783_v50 = vrot.slane %v13880_v36, %v12421_v43 }
0x1d92   :  { %v11331_v60 = vpop.eup %11330 }
0x1d93   :  { %v6599_v7 = vmul.f32 %v11331_v60, %v6551_v34  ;;  %10344 = vmatmul.mubr.msk.bf16.gmra.mxu1 %vm144_vm1, %v6621_v33  ;;  %v6618_v56 = vadd.f32 %v6613_v59, %v6608_v6  ;;  %v6706_v34 = vpack.c.bf16 %v124_v41, %v123_v28 }
0x1d94   :  { %10347 = vmatprep.mubr.msk.bf16.mxu1 %vm11524_vm0, %v11523_v0 }
0x1d95   :  { %v6609_v47 = vmul.f32 %v6603_v17, %v6599_v7  ;;  %10354 = vmatpush3.bf16.msra.mxu0 %v6706_v34  ;;  %v6704_v17 = vpack.c.bf16 %v120_v20, %v119_v9 }
0x1d96   :  { %10355 = vmatprep.subr.bf16.mxu0 %v11523_v0 }
0x1d97   :  { %v6619_v45 = vadd.f32 %v6613_v59, %v6609_v47 }
0x1d99   :  { %v6622_v12 = vpack.c.bf16 %v6619_v45, %v6618_v56  ;;  %10356 = vmatpush3.bf16.msra.mxu0 %v6705_v31 }
0x1d9a   :  { %10357 = vmatprep.subr.bf16.mxu0 %v11523_v0 }
0x1d9b   :  { %10348 = vmatmul.mubr.msk.bf16.gmra.mxu1 %vm144_vm1, %v6622_v12 }
0x1d9c   :  { %10375 = vmatprep.mubr.msk.bf16.mxu1 %vm11524_vm0, %v11523_v0 }
0x1d9d   :  { %10358 = vmatpush3.bf16.msra.mxu0 %v6704_v17 }
0x1d9e   :  { %10387 = vmatprep.subr.bf16.mxu0 %v11523_v0 }
0x1e1e   :  { %v6672_v30 = vpop.f32.mrf.mxu1 }
0x1e1f   :  { %v6673_v61 = vadd.f32 %v6672_v30, %v6628_v38 }
0x1e20   :  { %v10341_v11 = vpop.f32.mrf.mxu1 }
0x1e21   :  { %v6695_v51 = vmax.f32 %v6673_v61, 0.0 }
0x1e22   :  { %v6675_v59 = vpop.f32.mrf.mxu1 }
0x1e23   :  { %v6676_v46 = vadd.f32 %v6675_v59, %v6628_v38 }
0x1e24   :  { %v10342_v1 = vpop.f32.mrf.mxu1 }
0x1e25   :  { %v6696_v57 = vmax.f32 %v6676_v46, 0.0 }
0x1e27   :  { %v6701_v3 = vpack.c.bf16 %v6696_v57, %v6695_v51 }
0x1e29   :  { %10360 = vmatmul.mubr.msk.bf16.vlgmr.msra.gmra.mxu0 %vm2351_vm5, %v6701_v3 }
0x1e2a   :  { %10363 = vmatprep.mubr.msk.bf16.mxu0 %vm11524_vm0, %v11523_v0 }
0x1e53   :  { %v6680_v35 = vpop.f32.mrf.mxu1 }
0x1e54   :  { %v6681_v18 = vadd.f32 %v6680_v35, %v6628_v38 }
0x1e55   :  { %v10345_v42 = vpop.f32.mrf.mxu1 }
0x1e56   :  { %v6697_v8 = vmax.f32 %v6681_v18, 0.0 }
0x1e57   :  { %v6683_v14 = vpop.f32.mrf.mxu1 }
0x1e58   :  { %v6684_v10 = vadd.f32 %v6683_v14, %v6628_v38 }
0x1e59   :  { %v10346_v40 = vpop.f32.mrf.mxu1 }
0x1e5a   :  { %v6698_v44 = vmax.f32 %v6684_v10, 0.0  ;;  %v61_v40 = vld [vmem:[%s14788_s2 + $0x70] sm:$0xff] }
0x1e5b   :  { %v6688_v53 = vpop.f32.mrf.mxu1 }
0x1e5c   :  { %v6702_v29 = vpack.c.bf16 %v6698_v44, %v6697_v8  ;;  %v6689_v55 = vadd.f32 %v6688_v53, %v6628_v38  ;;  %v62_v8 = vld [vmem:[%s14788_s2 + $0x78] sm:$0xff]  ;;  %v59_v53 = vld [vmem:[%s14788_s2 + $0x60] sm:$0xff] }
0x1e5d   :  { %v10349_v26 = vpop.f32.mrf.mxu1  ;;  %v6892_v44 = vpack.c.bf16 %v62_v8, %v61_v40 }
0x1e5e   :  { %10364 = vmatmul.mubr.msk.bf16.gmra.mxu0 %vm2351_vm5, %v6702_v29  ;;  %v6699_v25 = vmax.f32 %v6689_v55, 0.0  ;;  %v60_v29 = vld [vmem:[%s14788_s2 + $0x68] sm:$0xff] }
0x1e5f   :  { %v6691_v21 = vpop.f32.mrf.mxu1  ;;  %10367 = vmatprep.mubr.msk.bf16.mxu0 %vm11524_vm0, %v11523_v0  ;;  %10372 = vmatpush3.bf16.msra.mxu1 %v6892_v44  ;;  %v6891_v26 = vpack.c.bf16 %v60_v29, %v59_v53 }
0x1e60   :  { %v6692_v63 = vadd.f32 %v6691_v21, %v6628_v38  ;;  %10373 = vmatprep.subr.bf16.mxu1 %v11523_v0 }
0x1e61   :  { %v10350_v19 = vpop.f32.mrf.mxu1 }
0x1e62   :  { %v6700_v2 = vmax.f32 %v6692_v63, 0.0 }
0x1e63   :  { %10374 = vmatpush3.bf16.msra.mxu1 %v6891_v26 }
0x1e64   :  { %v6703_v16 = vpack.c.bf16 %v6700_v2, %v6699_v25  ;;  %10393 = vmatprep.subr.bf16.mxu1 %v11523_v0 }
0x1e66   :  { %10368 = vmatmul.mubr.msk.bf16.gmra.mxu0 %vm2351_vm5, %v6703_v16 }
0x1e67   :  { %10389 = vmatprep.mubr.msk.bf16.mxu0 %vm11524_vm0, %v11523_v0 }
0x1ee9   :  { %v6751_v52 = vpop.f32.mrf.mxu0 }
0x1eea   :  { %v6774_v39 = vadd.f32 %v6751_v52, %v13807_v49 }
0x1eeb   :  { %v10361_v33 = vpop.f32.mrf.mxu0 }
0x1eec   :  { %v13932_v60 = vadd.f32 %v6783_v50, %v6774_v39 }
0x1eed   :  { %v6754_v7 = vpop.f32.mrf.mxu0 }
0x1eee   :  { %v6775_v6 = vadd.f32 %v6754_v7, %v13812_v5  ;;  %v6790_v47 = vsel %vm144_vm1, %v13932_v60, 0.0 }
0x1eef   :  { %6791 = vadd.xlane.f32.xlu0 %v6790_v47  ;;  %v10362_v56 = vpop.f32.mrf.mxu0 }
0x1ef0   :  { %v13937_v45 = vadd.f32 %v6783_v50, %v6775_v6 }
0x1ef2   :  { %v6793_v12 = vsel %vm144_vm1, %v13937_v45, 0.0 }
0x1ef3   :  { %6794 = vadd.xlane.f32.xlu1 %v6793_v12 }
0x1f1e   :  { %v6759_v28 = vpop.f32.mrf.mxu0 }
0x1f1f   :  { %v6776_v49 = vadd.f32 %v6759_v28, %v13817_v37 }
0x1f20   :  { %v10365_v41 = vpop.f32.mrf.mxu0 }
0x1f21   :  { %v13942_v34 = vadd.f32 %v6783_v50, %v6776_v49 }
0x1f22   :  { %v6762_v24 = vpop.f32.mrf.mxu0 }
0x1f23   :  { %v6777_v5 = vadd.f32 %v6762_v24, %v13822_v32  ;;  %v6796_v13 = vsel %vm144_vm1, %v13942_v34, 0.0 }
0x1f24   :  { %6797 = vadd.xlane.f32.xlu0 %v6796_v13  ;;  %v10366_v31 = vpop.f32.mrf.mxu0 }
0x1f25   :  { %v13947_v9 = vadd.f32 %v6783_v50, %v6777_v5 }
0x1f26   :  { %v6767_v20 = vpop.f32.mrf.mxu0 }
0x1f27   :  { %v6778_v17 = vadd.f32 %v6767_v20, %v13827_v4  ;;  %v6799_v38 = vsel %vm144_vm1, %v13947_v9, 0.0 }
0x1f28   :  { %6800 = vadd.xlane.f32.xlu1 %v6799_v38  ;;  %v10369_v37 = vpop.f32.mrf.mxu0 }
0x1f29   :  { %v13952_v30 = vadd.f32 %v6783_v50, %v6778_v17 }
0x1f2a   :  { %v6770_v11 = vpop.f32.mrf.mxu0 }
0x1f2b   :  { %v6779_v32 = vadd.f32 %v6770_v11, %v13832_v27  ;;  %v6802_v61 = vsel %vm144_vm1, %v13952_v30, 0.0  ;;  %v6871_v11 = vrot.slane %v13880_v36, %v11692_v54 }
0x1f2c   :  { %6803 = vadd.xlane.f32.xlu0 %v6802_v61  ;;  %v10370_v59 = vpop.f32.mrf.mxu0 }
0x1f2d   :  { %v13957_v46 = vadd.f32 %v6783_v50, %v6779_v32  ;;  %v6881_v59 = vrot.slane %v13880_v36, %v11698_v62 }
0x1f2f   :  { %v6805_v4 = vsel %vm144_vm1, %v13957_v46, 0.0 }
0x1f30   :  { %6806 = vadd.xlane.f32.xlu1 %v6805_v4 }
0x1f78   :  { %v6792_v1 = vpop.xlane.xlu0 %6791 }
0x1f79   :  { %v6808_v51 = vmul.f32 0.03125, %v6792_v1 }
0x1f7b   :  { %v6814_v57 = vsub.f32 %v13932_v60, %v6808_v51 }
0x1f7c   :  { %v6795_v3 = vpop.xlane.xlu1 %6794 }
0x1f7d   :  { %v6809_v35 = vmul.f32 0.03125, %v6795_v3  ;;  %v6820_v42 = vmul.f32 %v6814_v57, %v6814_v57 }
0x1f7f   :  { %v6815_v27 = vsub.f32 %v13937_v45, %v6809_v35  ;;  %v6826_v18 = vsel %vm144_vm1, %v6820_v42, 0.0 }
0x1f80   :  { %6827 = vadd.xlane.f32.xlu0 %v6826_v18 }
0x1f81   :  { %v6821_v14 = vmul.f32 %v6815_v27, %v6815_v27 }
0x1f83   :  { %v6829_v10 = vsel %vm144_vm1, %v6821_v14, 0.0 }
0x1f84   :  { %6830 = vadd.xlane.f32.xlu1 %v6829_v10 }
0x1fad   :  { %v6798_v55 = vpop.xlane.xlu0 %6797 }
0x1fae   :  { %v6810_v21 = vmul.f32 0.03125, %v6798_v55 }
0x1fb0   :  { %v6816_v63 = vsub.f32 %v13942_v34, %v6810_v21 }
0x1fb1   :  { %v6801_v19 = vpop.xlane.xlu1 %6800 }
0x1fb2   :  { %v6811_v25 = vmul.f32 0.03125, %v6801_v19  ;;  %v6822_v2 = vmul.f32 %v6816_v63, %v6816_v63 }
0x1fb4   :  { %v6817_v16 = vsub.f32 %v13947_v9, %v6811_v25  ;;  %v6832_v50 = vsel %vm144_vm1, %v6822_v2, 0.0 }
0x1fb5   :  { %6833 = vadd.xlane.f32.xlu0 %v6832_v50  ;;  %v6804_v52 = vpop.xlane.xlu0 %6803 }
0x1fb6   :  { %v6812_v39 = vmul.f32 0.03125, %v6804_v52  ;;  %v6823_v33 = vmul.f32 %v6817_v16, %v6817_v16 }
0x1fb8   :  { %v6818_v7 = vsub.f32 %v13952_v30, %v6812_v39  ;;  %v6835_v6 = vsel %vm144_vm1, %v6823_v33, 0.0 }
0x1fb9   :  { %6836 = vadd.xlane.f32.xlu1 %v6835_v6  ;;  %v6807_v47 = vpop.xlane.xlu1 %6806 }
0x1fba   :  { %v6813_v56 = vmul.f32 0.03125, %v6807_v47  ;;  %v6824_v12 = vmul.f32 %v6818_v7, %v6818_v7 }
0x1fbc   :  { %v6819_v28 = vsub.f32 %v13957_v46, %v6813_v56  ;;  %v6838_v49 = vsel %vm144_vm1, %v6824_v12, 0.0 }
0x1fbd   :  { %6839 = vadd.xlane.f32.xlu0 %v6838_v49 }
0x1fbe   :  { %v6825_v41 = vmul.f32 %v6819_v28, %v6819_v28 }
0x1fc0   :  { %v6841_v24 = vsel %vm144_vm1, %v6825_v41, 0.0 }
0x1fc1   :  { %6842 = vadd.xlane.f32.xlu1 %v6841_v24 }
0x2009   :  { %v6828_v5 = vpop.xlane.xlu0 %6827 }
0x200a   :  { %v6844_v13 = vmul.f32 0.03125, %v6828_v5 }
0x200c   :  { %v6850_v31 = vadd.f32 1e-05, %v6844_v13 }
0x200d   :  { %v6831_v20 = vpop.xlane.xlu1 %6830 }
0x200e   :  { %11332 = vrsqrt.f32 %v6850_v31  ;;  %v6845_v17 = vmul.f32 0.03125, %v6831_v20 }
0x2010   :  { %v6851_v38 = vadd.f32 1e-05, %v6845_v17 }
0x2012   :  { %11334 = vrsqrt.f32 %v6851_v38 }
0x201b   :  { %v11333_v37 = vpop.eup %11332 }
0x201c   :  { %v6862_v32 = vmul.f32 %v11333_v37, %v6814_v57 }
0x201e   :  { %v6872_v4 = vmul.f32 %v6871_v11, %v6862_v32 }
0x201f   :  { %v11335_v61 = vpop.eup %11334 }
0x2020   :  { %v6863_v1 = vmul.f32 %v11335_v61, %v6815_v27  ;;  %v6882_v3 = vadd.f32 %v6881_v59, %v6872_v4 }
0x2022   :  { %v6873_v51 = vmul.f32 %v6871_v11, %v6863_v1 }
0x2024   :  { %v6883_v35 = vadd.f32 %v6881_v59, %v6873_v51 }
0x2026   :  { %v6888_v42 = vpack.c.bf16 %v6883_v35, %v6882_v3 }
0x2028   :  { %10376 = vmatmul.mubr.msk.bf16.vlgmr.msra.gmra.mxu1 %vm144_vm1, %v6888_v42 }
0x2029   :  { %10379 = vmatprep.mubr.msk.bf16.mxu1 %vm11524_vm0, %v11523_v0 }
0x203e   :  { %v6834_v18 = vpop.xlane.xlu0 %6833 }
0x203f   :  { %v6846_v14 = vmul.f32 0.03125, %v6834_v18 }
0x2041   :  { %v6852_v10 = vadd.f32 1e-05, %v6846_v14 }
0x2042   :  { %v6837_v40 = vpop.xlane.xlu1 %6836 }
0x2043   :  { %11336 = vrsqrt.f32 %v6852_v10  ;;  %v6847_v57 = vmul.f32 0.03125, %v6837_v40 }
0x2045   :  { %v6853_v8 = vadd.f32 1e-05, %v6847_v57 }
0x2046   :  { %v6840_v44 = vpop.xlane.xlu0 %6839 }
0x2047   :  { %11338 = vrsqrt.f32 %v6853_v8  ;;  %v6848_v53 = vmul.f32 0.03125, %v6840_v44 }
0x2049   :  { %v6854_v27 = vadd.f32 1e-05, %v6848_v53 }
0x204a   :  { %v6843_v29 = vpop.xlane.xlu1 %6842 }
0x204b   :  { %11340 = vrsqrt.f32 %v6854_v27  ;;  %v6849_v26 = vmul.f32 0.03125, %v6843_v29 }
0x204d   :  { %v6855_v55 = vadd.f32 1e-05, %v6849_v26 }
0x204f   :  { %11342 = vrsqrt.f32 %v6855_v55 }
0x2050   :  { %v11337_v21 = vpop.eup %11336 }
0x2051   :  { %v6864_v19 = vmul.f32 %v11337_v21, %v6816_v63 }
0x2053   :  { %v6874_v50 = vmul.f32 %v6871_v11, %v6864_v19 }
0x2054   :  { %v11339_v25 = vpop.eup %11338 }
0x2055   :  { %v6865_v2 = vmul.f32 %v11339_v25, %v6817_v16  ;;  %v6884_v6 = vadd.f32 %v6881_v59, %v6874_v50 }
0x2057   :  { %v6875_v52 = vmul.f32 %v6871_v11, %v6865_v2 }
0x2058   :  { %v11341_v39 = vpop.eup %11340 }
0x2059   :  { %v6866_v33 = vmul.f32 %v11341_v39, %v6818_v7  ;;  %v6885_v47 = vadd.f32 %v6881_v59, %v6875_v52  ;;  %v6896_v7 = vrot.slane %v13880_v36, %v11717_v15 }
0x205b   :  { %v6889_v56 = vpack.c.bf16 %v6885_v47, %v6884_v6  ;;  %v6876_v41 = vmul.f32 %v6871_v11, %v6866_v33 }
0x205c   :  { %v11343_v12 = vpop.eup %11342 }
0x205d   :  { %v6867_v49 = vmul.f32 %v11343_v12, %v6819_v28  ;;  %10380 = vmatmul.mubr.msk.bf16.gmra.mxu1 %vm144_vm1, %v6889_v56  ;;  %v6886_v5 = vadd.f32 %v6881_v59, %v6876_v41 }
0x205e   :  { %10383 = vmatprep.mubr.msk.bf16.mxu1 %vm11524_vm0, %v11523_v0 }
0x205f   :  { %v6877_v24 = vmul.f32 %v6871_v11, %v6867_v49 }
0x2061   :  { %v6887_v63 = vadd.f32 %v6881_v59, %v6877_v24 }
0x2063   :  { %v6890_v13 = vpack.c.bf16 %v6887_v63, %v6886_v5 }
0x2065   :  { %10384 = vmatmul.mubr.msk.bf16.gmra.mxu1 %vm144_vm1, %v6890_v13 }
0x2066   :  { %10395 = vmatprep.mubr.msk.bf16.mxu1 %vm11524_vm0, %v11523_v0 }
0x20e8   :  { %v6940_v16 = vpop.f32.mrf.mxu1 }
0x20e9   :  { %v6941_v20 = vadd.f32 %v6940_v16, %v6896_v7 }
0x20ea   :  { %v10377_v28 = vpop.f32.mrf.mxu1 }
0x20ec   :  { %v6943_v31 = vpop.f32.mrf.mxu1 }
0x20ed   :  { %v6944_v17 = vadd.f32 %v6943_v31, %v6896_v7 }
0x20ee   :  { %v10378_v38 = vpop.f32.mrf.mxu1 }
0x20ef   :  { %v10882_v37 = vpack.i.bf16 %v6944_v17, %v6941_v20  ;;  %v14002_v32 = vpack.c.bf16 %v6944_v17, %v6941_v20 }
0x20f1   :  { %10883 = vrot.lane.b32.xlu0 %v10882_v37, %s11526_s25 }
0x211d   :  { %v6948_v11 = vpop.f32.mrf.mxu1 }
0x211e   :  { %v6949_v4 = vadd.f32 %v6948_v11, %v6896_v7 }
0x211f   :  { %v10381_v61 = vpop.f32.mrf.mxu1 }
0x2121   :  { %v6951_v59 = vpop.f32.mrf.mxu1 }
0x2122   :  { %v6952_v1 = vadd.f32 %v6951_v59, %v6896_v7 }
0x2123   :  { %v10382_v51 = vpop.f32.mrf.mxu1 }
0x2124   :  { %v10902_v3 = vpack.i.bf16 %v6952_v1, %v6949_v4  ;;  %v7024_v57 = vpack.c.bf16 %v6952_v1, %v6949_v4 }
0x2125   :  { %v6956_v35 = vpop.f32.mrf.mxu1 }
0x2126   :  { %10903 = vrot.lane.b32.xlu0 %v10902_v3, %s11527_s26  ;;  %10888 = vrot.lane.b32.xlu1 %v10902_v3, %s11526_s25  ;;  %v6957_v18 = vadd.f32 %v6956_v35, %v6896_v7 }
0x2127   :  { %v10385_v36 = vpop.f32.mrf.mxu1 }
0x2129   :  { %v6959_v42 = vpop.f32.mrf.mxu1 }
0x212a   :  { %v6960_v14 = vadd.f32 %v6959_v42, %v6896_v7  ;;  %10913 = vrot.lane.b32.xlu0 %v10882_v37, %s11528_s27 }
0x212b   :  { %v10386_v10 = vpop.f32.mrf.mxu1 }
0x212c   :  { %v10922_v40 = vpack.i.bf16 %v6960_v14, %v6957_v18  ;;  %v14016_v8 = vpack.c.bf16 %v6960_v14, %v6957_v18 }
0x212e   :  { %10923 = vrot.lane.b32.xlu0 %v10922_v40, %s11528_s27  ;;  %10893 = vrot.lane.b32.xlu1 %v10922_v40, %s11526_s25 }
0x2132   :  { %7086 = vrot.lane.b32.xlu0 %v7024_v57, %s11529_s29  ;;  %10898 = vrot.lane.b32.xlu1 %v10882_v37, %s11527_s26 }
0x2136   :  { %10908 = vrot.lane.b32.xlu1 %v10922_v40, %s11527_s26 }
0x213a   :  { %10918 = vrot.lane.b32.xlu1 %v10902_v3, %s11528_s27 }
0x213e   :  { %7036 = vrot.lane.b32.xlu1 %v14002_v32, %s11529_s29 }
0x2142   :  { %7136 = vrot.lane.b32.xlu1 %v14016_v8, %s11529_s29 }
0x2163   :  { %v10884_v44 = vpop.permute.xlu0 %10883 }
0x2164   :  { %v10886_v53 = vunpack.i.h.bf16 %v10884_v44  ;;  %v10885_v27 = vunpack.i.l.bf16 %v10884_v44 }
0x2166   :  { %v14020_v29 = vpack.c.bf16 %v10886_v53, %v10885_v27 }
0x2168   :  { %7186 = vrot.lane.b32.xlu0 %v14020_v29, %s11529_s29 }
0x2198   :  { %v10904_v26 = vpop.permute.xlu0 %10903  ;;  %v10889_v55 = vpop.permute.xlu1 %10888 }
0x2199   :  { %v10891_v21 = vunpack.i.h.bf16 %v10889_v55  ;;  %v10890_v19 = vunpack.i.l.bf16 %v10889_v55  ;;  %v10906_v6 = vunpack.i.h.bf16 %v10904_v26  ;;  %v10905_v47 = vunpack.i.l.bf16 %v10904_v26 }
0x219b   :  { %v14024_v25 = vpack.c.bf16 %v10891_v21, %v10890_v19  ;;  %v14033_v63 = vpack.c.bf16 %v10906_v6, %v10905_v47 }
0x219c   :  { %v10914_v2 = vpop.permute.xlu0 %10913 }
0x219d   :  { %7236 = vrot.lane.b32.xlu1 %v14024_v25, %s11529_s29  ;;  %v10916_v13 = vunpack.i.h.bf16 %v10914_v2  ;;  %v10915_v16 = vunpack.i.l.bf16 %v10914_v2 }
0x219f   :  { %v14042_v17 = vpack.c.bf16 %v10916_v13, %v10915_v16 }
0x21a0   :  { %v10924_v50 = vpop.permute.xlu0 %10923  ;;  %v10894_v52 = vpop.permute.xlu1 %10893 }
0x21a1   :  { %v10896_v39 = vunpack.i.h.bf16 %v10894_v52  ;;  %v10895_v33 = vunpack.i.l.bf16 %v10894_v52  ;;  %v10926_v38 = vunpack.i.h.bf16 %v10924_v50  ;;  %v10925_v37 = vunpack.i.l.bf16 %v10924_v50 }
0x21a3   :  { %v14028_v56 = vpack.c.bf16 %v10896_v39, %v10895_v33  ;;  %v14053_v1 = vpack.c.bf16 %v10926_v38, %v10925_v37 }
0x21a4   :  { %v7087_v12 = vpop.permute.xlu0 %7086  ;;  %v10899_v49 = vpop.permute.xlu1 %10898 }
0x21a5   :  { %v7092_v41 = vsel %vm500_vm2, %v7087_v12, 0  ;;  %v10901_v24 = vunpack.i.h.bf16 %v10899_v49  ;;  %v10900_v5 = vunpack.i.l.bf16 %v10899_v49  ;;  %7286 = vrot.lane.b32.xlu0 %v14028_v56, %s11529_s29 }
0x21a6   :  { %10394 = vmatpush3.bf16.xpose.msra.mxu1 %v7092_v41 }
0x21a7   :  { %v14035_v7 = vpack.c.bf16 %v10901_v24, %v10900_v5  ;;  %10405 = vmatprep.subr.bf16.mxu1 %v11523_v0  ;;  %v14145_v24 = vld [vmem:[%s14787_s1 + $0x10] sm:$0xff] }
0x21a8   :  { %v10909_v28 = vpop.permute.xlu1 %10908 }
0x21a9   :  { %v10911_v31 = vunpack.i.h.bf16 %v10909_v28  ;;  %v10910_v20 = vunpack.i.l.bf16 %v10909_v28  ;;  %7386 = vrot.lane.b32.xlu0 %v14033_v63, %s11529_s29  ;;  %7336 = vrot.lane.b32.xlu1 %v14035_v7, %s11529_s29 }
0x21ab   :  { %v14044_v11 = vpack.c.bf16 %v10911_v31, %v10910_v20  ;;  %v14155_v20 = vld [vmem:[%s14787_s1 + $0x18] sm:$0xff] }
0x21ac   :  { %v10919_v61 = vpop.permute.xlu1 %10918 }
0x21ad   :  { %v10921_v59 = vunpack.i.h.bf16 %v10919_v61  ;;  %v10920_v4 = vunpack.i.l.bf16 %v10919_v61  ;;  %10396 = vmatmul.mubr.msk.bf16.vlgmr.msra.gmra.mxu1 %vm500_vm2, %v7024_v57  ;;  %7486 = vrot.lane.b32.xlu0 %v14042_v17, %s11529_s29 }
0x21ae   :  { %7436 = vrot.lane.b32.xlu1 %v14044_v11, %s11529_s29  ;;  %10407 = vmatprep.mubr.msk.bf16.mxu1 %vm11524_vm0, %v11523_v0 }
0x21af   :  { %v14055_v51 = vpack.c.bf16 %v10921_v59, %v10920_v4 }
0x21b0   :  { %v7037_v3 = vpop.permute.xlu1 %7036 }
0x21b1   :  { %v7042_v35 = vsel %vm500_vm2, %v7037_v3, 0  ;;  %7586 = vrot.lane.b32.xlu0 %v14053_v1, %s11529_s29 }
0x21b2   :  { %7536 = vrot.lane.b32.xlu1 %v14055_v51, %s11529_s29  ;;  %10388 = vmatpush3.bf16.xpose.msra.mxu0 %v7042_v35 }
0x21b3   :  { %10399 = vmatprep.subr.bf16.mxu0 %v11523_v0 }
0x21b4   :  { %v7137_v36 = vpop.permute.xlu1 %7136 }
0x21b5   :  { %8006 = vrot.lane.b32.xlu0 %v7024_v57, %s11530_s30  ;;  %v7142_v42 = vsel %vm500_vm2, %v7137_v36, 0 }
0x21b6   :  { %7959 = vrot.lane.b32.xlu1 %v14002_v32, %s11530_s30 }
0x21b9   :  { %10390 = vmatmul.mubr.msk.bf16.vlgmr.msra.gmra.mxu0 %vm500_vm2, %v14002_v32  ;;  %8100 = vrot.lane.b32.xlu0 %v14020_v29, %s11530_s30 }
0x21ba   :  { %8053 = vrot.lane.b32.xlu1 %v14016_v8, %s11530_s30  ;;  %10400 = vmatpush3.bf16.xpose.msra.mxu0 %v7142_v42 }
0x21bb   :  { %10401 = vmatprep.mubr.msk.bf16.mxu0 %vm11524_vm0, %v11523_v0  ;;  %10411 = vmatprep.subr.bf16.mxu0 %v11523_v0 }
0x21bd   :  { %8194 = vrot.lane.b32.xlu0 %v14028_v56, %s11530_s30 }
0x21be   :  { %8147 = vrot.lane.b32.xlu1 %v14024_v25, %s11530_s30 }
0x21c1   :  { %10402 = vmatmul.mubr.msk.bf16.vlgmr.msra.gmra.mxu0 %vm500_vm2, %v14016_v8 }
0x21c2   :  { %8241 = vrot.lane.b32.xlu1 %v14035_v7, %s11530_s30  ;;  %10413 = vmatprep.mubr.msk.bf16.mxu0 %vm11524_vm0, %v11523_v0 }
0x21da   :  { %v7187_v32 = vpop.permute.xlu0 %7186 }
0x21db   :  { %v7192_v18 = vsel %vm500_vm2, %v7187_v32, 0 }
0x21dc   :  { %10406 = vmatpush3.bf16.xpose.msra.mxu1 %v7192_v18 }
0x21dd   :  { %10417 = vmatprep.subr.bf16.mxu1 %v11523_v0 }
0x21e3   :  { %10408 = vmatmul.mubr.msk.bf16.vlgmr.msra.gmra.mxu1 %vm500_vm2, %v14020_v29 }
0x21e4   :  { %10419 = vmatprep.mubr.msk.bf16.mxu1 %vm11524_vm0, %v11523_v0 }
0x220f   :  { %v7237_v14 = vpop.permute.xlu1 %7236 }
0x2210   :  { %v7242_v10 = vsel %vm500_vm2, %v7237_v14, 0 }
0x2211   :  { %10412 = vmatpush3.bf16.xpose.msra.mxu0 %v7242_v10 }
0x2212   :  { %10423 = vmatprep.subr.bf16.mxu0 %v11523_v0 }
0x2217   :  { %v7287_v40 = vpop.permute.xlu0 %7286 }
0x2218   :  { %v7292_v57 = vsel %vm500_vm2, %v7287_v40, 0  ;;  %10414 = vmatmul.mubr.msk.bf16.vlgmr.msra.gmra.mxu0 %vm500_vm2, %v14024_v25 }
0x2219   :  { %10418 = vmatpush3.bf16.xpose.msra.mxu1 %v7292_v57  ;;  %10425 = vmatprep.mubr.msk.bf16.mxu0 %vm11524_vm0, %v11523_v0 }
0x221a   :  { %10429 = vmatprep.subr.bf16.mxu1 %v11523_v0 }
0x221b   :  { %v7337_v8 = vpop.permute.xlu1 %7336  ;;  %v7387_v53 = vpop.permute.xlu0 %7386 }
0x221c   :  { %v7342_v44 = vsel %vm500_vm2, %v7337_v8, 0  ;;  %v7392_v27 = vsel %vm500_vm2, %v7387_v53, 0 }
0x221d   :  { %10424 = vmatpush3.bf16.xpose.msra.mxu0 %v7342_v44 }
0x221e   :  { %10435 = vmatprep.subr.bf16.mxu0 %v11523_v0 }
0x221f   :  { %v7487_v55 = vpop.permute.xlu0 %7486 }
0x2220   :  { %10420 = vmatmul.mubr.msk.bf16.vlgmr.msra.gmra.mxu1 %vm500_vm2, %v14028_v56  ;;  %v7437_v29 = vpop.permute.xlu1 %7436  ;;  %v7492_v21 = vsel %vm500_vm2, %v7487_v55, 0 }
0x2221   :  { %10430 = vmatpush3.bf16.xpose.msra.mxu1 %v7392_v27  ;;  %10431 = vmatprep.mubr.msk.bf16.mxu1 %vm11524_vm0, %v11523_v0  ;;  %v7442_v26 = vsel %vm500_vm2, %v7437_v29, 0 }
0x2222   :  { %10441 = vmatprep.subr.bf16.mxu1 %v11523_v0 }
0x2223   :  { %v7587_v2 = vpop.permute.xlu0 %7586 }
0x2224   :  { %10426 = vmatmul.mubr.msk.bf16.vlgmr.msra.gmra.mxu0 %vm500_vm2, %v14035_v7  ;;  %v7537_v19 = vpop.permute.xlu1 %7536  ;;  %v7592_v50 = vsel %vm500_vm2, %v7587_v2, 0 }
0x2225   :  { %10436 = vmatpush3.bf16.xpose.msra.mxu0 %v7442_v26  ;;  %10437 = vmatprep.mubr.msk.bf16.mxu0 %vm11524_vm0, %v11523_v0  ;;  %v7542_v25 = vsel %vm500_vm2, %v7537_v19, 0 }
0x2226   :  { %10447 = vmatprep.subr.bf16.mxu0 %v11523_v0 }
0x2227   :  { %v8007_v39 = vpop.permute.xlu0 %8006 }
0x2228   :  { %10432 = vmatmul.mubr.msk.bf16.vlgmr.msra.gmra.mxu1 %vm500_vm2, %v14033_v63  ;;  %v7960_v52 = vpop.permute.xlu1 %7959 }
0x2229   :  { %10442 = vmatpush3.bf16.xpose.msra.mxu1 %v7492_v21  ;;  %10443 = vmatprep.mubr.msk.bf16.mxu1 %vm11524_vm0, %v11523_v0 }
0x222a   :  { %10453 = vmatprep.subr.bf16.mxu1 %v11523_v0 }
0x222c   :  { %10438 = vmatmul.mubr.msk.bf16.vlgmr.msra.gmra.mxu0 %vm500_vm2, %v14044_v11 }
0x222d   :  { %10448 = vmatpush3.bf16.xpose.msra.mxu0 %v7542_v25  ;;  %10449 = vmatprep.mubr.msk.bf16.mxu0 %vm11524_vm0, %v11523_v0 }
0x222e   :  { %10459 = vmatprep.subr.bf16.mxu0 %v11523_v0 }
0x2230   :  { %10444 = vmatmul.mubr.msk.bf16.vlgmr.msra.gmra.mxu1 %vm500_vm2, %v14042_v17 }
0x2231   :  { %10454 = vmatpush3.bf16.xpose.msra.mxu1 %v7592_v50  ;;  %10455 = vmatprep.mubr.msk.bf16.mxu1 %vm11524_vm0, %v11523_v0 }
0x2232   :  { %10465 = vmatprep.subr.bf16.mxu1 %v11523_v0 }
0x2234   :  { %10450 = vmatmul.mubr.msk.bf16.vlgmr.msra.gmra.mxu0 %vm500_vm2, %v14055_v51 }
0x2235   :  { %10460 = vmatpush3.bf16.msra.mxu0 %v7960_v52  ;;  %10461 = vmatprep.mubr.msk.bf16.mxu0 %vm11524_vm0, %v11523_v0 }
0x2236   :  { %10471 = vmatprep.subr.bf16.mxu0 %v11523_v0 }
0x2238   :  { %10456 = vmatmul.mubr.msk.bf16.vlgmr.msra.gmra.mxu1 %vm500_vm2, %v14053_v1 }
0x2239   :  { %10466 = vmatpush3.bf16.msra.mxu1 %v8007_v39  ;;  %10467 = vmatprep.mubr.msk.bf16.mxu1 %vm11524_vm0, %v11523_v0 }
0x223a   :  { %10477 = vmatprep.subr.bf16.mxu1 %v11523_v0 }
0x226d   :  { %v7128_v33 = vpop.f32.mrf.mxu1 }
0x226e   :  { %v7637_v16 = vmul.f32 0.35355338, %v7128_v33 }
0x226f   :  { %v10397_v6 = vpop.f32.mrf.mxu1 }
0x2270   :  { %v14161_v61 = vadd.f32 %v14145_v24, %v7637_v16 }
0x2271   :  { %v7131_v47 = vpop.f32.mrf.mxu1 }
0x2272   :  { %v7638_v59 = vmul.f32 0.35355338, %v7131_v47  ;;  %v7689_v14 = vsel %vm1146_vm3, %v14161_v61, -inf }
0x2273   :  { %v10398_v56 = vpop.f32.mrf.mxu1 }
0x2274   :  { %v14169_v32 = vadd.f32 %v14155_v20, %v7638_v59 }
0x2276   :  { %v7692_v8 = vsel %vm1146_vm3, %v14169_v32, -inf }
0x2279   :  { %v7078_v12 = vpop.f32.mrf.mxu0 }
0x227a   :  { %v7635_v49 = vmul.f32 0.35355338, %v7078_v12 }
0x227b   :  { %v10391_v41 = vpop.f32.mrf.mxu0 }
0x227c   :  { %v14148_v5 = vadd.f32 %v14145_v24, %v7635_v49 }
0x227d   :  { %v7081_v13 = vpop.f32.mrf.mxu0 }
0x227e   :  { %v7636_v7 = vmul.f32 0.35355338, %v7081_v13  ;;  %v7683_v28 = vsel %vm1146_vm3, %v14148_v5, -inf }
0x227f   :  { %7684 = vmax.xlane.f32.xlu1 %v7683_v28  ;;  %v10392_v31 = vpop.f32.mrf.mxu0 }
0x2280   :  { %v14158_v38 = vadd.f32 %v14155_v20, %v7636_v7 }
0x2281   :  { %v7178_v37 = vpop.f32.mrf.mxu0 }
0x2282   :  { %v7639_v4 = vmul.f32 0.35355338, %v7178_v37  ;;  %v7686_v3 = vsel %vm1146_vm3, %v14158_v38, -inf }
0x2283   :  { %7687 = vmax.xlane.f32.xlu0 %v7686_v3  ;;  %v10403_v35 = vpop.f32.mrf.mxu0 }
0x2284   :  { %v14166_v36 = vadd.f32 %v14145_v24, %v7639_v4 }
0x2285   :  { %v7181_v42 = vpop.f32.mrf.mxu0 }
0x2286   :  { %v7640_v18 = vmul.f32 0.35355338, %v7181_v42  ;;  %v7695_v10 = vsel %vm1146_vm3, %v14166_v36, -inf }
0x2287   :  { %7690 = vmax.xlane.f32.xlu0 %v7689_v14  ;;  %7696 = vmax.xlane.f32.xlu1 %v7695_v10  ;;  %v10404_v40 = vpop.f32.mrf.mxu0 }
0x2288   :  { %v14176_v57 = vadd.f32 %v14155_v20, %v7640_v18 }
0x228a   :  { %v7698_v44 = vsel %vm1146_vm3, %v14176_v57, -inf }
0x228b   :  { %7693 = vmax.xlane.f32.xlu0 %v7692_v8 }
0x228f   :  { %7699 = vmax.xlane.f32.xlu0 %v7698_v44 }
0x22a3   :  { %v7228_v53 = vpop.f32.mrf.mxu1 }
0x22a4   :  { %v7641_v27 = vmul.f32 0.35355338, %v7228_v53 }
0x22a5   :  { %v10409_v29 = vpop.f32.mrf.mxu1 }
0x22a6   :  { %v14183_v26 = vadd.f32 %v14145_v24, %v7641_v27 }
0x22a7   :  { %v7231_v55 = vpop.f32.mrf.mxu1 }
0x22a8   :  { %v7642_v21 = vmul.f32 0.35355338, %v7231_v55  ;;  %v7701_v19 = vsel %vm1146_vm3, %v14183_v26, -inf }
0x22a9   :  { %v10410_v25 = vpop.f32.mrf.mxu1  ;;  %7702 = vmax.xlane.f32.xlu1 %v7701_v19 }
0x22aa   :  { %v14188_v2 = vadd.f32 %v14155_v20, %v7642_v21 }
0x22ac   :  { %v7704_v50 = vsel %vm1146_vm3, %v14188_v2, -inf }
0x22ad   :  { %7705 = vmax.xlane.f32.xlu0 %v7704_v50 }
0x22d8   :  { %v7278_v52 = vpop.f32.mrf.mxu0 }
0x22d9   :  { %v7643_v39 = vmul.f32 0.35355338, %v7278_v52 }
0x22da   :  { %v10415_v33 = vpop.f32.mrf.mxu0 }
0x22db   :  { %v14193_v6 = vadd.f32 %v14145_v24, %v7643_v39 }
0x22dc   :  { %v7281_v47 = vpop.f32.mrf.mxu0 }
0x22dd   :  { %v7644_v56 = vmul.f32 0.35355338, %v7281_v47  ;;  %v7707_v12 = vsel %vm1146_vm3, %v14193_v6, -inf }
0x22de   :  { %7708 = vmax.xlane.f32.xlu1 %v7707_v12  ;;  %v10416_v49 = vpop.f32.mrf.mxu0 }
0x22df   :  { %v14198_v41 = vadd.f32 %v14155_v20, %v7644_v56 }
0x22e0   :  { %v7328_v13 = vpop.f32.mrf.mxu1 }
0x22e1   :  { %v7645_v16 = vmul.f32 0.35355338, %v7328_v13  ;;  %v7710_v7 = vsel %vm1146_vm3, %v14198_v41, -inf }
0x22e2   :  { %v10421_v28 = vpop.f32.mrf.mxu1  ;;  %7711 = vmax.xlane.f32.xlu0 %v7710_v7 }
0x22e3   :  { %v14203_v31 = vadd.f32 %v14145_v24, %v7645_v16 }
0x22e4   :  { %v7331_v37 = vpop.f32.mrf.mxu1  ;;  %v7378_v59 = vpop.f32.mrf.mxu0 }
0x22e5   :  { %v7646_v4 = vmul.f32 0.35355338, %v7331_v37  ;;  %v7647_v3 = vmul.f32 0.35355338, %v7378_v59  ;;  %v7713_v35 = vsel %vm1146_vm3, %v14203_v31, -inf }
0x22e6   :  { %v10422_v42 = vpop.f32.mrf.mxu1  ;;  %7714 = vmax.xlane.f32.xlu1 %v7713_v35  ;;  %v10427_v18 = vpop.f32.mrf.mxu0 }
0x22e7   :  { %v14208_v14 = vadd.f32 %v14155_v20, %v7646_v4  ;;  %v14211_v10 = vadd.f32 %v14145_v24, %v7647_v3 }
0x22e8   :  { %v7381_v40 = vpop.f32.mrf.mxu0  ;;  %v7428_v8 = vpop.f32.mrf.mxu1 }
0x22e9   :  { %v7648_v44 = vmul.f32 0.35355338, %v7381_v40  ;;  %v7649_v53 = vmul.f32 0.35355338, %v7428_v8  ;;  %v7716_v27 = vsel %vm1146_vm3, %v14208_v14, -inf  ;;  %v7719_v29 = vsel %vm1146_vm3, %v14211_v10, -inf }
0x22ea   :  { %v10433_v55 = vpop.f32.mrf.mxu1  ;;  %7717 = vmax.xlane.f32.xlu0 %v7716_v27  ;;  %7720 = vmax.xlane.f32.xlu1 %v7719_v29  ;;  %v10428_v21 = vpop.f32.mrf.mxu0 }
0x22eb   :  { %v14218_v19 = vadd.f32 %v14155_v20, %v7648_v44  ;;  %v14221_v25 = vadd.f32 %v14145_v24, %v7649_v53 }
0x22ec   :  { %v7431_v50 = vpop.f32.mrf.mxu1  ;;  %v7478_v52 = vpop.f32.mrf.mxu0 }
0x22ed   :  { %v7650_v39 = vmul.f32 0.35355338, %v7431_v50  ;;  %v7651_v33 = vmul.f32 0.35355338, %v7478_v52  ;;  %v7725_v47 = vsel %vm1146_vm3, %v14221_v25, -inf  ;;  %v7722_v56 = vsel %vm1146_vm3, %v14218_v19, -inf  ;;  %v14247_v52 = vpop.permute.xlu1 %8053 }
0x22ee   :  { %v10434_v12 = vpop.f32.mrf.mxu1  ;;  %7726 = vmax.xlane.f32.xlu1 %v7725_v47  ;;  %7723 = vmax.xlane.f32.xlu0 %v7722_v56  ;;  %v10439_v49 = vpop.f32.mrf.mxu0 }
0x22ef   :  { %v14228_v13 = vadd.f32 %v14155_v20, %v7650_v39  ;;  %v14231_v16 = vadd.f32 %v14145_v24, %v7651_v33 }
0x22f0   :  { %v7481_v7 = vpop.f32.mrf.mxu0  ;;  %v7528_v28 = vpop.f32.mrf.mxu1 }
0x22f1   :  { %v7652_v37 = vmul.f32 0.35355338, %v7481_v7  ;;  %v7653_v59 = vmul.f32 0.35355338, %v7528_v28  ;;  %v7728_v4 = vsel %vm1146_vm3, %v14228_v13, -inf  ;;  %v7731_v3 = vsel %vm1146_vm3, %v14231_v16, -inf }
0x22f2   :  { %v10445_v35 = vpop.f32.mrf.mxu1  ;;  %7729 = vmax.xlane.f32.xlu0 %v7728_v4  ;;  %7732 = vmax.xlane.f32.xlu1 %v7731_v3  ;;  %v10440_v42 = vpop.f32.mrf.mxu0 }
0x22f3   :  { %v14238_v18 = vadd.f32 %v14155_v20, %v7652_v37  ;;  %v14241_v40 = vadd.f32 %v14145_v24, %v7653_v59 }
0x22f4   :  { %v7531_v8 = vpop.f32.mrf.mxu1  ;;  %v7578_v44 = vpop.f32.mrf.mxu0 }
0x22f5   :  { %v7654_v53 = vmul.f32 0.35355338, %v7531_v8  ;;  %v7655_v27 = vmul.f32 0.35355338, %v7578_v44  ;;  %v7737_v29 = vsel %vm1146_vm3, %v14241_v40, -inf  ;;  %v7734_v55 = vsel %vm1146_vm3, %v14238_v18, -inf }
0x22f6   :  { %v10446_v21 = vpop.f32.mrf.mxu1  ;;  %7738 = vmax.xlane.f32.xlu1 %v7737_v29  ;;  %7735 = vmax.xlane.f32.xlu0 %v7734_v55  ;;  %v10451_v50 = vpop.f32.mrf.mxu0 }
0x22f7   :  { %v14250_v39 = vadd.f32 %v14155_v20, %v7654_v53  ;;  %v14253_v33 = vadd.f32 %v14145_v24, %v7655_v27  ;;  %v14269_v53 = vpop.permute.xlu1 %8147  ;;  %v14276_v55 = vpop.permute.xlu0 %8100 }
0x22f8   :  { %v7581_v47 = vpop.f32.mrf.mxu0  ;;  %v7628_v56 = vpop.f32.mrf.mxu1 }
0x22f9   :  { %v7656_v12 = vmul.f32 0.35355338, %v7581_v47  ;;  %v7657_v49 = vmul.f32 0.35355338, %v7628_v56  ;;  %v7740_v7 = vsel %vm1146_vm3, %v14250_v39, -inf  ;;  %v7743_v28 = vsel %vm1146_vm3, %v14253_v33, -inf }
0x22fa   :  { %v10457_v37 = vpop.f32.mrf.mxu1  ;;  %7741 = vmax.xlane.f32.xlu0 %v7740_v7  ;;  %7744 = vmax.xlane.f32.xlu1 %v7743_v28  ;;  %v10452_v59 = vpop.f32.mrf.mxu0 }
0x22fb   :  { %v14260_v4 = vadd.f32 %v14155_v20, %v7656_v12  ;;  %v14263_v3 = vadd.f32 %v14145_v24, %v7657_v49  ;;  %v14278_v21 = vpop.permute.xlu1 %8241  ;;  %v14280_v50 = vpop.permute.xlu0 %8194 }
0x22fc   :  { %v7631_v35 = vpop.f32.mrf.mxu1 }
0x22fd   :  { %v7658_v42 = vmul.f32 0.35355338, %v7631_v35  ;;  %v7749_v8 = vsel %vm1146_vm3, %v14263_v3, -inf  ;;  %v7746_v44 = vsel %vm1146_vm3, %v14260_v4, -inf }
0x22fe   :  { %v10458_v27 = vpop.f32.mrf.mxu1  ;;  %7750 = vmax.xlane.f32.xlu1 %v7749_v8  ;;  %7747 = vmax.xlane.f32.xlu0 %v7746_v44 }
0x22ff   :  { %v14272_v29 = vadd.f32 %v14155_v20, %v7658_v42 }
0x2301   :  { %v7752_v24 = vsel %vm1146_vm3, %v14272_v29, -inf }
0x2302   :  { %7753 = vmax.xlane.f32.xlu0 %v7752_v24 }
0x2308   :  { %v7685_v47 = vpop.xlane.xlu1 %7684 }
0x2309   :  { %v7755_v56 = vsub.f32 %v14148_v5, %v7685_v47 }
0x230b   :  { %v7779_v12 = vmul.f32 1.442695, %v7755_v56 }
0x230c   :  { %v7688_v49 = vpop.xlane.xlu0 %7687 }
0x230d   :  { %11344 = vpow2.f32 %v7779_v12  ;;  %v7756_v7 = vsub.f32 %v14158_v38, %v7688_v49 }
0x230f   :  { %v7781_v20 = vmul.f32 1.442695, %v7756_v7 }
0x2310   :  { %v7691_v28 = vpop.xlane.xlu0 %7690  ;;  %v7697_v37 = vpop.xlane.xlu1 %7696 }
0x2311   :  { %11346 = vpow2.f32 %v7781_v20  ;;  %v7757_v59 = vsub.f32 %v14161_v61, %v7691_v28  ;;  %v7759_v35 = vsub.f32 %v14166_v36, %v7697_v37 }
0x2313   :  { %v7783_v42 = vmul.f32 1.442695, %v7757_v59  ;;  %v7787_v8 = vmul.f32 1.442695, %v7759_v35 }
0x2314   :  { %v7694_v44 = vpop.xlane.xlu0 %7693 }
0x2315   :  { %11348 = vpow2.f32 %v7783_v42  ;;  %v7758_v27 = vsub.f32 %v14169_v32, %v7694_v44 }
0x2316   :  { %11350 = vpow2.f32 %v7787_v8 }
0x2317   :  { %v7785_v5 = vmul.f32 1.442695, %v7758_v27 }
0x2318   :  { %v7700_v24 = vpop.xlane.xlu0 %7699 }
0x2319   :  { %11352 = vpow2.f32 %v7785_v5  ;;  %v7760_v38 = vsub.f32 %v14176_v57, %v7700_v24 }
0x231a   :  { %v14288_v47 = vpop.eup %11344 }
0x231b   :  { %v7789_v56 = vmul.f32 1.442695, %v7760_v38  ;;  %v7827_v61 = vsel %vm1146_vm3, %v14288_v47, 0.0 }
0x231c   :  { %7828 = vadd.xlane.f32.xlu1 %v7827_v61 }
0x231d   :  { %11354 = vpow2.f32 %v7789_v56 }
0x231e   :  { %v14292_v36 = vpop.eup %11346 }
0x231f   :  { %v7830_v12 = vsel %vm1146_vm3, %v14292_v36, 0.0 }
0x2320   :  { %7831 = vadd.xlane.f32.xlu0 %v7830_v12 }
0x2322   :  { %v14296_v32 = vpop.eup %11348 }
0x2323   :  { %v7833_v49 = vsel %vm1146_vm3, %v14296_v32, 0.0  ;;  %v14300_v57 = vpop.eup %11350 }
0x2324   :  { %7834 = vadd.xlane.f32.xlu1 %v7833_v49  ;;  %v7839_v20 = vsel %vm1146_vm3, %v14300_v57, 0.0 }
0x2326   :  { %v14302_v7 = vpop.eup %11352 }
0x2327   :  { %v7836_v28 = vsel %vm1146_vm3, %v14302_v7, 0.0 }
0x2328   :  { %7840 = vadd.xlane.f32.xlu1 %v7839_v20  ;;  %7837 = vadd.xlane.f32.xlu0 %v7836_v28 }
0x232a   :  { %v14308_v37 = vpop.eup %11354 }
0x232b   :  { %v7842_v59 = vsel %vm1146_vm3, %v14308_v37, 0.0 }
0x232c   :  { %7843 = vadd.xlane.f32.xlu0 %v7842_v59 }
0x2332   :  { %v7703_v35 = vpop.xlane.xlu1 %7702 }
0x2333   :  { %v7761_v42 = vsub.f32 %v14183_v26, %v7703_v35 }
0x2335   :  { %v7791_v8 = vmul.f32 1.442695, %v7761_v42 }
0x2336   :  { %v7706_v44 = vpop.xlane.xlu0 %7705 }
0x2337   :  { %11356 = vpow2.f32 %v7791_v8  ;;  %v7762_v27 = vsub.f32 %v14188_v2, %v7706_v44 }
0x2339   :  { %v7793_v5 = vmul.f32 1.442695, %v7762_v27 }
0x233b   :  { %11358 = vpow2.f32 %v7793_v5 }
0x2344   :  { %v14314_v24 = vpop.eup %11356 }
0x2345   :  { %v7845_v38 = vsel %vm1146_vm3, %v14314_v24, 0.0 }
0x2346   :  { %7846 = vadd.xlane.f32.xlu1 %v7845_v38 }
0x2348   :  { %v14318_v56 = vpop.eup %11358 }
0x2349   :  { %v7848_v61 = vsel %vm1146_vm3, %v14318_v56, 0.0 }
0x234a   :  { %7849 = vadd.xlane.f32.xlu0 %v7848_v61 }
0x2367   :  { %v7709_v26 = vpop.xlane.xlu1 %7708 }
0x2368   :  { %v7763_v12 = vsub.f32 %v14193_v6, %v7709_v26 }
0x236a   :  { %v7795_v49 = vmul.f32 1.442695, %v7763_v12 }
0x236b   :  { %v7712_v20 = vpop.xlane.xlu0 %7711 }
0x236c   :  { %11360 = vpow2.f32 %v7795_v49  ;;  %v7764_v2 = vsub.f32 %v14198_v41, %v7712_v20 }
0x236e   :  { %v7797_v28 = vmul.f32 1.442695, %v7764_v2 }
0x236f   :  { %v7715_v59 = vpop.xlane.xlu1 %7714 }
0x2370   :  { %11362 = vpow2.f32 %v7797_v28  ;;  %v7765_v35 = vsub.f32 %v14203_v31, %v7715_v59 }
0x2372   :  { %v7799_v42 = vmul.f32 1.442695, %v7765_v35 }
0x2373   :  { %v7718_v8 = vpop.xlane.xlu0 %7717  ;;  %v7721_v44 = vpop.xlane.xlu1 %7720 }
0x2374   :  { %11364 = vpow2.f32 %v7799_v42  ;;  %v7766_v27 = vsub.f32 %v14208_v14, %v7718_v8  ;;  %v7767_v5 = vsub.f32 %v14211_v10, %v7721_v44 }
0x2376   :  { %v7801_v38 = vmul.f32 1.442695, %v7766_v27  ;;  %v7803_v6 = vmul.f32 1.442695, %v7767_v5 }
0x2377   :  { %v7727_v61 = vpop.xlane.xlu1 %7726  ;;  %v7724_v26 = vpop.xlane.xlu0 %7723 }
0x2378   :  { %11366 = vpow2.f32 %v7801_v38  ;;  %v7769_v41 = vsub.f32 %v14221_v25, %v7727_v61  ;;  %v7768_v12 = vsub.f32 %v14218_v19, %v7724_v26 }
0x2379   :  { %v14329_v49 = vpop.eup %11360  ;;  %11368 = vpow2.f32 %v7803_v6 }
0x237a   :  { %v7807_v31 = vmul.f32 1.442695, %v7769_v41  ;;  %v7805_v20 = vmul.f32 1.442695, %v7768_v12  ;;  %v7851_v2 = vsel %vm1146_vm3, %v14329_v49, 0.0 }
0x237b   :  { %v7730_v14 = vpop.xlane.xlu0 %7729  ;;  %v7733_v28 = vpop.xlane.xlu1 %7732  ;;  %7852 = vadd.xlane.f32.xlu1 %v7851_v2 }
0x237c   :  { %11370 = vpow2.f32 %v7807_v31  ;;  %v7770_v10 = vsub.f32 %v14228_v13, %v7730_v14  ;;  %v7771_v59 = vsub.f32 %v14231_v16, %v7733_v28 }
0x237d   :  { %v14335_v35 = vpop.eup %11362  ;;  %11372 = vpow2.f32 %v7805_v20 }
0x237e   :  { %v7809_v19 = vmul.f32 1.442695, %v7770_v10  ;;  %v7811_v25 = vmul.f32 1.442695, %v7771_v59  ;;  %v7854_v42 = vsel %vm1146_vm3, %v14335_v35, 0.0 }
0x237f   :  { %v7739_v8 = vpop.xlane.xlu1 %7738  ;;  %v7736_v44 = vpop.xlane.xlu0 %7735  ;;  %7855 = vadd.xlane.f32.xlu0 %v7854_v42 }
0x2380   :  { %11374 = vpow2.f32 %v7809_v19  ;;  %v7773_v27 = vsub.f32 %v14241_v40, %v7739_v8  ;;  %v7772_v5 = vsub.f32 %v14238_v18, %v7736_v44 }
0x2381   :  { %v14341_v38 = vpop.eup %11364  ;;  %11376 = vpow2.f32 %v7811_v25 }
0x2382   :  { %v7815_v13 = vmul.f32 1.442695, %v7773_v27  ;;  %v7813_v16 = vmul.f32 1.442695, %v7772_v5  ;;  %v7857_v6 = vsel %vm1146_vm3, %v14341_v38, 0.0 }
0x2383   :  { %v7742_v61 = vpop.xlane.xlu0 %7741  ;;  %7858 = vadd.xlane.f32.xlu1 %v7857_v6  ;;  %v7745_v26 = vpop.xlane.xlu1 %7744 }
0x2384   :  { %11378 = vpow2.f32 %v7815_v13  ;;  %v7774_v41 = vsub.f32 %v14250_v39, %v7742_v61  ;;  %v7775_v12 = vsub.f32 %v14253_v33, %v7745_v26 }
0x2385   :  { %v14347_v31 = vpop.eup %11366  ;;  %11380 = vpow2.f32 %v7813_v16 }
0x2386   :  { %v14349_v18 = vpop.eup %11368  ;;  %v7817_v40 = vmul.f32 1.442695, %v7774_v41  ;;  %v7819_v20 = vmul.f32 1.442695, %v7775_v12  ;;  %v7860_v2 = vsel %vm1146_vm3, %v14347_v31, 0.0 }
0x2387   :  { %v7863_v14 = vsel %vm1146_vm3, %v14349_v18, 0.0  ;;  %7861 = vadd.xlane.f32.xlu0 %v7860_v2  ;;  %v7748_v26 = vpop.xlane.xlu0 %7747  ;;  %v7751_v41 = vpop.xlane.xlu1 %7750 }
0x2388   :  { %11382 = vpow2.f32 %v7817_v40  ;;  %7864 = vadd.xlane.f32.xlu1 %v7863_v14 }
0x2389   :  { %v14355_v28 = vpop.eup %11370  ;;  %11384 = vpow2.f32 %v7819_v20 }
0x238a   :  { %v14357_v39 = vpop.eup %11372  ;;  %v7869_v33 = vsel %vm1146_vm3, %v14355_v28, 0.0 }
0x238b   :  { %v7866_v10 = vsel %vm1146_vm3, %v14357_v39, 0.0  ;;  %v7754_v12 = vpop.xlane.xlu0 %7753 }
0x238c   :  { %7870 = vadd.xlane.f32.xlu1 %v7869_v33  ;;  %7867 = vadd.xlane.f32.xlu0 %v7866_v10  ;;  %v7776_v10 = vsub.f32 %v14260_v4, %v7748_v26 }
0x238d   :  { %v14363_v59 = vpop.eup %11374 }
0x238e   :  { %v14365_v19 = vpop.eup %11376  ;;  %v7872_v25 = vsel %vm1146_vm3, %v14363_v59, 0.0 }
0x238f   :  { %v7875_v42 = vsel %vm1146_vm3, %v14365_v19, 0.0 }
0x2390   :  { %7876 = vadd.xlane.f32.xlu1 %v7875_v42  ;;  %7873 = vadd.xlane.f32.xlu0 %v7872_v25 }
0x2391   :  { %v14371_v8 = vpop.eup %11378 }
0x2392   :  { %v14373_v44 = vpop.eup %11380  ;;  %v7881_v27 = vsel %vm1146_vm3, %v14371_v8, 0.0 }
0x2393   :  { %v7878_v5 = vsel %vm1146_vm3, %v14373_v44, 0.0 }
0x2394   :  { %7882 = vadd.xlane.f32.xlu1 %v7881_v27  ;;  %7879 = vadd.xlane.f32.xlu0 %v7878_v5  ;;  %v7777_v27 = vsub.f32 %v14263_v3, %v7751_v41  ;;  %v7821_v5 = vmul.f32 1.442695, %v7776_v10 }
0x2395   :  { %v14379_v13 = vpop.eup %11382 }
0x2396   :  { %v14381_v16 = vpop.eup %11384  ;;  %v7884_v6 = vsel %vm1146_vm3, %v14379_v13, 0.0 }
0x2397   :  { %v7887_v61 = vsel %vm1146_vm3, %v14381_v16, 0.0 }
0x2398   :  { %7888 = vadd.xlane.f32.xlu1 %v7887_v61  ;;  %7885 = vadd.xlane.f32.xlu0 %v7884_v6 }
0x23a5   :  { %v7829_v40 = vpop.xlane.xlu1 %7828 }
0x23a6   :  { %11386 = vrcp.f32 %v7829_v40  ;;  %v7823_v40 = vmul.f32 1.442695, %v7777_v27 }
0x23a9   :  { %8335 = vrot.lane.b32.xlu1 %v14044_v11, %s11530_s30  ;;  %v7832_v20 = vpop.xlane.xlu0 %7831 }
0x23aa   :  { %11388 = vrcp.f32 %v7832_v20 }
0x23ad   :  { %8382 = vrot.lane.b32.xlu1 %v14042_v17, %s11530_s30  ;;  %v7835_v2 = vpop.xlane.xlu1 %7834  ;;  %v7778_v17 = vsub.f32 %v14272_v29, %v7754_v12 }
0x23ae   :  { %8288 = vrot.lane.b32.xlu0 %v14033_v63, %s11530_s30  ;;  %11390 = vrcp.f32 %v7835_v2 }
0x23af   :  { %v7825_v20 = vmul.f32 1.442695, %v7778_v17 }
0x23b1   :  { %v7841_v14 = vpop.xlane.xlu1 %7840  ;;  %v7838_v33 = vpop.xlane.xlu0 %7837 }
0x23b2   :  { %11392 = vrcp.f32 %v7838_v33 }
0x23b3   :  { %11394 = vrcp.f32 %v7841_v14  ;;  %v11387_v25 = vpop.eup %11386 }
0x23b4   :  { %v7923_v6 = vmul.f32 %v11387_v25, %v14288_v47 }
0x23b5   :  { %v7844_v42 = vpop.xlane.xlu0 %7843 }
0x23b6   :  { %11396 = vrcp.f32 %v7844_v42 }
0x23b7   :  { %v11389_v11 = vpop.eup %11388  ;;  %11398 = vpow2.f32 %v7821_v5 }
0x23b8   :  { %v7924_v63 = vmul.f32 %v11389_v11, %v14292_v36  ;;  %11400 = vpow2.f32 %v7823_v40 }
0x23b9   :  { %11402 = vpow2.f32 %v7825_v20 }
0x23ba   :  { %v7947_v61 = vpack.c.bf16 %v7924_v63, %v7923_v6 }
0x23bb   :  { %v11391_v4 = vpop.eup %11390 }
0x23bc   :  { %10462 = vmatmul.mubr.msk.bf16.vlgmr.msra.gmra.mxu0 %vm1146_vm3, %v7947_v61  ;;  %v7925_v47 = vmul.f32 %v11391_v4, %v14296_v32 }
0x23bd   :  { %10472 = vmatpush3.bf16.msra.mxu0 %v14247_v52  ;;  %10473 = vmatprep.mubr.msk.bf16.mxu0 %vm11524_vm0, %v11523_v0 }
0x23be   :  { %10483 = vmatprep.subr.bf16.mxu0 %v11523_v0 }
0x23bf   :  { %v11393_v3 = vpop.eup %11392 }
0x23c0   :  { %v11395_v29 = vpop.eup %11394  ;;  %v7926_v36 = vmul.f32 %v11393_v3, %v14302_v7 }
0x23c1   :  { %v7927_v12 = vmul.f32 %v11395_v29, %v14300_v57 }
0x23c2   :  { %v7948_v41 = vpack.c.bf16 %v7926_v36, %v7925_v47 }
0x23c3   :  { %v11397_v26 = vpop.eup %11396 }
0x23c4   :  { %v7928_v52 = vmul.f32 %v11397_v26, %v14308_v37  ;;  %10468 = vmatmul.mubr.msk.bf16.vlgmr.msra.gmra.mxu1 %vm1146_vm3, %v7948_v41  ;;  %v14413_v32 = vpop.eup %11398 }
0x23c5   :  { %10478 = vmatpush3.bf16.msra.mxu1 %v14276_v55  ;;  %10479 = vmatprep.mubr.msk.bf16.mxu1 %vm11524_vm0, %v11523_v0  ;;  %v14419_v57 = vpop.eup %11400  ;;  %v7890_v55 = vsel %vm1146_vm3, %v14413_v32, 0.0 }
0x23c6   :  { %v7949_v2 = vpack.c.bf16 %v7928_v52, %v7927_v12  ;;  %10489 = vmatprep.subr.bf16.mxu1 %v11523_v0  ;;  %v14423_v7 = vpop.eup %11402  ;;  %v7893_v14 = vsel %vm1146_vm3, %v14419_v57, 0.0 }
0x23c8   :  { %10474 = vmatmul.mubr.msk.bf16.vlgmr.msra.gmra.mxu0 %vm1146_vm3, %v7949_v2 }
0x23c9   :  { %10484 = vmatpush3.bf16.msra.mxu0 %v14269_v53  ;;  %10485 = vmatprep.mubr.msk.bf16.mxu0 %vm11524_vm0, %v11523_v0  ;;  %v7896_v53 = vsel %vm1146_vm3, %v14423_v7, 0.0 }
0x23ca   :  { %10495 = vmatprep.subr.bf16.mxu0 %v11523_v0 }
0x23cd   :  { %7891 = vadd.xlane.f32.xlu0 %v7890_v55 }
0x23cf   :  { %v7847_v37 = vpop.xlane.xlu1 %7846 }
0x23d0   :  { %11404 = vrcp.f32 %v7847_v37 }
0x23d1   :  { %7894 = vadd.xlane.f32.xlu1 %v7893_v14  ;;  %7897 = vadd.xlane.f32.xlu0 %v7896_v53 }
0x23d3   :  { %v7850_v33 = vpop.xlane.xlu0 %7849 }
0x23d4   :  { %11406 = vrcp.f32 %v7850_v33 }
0x23dd   :  { %v11405_v10 = vpop.eup %11404 }
0x23de   :  { %v7929_v42 = vmul.f32 %v11405_v10, %v14314_v24 }
0x23e1   :  { %v11407_v25 = vpop.eup %11406 }
0x23e2   :  { %8429 = vrot.lane.b32.xlu1 %v14055_v51, %s11530_s30  ;;  %v7930_v11 = vmul.f32 %v11407_v25, %v14318_v56 }
0x23e4   :  { %v7950_v27 = vpack.c.bf16 %v7930_v11, %v7929_v42 }
0x23e6   :  { %10480 = vmatmul.mubr.msk.bf16.vlgmr.msra.gmra.mxu1 %vm1146_vm3, %v7950_v27 }
0x23e7   :  { %8476 = vrot.lane.b32.xlu0 %v14053_v1, %s11530_s30  ;;  %10490 = vmatpush3.bf16.msra.mxu1 %v14280_v50 }
0x23e8   :  { %10491 = vmatprep.mubr.msk.bf16.mxu1 %vm11524_vm0, %v11523_v0  ;;  %10501 = vmatprep.subr.bf16.mxu1 %v11523_v0 }
0x2404   :  { %v7853_v5 = vpop.xlane.xlu1 %7852 }
0x2405   :  { %11408 = vrcp.f32 %v7853_v5 }
0x2408   :  { %v7856_v51 = vpop.xlane.xlu0 %7855 }
0x2409   :  { %11410 = vrcp.f32 %v7856_v51 }
0x240c   :  { %v7859_v24 = vpop.xlane.xlu1 %7858 }
0x240d   :  { %11412 = vrcp.f32 %v7859_v24 }
0x2410   :  { %v7862_v56 = vpop.xlane.xlu0 %7861 }
0x2411   :  { %v7865_v17 = vpop.xlane.xlu1 %7864  ;;  %11414 = vrcp.f32 %v7862_v56 }
0x2412   :  { %v11409_v6 = vpop.eup %11408  ;;  %11416 = vrcp.f32 %v7865_v17 }
0x2413   :  { %v7931_v50 = vmul.f32 %v11409_v6, %v14329_v49 }
0x2415   :  { %v7871_v1 = vpop.xlane.xlu1 %7870  ;;  %v7868_v63 = vpop.xlane.xlu0 %7867 }
0x2416   :  { %v11411_v61 = vpop.eup %11410  ;;  %11418 = vrcp.f32 %v7868_v63 }
0x2417   :  { %v7932_v40 = vmul.f32 %v11411_v61, %v14335_v35  ;;  %11420 = vrcp.f32 %v7871_v1 }
0x2419   :  { %v7951_v20 = vpack.c.bf16 %v7932_v40, %v7931_v50  ;;  %v7877_v4 = vpop.xlane.xlu1 %7876  ;;  %v7874_v3 = vpop.xlane.xlu0 %7873 }
0x241a   :  { %11422 = vrcp.f32 %v7874_v3  ;;  %v11413_v29 = vpop.eup %11412 }
0x241b   :  { %10486 = vmatmul.mubr.msk.bf16.vlgmr.msra.gmra.mxu0 %vm1146_vm3, %v7951_v20  ;;  %11424 = vrcp.f32 %v7877_v4  ;;  %v7933_v35 = vmul.f32 %v11413_v29, %v14341_v38 }
0x241c   :  { %10496 = vmatpush3.bf16.msra.mxu0 %v14278_v21  ;;  %10497 = vmatprep.mubr.msk.bf16.mxu0 %vm11524_vm0, %v11523_v0 }
0x241d   :  { %v7883_v47 = vpop.xlane.xlu1 %7882  ;;  %v7880_v36 = vpop.xlane.xlu0 %7879  ;;  %10507 = vmatprep.subr.bf16.mxu0 %v11523_v0 }
0x241e   :  { %v11415_v49 = vpop.eup %11414  ;;  %11426 = vrcp.f32 %v7880_v36 }
0x241f   :  { %v7934_v26 = vmul.f32 %v11415_v49, %v14347_v31  ;;  %11428 = vrcp.f32 %v7883_v47  ;;  %v11417_v2 = vpop.eup %11416 }
0x2420   :  { %v7935_v55 = vmul.f32 %v11417_v2, %v14349_v18 }
0x2421   :  { %v7952_v41 = vpack.c.bf16 %v7934_v26, %v7933_v35  ;;  %v7889_v12 = vpop.xlane.xlu1 %7888  ;;  %v7886_v52 = vpop.xlane.xlu0 %7885 }
0x2422   :  { %11430 = vrcp.f32 %v7886_v52 }
0x2423   :  { %10492 = vmatmul.mubr.msk.bf16.vlgmr.msra.gmra.mxu1 %vm1146_vm3, %v7952_v41  ;;  %v11419_v21 = vpop.eup %11418  ;;  %11432 = vrcp.f32 %v7889_v12 }
0x2424   :  { %10503 = vmatprep.mubr.msk.bf16.mxu1 %vm11524_vm0, %v11523_v0  ;;  %v7936_v37 = vmul.f32 %v11419_v21, %v14357_v39  ;;  %v11421_v14 = vpop.eup %11420 }
0x2425   :  { %v8289_v38 = vpop.permute.xlu0 %8288  ;;  %v8336_v53 = vpop.permute.xlu1 %8335  ;;  %v7937_v10 = vmul.f32 %v11421_v14, %v14355_v28 }
0x2426   :  { %10502 = vmatpush3.bf16.msra.mxu1 %v8289_v38  ;;  %v7953_v31 = vpack.c.bf16 %v7936_v37, %v7935_v55 }
0x2427   :  { %10513 = vmatprep.subr.bf16.mxu1 %v11523_v0  ;;  %v11423_v33 = vpop.eup %11422 }
0x2428   :  { %v7938_v25 = vmul.f32 %v11423_v33, %v14363_v59  ;;  %10498 = vmatmul.mubr.msk.bf16.vlgmr.msra.gmra.mxu0 %vm1146_vm3, %v7953_v31  ;;  %v11425_v42 = vpop.eup %11424 }
0x2429   :  { %10508 = vmatpush3.bf16.msra.mxu0 %v8336_v53  ;;  %10509 = vmatprep.mubr.msk.bf16.mxu0 %vm11524_vm0, %v11523_v0  ;;  %v7939_v11 = vmul.f32 %v11425_v42, %v14365_v19  ;;  %v8383_v5 = vpop.permute.xlu1 %8382 }
0x242a   :  { %v7954_v18 = vpack.c.bf16 %v7938_v25, %v7937_v10  ;;  %10519 = vmatprep.subr.bf16.mxu0 %v11523_v0 }
0x242b   :  { %v11427_v39 = vpop.eup %11426 }
0x242c   :  { %v7940_v27 = vmul.f32 %v11427_v39, %v14373_v44  ;;  %10504 = vmatmul.mubr.msk.bf16.vlgmr.msra.gmra.mxu1 %vm1146_vm3, %v7954_v18  ;;  %v11429_v28 = vpop.eup %11428 }
0x242d   :  { %10514 = vmatpush3.bf16.msra.mxu1 %v8383_v5  ;;  %10515 = vmatprep.mubr.msk.bf16.mxu1 %vm11524_vm0, %v11523_v0  ;;  %v7941_v24 = vmul.f32 %v11429_v28, %v14371_v8  ;;  %v82_v5 = vld [vmem:[%s14789_s3 + $0x98] sm:$0xff] }
0x242e   :  { %v7955_v59 = vpack.c.bf16 %v7940_v27, %v7939_v11  ;;  %10525 = vmatprep.subr.bf16.mxu1 %v11523_v0  ;;  %v81_v27 = vld [vmem:[%s14789_s3 + $0x90] sm:$0xff] }
0x242f   :  { %v11431_v51 = vpop.eup %11430  ;;  %v8617_v28 = vpack.c.bf16 %v82_v5, %v81_v27 }
0x2430   :  { %v7942_v56 = vmul.f32 %v11431_v51, %v14379_v13  ;;  %10510 = vmatmul.mubr.msk.bf16.vlgmr.msra.gmra.mxu0 %vm1146_vm3, %v7955_v59  ;;  %v11433_v1 = vpop.eup %11432 }
0x2431   :  { %10521 = vmatprep.mubr.msk.bf16.mxu0 %vm11524_vm0, %v11523_v0  ;;  %v7943_v61 = vmul.f32 %v11433_v1, %v14381_v16 }
0x2432   :  { %v7956_v19 = vpack.c.bf16 %v7942_v56, %v7941_v24 }
0x2434   :  { %10516 = vmatmul.mubr.msk.bf16.vlgmr.msra.gmra.mxu1 %vm1146_vm3, %v7956_v19 }
0x2435   :  { %10527 = vmatprep.mubr.msk.bf16.mxu1 %vm11524_vm0, %v11523_v0 }
0x2456   :  { %v7892_v44 = vpop.xlane.xlu0 %7891 }
0x2457   :  { %11434 = vrcp.f32 %v7892_v44 }
0x245a   :  { %v7895_v17 = vpop.xlane.xlu1 %7894  ;;  %v7898_v6 = vpop.xlane.xlu0 %7897 }
0x245b   :  { %11436 = vrcp.f32 %v7895_v17  ;;  %v79_v17 = vld [vmem:[%s14789_s3 + $0x80] sm:$0xff] }
0x245c   :  { %11438 = vrcp.f32 %v7898_v6  ;;  %v80_v6 = vld [vmem:[%s14789_s3 + $0x88] sm:$0xff] }
0x245e   :  { %v8430_v8 = vpop.permute.xlu1 %8429  ;;  %v8477_v13 = vpop.permute.xlu0 %8476 }
0x245f   :  { %10520 = vmatpush3.bf16.msra.mxu0 %v8430_v8  ;;  %10526 = vmatpush3.bf16.msra.mxu1 %v8477_v13  ;;  %v8616_v8 = vpack.c.bf16 %v80_v6, %v79_v17 }
0x2460   :  { %10531 = vmatprep.subr.bf16.mxu0 %v11523_v0  ;;  %10547 = vmatprep.subr.bf16.mxu1 %v11523_v0 }
0x2464   :  { %v11435_v63 = vpop.eup %11434 }
0x2465   :  { %v7944_v50 = vmul.f32 %v11435_v63, %v14413_v32 }
0x2467   :  { %v7957_v40 = vpack.c.bf16 %v7944_v50, %v7943_v61 }
0x2468   :  { %v11437_v20 = vpop.eup %11436 }
0x2469   :  { %v11439_v4 = vpop.eup %11438  ;;  %v7945_v3 = vmul.f32 %v11437_v20, %v14419_v57  ;;  %10522 = vmatmul.mubr.msk.bf16.vlgmr.msra.gmra.mxu0 %vm1146_vm3, %v7957_v40 }
0x246a   :  { %v7946_v29 = vmul.f32 %v11439_v4, %v14423_v7  ;;  %10535 = vmatprep.mubr.msk.bf16.mxu0 %vm11524_vm0, %v11523_v0  ;;  %10532 = vmatpush3.bf16.msra.mxu0 %v8617_v28 }
0x246b   :  { %10533 = vmatprep.subr.bf16.mxu0 %v11523_v0 }
0x246c   :  { %v7958_v47 = vpack.c.bf16 %v7946_v29, %v7945_v3 }
0x246e   :  { %10528 = vmatmul.mubr.msk.bf16.vlgmr.msra.gmra.mxu1 %vm1146_vm3, %v7958_v47  ;;  %10534 = vmatpush3.bf16.msra.mxu0 %v8616_v8 }
0x246f   :  { %10551 = vmatprep.mubr.msk.bf16.mxu1 %vm11524_vm0, %v11523_v0  ;;  %10563 = vmatprep.subr.bf16.mxu0 %v11523_v0 }
0x247c   :  { %v14487_v16 = vpop.f32.mrf.mxu0 }
0x247e   :  { %v10463_v32 = vpop.f32.mrf.mxu0 }
0x2480   :  { %v14489_v36 = vpop.f32.mrf.mxu0 }
0x2482   :  { %v10464_v49 = vpop.f32.mrf.mxu0 }
0x2484   :  { %v14491_v57 = vpop.f32.mrf.mxu1 }
0x2486   :  { %v10469_v35 = vpop.f32.mrf.mxu1 }
0x2488   :  { %v14493_v26 = vpop.f32.mrf.mxu0  ;;  %v14495_v7 = vpop.f32.mrf.mxu1 }
0x248a   :  { %v10475_v41 = vpop.f32.mrf.mxu0  ;;  %v10470_v12 = vpop.f32.mrf.mxu1 }
0x248c   :  { %v14497_v52 = vpop.f32.mrf.mxu0 }
0x248e   :  { %v10476_v2 = vpop.f32.mrf.mxu0 }
0x24a6   :  { %v8140_v21 = vpop.f32.mrf.mxu1 }
0x24a8   :  { %v10481_v55 = vpop.f32.mrf.mxu1 }
0x24aa   :  { %v8143_v37 = vpop.f32.mrf.mxu1 }
0x24ab   :  { %v10927_v38 = vpack.i.bf16 %v8143_v37, %v8140_v21 }
0x24ac   :  { %v10482_v14 = vpop.f32.mrf.mxu1 }
0x24ad   :  { %10928 = vrot.lane.b32.xlu1 %v10927_v38, %s11522_s28 }
0x24db   :  { %v8187_v31 = vpop.f32.mrf.mxu0 }
0x24dd   :  { %v10487_v53 = vpop.f32.mrf.mxu0 }
0x24df   :  { %v8190_v33 = vpop.f32.mrf.mxu0 }
0x24e0   :  { %v10942_v63 = vpack.i.bf16 %v8190_v33, %v8187_v31 }
0x24e1   :  { %v10488_v10 = vpop.f32.mrf.mxu0 }
0x24e3   :  { %v8234_v25 = vpop.f32.mrf.mxu1 }
0x24e5   :  { %v10493_v42 = vpop.f32.mrf.mxu1 }
0x24e7   :  { %v8237_v18 = vpop.f32.mrf.mxu1 }
0x24e8   :  { %v8281_v39 = vpop.f32.mrf.mxu0  ;;  %v10957_v35 = vpack.i.bf16 %v8237_v18, %v8234_v25 }
0x24e9   :  { %v10494_v11 = vpop.f32.mrf.mxu1 }
0x24ea   :  { %v10499_v59 = vpop.f32.mrf.mxu0 }
0x24ec   :  { %v8284_v51 = vpop.f32.mrf.mxu0  ;;  %v8328_v24 = vpop.f32.mrf.mxu1 }
0x24ed   :  { %v10932_v56 = vpack.i.bf16 %v8284_v51, %v8281_v39 }
0x24ee   :  { %v10500_v19 = vpop.f32.mrf.mxu0  ;;  %v10505_v44 = vpop.f32.mrf.mxu1 }
0x24ef   :  { %10933 = vrot.lane.b32.xlu0 %v10932_v56, %s11531_s19 }
0x24f0   :  { %v8331_v13 = vpop.f32.mrf.mxu1  ;;  %v8375_v1 = vpop.f32.mrf.mxu0 }
0x24f1   :  { %v10947_v49 = vpack.i.bf16 %v8331_v13, %v8328_v24 }
0x24f2   :  { %v10506_v61 = vpop.f32.mrf.mxu1  ;;  %v10511_v50 = vpop.f32.mrf.mxu0 }
0x24f3   :  { %10943 = vrot.lane.b32.xlu0 %v10942_v63, %s11522_s28 }
0x24f4   :  { %v8378_v40 = vpop.f32.mrf.mxu0  ;;  %v8422_v20 = vpop.f32.mrf.mxu1 }
0x24f5   :  { %v10962_v14 = vpack.i.bf16 %v8378_v40, %v8375_v1 }
0x24f6   :  { %v10512_v4 = vpop.f32.mrf.mxu0  ;;  %v10517_v3 = vpop.f32.mrf.mxu1 }
0x24f8   :  { %v8425_v29 = vpop.f32.mrf.mxu1 }
0x24f9   :  { %v10937_v47 = vpack.i.bf16 %v8425_v29, %v8422_v20 }
0x24fa   :  { %v10518_v32 = vpop.f32.mrf.mxu1 }
0x24fb   :  { %10938 = vrot.lane.b32.xlu1 %v10937_v47, %s11532_s20 }
0x24ff   :  { %10948 = vrot.lane.b32.xlu1 %v10947_v49, %s11531_s19 }
0x2503   :  { %10958 = vrot.lane.b32.xlu1 %v10957_v35, %s11522_s28 }
0x251f   :  { %v10929_v10 = vpop.permute.xlu1 %10928 }
0x2520   :  { %v10931_v42 = vunpack.i.h.bf16 %v10929_v10  ;;  %v10930_v18 = vunpack.i.l.bf16 %v10929_v10 }
0x2522   :  { %v8595_v5 = vsel %vm500_vm2, %v14487_v16, %v10930_v18  ;;  %v8596_v28 = vsel %vm500_vm2, %v14489_v36, %v10931_v42 }
0x2529   :  { %v8469_v41 = vpop.f32.mrf.mxu0 }
0x252b   :  { %v10523_v12 = vpop.f32.mrf.mxu0 }
0x252d   :  { %v8472_v2 = vpop.f32.mrf.mxu0 }
0x252e   :  { %v10952_v21 = vpack.i.bf16 %v8472_v2, %v8469_v41  ;;  %v8516_v55 = vpop.f32.mrf.mxu1 }
0x252f   :  { %v10524_v37 = vpop.f32.mrf.mxu0 }
0x2530   :  { %v10529_v38 = vpop.f32.mrf.mxu1  ;;  %10953 = vrot.lane.b32.xlu0 %v10952_v21, %s11532_s20 }
0x2532   :  { %v8519_v31 = vpop.f32.mrf.mxu1 }
0x2533   :  { %v10967_v53 = vpack.i.bf16 %v8519_v31, %v8516_v55 }
0x2534   :  { %v10530_v33 = vpop.f32.mrf.mxu1  ;;  %10963 = vrot.lane.b32.xlu0 %v10962_v14, %s11531_s19 }
0x2535   :  { %10968 = vrot.lane.b32.xlu1 %v10967_v53, %s11532_s20 }
0x2561   :  { %v10934_v25 = vpop.permute.xlu0 %10933 }
0x2562   :  { %v10936_v39 = vunpack.i.h.bf16 %v10934_v25  ;;  %v10935_v11 = vunpack.i.l.bf16 %v10934_v25 }
0x2564   :  { %v8602_v24 = vsel %vm1146_vm3, %v8596_v28, %v10936_v39  ;;  %v8601_v56 = vsel %vm1146_vm3, %v8595_v5, %v10935_v11 }
0x2565   :  { %v10944_v6 = vpop.permute.xlu0 %10943 }
0x2566   :  { %v10946_v8 = vunpack.i.h.bf16 %v10944_v6  ;;  %v10945_v36 = vunpack.i.l.bf16 %v10944_v6 }
0x2568   :  { %v8598_v50 = vsel %vm500_vm2, %v14495_v7, %v10946_v8  ;;  %v8597_v40 = vsel %vm500_vm2, %v14491_v57, %v10945_v36 }
0x256d   :  { %v10939_v27 = vpop.permute.xlu1 %10938 }
0x256e   :  { %v10941_v59 = vunpack.i.h.bf16 %v10939_v27  ;;  %v10940_v51 = vunpack.i.l.bf16 %v10939_v27 }
0x2570   :  { %v8607_v19 = vsel %vm2071_vm4, %v8601_v56, %v10940_v51  ;;  %v8608_v44 = vsel %vm2071_vm4, %v8602_v24, %v10941_v59 }
0x2571   :  { %v8613_v17 = vpack.c.bf16 %v8608_v44, %v8607_v19  ;;  %v10949_v16 = vpop.permute.xlu1 %10948 }
0x2572   :  { %v10951_v13 = vunpack.i.h.bf16 %v10949_v16  ;;  %v10950_v1 = vunpack.i.l.bf16 %v10949_v16 }
0x2573   :  { %10536 = vmatmul.mubr.msk.bf16.vlgmr.msra.gmra.mxu0 %vm144_vm1, %v8613_v17 }
0x2574   :  { %10539 = vmatprep.mubr.msk.bf16.mxu0 %vm11524_vm0, %v11523_v0  ;;  %v8603_v3 = vsel %vm1146_vm3, %v8597_v40, %v10950_v1  ;;  %v8604_v29 = vsel %vm1146_vm3, %v8598_v50, %v10951_v13 }
0x2575   :  { %v10959_v63 = vpop.permute.xlu1 %10958 }
0x2576   :  { %v10961_v47 = vunpack.i.h.bf16 %v10959_v63  ;;  %v10960_v32 = vunpack.i.l.bf16 %v10959_v63 }
0x2578   :  { %v8599_v57 = vsel %vm500_vm2, %v14493_v26, %v10960_v32  ;;  %v8600_v55 = vsel %vm500_vm2, %v14497_v52, %v10961_v47  ;;  %v11497_v26 = vld [vmem:[%s14792_s6 + $0x18] sm:$0xff] }
0x2579   :  { %v8693_v52 = vrot.slane %v11497_v26, %v12275_v23 }
0x25a2   :  { %v10954_v61 = vpop.permute.xlu0 %10953 }
0x25a3   :  { %v10956_v20 = vunpack.i.h.bf16 %v10954_v61  ;;  %v10955_v4 = vunpack.i.l.bf16 %v10954_v61 }
0x25a5   :  { %v8610_v49 = vsel %vm2071_vm4, %v8604_v29, %v10956_v20  ;;  %v8609_v35 = vsel %vm2071_vm4, %v8603_v3, %v10955_v4 }
0x25a6   :  { %v8614_v41 = vpack.c.bf16 %v8610_v49, %v8609_v35  ;;  %v10964_v12 = vpop.permute.xlu0 %10963 }
0x25a7   :  { %v10969_v2 = vpop.permute.xlu1 %10968  ;;  %v10966_v21 = vunpack.i.h.bf16 %v10964_v12  ;;  %v10965_v7 = vunpack.i.l.bf16 %v10964_v12  ;;  %v101_v12 = vld [vmem:[%s14790_s4 + $0x70] sm:$0xff] }
0x25a8   :  { %v10971_v37 = vunpack.i.h.bf16 %v10969_v2  ;;  %v10970_v38 = vunpack.i.l.bf16 %v10969_v2  ;;  %10540 = vmatmul.mubr.msk.bf16.gmra.mxu0 %vm144_vm1, %v8614_v41  ;;  %v102_v2 = vld [vmem:[%s14790_s4 + $0x78] sm:$0xff] }
0x25a9   :  { %v8606_v14 = vsel %vm1146_vm3, %v8600_v55, %v10966_v21  ;;  %v8605_v31 = vsel %vm1146_vm3, %v8599_v57, %v10965_v7  ;;  %10543 = vmatprep.mubr.msk.bf16.mxu0 %vm11524_vm0, %v11523_v0  ;;  %v8802_v21 = vpack.c.bf16 %v102_v2, %v101_v12  ;;  %v99_v7 = vld [vmem:[%s14790_s4 + $0x60] sm:$0xff]  ;;  %v100_v57 = vld [vmem:[%s14790_s4 + $0x68] sm:$0xff] }
0x25aa   :  { %v8612_v53 = vsel %vm2071_vm4, %v8606_v14, %v10971_v37  ;;  %v8611_v33 = vsel %vm2071_vm4, %v8605_v31, %v10970_v38  ;;  %v8801_v55 = vpack.c.bf16 %v100_v57, %v99_v7 }
0x25ab   :  { %v8615_v10 = vpack.c.bf16 %v8612_v53, %v8611_v33  ;;  %10548 = vmatpush3.bf16.msra.mxu1 %v8802_v21 }
0x25ac   :  { %10549 = vmatprep.subr.bf16.mxu1 %v11523_v0 }
0x25af   :  { %10550 = vmatpush3.bf16.msra.mxu1 %v8801_v55 }
0x25b0   :  { %10544 = vmatmul.mubr.msk.bf16.gmra.mxu0 %vm144_vm1, %v8615_v10  ;;  %10583 = vmatprep.subr.bf16.mxu1 %v11523_v0 }
0x25b1   :  { %10571 = vmatprep.mubr.msk.bf16.mxu0 %vm11524_vm0, %v11523_v0 }
0x2633   :  { %v8661_v25 = vpop.f32.mrf.mxu0 }
0x2634   :  { %v8684_v42 = vadd.f32 %v8661_v25, %v13932_v60 }
0x2635   :  { %v10537_v18 = vpop.f32.mrf.mxu0 }
0x2636   :  { %v14560_v39 = vadd.f32 %v8693_v52, %v8684_v42 }
0x2637   :  { %v8664_v11 = vpop.f32.mrf.mxu0 }
0x2638   :  { %v8685_v27 = vadd.f32 %v8664_v11, %v13937_v45  ;;  %v8700_v5 = vsel %vm144_vm1, %v14560_v39, 0.0 }
0x2639   :  { %8701 = vadd.xlane.f32.xlu0 %v8700_v5  ;;  %v10538_v28 = vpop.f32.mrf.mxu0 }
0x263a   :  { %v14565_v59 = vadd.f32 %v8693_v52, %v8685_v27 }
0x263c   :  { %v8703_v51 = vsel %vm144_vm1, %v14565_v59, 0.0 }
0x263d   :  { %8704 = vadd.xlane.f32.xlu1 %v8703_v51 }
0x2668   :  { %v8669_v24 = vpop.f32.mrf.mxu0 }
0x2669   :  { %v8686_v60 = vadd.f32 %v8669_v24, %v13942_v34 }
0x266a   :  { %v10541_v56 = vpop.f32.mrf.mxu0 }
0x266b   :  { %v14570_v19 = vadd.f32 %v8693_v52, %v8686_v60 }
0x266c   :  { %v8672_v44 = vpop.f32.mrf.mxu0 }
0x266d   :  { %v8687_v45 = vadd.f32 %v8672_v44, %v13947_v9  ;;  %v8706_v17 = vsel %vm144_vm1, %v14570_v19, 0.0  ;;  %v133_v44 = vld [vmem:[%s14791_s5 + $0xf0] sm:$0xff] }
0x266e   :  { %8707 = vadd.xlane.f32.xlu0 %v8706_v17  ;;  %v10542_v16 = vpop.f32.mrf.mxu0 }
0x266f   :  { %v14575_v6 = vadd.f32 %v8693_v52, %v8687_v45  ;;  %v134_v45 = vld [vmem:[%s14791_s5 + $0xf8] sm:$0xff] }
0x2670   :  { %v8677_v8 = vpop.f32.mrf.mxu0  ;;  %v8885_v17 = vpack.c.bf16 %v134_v45, %v133_v44 }
0x2671   :  { %v8688_v36 = vadd.f32 %v8677_v8, %v13952_v30  ;;  %v8709_v13 = vsel %vm144_vm1, %v14575_v6, 0.0 }
0x2672   :  { %8710 = vadd.xlane.f32.xlu0 %v8709_v13  ;;  %v10545_v34 = vpop.f32.mrf.mxu0  ;;  %10564 = vmatpush3.bf16.msra.mxu0 %v8885_v17 }
0x2673   :  { %v14580_v1 = vadd.f32 %v8693_v52, %v8688_v36  ;;  %10565 = vmatprep.subr.bf16.mxu0 %v11523_v0 }
0x2674   :  { %v8680_v63 = vpop.f32.mrf.mxu0 }
0x2675   :  { %v8689_v9 = vadd.f32 %v8680_v63, %v13957_v46  ;;  %v8712_v61 = vsel %vm144_vm1, %v14580_v1, 0.0 }
0x2676   :  { %8713 = vadd.xlane.f32.xlu0 %v8712_v61  ;;  %v10546_v50 = vpop.f32.mrf.mxu0 }
0x2677   :  { %v14585_v40 = vadd.f32 %v8693_v52, %v8689_v9  ;;  %v14633_v9 = vld [vmem:[%s14792_s6 + $0x20] sm:$0xff] }
0x2678   :  { %v8781_v50 = vrot.slane %v14633_v9, %v11610_v22 }
0x2679   :  { %v8715_v30 = vsel %vm144_vm1, %v14585_v40, 0.0 }
0x267a   :  { %8716 = vadd.xlane.f32.xlu1 %v8715_v30 }
0x26c2   :  { %v8702_v20 = vpop.xlane.xlu0 %8701 }
0x26c3   :  { %v8718_v4 = vmul.f32 0.03125, %v8702_v20 }
0x26c5   :  { %v8724_v3 = vsub.f32 %v14560_v39, %v8718_v4 }
0x26c6   :  { %v8705_v29 = vpop.xlane.xlu1 %8704 }
0x26c7   :  { %v8719_v47 = vmul.f32 0.03125, %v8705_v29  ;;  %v8730_v32 = vmul.f32 %v8724_v3, %v8724_v3 }
0x26c9   :  { %v8725_v46 = vsub.f32 %v14565_v59, %v8719_v47  ;;  %v8736_v49 = vsel %vm144_vm1, %v8730_v32, 0.0  ;;  %v8791_v47 = vrot.slane %v14633_v9, %v12368_v58 }
0x26ca   :  { %8737 = vadd.xlane.f32.xlu0 %v8736_v49 }
0x26cb   :  { %v8731_v35 = vmul.f32 %v8725_v46, %v8725_v46 }
0x26cd   :  { %v8739_v41 = vsel %vm144_vm1, %v8731_v35, 0.0 }
0x26ce   :  { %8740 = vadd.xlane.f32.xlu1 %v8739_v41 }
0x26f7   :  { %v8708_v37 = vpop.xlane.xlu0 %8707 }
0x26f8   :  { %v8720_v38 = vmul.f32 0.03125, %v8708_v37 }
0x26fa   :  { %v14608_v14 = vsub.f32 %v14570_v19, %v8720_v38 }
0x26fb   :  { %v8711_v31 = vpop.xlane.xlu0 %8710 }
0x26fc   :  { %v8721_v53 = vmul.f32 0.03125, %v8711_v31  ;;  %v8732_v33 = vmul.f32 %v14608_v14, %v14608_v14 }
0x26fe   :  { %v14613_v10 = vsub.f32 %v14575_v6, %v8721_v53  ;;  %v8742_v26 = vsel %vm144_vm1, %v8732_v33, 0.0 }
0x26ff   :  { %8743 = vadd.xlane.f32.xlu0 %v8742_v26  ;;  %v8714_v52 = vpop.xlane.xlu0 %8713 }
0x2700   :  { %v8722_v25 = vmul.f32 0.03125, %v8714_v52  ;;  %v8733_v42 = vmul.f32 %v14613_v10, %v14613_v10 }
0x2702   :  { %v8728_v18 = vsub.f32 %v14580_v1, %v8722_v25  ;;  %v8745_v11 = vsel %vm144_vm1, %v8733_v42, 0.0 }
0x2703   :  { %8746 = vadd.xlane.f32.xlu1 %v8745_v11  ;;  %v8717_v27 = vpop.xlane.xlu1 %8716 }
0x2704   :  { %v8723_v5 = vmul.f32 0.03125, %v8717_v27  ;;  %v8734_v28 = vmul.f32 %v8728_v18, %v8728_v18 }
0x2706   :  { %v8729_v51 = vsub.f32 %v14585_v40, %v8723_v5  ;;  %v8748_v24 = vsel %vm144_vm1, %v8734_v28, 0.0 }
0x2707   :  { %8749 = vadd.xlane.f32.xlu0 %v8748_v24 }
0x2708   :  { %v8735_v60 = vmul.f32 %v8729_v51, %v8729_v51 }
0x270a   :  { %v8751_v56 = vsel %vm144_vm1, %v8735_v60, 0.0 }
0x270b   :  { %8752 = vadd.xlane.f32.xlu1 %v8751_v56 }
0x2753   :  { %v8738_v16 = vpop.xlane.xlu0 %8737 }
0x2754   :  { %v8754_v8 = vmul.f32 0.03125, %v8738_v16  ;;  %v129_v16 = vld [vmem:[%s14791_s5 + $0xd0] sm:$0xff] }
0x2756   :  { %v8760_v36 = vadd.f32 1e-05, %v8754_v8  ;;  %v130_v8 = vld [vmem:[%s14791_s5 + $0xd8] sm:$0xff] }
0x2757   :  { %v8741_v13 = vpop.xlane.xlu1 %8740 }
0x2758   :  { %11440 = vrsqrt.f32 %v8760_v36  ;;  %v8755_v34 = vmul.f32 0.03125, %v8741_v13  ;;  %v8883_v36 = vpack.c.bf16 %v130_v8, %v129_v16  ;;  %v127_v13 = vld [vmem:[%s14791_s5 + $0xc0] sm:$0xff] }
0x275a   :  { %v8761_v63 = vadd.f32 1e-05, %v8755_v34  ;;  %v128_v34 = vld [vmem:[%s14791_s5 + $0xc8] sm:$0xff] }
0x275c   :  { %11442 = vrsqrt.f32 %v8761_v63  ;;  %v8882_v63 = vpack.c.bf16 %v128_v34, %v127_v13 }
0x2765   :  { %v11441_v61 = vpop.eup %11440 }
0x2766   :  { %v8772_v30 = vmul.f32 %v11441_v61, %v8724_v3  ;;  %v8806_v61 = vrot.slane %v14633_v9, %v12407_v48 }
0x2768   :  { %v8782_v4 = vmul.f32 %v8781_v50, %v8772_v30 }
0x2769   :  { %v11443_v20 = vpop.eup %11442 }
0x276a   :  { %v8773_v29 = vmul.f32 %v11443_v20, %v8725_v46  ;;  %v8792_v49 = vadd.f32 %v8791_v47, %v8782_v4 }
0x276c   :  { %v8783_v32 = vmul.f32 %v8781_v50, %v8773_v29 }
0x276e   :  { %v8793_v35 = vadd.f32 %v8791_v47, %v8783_v32 }
0x2770   :  { %v8798_v41 = vpack.c.bf16 %v8793_v35, %v8792_v49 }
0x2772   :  { %10552 = vmatmul.mubr.msk.bf16.vlgmr.msra.gmra.mxu1 %vm144_vm1, %v8798_v41 }
0x2773   :  { %10555 = vmatprep.mubr.msk.bf16.mxu1 %vm11524_vm0, %v11523_v0 }
0x2788   :  { %v8744_v12 = vpop.xlane.xlu0 %8743 }
0x2789   :  { %v8756_v2 = vmul.f32 0.03125, %v8744_v12 }
0x278b   :  { %v8762_v21 = vadd.f32 1e-05, %v8756_v2 }
0x278c   :  { %v8747_v22 = vpop.xlane.xlu1 %8746 }
0x278d   :  { %11444 = vrsqrt.f32 %v8762_v21  ;;  %v8757_v3 = vmul.f32 0.03125, %v8747_v22 }
0x278f   :  { %v8763_v7 = vadd.f32 1e-05, %v8757_v3 }
0x2790   :  { %v8750_v46 = vpop.xlane.xlu0 %8749 }
0x2791   :  { %11446 = vrsqrt.f32 %v8763_v7  ;;  %v8758_v57 = vmul.f32 0.03125, %v8750_v46 }
0x2793   :  { %v8764_v58 = vadd.f32 1e-05, %v8758_v57 }
0x2794   :  { %v8753_v55 = vpop.xlane.xlu1 %8752 }
0x2795   :  { %11448 = vrsqrt.f32 %v8764_v58  ;;  %v8759_v37 = vmul.f32 0.03125, %v8753_v55 }
0x2797   :  { %v8765_v38 = vadd.f32 1e-05, %v8759_v37 }
0x2799   :  { %11450 = vrsqrt.f32 %v8765_v38 }
0x279a   :  { %v11445_v31 = vpop.eup %11444 }
0x279b   :  { %v8774_v53 = vmul.f32 %v11445_v31, %v14608_v14 }
0x279d   :  { %v8784_v52 = vmul.f32 %v8781_v50, %v8774_v53 }
0x279e   :  { %v11447_v33 = vpop.eup %11446 }
0x279f   :  { %v8775_v26 = vmul.f32 %v11447_v33, %v14613_v10  ;;  %v8794_v27 = vadd.f32 %v8791_v47, %v8784_v52  ;;  %v131_v10 = vld [vmem:[%s14791_s5 + $0xe0] sm:$0xff]  ;;  %v8961_v52 = vrot.slane %v14633_v9, %v12421_v43 }
0x27a1   :  { %v8785_v25 = vmul.f32 %v8781_v50, %v8775_v26 }
0x27a2   :  { %v11449_v42 = vpop.eup %11448 }
0x27a3   :  { %v8776_v11 = vmul.f32 %v11449_v42, %v8728_v18  ;;  %v8795_v5 = vadd.f32 %v8791_v47, %v8785_v25  ;;  %v132_v18 = vld [vmem:[%s14791_s5 + $0xe8] sm:$0xff] }
0x27a5   :  { %v8799_v28 = vpack.c.bf16 %v8795_v5, %v8794_v27  ;;  %v8786_v56 = vmul.f32 %v8781_v50, %v8776_v11 }
0x27a6   :  { %v11451_v24 = vpop.eup %11450 }
0x27a7   :  { %v8777_v60 = vmul.f32 %v11451_v24, %v8729_v51  ;;  %10556 = vmatmul.mubr.msk.bf16.gmra.mxu1 %vm144_vm1, %v8799_v28  ;;  %v8796_v14 = vadd.f32 %v8791_v47, %v8786_v56  ;;  %v8884_v51 = vpack.c.bf16 %v132_v18, %v131_v10 }
0x27a8   :  { %10559 = vmatprep.mubr.msk.bf16.mxu1 %vm11524_vm0, %v11523_v0 }
0x27a9   :  { %v8787_v44 = vmul.f32 %v8781_v50, %v8777_v60  ;;  %10566 = vmatpush3.bf16.msra.mxu0 %v8884_v51 }
0x27aa   :  { %10567 = vmatprep.subr.bf16.mxu0 %v11523_v0 }
0x27ab   :  { %v8797_v45 = vadd.f32 %v8791_v47, %v8787_v44 }
0x27ad   :  { %v8800_v17 = vpack.c.bf16 %v8797_v45, %v8796_v14  ;;  %10568 = vmatpush3.bf16.msra.mxu0 %v8883_v36 }
0x27ae   :  { %10569 = vmatprep.subr.bf16.mxu0 %v11523_v0 }
0x27af   :  { %10560 = vmatmul.mubr.msk.bf16.gmra.mxu1 %vm144_vm1, %v8800_v17 }
0x27b0   :  { %10587 = vmatprep.mubr.msk.bf16.mxu1 %vm11524_vm0, %v11523_v0 }
0x27b1   :  { %10570 = vmatpush3.bf16.msra.mxu0 %v8882_v63 }
0x2832   :  { %v8850_v50 = vpop.f32.mrf.mxu1 }
0x2833   :  { %v8851_v20 = vadd.f32 %v8850_v50, %v8806_v61 }
0x2834   :  { %v10553_v30 = vpop.f32.mrf.mxu1 }
0x2835   :  { %v8873_v32 = vmax.f32 %v8851_v20, 0.0 }
0x2836   :  { %v8853_v4 = vpop.f32.mrf.mxu1 }
0x2837   :  { %v8854_v29 = vadd.f32 %v8853_v4, %v8806_v61 }
0x2838   :  { %v10554_v47 = vpop.f32.mrf.mxu1 }
0x2839   :  { %v8874_v49 = vmax.f32 %v8854_v29, 0.0 }
0x283b   :  { %v8879_v35 = vpack.c.bf16 %v8874_v49, %v8873_v32 }
0x283d   :  { %10572 = vmatmul.mubr.msk.bf16.vlgmr.msra.gmra.mxu0 %vm2351_vm5, %v8879_v35 }
0x283e   :  { %10575 = vmatprep.mubr.msk.bf16.mxu0 %vm11524_vm0, %v11523_v0 }
0x2867   :  { %v8858_v41 = vpop.f32.mrf.mxu1 }
0x2868   :  { %v8859_v2 = vadd.f32 %v8858_v41, %v8806_v61 }
0x2869   :  { %v10557_v12 = vpop.f32.mrf.mxu1 }
0x286a   :  { %v8875_v3 = vmax.f32 %v8859_v2, 0.0  ;;  %v85_v12 = vld [vmem:[%s14789_s3 + $0xb0] sm:$0xff]  ;;  %v86_v2 = vld [vmem:[%s14789_s3 + $0xb8] sm:$0xff] }
0x286b   :  { %v8861_v21 = vpop.f32.mrf.mxu1 }
0x286c   :  { %v8862_v22 = vadd.f32 %v8861_v21, %v8806_v61  ;;  %v9070_v21 = vpack.c.bf16 %v86_v2, %v85_v12 }
0x286d   :  { %v10558_v48 = vpop.f32.mrf.mxu1 }
0x286e   :  { %v8876_v7 = vmax.f32 %v8862_v22, 0.0  ;;  %10584 = vmatpush3.bf16.msra.mxu1 %v9070_v21  ;;  %v83_v22 = vld [vmem:[%s14789_s3 + $0xa0] sm:$0xff]  ;;  %v84_v48 = vld [vmem:[%s14789_s3 + $0xa8] sm:$0xff] }
0x286f   :  { %v8866_v46 = vpop.f32.mrf.mxu1  ;;  %10585 = vmatprep.subr.bf16.mxu1 %v11523_v0 }
0x2870   :  { %v8880_v57 = vpack.c.bf16 %v8876_v7, %v8875_v3  ;;  %v8867_v55 = vadd.f32 %v8866_v46, %v8806_v61  ;;  %v9069_v3 = vpack.c.bf16 %v84_v48, %v83_v22 }
0x2871   :  { %v10561_v58 = vpop.f32.mrf.mxu1 }
0x2872   :  { %10576 = vmatmul.mubr.msk.bf16.gmra.mxu0 %vm2351_vm5, %v8880_v57  ;;  %v8877_v53 = vmax.f32 %v8867_v55, 0.0  ;;  %10586 = vmatpush3.bf16.msra.mxu1 %v9069_v3 }
0x2873   :  { %v8869_v37 = vpop.f32.mrf.mxu1  ;;  %10579 = vmatprep.mubr.msk.bf16.mxu0 %vm11524_vm0, %v11523_v0 }
0x2874   :  { %v8870_v38 = vadd.f32 %v8869_v37, %v8806_v61 }
0x2875   :  { %v10562_v31 = vpop.f32.mrf.mxu1 }
0x2876   :  { %v8878_v33 = vmax.f32 %v8870_v38, 0.0 }
0x2878   :  { %v8881_v26 = vpack.c.bf16 %v8878_v33, %v8877_v53 }
0x287a   :  { %10580 = vmatmul.mubr.msk.bf16.gmra.mxu0 %vm2351_vm5, %v8881_v26 }
0x28fd   :  { %v8929_v25 = vpop.f32.mrf.mxu0 }
0x28fe   :  { %v8952_v42 = vadd.f32 %v8929_v25, %v14560_v39 }
0x28ff   :  { %v10573_v11 = vpop.f32.mrf.mxu0 }
0x2900   :  { %v8962_v27 = vadd.f32 %v8961_v52, %v8952_v42 }
0x2901   :  { %v8932_v5 = vpop.f32.mrf.mxu0 }
0x2902   :  { %v8953_v28 = vadd.f32 %v8932_v5, %v14565_v59  ;;  %v8968_v24 = vsel %vm144_vm1, %v8962_v27, 0.0 }
0x2903   :  { %8969 = vadd.xlane.f32.xlu0 %v8968_v24  ;;  %v10574_v60 = vpop.f32.mrf.mxu0 }
0x2904   :  { %v8963_v56 = vadd.f32 %v8961_v52, %v8953_v28 }
0x2906   :  { %v8971_v44 = vsel %vm144_vm1, %v8963_v56, 0.0 }
0x2907   :  { %8972 = vadd.xlane.f32.xlu1 %v8971_v44 }
0x2932   :  { %v8937_v14 = vpop.f32.mrf.mxu0 }
0x2933   :  { %v8954_v45 = vadd.f32 %v8937_v14, %v14570_v19 }
0x2934   :  { %v10577_v43 = vpop.f32.mrf.mxu0 }
0x2935   :  { %v8964_v17 = vadd.f32 %v8961_v52, %v8954_v45 }
0x2936   :  { %v8940_v10 = vpop.f32.mrf.mxu0 }
0x2937   :  { %v8955_v39 = vadd.f32 %v8940_v10, %v14575_v6  ;;  %v8974_v18 = vsel %vm144_vm1, %v8964_v17, 0.0 }
0x2938   :  { %8975 = vadd.xlane.f32.xlu0 %v8974_v18  ;;  %v10578_v59 = vpop.f32.mrf.mxu0 }
0x2939   :  { %v8965_v51 = vadd.f32 %v8961_v52, %v8955_v39  ;;  %v9049_v39 = vrot.slane %v14633_v9, %v11692_v54 }
0x293a   :  { %v8945_v16 = vpop.f32.mrf.mxu0 }
0x293b   :  { %v8956_v8 = vadd.f32 %v8945_v16, %v14580_v1  ;;  %v8977_v36 = vsel %vm144_vm1, %v8965_v51, 0.0 }
0x293c   :  { %8978 = vadd.xlane.f32.xlu1 %v8977_v36  ;;  %v10581_v13 = vpop.f32.mrf.mxu0 }
0x293d   :  { %v8966_v34 = vadd.f32 %v8961_v52, %v8956_v8 }
0x293e   :  { %v8948_v63 = vpop.f32.mrf.mxu0 }
0x293f   :  { %v8957_v19 = vadd.f32 %v8948_v63, %v14585_v40  ;;  %v8980_v61 = vsel %vm144_vm1, %v8966_v34, 0.0 }
0x2940   :  { %8981 = vadd.xlane.f32.xlu0 %v8980_v61  ;;  %v10582_v6 = vpop.f32.mrf.mxu0 }
0x2941   :  { %v8967_v50 = vadd.f32 %v8961_v52, %v8957_v19 }
0x2943   :  { %v8983_v30 = vsel %vm144_vm1, %v8967_v50, 0.0 }
0x2944   :  { %8984 = vadd.xlane.f32.xlu1 %v8983_v30 }
0x298c   :  { %v8970_v20 = vpop.xlane.xlu0 %8969 }
0x298d   :  { %v8986_v4 = vmul.f32 0.03125, %v8970_v20 }
0x298f   :  { %v8992_v29 = vsub.f32 %v8962_v27, %v8986_v4 }
0x2990   :  { %v8973_v1 = vpop.xlane.xlu1 %8972 }
0x2991   :  { %v8987_v47 = vmul.f32 0.03125, %v8973_v1  ;;  %v8998_v32 = vmul.f32 %v8992_v29, %v8992_v29 }
0x2993   :  { %v8993_v49 = vsub.f32 %v8963_v56, %v8987_v47  ;;  %v9004_v35 = vsel %vm144_vm1, %v8998_v32, 0.0 }
0x2994   :  { %9005 = vadd.xlane.f32.xlu0 %v9004_v35 }
0x2995   :  { %v8999_v41 = vmul.f32 %v8993_v49, %v8993_v49 }
0x2997   :  { %v9007_v40 = vsel %vm144_vm1, %v8999_v41, 0.0 }
0x2998   :  { %9008 = vadd.xlane.f32.xlu1 %v9007_v40 }
0x29c1   :  { %v8976_v7 = vpop.xlane.xlu0 %8975 }
0x29c2   :  { %v8988_v46 = vmul.f32 0.03125, %v8976_v7 }
0x29c4   :  { %v8994_v57 = vsub.f32 %v8964_v17, %v8988_v46 }
0x29c5   :  { %v8979_v58 = vpop.xlane.xlu1 %8978 }
0x29c6   :  { %v8989_v55 = vmul.f32 0.03125, %v8979_v58  ;;  %v9000_v37 = vmul.f32 %v8994_v57, %v8994_v57 }
0x29c8   :  { %v8995_v38 = vsub.f32 %v8965_v51, %v8989_v55  ;;  %v9010_v31 = vsel %vm144_vm1, %v9000_v37, 0.0  ;;  %v9059_v51 = vrot.slane %v14633_v9, %v11698_v62 }
0x29c9   :  { %9011 = vadd.xlane.f32.xlu0 %v9010_v31  ;;  %v8982_v53 = vpop.xlane.xlu0 %8981 }
0x29ca   :  { %v8990_v33 = vmul.f32 0.03125, %v8982_v53  ;;  %v9001_v26 = vmul.f32 %v8995_v38, %v8995_v38 }
0x29cc   :  { %v8996_v52 = vsub.f32 %v8966_v34, %v8990_v33  ;;  %v9013_v25 = vsel %vm144_vm1, %v9001_v26, 0.0 }
0x29cd   :  { %9014 = vadd.xlane.f32.xlu1 %v9013_v25  ;;  %v8985_v42 = vpop.xlane.xlu1 %8984 }
0x29ce   :  { %v8991_v11 = vmul.f32 0.03125, %v8985_v42  ;;  %v9002_v27 = vmul.f32 %v8996_v52, %v8996_v52 }
0x29d0   :  { %v8997_v5 = vsub.f32 %v8967_v50, %v8991_v11  ;;  %v9016_v28 = vsel %vm144_vm1, %v9002_v27, 0.0 }
0x29d1   :  { %9017 = vadd.xlane.f32.xlu0 %v9016_v28 }
0x29d2   :  { %v9003_v24 = vmul.f32 %v8997_v5, %v8997_v5 }
0x29d4   :  { %v9019_v60 = vsel %vm144_vm1, %v9003_v24, 0.0 }
0x29d5   :  { %9020 = vadd.xlane.f32.xlu1 %v9019_v60 }
0x2a1d   :  { %v9006_v56 = vpop.xlane.xlu0 %9005 }
0x2a1e   :  { %v9022_v44 = vmul.f32 0.03125, %v9006_v56 }
0x2a20   :  { %v9028_v14 = vadd.f32 1e-05, %v9022_v44 }
0x2a21   :  { %v9009_v45 = vpop.xlane.xlu1 %9008 }
0x2a22   :  { %11452 = vrsqrt.f32 %v9028_v14  ;;  %v9023_v43 = vmul.f32 0.03125, %v9009_v45 }
0x2a24   :  { %v9029_v17 = vadd.f32 1e-05, %v9023_v43 }
0x2a26   :  { %11454 = vrsqrt.f32 %v9029_v17 }
0x2a2f   :  { %v11453_v10 = vpop.eup %11452 }
0x2a30   :  { %v9040_v18 = vmul.f32 %v11453_v10, %v8992_v29 }
0x2a32   :  { %v9050_v16 = vmul.f32 %v9049_v39, %v9040_v18 }
0x2a33   :  { %v11455_v59 = vpop.eup %11454 }
0x2a34   :  { %v9041_v8 = vmul.f32 %v11455_v59, %v8993_v49  ;;  %v9060_v13 = vadd.f32 %v9059_v51, %v9050_v16 }
0x2a36   :  { %v9051_v36 = vmul.f32 %v9049_v39, %v9041_v8 }
0x2a38   :  { %v9061_v34 = vadd.f32 %v9059_v51, %v9051_v36 }
0x2a3a   :  { %v9066_v63 = vpack.c.bf16 %v9061_v34, %v9060_v13 }
0x2a3c   :  { %10588 = vmatmul.mubr.msk.bf16.vlgmr.msra.gmra.mxu1 %vm144_vm1, %v9066_v63 }
0x2a3d   :  { %10591 = vmatprep.mubr.msk.bf16.mxu1 %vm11524_vm0, %v11523_v0 }
0x2a52   :  { %v9012_v19 = vpop.xlane.xlu0 %9011 }
0x2a53   :  { %v9024_v61 = vmul.f32 0.03125, %v9012_v19 }
0x2a55   :  { %v9030_v6 = vadd.f32 1e-05, %v9024_v61 }
0x2a56   :  { %v9015_v54 = vpop.xlane.xlu1 %9014 }
0x2a57   :  { %11456 = vrsqrt.f32 %v9030_v6  ;;  %v9025_v50 = vmul.f32 0.03125, %v9015_v54 }
0x2a59   :  { %v9031_v30 = vadd.f32 1e-05, %v9025_v50 }
0x2a5a   :  { %v9018_v20 = vpop.xlane.xlu0 %9017 }
0x2a5b   :  { %11458 = vrsqrt.f32 %v9031_v30  ;;  %v9026_v62 = vmul.f32 0.03125, %v9018_v20 }
0x2a5d   :  { %v9032_v4 = vadd.f32 1e-05, %v9026_v62 }
0x2a5e   :  { %v9021_v29 = vpop.xlane.xlu1 %9020 }
0x2a5f   :  { %11460 = vrsqrt.f32 %v9032_v4  ;;  %v9027_v1 = vmul.f32 0.03125, %v9021_v29 }
0x2a61   :  { %v9033_v47 = vadd.f32 1e-05, %v9027_v1 }
0x2a63   :  { %11462 = vrsqrt.f32 %v9033_v47 }
0x2a64   :  { %v11457_v32 = vpop.eup %11456 }
0x2a65   :  { %v9042_v49 = vmul.f32 %v11457_v32, %v8994_v57 }
0x2a67   :  { %v9052_v40 = vmul.f32 %v9049_v39, %v9042_v49 }
0x2a68   :  { %v11459_v35 = vpop.eup %11458 }
0x2a69   :  { %v9043_v41 = vmul.f32 %v11459_v35, %v8995_v38  ;;  %v9062_v22 = vadd.f32 %v9059_v51, %v9052_v40 }
0x2a6b   :  { %v9053_v12 = vmul.f32 %v9049_v39, %v9043_v41 }
0x2a6c   :  { %v11461_v2 = vpop.eup %11460 }
0x2a6d   :  { %v9044_v21 = vmul.f32 %v11461_v2, %v8996_v52  ;;  %v9063_v48 = vadd.f32 %v9059_v51, %v9053_v12  ;;  %v9074_v52 = vrot.slane %v14633_v9, %v11717_v15 }
0x2a6f   :  { %v9067_v3 = vpack.c.bf16 %v9063_v48, %v9062_v22  ;;  %v9054_v58 = vmul.f32 %v9049_v39, %v9044_v21 }
0x2a70   :  { %v11463_v7 = vpop.eup %11462 }
0x2a71   :  { %v9045_v46 = vmul.f32 %v11463_v7, %v8997_v5  ;;  %10592 = vmatmul.mubr.msk.bf16.gmra.mxu1 %vm144_vm1, %v9067_v3  ;;  %v9064_v37 = vadd.f32 %v9059_v51, %v9054_v58 }
0x2a72   :  { %10595 = vmatprep.mubr.msk.bf16.mxu1 %vm11524_vm0, %v11523_v0 }
0x2a73   :  { %v9055_v55 = vmul.f32 %v9049_v39, %v9045_v46 }
0x2a75   :  { %v9065_v57 = vadd.f32 %v9059_v51, %v9055_v55 }
0x2a77   :  { %v9068_v31 = vpack.c.bf16 %v9065_v57, %v9064_v37 }
0x2a79   :  { %10596 = vmatmul.mubr.msk.bf16.gmra.mxu1 %vm144_vm1, %v9068_v31 }
0x2afc   :  { %v9118_v38 = vpop.f32.mrf.mxu1 }
0x2afd   :  { %v9119_v11 = vadd.f32 %v9118_v38, %v9074_v52 }
0x2afe   :  { %v10589_v53 = vpop.f32.mrf.mxu1 }
0x2aff   :  { %v9141_v24 = vmax.f32 %v9119_v11, 0.0 }
0x2b00   :  { %v9121_v33 = vpop.f32.mrf.mxu1 }
0x2b01   :  { %v9122_v25 = vadd.f32 %v9121_v33, %v9074_v52  ;;  %v9147_v17 = vsel %vm144_vm1, %v9141_v24, 0.0 }
0x2b02   :  { %v10590_v26 = vpop.f32.mrf.mxu1 }
0x2b03   :  { %v9142_v28 = vmax.f32 %v9122_v25, 0.0 }
0x2b05   :  { %v9148_v14 = vsel %vm144_vm1, %v9142_v28, 0.0 }
0x2b06   :  { %v9149_v39 = vadd.f32 %v9148_v14, %v9147_v17 }
0x2b31   :  { %v9126_v42 = vpop.f32.mrf.mxu1 }
0x2b32   :  { %v9127_v27 = vadd.f32 %v9126_v42, %v9074_v52 }
0x2b33   :  { %v10593_v5 = vpop.f32.mrf.mxu1 }
0x2b34   :  { %v9143_v60 = vmax.f32 %v9127_v27, 0.0 }
0x2b35   :  { %v9129_v0 = vpop.f32.mrf.mxu1 }
0x2b36   :  { %v9130_v56 = vadd.f32 %v9129_v0, %v9074_v52  ;;  %v9150_v10 = vsel %vm144_vm1, %v9143_v60, 0.0 }
0x2b37   :  { %v10594_v44 = vpop.f32.mrf.mxu1  ;;  %v9151_v16 = vadd.f32 %v9150_v10, %v9149_v39 }
0x2b38   :  { %v9144_v45 = vmax.f32 %v9130_v56, 0.0 }
0x2b39   :  { %v9134_v43 = vpop.f32.mrf.mxu1 }
0x2b3a   :  { %v9135_v15 = vadd.f32 %v9134_v43, %v9074_v52  ;;  %v9152_v59 = vsel %vm144_vm1, %v9144_v45, 0.0  ;;  %v9438_v43 = vld [vmem:[%s14792_s6 + $0x28] ss:$0 sm:$0xff] }
0x2b3b   :  { %v10597_v18 = vpop.f32.mrf.mxu1  ;;  %v9153_v34 = vadd.f32 %v9152_v59, %v9151_v16 }
0x2b3c   :  { %v9145_v51 = vmax.f32 %v9135_v15, 0.0 }
0x2b3d   :  { %v9137_v8 = vpop.f32.mrf.mxu1 }
0x2b3e   :  { %v9154_v36 = vsel %vm144_vm1, %v9145_v51, 0.0  ;;  %v9138_v13 = vadd.f32 %v9137_v8, %v9074_v52 }
0x2b3f   :  { %v10598_v63 = vpop.f32.mrf.mxu1  ;;  %v9155_v61 = vadd.f32 %v9154_v36, %v9153_v34 }
0x2b40   :  { %v9146_v19 = vmax.f32 %v9138_v13, 0.0 }
0x2b42   :  { %v9156_v6 = vsel %vm144_vm1, %v9146_v19, 0.0 }
0x2b43   :  { %v9157_v54 = vadd.f32 %v9156_v6, %v9155_v61 }
0x2b45   :  { %v9158_v50 = vrot.slane %v9157_v54, 4 }
0x2b47   :  { %v9159_v30 = vadd.f32 %v9158_v50, %v9157_v54 }
0x2b49   :  { %v9160_v20 = vrot.slane %v9159_v30, 2 }
0x2b4b   :  { %v9161_v62 = vadd.f32 %v9160_v20, %v9159_v30 }
0x2b4d   :  { %v9162_v4 = vrot.slane %v9161_v62, 1 }
0x2b4f   :  { %v9163_v29 = vadd.f32 %v9162_v4, %v9161_v62 }
0x2b51   :  { %v9165_v1 = vmul.f32 0.020833334, %v9163_v29 }
0x2b53   :  { %v9166_v47 = vsub.f32 %v9141_v24, %v9165_v1  ;;  %v9167_v32 = vsub.f32 %v9142_v28, %v9165_v1  ;;  %v9168_v49 = vsub.f32 %v9143_v60, %v9165_v1  ;;  %v9169_v35 = vsub.f32 %v9144_v45, %v9165_v1 }
0x2b54   :  { %v9170_v41 = vsub.f32 %v9145_v51, %v9165_v1  ;;  %v9171_v21 = vsub.f32 %v9146_v19, %v9165_v1  ;;  %v9207_v24 = vrot.slane %v14633_v9, %v12275_v23 }
0x2b55   :  { %v9172_v40 = vmul.f32 %v9166_v47, %v9166_v47  ;;  %v9173_v12 = vmul.f32 %v9167_v32, %v9167_v32  ;;  %v9174_v2 = vmul.f32 %v9168_v49, %v9168_v49  ;;  %v9175_v22 = vmul.f32 %v9169_v35, %v9169_v35 }
0x2b56   :  { %v9176_v46 = vmul.f32 %v9170_v41, %v9170_v41  ;;  %v9177_v37 = vmul.f32 %v9171_v21, %v9171_v21 }
0x2b57   :  { %v9178_v48 = vsel %vm144_vm1, %v9172_v40, 0.0  ;;  %v9179_v3 = vsel %vm144_vm1, %v9173_v12, 0.0  ;;  %v9181_v58 = vsel %vm144_vm1, %v9174_v2, 0.0  ;;  %v9183_v57 = vsel %vm144_vm1, %v9175_v22, 0.0 }
0x2b58   :  { %v9180_v7 = vadd.f32 %v9179_v3, %v9178_v48  ;;  %v9185_v38 = vsel %vm144_vm1, %v9176_v46, 0.0  ;;  %v9187_v33 = vsel %vm144_vm1, %v9177_v37, 0.0 }
0x2b5a   :  { %v9182_v55 = vadd.f32 %v9181_v58, %v9180_v7 }
0x2b5c   :  { %v9184_v31 = vadd.f32 %v9183_v57, %v9182_v55 }
0x2b5e   :  { %v9186_v53 = vadd.f32 %v9185_v38, %v9184_v31 }
0x2b60   :  { %v9188_v26 = vadd.f32 %v9187_v33, %v9186_v53 }
0x2b62   :  { %v9189_v52 = vrot.slane %v9188_v26, 4 }
0x2b64   :  { %v9190_v25 = vadd.f32 %v9189_v52, %v9188_v26 }
0x2b66   :  { %v9191_v42 = vrot.slane %v9190_v25, 2 }
0x2b68   :  { %v9192_v11 = vadd.f32 %v9191_v42, %v9190_v25 }
0x2b6a   :  { %v9193_v27 = vrot.slane %v9192_v11, 1 }
0x2b6c   :  { %v9194_v5 = vadd.f32 %v9193_v27, %v9192_v11 }
0x2b6e   :  { %v9195_v28 = vmul.f32 0.020833334, %v9194_v5 }
0x2b70   :  { %v9196_v0 = vadd.f32 1e-05, %v9195_v28 }
0x2b72   :  { %11464 = vrsqrt.f32 %v9196_v0 }
0x2b7f   :  { %v11465_v60 = vpop.eup %11464 }
0x2b80   :  { %v9198_v56 = vmul.f32 %v11465_v60, %v9166_v47  ;;  %v9199_v44 = vmul.f32 %v11465_v60, %v9167_v32  ;;  %v9200_v14 = vmul.f32 %v11465_v60, %v9168_v49  ;;  %v9201_v45 = vmul.f32 %v11465_v60, %v9169_v35 }
0x2b81   :  { %v9202_v17 = vmul.f32 %v11465_v60, %v9170_v41  ;;  %v9203_v10 = vmul.f32 %v11465_v60, %v9171_v21 }
0x2b82   :  { %v9208_v15 = vmul.f32 %v9207_v24, %v9198_v56  ;;  %v9209_v39 = vmul.f32 %v9207_v24, %v9199_v44  ;;  %v9210_v18 = vmul.f32 %v9207_v24, %v9200_v14  ;;  %v9211_v59 = vmul.f32 %v9207_v24, %v9201_v45 }
0x2b83   :  { %v9212_v51 = vmul.f32 %v9207_v24, %v9202_v17  ;;  %v9213_v16 = vmul.f32 %v9207_v24, %v9203_v10 }
0x2b84   :  { %v9218_v8 = vadd.f32 %v9438_v43, %v9208_v15  ;;  %v14742_v36 = vadd.f32 %v9438_v43, %v9209_v39  ;;  %v14744_v23 = vadd.f32 %v9438_v43, %v9210_v18  ;;  %v14746_v9 = vadd.f32 %v9438_v43, %v9211_v59 }
0x2b85   :  { %v14748_v13 = vadd.f32 %v9438_v43, %v9212_v51  ;;  %v14750_v34 = vadd.f32 %v9438_v43, %v9213_v16 }
0x2b86   :  { %v9230_v63 = vand.u32 2147483647, %v9218_v8  ;;  %v9231_v19 = vand.u32 2147483647, %v14742_v36  ;;  %v9232_v61 = vand.u32 2147483647, %v14744_v23 }
0x2b87   :  { %v9233_v6 = vand.u32 2147483647, %v14746_v9  ;;  %v9234_v54 = vand.u32 2147483647, %v14748_v13  ;;  %v9235_v50 = vand.u32 2147483647, %v14750_v34 }
0x2b88   :  { %v9236_v30 = vsub.f32 0.0, %v9230_v63  ;;  %v9237_v20 = vsub.f32 0.0, %v9231_v19  ;;  %v9238_v62 = vsub.f32 0.0, %v9232_v61  ;;  %v9224_v53 = vmax.f32 %v9218_v8, 0.0 }
0x2b89   :  { %v9239_v4 = vsub.f32 0.0, %v9233_v6  ;;  %v9240_v29 = vsub.f32 0.0, %v9234_v54  ;;  %v9241_v1 = vsub.f32 0.0, %v9235_v50  ;;  %v9225_v52 = vmax.f32 %v14742_v36, 0.0 }
0x2b8a   :  { %v9242_v47 = vmul.f32 1.442695, %v9236_v30  ;;  %v9244_v32 = vmul.f32 1.442695, %v9237_v20  ;;  %v9246_v49 = vmul.f32 1.442695, %v9238_v62 }
0x2b8b   :  { %v9248_v35 = vmul.f32 1.442695, %v9239_v4  ;;  %v9250_v41 = vmul.f32 1.442695, %v9240_v29  ;;  %v9252_v40 = vmul.f32 1.442695, %v9241_v1 }
0x2b8c   :  { %11466 = vpow2.f32 %v9242_v47  ;;  %v9226_v11 = vmax.f32 %v14744_v23, 0.0  ;;  %v9227_v0 = vmax.f32 %v14746_v9, 0.0  ;;  %v9228_v44 = vmax.f32 %v14748_v13, 0.0 }
0x2b8d   :  { %11468 = vpow2.f32 %v9244_v32  ;;  %v9229_v43 = vmax.f32 %v14750_v34, 0.0 }
0x2b8e   :  { %11470 = vpow2.f32 %v9246_v49 }
0x2b8f   :  { %11472 = vpow2.f32 %v9248_v35 }
0x2b90   :  { %11474 = vpow2.f32 %v9250_v41 }
0x2b91   :  { %11476 = vpow2.f32 %v9252_v40 }
0x2b99   :  { %v11467_v12 = vpop.eup %11466 }
0x2b9a   :  { %v11469_v2 = vpop.eup %11468  ;;  %v9254_v21 = vadd.f32 1.0, %v11467_v12 }
0x2b9b   :  { %v11471_v22 = vpop.eup %11470  ;;  %v9255_v48 = vadd.f32 1.0, %v11469_v2 }
0x2b9c   :  { %v11473_v3 = vpop.eup %11472  ;;  %v9256_v7 = vadd.f32 1.0, %v11471_v22  ;;  %11478 = vlog2.f32 %v9254_v21 }
0x2b9d   :  { %v11475_v46 = vpop.eup %11474  ;;  %v9257_v58 = vadd.f32 1.0, %v11473_v3  ;;  %11480 = vlog2.f32 %v9255_v48 }
0x2b9e   :  { %v11477_v55 = vpop.eup %11476  ;;  %v9258_v37 = vadd.f32 1.0, %v11475_v46  ;;  %11482 = vlog2.f32 %v9256_v7 }
0x2b9f   :  { %v9259_v57 = vadd.f32 1.0, %v11477_v55  ;;  %11484 = vlog2.f32 %v9257_v58 }
0x2ba0   :  { %11486 = vlog2.f32 %v9258_v37 }
0x2ba1   :  { %11488 = vlog2.f32 %v9259_v57 }
0x2ba9   :  { %v11479_v31 = vpop.eup %11478 }
0x2baa   :  { %v11481_v38 = vpop.eup %11480  ;;  %v9261_v33 = vmul.f32 0.6931472, %v11479_v31 }
0x2bab   :  { %v11483_v26 = vpop.eup %11482  ;;  %v9263_v25 = vmul.f32 0.6931472, %v11481_v38 }
0x2bac   :  { %v11485_v42 = vpop.eup %11484  ;;  %v9265_v27 = vmul.f32 0.6931472, %v11483_v26  ;;  %v9272_v5 = vadd.f32 %v9261_v33, %v9224_v53 }
0x2bad   :  { %v11487_v28 = vpop.eup %11486  ;;  %v9267_v24 = vmul.f32 0.6931472, %v11485_v42  ;;  %v9273_v60 = vadd.f32 %v9263_v25, %v9225_v52 }
0x2bae   :  { %v11489_v56 = vpop.eup %11488  ;;  %v9269_v14 = vmul.f32 0.6931472, %v11487_v28  ;;  %v9274_v45 = vadd.f32 %v9265_v27, %v9226_v11  ;;  %9279 = vst.msk [vmem:[%s14793_s7] sm:$0xff] %vm9278_vm6, %v9272_v5 }
0x2baf   :  { %v9271_v17 = vmul.f32 0.6931472, %v11489_v56  ;;  %v9275_v10 = vadd.f32 %v9267_v24, %v9227_v0  ;;  %9280 = vst.msk [vmem:[%s14793_s7 + $0x8] sm:$0xff] %vm9278_vm6, %v9273_v60 }
0x2bb0   :  { %v9276_v15 = vadd.f32 %v9269_v14, %v9228_v44  ;;  %9281 = vst.msk [vmem:[%s14793_s7 + $0x10] sm:$0xff] %vm9278_vm6, %v9274_v45 }
0x2bb1   :  { %v9277_v39 = vadd.f32 %v9271_v17, %v9229_v43  ;;  %9282 = vst.msk [vmem:[%s14793_s7 + $0x18] sm:$0xff] %vm9278_vm6, %v9275_v10 }
0x2bb2   :  { %9283 = vst.msk [vmem:[%s14793_s7 + $0x20] sm:$0xff] %vm9278_vm6, %v9276_v15 }
0x2bb3   :  { %9284 = vst.msk [vmem:[%s14793_s7 + $0x28] sm:$0xff] %vm9278_vm6, %v9277_v39 }
0x2bb4   :  { %9289 = vsyncpa [#allocation3], 1 }

</bundles_post_ra>
